<compile_context>
chip_gen: v7x
topology: tpu7x:2x2x1
jax: 0.10.0
libtpu: 0.0.40
codegen_flags: <defaults>
</compile_context>

<pallas_src>
import jax
import jax.numpy as jnp
from jax import lax
from jax.experimental import pallas as pl
from jax.experimental.pallas import tpu as pltpu

IN_FEATURES = 196608   # 3 * 256 * 256, hard-coded in the PyTorch module
OUT_FEATURES = 10


def _linear_kernel(x_ref, w_ref, o_ref, acc_ref):
    # Grid = (core_slice, k_tile); k (axis 1, innermost) is the reduction axis.
    k = pl.program_id(1)

    @pl.when(k == 0)
    def _init():
        acc_ref[...] = jnp.zeros_like(acc_ref)

    x = x_ref[...]            # (B, tkc, 128)  fully (8,128)-tiled
    w = w_ref[...]            # (N, tkc, 128)  fully (8,128)-tiled
    B = x.shape[0]
    N = w.shape[0]

    # VPU contraction without materializing a (B, N, tk) intermediate:
    # for each (b, n): elementwise multiply (tkc,128) tiles, reduce over the
    # sublane axis only (VALU adds), accumulate lane-wide partials.
    for b in range(B):
        xb = x[b]                                          # (tkc, 128)
        for n in range(N):
            part = jnp.sum(xb * w[n], axis=0, keepdims=True)   # (1, 128)
            acc_ref[b, n:n + 1, :] += part

    @pl.when(k == pl.num_programs(1) - 1)
    def _finalize():
        # Single cross-lane reduce at the very end: (B, N, 128) -> (B, N).
        o_ref[...] = jnp.sum(acc_ref[...], axis=-1).astype(o_ref.dtype)


def ell_linear(x, weight, bias, *, tk=49152, num_cores=2):
    """x: (B, 196608) f32, weight: (10, 196608) f32, bias: (10,) f32 -> (B, 10) f32."""
    B, F = x.shape
    N, F2 = weight.shape
    assert F == F2, (F, F2)
    assert F % 128 == 0 and tk % 128 == 0
    assert F % (num_cores * tk) == 0, (F, num_cores, tk)

    kpc = F // (num_cores * tk)        # K tiles per core slice
    tkc = tk // 128                    # sublane-blocks per K tile
    fc = F // 128

    # Row-major split of the feature axis: free reshape, same HBM layout.
    x3 = x.reshape(B, fc, 128).astype(jnp.float32)
    w3 = weight.reshape(N, fc, 128).astype(jnp.float32)

    flops = 2 * B * N * F
    bytes_accessed = 4 * (B * F + N * F + num_cores * B * N)

    partials = pl.pallas_call(
        _linear_kernel,
        out_shape=jax.ShapeDtypeStruct((num_cores, B, N), jnp.float32),
        grid_spec=pltpu.PrefetchScalarGridSpec(
            num_scalar_prefetch=0,
            grid=(num_cores, kpc),
            in_specs=[
                # x tile: (B, tkc, 128) window walking the feature axis.
                pl.BlockSpec((B, tkc, 128), lambda c, k: (0, c * kpc + k, 0)),
                # weight tile: natural row layout, lane-dense, no padding.
                pl.BlockSpec((N, tkc, 128), lambda c, k: (0, c * kpc + k, 0)),
            ],
            # One partial (B, N) slab per core slice; leading dim squeezed.
            out_specs=pl.BlockSpec((None, B, N), lambda c, k: (c, 0, 0)),
            scratch_shapes=[pltpu.VMEM((B, N, 128), jnp.float32)],
        ),
        compiler_params=pltpu.CompilerParams(
            # core-slice axis shardable across TCs (v7x); K is a reduction axis.
            dimension_semantics=("parallel", "arbitrary"),
        ),
        cost_estimate=pl.CostEstimate(
            flops=int(flops), transcendentals=0, bytes_accessed=int(bytes_accessed)
        ),
    )(x3, w3)

    # Sum per-core partials and add the bias once (tiny XLA glue).
    out = jnp.sum(partials, axis=0) + bias.astype(jnp.float32)[None, :]
    return out.astype(x.dtype)


if __name__ == "__main__":
    key = jax.random.PRNGKey(0)
    kx, kw, kb = jax.random.split(key, 3)

    B = 2
    # Deterministic synthetic parameters (PyTorch-Linear-like uniform init scale).
    bound = 1.0 / (IN_FEATURES ** 0.5)
    weight = jax.random.uniform(
        kw, (OUT_FEATURES, IN_FEATURES), jnp.float32, minval=-bound, maxval=bound
    )
    bias = jax.random.uniform(
        kb, (OUT_FEATURES,), jnp.float32, minval=-bound, maxval=bound
    )
    x = jax.random.normal(kx, (B, IN_FEATURES), jnp.float32)

    out = jax.block_until_ready(ell_linear(x, weight, bias))

    # Correctness check against a high-precision JAX reference.
    ref = (
        jnp.einsum("bf,nf->bn", x, weight, precision=lax.Precision.HIGHEST)
        + bias[None, :]
    )
    assert out.shape == (B, OUT_FEATURES), out.shape
    assert jnp.allclose(out, ref, atol=2e-3, rtol=2e-3), (
        float(jnp.max(jnp.abs(out - ref)))
    )
    print("KERNEL_OK")
</pallas_src>

<mosaic_0001>
module attributes {stable_mosaic.version = 11 : i64} {
  func.func @_linear_kernel(%arg0: i32, %arg1: i32, %arg2: memref<2x384x128xf32, #tpu.memory_space<vmem>>, %arg3: memref<10x384x128xf32, #tpu.memory_space<vmem>>, %arg4: memref<1x2x10xf32, #tpu.memory_space<vmem>>, %arg5: memref<2x10x128xf32, #tpu.memory_space<vmem>>) attributes {dimension_semantics = [#tpu.dimension_semantics<parallel>, #tpu.dimension_semantics<arbitrary>], iteration_bounds = array<i64: 2, 2>, scalar_prefetch = 0 : i64, scratch_operands = 1 : i64, tpu.core_type = #tpu.core_type<tc>, window_params = [{transform_indices = @transform_0, window_bounds = array<i64: 2, 384, 128>}, {transform_indices = @transform_1, window_bounds = array<i64: 10, 384, 128>}, {transform_indices = @transform_2, window_bounds = array<i64: 1, 2, 10>}]} {
    %c0_i32 = arith.constant 0 : i32
    %0 = arith.cmpi eq, %arg1, %c0_i32 : i32
    %1 = arith.extui %0 : i1 to i32
    %c0_i32_0 = arith.constant 0 : i32
    %2 = arith.cmpi ne, %1, %c0_i32_0 : i32
    scf.if %2 {
      %cst_137 = arith.constant 0.000000e+00 : f32
      %232 = vector.broadcast %cst_137 : f32 to vector<2x10x128xf32>
      %c0_138 = arith.constant 0 : index
      %c0_139 = arith.constant 0 : index
      %c0_140 = arith.constant 0 : index
      %233 = vector.load %arg5[%c0_138, %c0_139, %c0_140] : memref<2x10x128xf32, #tpu.memory_space<vmem>>, vector<2x10x128xf32>
      tpu.vector_store %arg5[%c0_138, %c0_139, %c0_140], %232 {strides = array<i32>} : memref<2x10x128xf32, #tpu.memory_space<vmem>>, vector<2x10x128xf32>,
    } else {
    }
    %c0 = arith.constant 0 : index
    %c0_1 = arith.constant 0 : index
    %c0_2 = arith.constant 0 : index
    %3 = vector.load %arg2[%c0, %c0_1, %c0_2] : memref<2x384x128xf32, #tpu.memory_space<vmem>>, vector<2x384x128xf32>
    %c0_3 = arith.constant 0 : index
    %c0_4 = arith.constant 0 : index
    %c0_5 = arith.constant 0 : index
    %4 = vector.load %arg3[%c0_3, %c0_4, %c0_5] : memref<10x384x128xf32, #tpu.memory_space<vmem>>, vector<10x384x128xf32>
    %5 = vector.extract_strided_slice %3 {offsets = [0, 0, 0], sizes = [1, 384, 128], strides = [1, 1, 1]} : vector<2x384x128xf32> to vector<1x384x128xf32>
    %6 = vector.shape_cast %5 : vector<1x384x128xf32> to vector<384x128xf32>
    %7 = vector.extract_strided_slice %4 {offsets = [0, 0, 0], sizes = [1, 384, 128], strides = [1, 1, 1]} : vector<10x384x128xf32> to vector<1x384x128xf32>
    %8 = vector.shape_cast %7 : vector<1x384x128xf32> to vector<384x128xf32>
    %9 = arith.mulf %6, %8 : vector<384x128xf32>
    %cst = arith.constant dense<0.000000e+00> : vector<128xf32>
    %10 = vector.multi_reduction <add>, %9, %cst [0] : vector<384x128xf32> to vector<128xf32>
    %11 = vector.shape_cast %10 : vector<128xf32> to vector<1x128xf32>
    %c0_6 = arith.constant 0 : index
    %c0_7 = arith.constant 0 : index
    %c0_8 = arith.constant 0 : index
    %12 = vector.load %arg5[%c0_6, %c0_7, %c0_8] : memref<2x10x128xf32, #tpu.memory_space<vmem>>, vector<1x1x128xf32>
    %13 = vector.shape_cast %12 : vector<1x1x128xf32> to vector<1x128xf32>
    %14 = arith.addf %13, %11 : vector<1x128xf32>
    %c0_9 = arith.constant 0 : index
    %c0_10 = arith.constant 0 : index
    %c0_11 = arith.constant 0 : index
    %15 = vector.load %arg5[%c0_9, %c0_10, %c0_11] : memref<2x10x128xf32, #tpu.memory_space<vmem>>, vector<1x1x128xf32>
    %16 = vector.shape_cast %15 : vector<1x1x128xf32> to vector<1x128xf32>
    %17 = vector.shape_cast %14 : vector<1x128xf32> to vector<1x1x128xf32>
    tpu.vector_store %arg5[%c0_9, %c0_10, %c0_11], %17 {strides = array<i32>} : memref<2x10x128xf32, #tpu.memory_space<vmem>>, vector<1x1x128xf32>,
    %18 = vector.extract_strided_slice %4 {offsets = [1, 0, 0], sizes = [1, 384, 128], strides = [1, 1, 1]} : vector<10x384x128xf32> to vector<1x384x128xf32>
    %19 = vector.shape_cast %18 : vector<1x384x128xf32> to vector<384x128xf32>
    %20 = arith.mulf %6, %19 : vector<384x128xf32>
    %cst_12 = arith.constant dense<0.000000e+00> : vector<128xf32>
    %21 = vector.multi_reduction <add>, %20, %cst_12 [0] : vector<384x128xf32> to vector<128xf32>
    %22 = vector.shape_cast %21 : vector<128xf32> to vector<1x128xf32>
    %c0_13 = arith.constant 0 : index
    %c1 = arith.constant 1 : index
    %c0_14 = arith.constant 0 : index
    %23 = vector.load %arg5[%c0_13, %c1, %c0_14] : memref<2x10x128xf32, #tpu.memory_space<vmem>>, vector<1x1x128xf32>
    %24 = vector.shape_cast %23 : vector<1x1x128xf32> to vector<1x128xf32>
    %25 = arith.addf %24, %22 : vector<1x128xf32>
    %c0_15 = arith.constant 0 : index
    %c1_16 = arith.constant 1 : index
    %c0_17 = arith.constant 0 : index
    %26 = vector.load %arg5[%c0_15, %c1_16, %c0_17] : memref<2x10x128xf32, #tpu.memory_space<vmem>>, vector<1x1x128xf32>
    %27 = vector.shape_cast %26 : vector<1x1x128xf32> to vector<1x128xf32>
    %28 = vector.shape_cast %25 : vector<1x128xf32> to vector<1x1x128xf32>
    tpu.vector_store %arg5[%c0_15, %c1_16, %c0_17], %28 {strides = array<i32>} : memref<2x10x128xf32, #tpu.memory_space<vmem>>, vector<1x1x128xf32>,
    %29 = vector.extract_strided_slice %4 {offsets = [2, 0, 0], sizes = [1, 384, 128], strides = [1, 1, 1]} : vector<10x384x128xf32> to vector<1x384x128xf32>
    %30 = vector.shape_cast %29 : vector<1x384x128xf32> to vector<384x128xf32>
    %31 = arith.mulf %6, %30 : vector<384x128xf32>
    %cst_18 = arith.constant dense<0.000000e+00> : vector<128xf32>
    %32 = vector.multi_reduction <add>, %31, %cst_18 [0] : vector<384x128xf32> to vector<128xf32>
    %33 = vector.shape_cast %32 : vector<128xf32> to vector<1x128xf32>
    %c0_19 = arith.constant 0 : index
    %c2 = arith.constant 2 : index
    %c0_20 = arith.constant 0 : index
    %34 = vector.load %arg5[%c0_19, %c2, %c0_20] : memref<2x10x128xf32, #tpu.memory_space<vmem>>, vector<1x1x128xf32>
    %35 = vector.shape_cast %34 : vector<1x1x128xf32> to vector<1x128xf32>
    %36 = arith.addf %35, %33 : vector<1x128xf32>
    %c0_21 = arith.constant 0 : index
    %c2_22 = arith.constant 2 : index
    %c0_23 = arith.constant 0 : index
    %37 = vector.load %arg5[%c0_21, %c2_22, %c0_23] : memref<2x10x128xf32, #tpu.memory_space<vmem>>, vector<1x1x128xf32>
    %38 = vector.shape_cast %37 : vector<1x1x128xf32> to vector<1x128xf32>
    %39 = vector.shape_cast %36 : vector<1x128xf32> to vector<1x1x128xf32>
    tpu.vector_store %arg5[%c0_21, %c2_22, %c0_23], %39 {strides = array<i32>} : memref<2x10x128xf32, #tpu.memory_space<vmem>>, vector<1x1x128xf32>,
    %40 = vector.extract_strided_slice %4 {offsets = [3, 0, 0], sizes = [1, 384, 128], strides = [1, 1, 1]} : vector<10x384x128xf32> to vector<1x384x128xf32>
    %41 = vector.shape_cast %40 : vector<1x384x128xf32> to vector<384x128xf32>
    %42 = arith.mulf %6, %41 : vector<384x128xf32>
    %cst_24 = arith.constant dense<0.000000e+00> : vector<128xf32>
    %43 = vector.multi_reduction <add>, %42, %cst_24 [0] : vector<384x128xf32> to vector<128xf32>
    %44 = vector.shape_cast %43 : vector<128xf32> to vector<1x128xf32>
    %c0_25 = arith.constant 0 : index
    %c3 = arith.constant 3 : index
    %c0_26 = arith.constant 0 : index
    %45 = vector.load %arg5[%c0_25, %c3, %c0_26] : memref<2x10x128xf32, #tpu.memory_space<vmem>>, vector<1x1x128xf32>
    %46 = vector.shape_cast %45 : vector<1x1x128xf32> to vector<1x128xf32>
    %47 = arith.addf %46, %44 : vector<1x128xf32>
    %c0_27 = arith.constant 0 : index
    %c3_28 = arith.constant 3 : index
    %c0_29 = arith.constant 0 : index
    %48 = vector.load %arg5[%c0_27, %c3_28, %c0_29] : memref<2x10x128xf32, #tpu.memory_space<vmem>>, vector<1x1x128xf32>
    %49 = vector.shape_cast %48 : vector<1x1x128xf32> to vector<1x128xf32>
    %50 = vector.shape_cast %47 : vector<1x128xf32> to vector<1x1x128xf32>
    tpu.vector_store %arg5[%c0_27, %c3_28, %c0_29], %50 {strides = array<i32>} : memref<2x10x128xf32, #tpu.memory_space<vmem>>, vector<1x1x128xf32>,
    %51 = vector.extract_strided_slice %4 {offsets = [4, 0, 0], sizes = [1, 384, 128], strides = [1, 1, 1]} : vector<10x384x128xf32> to vector<1x384x128xf32>
    %52 = vector.shape_cast %51 : vector<1x384x128xf32> to vector<384x128xf32>
    %53 = arith.mulf %6, %52 : vector<384x128xf32>
    %cst_30 = arith.constant dense<0.000000e+00> : vector<128xf32>
    %54 = vector.multi_reduction <add>, %53, %cst_30 [0] : vector<384x128xf32> to vector<128xf32>
    %55 = vector.shape_cast %54 : vector<128xf32> to vector<1x128xf32>
    %c0_31 = arith.constant 0 : index
    %c4 = arith.constant 4 : index
    %c0_32 = arith.constant 0 : index
    %56 = vector.load %arg5[%c0_31, %c4, %c0_32] : memref<2x10x128xf32, #tpu.memory_space<vmem>>, vector<1x1x128xf32>
    %57 = vector.shape_cast %56 : vector<1x1x128xf32> to vector<1x128xf32>
    %58 = arith.addf %57, %55 : vector<1x128xf32>
    %c0_33 = arith.constant 0 : index
    %c4_34 = arith.constant 4 : index
    %c0_35 = arith.constant 0 : index
    %59 = vector.load %arg5[%c0_33, %c4_34, %c0_35] : memref<2x10x128xf32, #tpu.memory_space<vmem>>, vector<1x1x128xf32>
    %60 = vector.shape_cast %59 : vector<1x1x128xf32> to vector<1x128xf32>
    %61 = vector.shape_cast %58 : vector<1x128xf32> to vector<1x1x128xf32>
    tpu.vector_store %arg5[%c0_33, %c4_34, %c0_35], %61 {strides = array<i32>} : memref<2x10x128xf32, #tpu.memory_space<vmem>>, vector<1x1x128xf32>,
    %62 = vector.extract_strided_slice %4 {offsets = [5, 0, 0], sizes = [1, 384, 128], strides = [1, 1, 1]} : vector<10x384x128xf32> to vector<1x384x128xf32>
    %63 = vector.shape_cast %62 : vector<1x384x128xf32> to vector<384x128xf32>
    %64 = arith.mulf %6, %63 : vector<384x128xf32>
    %cst_36 = arith.constant dense<0.000000e+00> : vector<128xf32>
    %65 = vector.multi_reduction <add>, %64, %cst_36 [0] : vector<384x128xf32> to vector<128xf32>
    %66 = vector.shape_cast %65 : vector<128xf32> to vector<1x128xf32>
    %c0_37 = arith.constant 0 : index
    %c5 = arith.constant 5 : index
    %c0_38 = arith.constant 0 : index
    %67 = vector.load %arg5[%c0_37, %c5, %c0_38] : memref<2x10x128xf32, #tpu.memory_space<vmem>>, vector<1x1x128xf32>
    %68 = vector.shape_cast %67 : vector<1x1x128xf32> to vector<1x128xf32>
    %69 = arith.addf %68, %66 : vector<1x128xf32>
    %c0_39 = arith.constant 0 : index
    %c5_40 = arith.constant 5 : index
    %c0_41 = arith.constant 0 : index
    %70 = vector.load %arg5[%c0_39, %c5_40, %c0_41] : memref<2x10x128xf32, #tpu.memory_space<vmem>>, vector<1x1x128xf32>
    %71 = vector.shape_cast %70 : vector<1x1x128xf32> to vector<1x128xf32>
    %72 = vector.shape_cast %69 : vector<1x128xf32> to vector<1x1x128xf32>
    tpu.vector_store %arg5[%c0_39, %c5_40, %c0_41], %72 {strides = array<i32>} : memref<2x10x128xf32, #tpu.memory_space<vmem>>, vector<1x1x128xf32>,
    %73 = vector.extract_strided_slice %4 {offsets = [6, 0, 0], sizes = [1, 384, 128], strides = [1, 1, 1]} : vector<10x384x128xf32> to vector<1x384x128xf32>
    %74 = vector.shape_cast %73 : vector<1x384x128xf32> to vector<384x128xf32>
    %75 = arith.mulf %6, %74 : vector<384x128xf32>
    %cst_42 = arith.constant dense<0.000000e+00> : vector<128xf32>
    %76 = vector.multi_reduction <add>, %75, %cst_42 [0] : vector<384x128xf32> to vector<128xf32>
    %77 = vector.shape_cast %76 : vector<128xf32> to vector<1x128xf32>
    %c0_43 = arith.constant 0 : index
    %c6 = arith.constant 6 : index
    %c0_44 = arith.constant 0 : index
    %78 = vector.load %arg5[%c0_43, %c6, %c0_44] : memref<2x10x128xf32, #tpu.memory_space<vmem>>, vector<1x1x128xf32>
    %79 = vector.shape_cast %78 : vector<1x1x128xf32> to vector<1x128xf32>
    %80 = arith.addf %79, %77 : vector<1x128xf32>
    %c0_45 = arith.constant 0 : index
    %c6_46 = arith.constant 6 : index
    %c0_47 = arith.constant 0 : index
    %81 = vector.load %arg5[%c0_45, %c6_46, %c0_47] : memref<2x10x128xf32, #tpu.memory_space<vmem>>, vector<1x1x128xf32>
    %82 = vector.shape_cast %81 : vector<1x1x128xf32> to vector<1x128xf32>
    %83 = vector.shape_cast %80 : vector<1x128xf32> to vector<1x1x128xf32>
    tpu.vector_store %arg5[%c0_45, %c6_46, %c0_47], %83 {strides = array<i32>} : memref<2x10x128xf32, #tpu.memory_space<vmem>>, vector<1x1x128xf32>,
    %84 = vector.extract_strided_slice %4 {offsets = [7, 0, 0], sizes = [1, 384, 128], strides = [1, 1, 1]} : vector<10x384x128xf32> to vector<1x384x128xf32>
    %85 = vector.shape_cast %84 : vector<1x384x128xf32> to vector<384x128xf32>
    %86 = arith.mulf %6, %85 : vector<384x128xf32>
    %cst_48 = arith.constant dense<0.000000e+00> : vector<128xf32>
    %87 = vector.multi_reduction <add>, %86, %cst_48 [0] : vector<384x128xf32> to vector<128xf32>
    %88 = vector.shape_cast %87 : vector<128xf32> to vector<1x128xf32>
    %c0_49 = arith.constant 0 : index
    %c7 = arith.constant 7 : index
    %c0_50 = arith.constant 0 : index
    %89 = vector.load %arg5[%c0_49, %c7, %c0_50] : memref<2x10x128xf32, #tpu.memory_space<vmem>>, vector<1x1x128xf32>
    %90 = vector.shape_cast %89 : vector<1x1x128xf32> to vector<1x128xf32>
    %91 = arith.addf %90, %88 : vector<1x128xf32>
    %c0_51 = arith.constant 0 : index
    %c7_52 = arith.constant 7 : index
    %c0_53 = arith.constant 0 : index
    %92 = vector.load %arg5[%c0_51, %c7_52, %c0_53] : memref<2x10x128xf32, #tpu.memory_space<vmem>>, vector<1x1x128xf32>
    %93 = vector.shape_cast %92 : vector<1x1x128xf32> to vector<1x128xf32>
    %94 = vector.shape_cast %91 : vector<1x128xf32> to vector<1x1x128xf32>
    tpu.vector_store %arg5[%c0_51, %c7_52, %c0_53], %94 {strides = array<i32>} : memref<2x10x128xf32, #tpu.memory_space<vmem>>, vector<1x1x128xf32>,
    %95 = vector.extract_strided_slice %4 {offsets = [8, 0, 0], sizes = [1, 384, 128], strides = [1, 1, 1]} : vector<10x384x128xf32> to vector<1x384x128xf32>
    %96 = vector.shape_cast %95 : vector<1x384x128xf32> to vector<384x128xf32>
    %97 = arith.mulf %6, %96 : vector<384x128xf32>
    %cst_54 = arith.constant dense<0.000000e+00> : vector<128xf32>
    %98 = vector.multi_reduction <add>, %97, %cst_54 [0] : vector<384x128xf32> to vector<128xf32>
    %99 = vector.shape_cast %98 : vector<128xf32> to vector<1x128xf32>
    %c0_55 = arith.constant 0 : index
    %c8 = arith.constant 8 : index
    %c0_56 = arith.constant 0 : index
    %100 = vector.load %arg5[%c0_55, %c8, %c0_56] : memref<2x10x128xf32, #tpu.memory_space<vmem>>, vector<1x1x128xf32>
    %101 = vector.shape_cast %100 : vector<1x1x128xf32> to vector<1x128xf32>
    %102 = arith.addf %101, %99 : vector<1x128xf32>
    %c0_57 = arith.constant 0 : index
    %c8_58 = arith.constant 8 : index
    %c0_59 = arith.constant 0 : index
    %103 = vector.load %arg5[%c0_57, %c8_58, %c0_59] : memref<2x10x128xf32, #tpu.memory_space<vmem>>, vector<1x1x128xf32>
    %104 = vector.shape_cast %103 : vector<1x1x128xf32> to vector<1x128xf32>
    %105 = vector.shape_cast %102 : vector<1x128xf32> to vector<1x1x128xf32>
    tpu.vector_store %arg5[%c0_57, %c8_58, %c0_59], %105 {strides = array<i32>} : memref<2x10x128xf32, #tpu.memory_space<vmem>>, vector<1x1x128xf32>,
    %106 = vector.extract_strided_slice %4 {offsets = [9, 0, 0], sizes = [1, 384, 128], strides = [1, 1, 1]} : vector<10x384x128xf32> to vector<1x384x128xf32>
    %107 = vector.shape_cast %106 : vector<1x384x128xf32> to vector<384x128xf32>
    %108 = arith.mulf %6, %107 : vector<384x128xf32>
    %cst_60 = arith.constant dense<0.000000e+00> : vector<128xf32>
    %109 = vector.multi_reduction <add>, %108, %cst_60 [0] : vector<384x128xf32> to vector<128xf32>
    %110 = vector.shape_cast %109 : vector<128xf32> to vector<1x128xf32>
    %c0_61 = arith.constant 0 : index
    %c9 = arith.constant 9 : index
    %c0_62 = arith.constant 0 : index
    %111 = vector.load %arg5[%c0_61, %c9, %c0_62] : memref<2x10x128xf32, #tpu.memory_space<vmem>>, vector<1x1x128xf32>
    %112 = vector.shape_cast %111 : vector<1x1x128xf32> to vector<1x128xf32>
    %113 = arith.addf %112, %110 : vector<1x128xf32>
    %c0_63 = arith.constant 0 : index
    %c9_64 = arith.constant 9 : index
    %c0_65 = arith.constant 0 : index
    %114 = vector.load %arg5[%c0_63, %c9_64, %c0_65] : memref<2x10x128xf32, #tpu.memory_space<vmem>>, vector<1x1x128xf32>
    %115 = vector.shape_cast %114 : vector<1x1x128xf32> to vector<1x128xf32>
    %116 = vector.shape_cast %113 : vector<1x128xf32> to vector<1x1x128xf32>
    tpu.vector_store %arg5[%c0_63, %c9_64, %c0_65], %116 {strides = array<i32>} : memref<2x10x128xf32, #tpu.memory_space<vmem>>, vector<1x1x128xf32>,
    %117 = vector.extract_strided_slice %3 {offsets = [1, 0, 0], sizes = [1, 384, 128], strides = [1, 1, 1]} : vector<2x384x128xf32> to vector<1x384x128xf32>
    %118 = vector.shape_cast %117 : vector<1x384x128xf32> to vector<384x128xf32>
    %119 = vector.extract_strided_slice %4 {offsets = [0, 0, 0], sizes = [1, 384, 128], strides = [1, 1, 1]} : vector<10x384x128xf32> to vector<1x384x128xf32>
    %120 = vector.shape_cast %119 : vector<1x384x128xf32> to vector<384x128xf32>
    %121 = arith.mulf %118, %120 : vector<384x128xf32>
    %cst_66 = arith.constant dense<0.000000e+00> : vector<128xf32>
    %122 = vector.multi_reduction <add>, %121, %cst_66 [0] : vector<384x128xf32> to vector<128xf32>
    %123 = vector.shape_cast %122 : vector<128xf32> to vector<1x128xf32>
    %c1_67 = arith.constant 1 : index
    %c0_68 = arith.constant 0 : index
    %c0_69 = arith.constant 0 : index
    %124 = vector.load %arg5[%c1_67, %c0_68, %c0_69] : memref<2x10x128xf32, #tpu.memory_space<vmem>>, vector<1x1x128xf32>
    %125 = vector.shape_cast %124 : vector<1x1x128xf32> to vector<1x128xf32>
    %126 = arith.addf %125, %123 : vector<1x128xf32>
    %c1_70 = arith.constant 1 : index
    %c0_71 = arith.constant 0 : index
    %c0_72 = arith.constant 0 : index
    %127 = vector.load %arg5[%c1_70, %c0_71, %c0_72] : memref<2x10x128xf32, #tpu.memory_space<vmem>>, vector<1x1x128xf32>
    %128 = vector.shape_cast %127 : vector<1x1x128xf32> to vector<1x128xf32>
    %129 = vector.shape_cast %126 : vector<1x128xf32> to vector<1x1x128xf32>
    tpu.vector_store %arg5[%c1_70, %c0_71, %c0_72], %129 {strides = array<i32>} : memref<2x10x128xf32, #tpu.memory_space<vmem>>, vector<1x1x128xf32>,
    %130 = vector.extract_strided_slice %4 {offsets = [1, 0, 0], sizes = [1, 384, 128], strides = [1, 1, 1]} : vector<10x384x128xf32> to vector<1x384x128xf32>
    %131 = vector.shape_cast %130 : vector<1x384x128xf32> to vector<384x128xf32>
    %132 = arith.mulf %118, %131 : vector<384x128xf32>
    %cst_73 = arith.constant dense<0.000000e+00> : vector<128xf32>
    %133 = vector.multi_reduction <add>, %132, %cst_73 [0] : vector<384x128xf32> to vector<128xf32>
    %134 = vector.shape_cast %133 : vector<128xf32> to vector<1x128xf32>
    %c1_74 = arith.constant 1 : index
    %c1_75 = arith.constant 1 : index
    %c0_76 = arith.constant 0 : index
    %135 = vector.load %arg5[%c1_74, %c1_75, %c0_76] : memref<2x10x128xf32, #tpu.memory_space<vmem>>, vector<1x1x128xf32>
    %136 = vector.shape_cast %135 : vector<1x1x128xf32> to vector<1x128xf32>
    %137 = arith.addf %136, %134 : vector<1x128xf32>
    %c1_77 = arith.constant 1 : index
    %c1_78 = arith.constant 1 : index
    %c0_79 = arith.constant 0 : index
    %138 = vector.load %arg5[%c1_77, %c1_78, %c0_79] : memref<2x10x128xf32, #tpu.memory_space<vmem>>, vector<1x1x128xf32>
    %139 = vector.shape_cast %138 : vector<1x1x128xf32> to vector<1x128xf32>
    %140 = vector.shape_cast %137 : vector<1x128xf32> to vector<1x1x128xf32>
    tpu.vector_store %arg5[%c1_77, %c1_78, %c0_79], %140 {strides = array<i32>} : memref<2x10x128xf32, #tpu.memory_space<vmem>>, vector<1x1x128xf32>,
    %141 = vector.extract_strided_slice %4 {offsets = [2, 0, 0], sizes = [1, 384, 128], strides = [1, 1, 1]} : vector<10x384x128xf32> to vector<1x384x128xf32>
    %142 = vector.shape_cast %141 : vector<1x384x128xf32> to vector<384x128xf32>
    %143 = arith.mulf %118, %142 : vector<384x128xf32>
    %cst_80 = arith.constant dense<0.000000e+00> : vector<128xf32>
    %144 = vector.multi_reduction <add>, %143, %cst_80 [0] : vector<384x128xf32> to vector<128xf32>
    %145 = vector.shape_cast %144 : vector<128xf32> to vector<1x128xf32>
    %c1_81 = arith.constant 1 : index
    %c2_82 = arith.constant 2 : index
    %c0_83 = arith.constant 0 : index
    %146 = vector.load %arg5[%c1_81, %c2_82, %c0_83] : memref<2x10x128xf32, #tpu.memory_space<vmem>>, vector<1x1x128xf32>
    %147 = vector.shape_cast %146 : vector<1x1x128xf32> to vector<1x128xf32>
    %148 = arith.addf %147, %145 : vector<1x128xf32>
    %c1_84 = arith.constant 1 : index
    %c2_85 = arith.constant 2 : index
    %c0_86 = arith.constant 0 : index
    %149 = vector.load %arg5[%c1_84, %c2_85, %c0_86] : memref<2x10x128xf32, #tpu.memory_space<vmem>>, vector<1x1x128xf32>
    %150 = vector.shape_cast %149 : vector<1x1x128xf32> to vector<1x128xf32>
    %151 = vector.shape_cast %148 : vector<1x128xf32> to vector<1x1x128xf32>
    tpu.vector_store %arg5[%c1_84, %c2_85, %c0_86], %151 {strides = array<i32>} : memref<2x10x128xf32, #tpu.memory_space<vmem>>, vector<1x1x128xf32>,
    %152 = vector.extract_strided_slice %4 {offsets = [3, 0, 0], sizes = [1, 384, 128], strides = [1, 1, 1]} : vector<10x384x128xf32> to vector<1x384x128xf32>
    %153 = vector.shape_cast %152 : vector<1x384x128xf32> to vector<384x128xf32>
    %154 = arith.mulf %118, %153 : vector<384x128xf32>
    %cst_87 = arith.constant dense<0.000000e+00> : vector<128xf32>
    %155 = vector.multi_reduction <add>, %154, %cst_87 [0] : vector<384x128xf32> to vector<128xf32>
    %156 = vector.shape_cast %155 : vector<128xf32> to vector<1x128xf32>
    %c1_88 = arith.constant 1 : index
    %c3_89 = arith.constant 3 : index
    %c0_90 = arith.constant 0 : index
    %157 = vector.load %arg5[%c1_88, %c3_89, %c0_90] : memref<2x10x128xf32, #tpu.memory_space<vmem>>, vector<1x1x128xf32>
    %158 = vector.shape_cast %157 : vector<1x1x128xf32> to vector<1x128xf32>
    %159 = arith.addf %158, %156 : vector<1x128xf32>
    %c1_91 = arith.constant 1 : index
    %c3_92 = arith.constant 3 : index
    %c0_93 = arith.constant 0 : index
    %160 = vector.load %arg5[%c1_91, %c3_92, %c0_93] : memref<2x10x128xf32, #tpu.memory_space<vmem>>, vector<1x1x128xf32>
    %161 = vector.shape_cast %160 : vector<1x1x128xf32> to vector<1x128xf32>
    %162 = vector.shape_cast %159 : vector<1x128xf32> to vector<1x1x128xf32>
    tpu.vector_store %arg5[%c1_91, %c3_92, %c0_93], %162 {strides = array<i32>} : memref<2x10x128xf32, #tpu.memory_space<vmem>>, vector<1x1x128xf32>,
    %163 = vector.extract_strided_slice %4 {offsets = [4, 0, 0], sizes = [1, 384, 128], strides = [1, 1, 1]} : vector<10x384x128xf32> to vector<1x384x128xf32>
    %164 = vector.shape_cast %163 : vector<1x384x128xf32> to vector<384x128xf32>
    %165 = arith.mulf %118, %164 : vector<384x128xf32>
    %cst_94 = arith.constant dense<0.000000e+00> : vector<128xf32>
    %166 = vector.multi_reduction <add>, %165, %cst_94 [0] : vector<384x128xf32> to vector<128xf32>
    %167 = vector.shape_cast %166 : vector<128xf32> to vector<1x128xf32>
    %c1_95 = arith.constant 1 : index
    %c4_96 = arith.constant 4 : index
    %c0_97 = arith.constant 0 : index
    %168 = vector.load %arg5[%c1_95, %c4_96, %c0_97] : memref<2x10x128xf32, #tpu.memory_space<vmem>>, vector<1x1x128xf32>
    %169 = vector.shape_cast %168 : vector<1x1x128xf32> to vector<1x128xf32>
    %170 = arith.addf %169, %167 : vector<1x128xf32>
    %c1_98 = arith.constant 1 : index
    %c4_99 = arith.constant 4 : index
    %c0_100 = arith.constant 0 : index
    %171 = vector.load %arg5[%c1_98, %c4_99, %c0_100] : memref<2x10x128xf32, #tpu.memory_space<vmem>>, vector<1x1x128xf32>
    %172 = vector.shape_cast %171 : vector<1x1x128xf32> to vector<1x128xf32>
    %173 = vector.shape_cast %170 : vector<1x128xf32> to vector<1x1x128xf32>
    tpu.vector_store %arg5[%c1_98, %c4_99, %c0_100], %173 {strides = array<i32>} : memref<2x10x128xf32, #tpu.memory_space<vmem>>, vector<1x1x128xf32>,
    %174 = vector.extract_strided_slice %4 {offsets = [5, 0, 0], sizes = [1, 384, 128], strides = [1, 1, 1]} : vector<10x384x128xf32> to vector<1x384x128xf32>
    %175 = vector.shape_cast %174 : vector<1x384x128xf32> to vector<384x128xf32>
    %176 = arith.mulf %118, %175 : vector<384x128xf32>
    %cst_101 = arith.constant dense<0.000000e+00> : vector<128xf32>
    %177 = vector.multi_reduction <add>, %176, %cst_101 [0] : vector<384x128xf32> to vector<128xf32>
    %178 = vector.shape_cast %177 : vector<128xf32> to vector<1x128xf32>
    %c1_102 = arith.constant 1 : index
    %c5_103 = arith.constant 5 : index
    %c0_104 = arith.constant 0 : index
    %179 = vector.load %arg5[%c1_102, %c5_103, %c0_104] : memref<2x10x128xf32, #tpu.memory_space<vmem>>, vector<1x1x128xf32>
    %180 = vector.shape_cast %179 : vector<1x1x128xf32> to vector<1x128xf32>
    %181 = arith.addf %180, %178 : vector<1x128xf32>
    %c1_105 = arith.constant 1 : index
    %c5_106 = arith.constant 5 : index
    %c0_107 = arith.constant 0 : index
    %182 = vector.load %arg5[%c1_105, %c5_106, %c0_107] : memref<2x10x128xf32, #tpu.memory_space<vmem>>, vector<1x1x128xf32>
    %183 = vector.shape_cast %182 : vector<1x1x128xf32> to vector<1x128xf32>
    %184 = vector.shape_cast %181 : vector<1x128xf32> to vector<1x1x128xf32>
    tpu.vector_store %arg5[%c1_105, %c5_106, %c0_107], %184 {strides = array<i32>} : memref<2x10x128xf32, #tpu.memory_space<vmem>>, vector<1x1x128xf32>,
    %185 = vector.extract_strided_slice %4 {offsets = [6, 0, 0], sizes = [1, 384, 128], strides = [1, 1, 1]} : vector<10x384x128xf32> to vector<1x384x128xf32>
    %186 = vector.shape_cast %185 : vector<1x384x128xf32> to vector<384x128xf32>
    %187 = arith.mulf %118, %186 : vector<384x128xf32>
    %cst_108 = arith.constant dense<0.000000e+00> : vector<128xf32>
    %188 = vector.multi_reduction <add>, %187, %cst_108 [0] : vector<384x128xf32> to vector<128xf32>
    %189 = vector.shape_cast %188 : vector<128xf32> to vector<1x128xf32>
    %c1_109 = arith.constant 1 : index
    %c6_110 = arith.constant 6 : index
    %c0_111 = arith.constant 0 : index
    %190 = vector.load %arg5[%c1_109, %c6_110, %c0_111] : memref<2x10x128xf32, #tpu.memory_space<vmem>>, vector<1x1x128xf32>
    %191 = vector.shape_cast %190 : vector<1x1x128xf32> to vector<1x128xf32>
    %192 = arith.addf %191, %189 : vector<1x128xf32>
    %c1_112 = arith.constant 1 : index
    %c6_113 = arith.constant 6 : index
    %c0_114 = arith.constant 0 : index
    %193 = vector.load %arg5[%c1_112, %c6_113, %c0_114] : memref<2x10x128xf32, #tpu.memory_space<vmem>>, vector<1x1x128xf32>
    %194 = vector.shape_cast %193 : vector<1x1x128xf32> to vector<1x128xf32>
    %195 = vector.shape_cast %192 : vector<1x128xf32> to vector<1x1x128xf32>
    tpu.vector_store %arg5[%c1_112, %c6_113, %c0_114], %195 {strides = array<i32>} : memref<2x10x128xf32, #tpu.memory_space<vmem>>, vector<1x1x128xf32>,
    %196 = vector.extract_strided_slice %4 {offsets = [7, 0, 0], sizes = [1, 384, 128], strides = [1, 1, 1]} : vector<10x384x128xf32> to vector<1x384x128xf32>
    %197 = vector.shape_cast %196 : vector<1x384x128xf32> to vector<384x128xf32>
    %198 = arith.mulf %118, %197 : vector<384x128xf32>
    %cst_115 = arith.constant dense<0.000000e+00> : vector<128xf32>
    %199 = vector.multi_reduction <add>, %198, %cst_115 [0] : vector<384x128xf32> to vector<128xf32>
    %200 = vector.shape_cast %199 : vector<128xf32> to vector<1x128xf32>
    %c1_116 = arith.constant 1 : index
    %c7_117 = arith.constant 7 : index
    %c0_118 = arith.constant 0 : index
    %201 = vector.load %arg5[%c1_116, %c7_117, %c0_118] : memref<2x10x128xf32, #tpu.memory_space<vmem>>, vector<1x1x128xf32>
    %202 = vector.shape_cast %201 : vector<1x1x128xf32> to vector<1x128xf32>
    %203 = arith.addf %202, %200 : vector<1x128xf32>
    %c1_119 = arith.constant 1 : index
    %c7_120 = arith.constant 7 : index
    %c0_121 = arith.constant 0 : index
    %204 = vector.load %arg5[%c1_119, %c7_120, %c0_121] : memref<2x10x128xf32, #tpu.memory_space<vmem>>, vector<1x1x128xf32>
    %205 = vector.shape_cast %204 : vector<1x1x128xf32> to vector<1x128xf32>
    %206 = vector.shape_cast %203 : vector<1x128xf32> to vector<1x1x128xf32>
    tpu.vector_store %arg5[%c1_119, %c7_120, %c0_121], %206 {strides = array<i32>} : memref<2x10x128xf32, #tpu.memory_space<vmem>>, vector<1x1x128xf32>,
    %207 = vector.extract_strided_slice %4 {offsets = [8, 0, 0], sizes = [1, 384, 128], strides = [1, 1, 1]} : vector<10x384x128xf32> to vector<1x384x128xf32>
    %208 = vector.shape_cast %207 : vector<1x384x128xf32> to vector<384x128xf32>
    %209 = arith.mulf %118, %208 : vector<384x128xf32>
    %cst_122 = arith.constant dense<0.000000e+00> : vector<128xf32>
    %210 = vector.multi_reduction <add>, %209, %cst_122 [0] : vector<384x128xf32> to vector<128xf32>
    %211 = vector.shape_cast %210 : vector<128xf32> to vector<1x128xf32>
    %c1_123 = arith.constant 1 : index
    %c8_124 = arith.constant 8 : index
    %c0_125 = arith.constant 0 : index
    %212 = vector.load %arg5[%c1_123, %c8_124, %c0_125] : memref<2x10x128xf32, #tpu.memory_space<vmem>>, vector<1x1x128xf32>
    %213 = vector.shape_cast %212 : vector<1x1x128xf32> to vector<1x128xf32>
    %214 = arith.addf %213, %211 : vector<1x128xf32>
    %c1_126 = arith.constant 1 : index
    %c8_127 = arith.constant 8 : index
    %c0_128 = arith.constant 0 : index
    %215 = vector.load %arg5[%c1_126, %c8_127, %c0_128] : memref<2x10x128xf32, #tpu.memory_space<vmem>>, vector<1x1x128xf32>
    %216 = vector.shape_cast %215 : vector<1x1x128xf32> to vector<1x128xf32>
    %217 = vector.shape_cast %214 : vector<1x128xf32> to vector<1x1x128xf32>
    tpu.vector_store %arg5[%c1_126, %c8_127, %c0_128], %217 {strides = array<i32>} : memref<2x10x128xf32, #tpu.memory_space<vmem>>, vector<1x1x128xf32>,
    %218 = vector.extract_strided_slice %4 {offsets = [9, 0, 0], sizes = [1, 384, 128], strides = [1, 1, 1]} : vector<10x384x128xf32> to vector<1x384x128xf32>
    %219 = vector.shape_cast %218 : vector<1x384x128xf32> to vector<384x128xf32>
    %220 = arith.mulf %118, %219 : vector<384x128xf32>
    %cst_129 = arith.constant dense<0.000000e+00> : vector<128xf32>
    %221 = vector.multi_reduction <add>, %220, %cst_129 [0] : vector<384x128xf32> to vector<128xf32>
    %222 = vector.shape_cast %221 : vector<128xf32> to vector<1x128xf32>
    %c1_130 = arith.constant 1 : index
    %c9_131 = arith.constant 9 : index
    %c0_132 = arith.constant 0 : index
    %223 = vector.load %arg5[%c1_130, %c9_131, %c0_132] : memref<2x10x128xf32, #tpu.memory_space<vmem>>, vector<1x1x128xf32>
    %224 = vector.shape_cast %223 : vector<1x1x128xf32> to vector<1x128xf32>
    %225 = arith.addf %224, %222 : vector<1x128xf32>
    %c1_133 = arith.constant 1 : index
    %c9_134 = arith.constant 9 : index
    %c0_135 = arith.constant 0 : index
    %226 = vector.load %arg5[%c1_133, %c9_134, %c0_135] : memref<2x10x128xf32, #tpu.memory_space<vmem>>, vector<1x1x128xf32>
    %227 = vector.shape_cast %226 : vector<1x1x128xf32> to vector<1x128xf32>
    %228 = vector.shape_cast %225 : vector<1x128xf32> to vector<1x1x128xf32>
    tpu.vector_store %arg5[%c1_133, %c9_134, %c0_135], %228 {strides = array<i32>} : memref<2x10x128xf32, #tpu.memory_space<vmem>>, vector<1x1x128xf32>,
    %c1_i32 = arith.constant 1 : i32
    %229 = arith.cmpi eq, %arg1, %c1_i32 : i32
    %230 = arith.extui %229 : i1 to i32
    %c0_i32_136 = arith.constant 0 : i32
    %231 = arith.cmpi ne, %230, %c0_i32_136 : i32
    scf.if %231 {
      %c0_137 = arith.constant 0 : index
      %c0_138 = arith.constant 0 : index
      %c0_139 = arith.constant 0 : index
      %232 = vector.load %arg5[%c0_137, %c0_138, %c0_139] : memref<2x10x128xf32, #tpu.memory_space<vmem>>, vector<2x10x128xf32>
      %cst_140 = arith.constant dense<0.000000e+00> : vector<2x10xf32>
      %233 = vector.multi_reduction <add>, %232, %cst_140 [2] : vector<2x10x128xf32> to vector<2x10xf32>
      %c0_141 = arith.constant 0 : index
      %c0_142 = arith.constant 0 : index
      %c0_143 = arith.constant 0 : index
      %234 = vector.load %arg4[%c0_141, %c0_142, %c0_143] : memref<1x2x10xf32, #tpu.memory_space<vmem>>, vector<1x2x10xf32>
      %235 = vector.shape_cast %234 : vector<1x2x10xf32> to vector<2x10xf32>
      %236 = vector.shape_cast %233 : vector<2x10xf32> to vector<1x2x10xf32>
      tpu.vector_store %arg4[%c0_141, %c0_142, %c0_143], %236 {strides = array<i32>} : memref<1x2x10xf32, #tpu.memory_space<vmem>>, vector<1x2x10xf32>,
    } else {
    }
    return
  }
  func.func @transform_0(%arg0: i32, %arg1: i32) -> (i32, i32, i32) {
    %c2_i32 = arith.constant 2 : i32
    %0 = arith.muli %arg0, %c2_i32 : i32
    %1 = arith.addi %0, %arg1 : i32
    %c0_i32 = arith.constant 0 : i32
    %c0_i32_0 = arith.constant 0 : i32
    %c0_i32_1 = arith.constant 0 : i32
    return %c0_i32, %1, %c0_i32_0 : i32, i32, i32
  }
  func.func @transform_1(%arg0: i32, %arg1: i32) -> (i32, i32, i32) {
    %c2_i32 = arith.constant 2 : i32
    %0 = arith.muli %arg0, %c2_i32 : i32
    %1 = arith.addi %0, %arg1 : i32
    %c0_i32 = arith.constant 0 : i32
    %c0_i32_0 = arith.constant 0 : i32
    %c0_i32_1 = arith.constant 0 : i32
    return %c0_i32, %1, %c0_i32_0 : i32, i32, i32
  }
  func.func @transform_2(%arg0: i32, %arg1: i32) -> (i32, i32, i32) {
    %c0_i32 = arith.constant 0 : i32
    %c0_i32_0 = arith.constant 0 : i32
    %c0_i32_1 = arith.constant 0 : i32
    return %arg0, %c0_i32, %c0_i32_0 : i32, i32, i32
  }
}

</mosaic_0001>

<bundles_post_ra>
// kernel: tpu_custom_call.1
= control target key start
LH: loop header
LB: loop body
LE: loop exit
PB: predicated region body
PF: predicated region fallthrough
CT: control target
= control target key end

     0   :  { %7 = vsyncpa [#allocation4], 0  ;;  %s7408_s0 = inlined_call_operand.hbm [shape: f32[2,1536,128], index: 0, kind: input, shape index: {}]   ;;  %s7409_s1 = inlined_call_operand.hbm [shape: f32[10,1536,128], index: 1, kind: input, shape index: {}]   ;;  %s7410_s2 = inlined_call_operand.hbm [shape: f32[2,2,10], index: 2, kind: output, shape index: {}]  }
   0x1   :  { %9 = vsyncpa [#allocation4 + $0x1], 0 }
   0x2   :  { %10 = vsyncpa [#allocation7], 0 }
   0x3   :  { %12 = vsyncpa [#allocation7 + $0x1], 0 }
   0x4   :  { %13 = vsyncpa [#allocation5], 0 }
   0x5   :  { %15 = vsyncpa [#allocation5 + $0x1], 0  ;;  %s4065_s9 = smov 0   ;;  %s4067_s10 = smov 0  }
   0x6   :  { %s4069_s11 = smov 0   ;;  %s4071_s12 = smov 0  }
   0x7   :  { %s4073_s13 = smov 0   ;;  %s4075_s14 = smov 0  }
   0x8   :  { %s4077_s15 = smov 0   ;;  %s4079_s16 = smov 0  }
   0x9   :  { %s4081_s17 = smov 0   ;;  %s4083_s18 = smov 0  }
   0xa   :  { %s4085_s19 = smov 0  }
   0xb LB: > { %7626 = sst [smem:[#allocation18_spill]] %s4026_s17  ;;  %s3119_s20 = sadd.s32 4294967295, %s4034_s19   ;;  %s4034_s19 = sphi %s4085_s19, %s21_s19   ;;  %s4030_s18 = sphi %s4083_s18, %s7957_s18   ;;  %s4026_s17 = sphi %s4081_s17, %s7956_s17   ;;  %s4022_s16 = sphi %s4079_s16, %s7955_s16   ;;  %s4018_s15 = sphi %s4077_s15, %s7954_s15   ;;  %s4014_s14 = sphi %s4075_s14, %s7963_s14   ;;  %s4010_s13 = sphi %s4073_s13, %s7962_s13   ;;  %s4006_s12 = sphi %s4071_s12, %s7961_s12   ;;  %s4002_s11 = sphi %s4069_s11, %s7960_s11   ;;  %s3998_s10 = sphi %s4067_s10, %s7959_s10   ;;  %s3994_s9 = sphi %s4065_s9, %s7958_s9  }
   0xc   : > { %7627 = sst [smem:[#allocation19_spill]] %s4030_s18  ;;  %s3120_s21 = sadd.s32 4294967294, %s4034_s19  }
   0xd   : > { %s30_s22 = sadd.s32 1, %s4026_s17  ;;  %s33_s23 = sadd.s32 1, %s4030_s18 }
   0xe   : > { %p31_p0 = scmp.ge.s32.totalorder %s30_s22, 2  ;;  %s3121_s24 = sshll.u32 %s4030_s18, 1 }
   0xf   : > { %s4124_s25 = sadd.s32 %s4026_s17, %s3121_s24  ;;  %s44_s26 = sadd.s32 1, %s4014_s14 }
  0x10   : > { %s7965_s22 = smov (%p31_p0, %s30_s22), 0  ;;  %s7967_s23 = smov (!%p31_p0, %s33_s23), %s4030_s18 }
  0x11   : > { %7628 = sst [smem:[#allocation20_spill]] %s7965_s22  ;;  %p51_p1 = scmp.ne.s32.totalorder %s4014_s14, %s4010_s13 }
  0x12   : > { %p52_p2 = scmp.eq.s32.totalorder %s4034_s19, 0  ;;  %p35_p3 = scmp.ge.s32.totalorder %s7967_s23, 2 }
  0x13   : > { %p57_p4 = scmp.ne.s32.totalorder %s4010_s13, %s4006_s12  ;;  %p58_p6 = scmp.eq.s32.totalorder %s3119_s20, 0 }
  0x14   : > { %p4134_p5 = por %p52_p2, %p51_p1  ;;  %s7969_s23 = smov (%p35_p3, %s7967_s23), 0 }
  0x15   : > { %7630 = sst [smem:[#allocation21_spill]] %s7969_s23  ;;  %p4140_p7 = por %p58_p6, %p57_p4 }
  0x16   : > { %s100_s29 = sadd.s32 1, %s4002_s11  ;;  %s3122_s30 = sshll.u32 %s7969_s23, 1 }
  0x17   : > { %s97_s3 = ssub.s32 %s4030_s18, %s7969_s23  ;;  %s40_s4 = sadd.s32 %s3122_s30, %s7965_s22 }
  0x18   : > { %p98_p8 = scmp.eq.s32.totalorder %s97_s3, 0  ;;  %s41_s5 = ssub.s32 %s4124_s25, %s40_s4 }
  0x19   : > { %p110_p9 = scmp.ne.s32.totalorder %s4002_s11, %s3998_s10  ;;  %p42_p10 = scmp.eq.s32.totalorder %s41_s5, 0 }
  0x1a   : > { %p111_p11 = scmp.eq.s32.totalorder %s3119_s20, 3  ;;  %p116_p13 = scmp.ne.s32.totalorder %s3998_s10, %s3994_s9 }
  0x1b   : > { %s4153_s6 = scalar_select %p98_p8, %s4002_s11, %s100_s29  }
  0x1c   : > { %s4156_s7 = scalar_select %p42_p10, %s4014_s14, %s44_s26  }
  0x1d   : > { %p4158_p12 = por %p111_p11, %p110_p9  ;;  %p117_p0 = scmp.eq.s32.totalorder %s3120_s21, 3 }
  0x1e   : > { %p3126_p2 = scmp.ge.s32.totalorder %s4034_s19, 4 }
  0x1f   : > { %p4166_p1 = por %p117_p0, %p116_p13 }
  0x20   : > { %133 = sbr.rel (%p3126_p2) target bundleno = 66 (0x42), region = 16 }
  0x27   : > { %s4172_s20 = sand.u32 1, %s4014_s14   ;;  %s3143_s24 = smul.u32 6144, %s4124_s25 }
  0x28   : > { %s3145_s21 = smul.u32 768, %s4172_s20  ;;  %s4036_s26 = smov 24576  }
  0x29   : > { %3150 = sst [smem:[#allocation10]] (%p4134_p5), %s4036_s26  ;;  %s149_s4 = scalar_lea.hbm %s7408_s0, %s3143_s24 }
  0x2a   : > { %s3149_s29 = scalar_select %p4134_p5, [#allocation0], [#allocation13] }
  0x2b   : > { %s141_s23 = scalar_lea.vmem [#allocation3], %s3145_s21  ;;  %s4037_s18 = smov 6144  }
  0x2c   : > { %s154_s5 = sld [smem:[%s3149_s29]]   ;;  %s162_s22 = sshll.u32 %s141_s23, 4  ;;  %s163_s22 = int_to_ptr.vmem [resolvable:$true] %s162_s22 }
  0x2d   : > { %3151 = sst [smem:[#allocation10 + $0x1]] (%p4134_p5), %s4037_s18  ;;  %s4038_s25 = smov 48  }
  0x2e   : > { %3152 = sst [smem:[#allocation10 + $0x2]] (%p4134_p5), %s4038_s25  ;;  %s4039_s17 = smov 128  }
  0x2f   : > { %3153 = sst [smem:[#allocation10 + $0x3]] (%p4134_p5), %s4039_s17  ;;  %s4040_s26 = smov 8  }
  0x30   : > { %3154 = sst [smem:[#allocation10 + $0x4]] (%p4134_p5), %s4039_s17  ;;  %s138_s21 = scalar_lea.sflag [#allocation4], %s4172_s20 }
  0x31   : > { %3155 = sst [smem:[#allocation10 + $0x5]] (%p4134_p5), %s4040_s26  ;;  %s4041_s3 = smov [#allocation9]  }
  0x32   : > { %s3129_s30 = sshll.u32 %s154_s5, 26 }
  0x33   : > { %s3130_s29 = sadd.s32 134217728, %s3129_s30 }
  0x34   : > { %3156 = dma.general (%p4134_p5), %s149_s4, 12288, %s163_s22, %s138_s21, %s4041_s3, [#allocation10], %s3130_s29, 0  }
  0x35   : > { %s3146_s18 = smul.u32 3840, %s4172_s20  ;;  %s4042_s23 = smov 24576  }
  0x36   : > { %3158 = sst [smem:[#allocation12]] (%p4134_p5), %s4042_s23  ;;  %s197_s26 = scalar_lea.hbm %s7409_s1, %s3143_s24 }
  0x37   : > { %s3157_s17 = scalar_select %p4134_p5, [#allocation0], [#allocation14] }
  0x38   : > { %s189_s4 = scalar_lea.vmem [#allocation6], %s3146_s18  ;;  %s4043_s29 = smov 6144  }
  0x39   : > { %s202_s22 = sld [smem:[%s3157_s17]]   ;;  %s210_s30 = sshll.u32 %s189_s4, 4  ;;  %s211_s30 = int_to_ptr.vmem [resolvable:$true] %s210_s30 }
  0x3a   : > { %3159 = sst [smem:[#allocation12 + $0x1]] (%p4134_p5), %s4043_s29  ;;  %s4044_s21 = smov 48  }
  0x3b   : > { %3160 = sst [smem:[#allocation12 + $0x2]] (%p4134_p5), %s4044_s21  ;;  %s4045_s3 = smov 128  }
  0x3c   : > { %3161 = sst [smem:[#allocation12 + $0x3]] (%p4134_p5), %s4045_s3  ;;  %s4046_s23 = smov 8  }
  0x3d   : > { %3162 = sst [smem:[#allocation12 + $0x4]] (%p4134_p5), %s4045_s3  ;;  %s186_s18 = scalar_lea.sflag [#allocation7], %s4172_s20 }
  0x3e   : > { %3163 = sst [smem:[#allocation12 + $0x5]] (%p4134_p5), %s4046_s23  ;;  %s4047_s5 = smov [#allocation11]  }
  0x3f   : > { %s3133_s24 = sshll.u32 %s202_s22, 26 }
  0x40   : > { %s3134_s17 = sadd.s32 134217728, %s3133_s24 }
  0x41   : > { %3164 = dma.general (%p4134_p5), %s197_s26, 61440, %s211_s30, %s186_s18, %s4047_s5, [#allocation12], %s3134_s17, 0  }
  0x42 PF: > { %p3135_p3 = scmp.ge.s32.totalorder %s4034_s19, 1  ;;  %p231_p4 = scmp.lt.s32.totalorder %s4034_s19, 5 }
  0x44   : > { %p232_p6 = pnand %p3135_p3, %p231_p4 }
  0x46   : > { %235 = sbr.rel (%p232_p6) target bundleno = 871 (0x367), region = 28 }
  0x4d   : > { %s237_s25 = sand.u32 1, %s4010_s13  }
  0x4e   : > { %s3147_s4 = smul.u32 768, %s237_s25  ;;  %s238_s29 = scalar_lea.sflag [#allocation4], %s237_s25 }
  0x50   : > { %s4220_s21 = scalar_lea.vmem [#allocation3], %s3147_s4 }
  0x51   : > { %3981 = dma.done.wait (%p4140_p7), %s238_s29, 12288  }
  0x52   : > { %3983 = vsyncadd (%p4140_p7), %s238_s29, 4294955008  ;;  %s3148_s27 = smul.u32 3840, %s237_s25  ;;  %s247_s20 = scalar_lea.sflag [#allocation7], %s237_s25 }
  0x54   : > { %s4226_s26 = scalar_lea.vmem [#allocation6], %s3148_s27 }
  0x55   : > { %3985 = dma.done.wait (%p4140_p7), %s247_s20, 61440  }
  0x56   : > { %3987 = vsyncadd (%p4140_p7), %s247_s20, 4294905856  ;;  %s273_s22 = sand.u32 1, %s3998_s10   ;;  %p3137_p5 = scmp.ne.s32.totalorder %s4018_s15, 0 }
  0x57   : > { %s4235_s30 = sshll.u32 %s273_s22, 1  ;;  %v4048_v0 = vmov (!%p3137_p5), 0.0  }
  0x58   : > { %s275_s3 = scalar_lea.vmem [#allocation8], %s4235_s30  ;;  %285 = sbr.rel (%p3137_p5) target bundleno = 95 (0x5f), region = 40  ;;  %286 = vst [vmem:[#allocation2] sm:$0xff] (!%p3137_p5), %v4048_v0  ;;  %287 = vst [vmem:[#allocation2 + $0x8] sm:$0x3] (!%p3137_p5), %v4048_v0 }
  0x59   : > { %288 = vst [vmem:[#allocation2 + $0x10] sm:$0xff] (!%p3137_p5), %v4048_v0  ;;  %289 = vst [vmem:[#allocation2 + $0x18] sm:$0x3] (!%p3137_p5), %v4048_v0 }
  0x5f PF: > { %v4240_v1 = vld [vmem:[%s4220_s21] sm:$0xff]  ;;  %v4243_v2 = vld [vmem:[%s4220_s21 + $0x8] sm:$0xff]  ;;  %v4248_v5 = vld [vmem:[%s4220_s21 + $0x10] sm:$0xff]  ;;  %p3138_p7 = scmp.ne.s32.totalorder %s4018_s15, 1 }
  0x60   : > { %7634 = vst [vmem:[#allocation22_spill] sm:$0xff] %v4240_v1  ;;  %7635 = vst [vmem:[#allocation23_spill] sm:$0xff] %v4243_v2  ;;  %v386_v3 = vld [vmem:[%s4226_s26] sm:$0xff]  ;;  %v387_v4 = vld [vmem:[%s4226_s26 + $0x8] sm:$0xff]  ;;  %vm2957_vm0 = vcmask (!%p3138_p7), 1041408   ;;  %vm2981_vm1 = vcmask (!%p3138_p7), 130112  }
  0x61   : > { %7636 = vst [vmem:[#allocation24_spill] sm:$0xff] %v4248_v5  ;;  %v388_v6 = vld [vmem:[%s4226_s26 + $0x10] sm:$0xff]  ;;  %v866_v7 = vmul.f32 %v386_v3, %v4240_v1  ;;  %v867_v8 = vmul.f32 %v387_v4, %v4243_v2  ;;  %v4254_v9 = vld [vmem:[%s4220_s21 + $0x18] sm:$0xff]  ;;  %v434_v13 = vld [vmem:[%s4226_s26 + $0x180] sm:$0xff]  ;;  %vm2992_vm2 = vcmask (!%p3138_p7), 1041409   ;;  %vm2995_vm3 = vcmask (!%p3138_p7), 74752  }
  0x62   : > { %7637 = vst [vmem:[#allocation25_spill] sm:$0xff] %v4254_v9  ;;  %v389_v10 = vld [vmem:[%s4226_s26 + $0x18] sm:$0xff]  ;;  %v868_v11 = vmul.f32 %v388_v6, %v4248_v5  ;;  %v435_v14 = vld [vmem:[%s4226_s26 + $0x188] sm:$0xff]  ;;  %v4262_v17 = vld [vmem:[%s4220_s21 + $0x20] sm:$0xff]  ;;  %v970_v19 = vmul.f32 %v434_v13, %v4240_v1 }
  0x63   : > { %v914_v12 = vadd.f32 %v867_v8, %v866_v7  ;;  %v869_v15 = vmul.f32 %v389_v10, %v4254_v9  ;;  %7638 = vst [vmem:[#allocation26_spill] sm:$0xff] %v4262_v17  ;;  %v390_v18 = vld [vmem:[%s4226_s26 + $0x20] sm:$0xff]  ;;  %v971_v20 = vmul.f32 %v435_v14, %v4243_v2  ;;  %v436_v21 = vld [vmem:[%s4226_s26 + $0x190] sm:$0xff]  ;;  %v4270_v24 = vld [vmem:[%s4220_s21 + $0x28] sm:$0xff] }
  0x64   : > { %v870_v22 = vmul.f32 %v390_v18, %v4262_v17  ;;  %7639 = vst [vmem:[#allocation27_spill] sm:$0xff] %v4270_v24  ;;  %v391_v25 = vld [vmem:[%s4226_s26 + $0x28] sm:$0xff]  ;;  %v972_v26 = vmul.f32 %v436_v21, %v4248_v5  ;;  %v437_v28 = vld [vmem:[%s4226_s26 + $0x198] sm:$0xff]  ;;  %v4277_v31 = vld [vmem:[%s4220_s21 + $0x30] sm:$0xff] }
  0x65   : > { %v915_v16 = vadd.f32 %v914_v12, %v868_v11  ;;  %v1018_v27 = vadd.f32 %v971_v20, %v970_v19  ;;  %v871_v29 = vmul.f32 %v391_v25, %v4270_v24  ;;  %v392_v32 = vld [vmem:[%s4226_s26 + $0x30] sm:$0xff]  ;;  %v973_v33 = vmul.f32 %v437_v28, %v4254_v9  ;;  %v438_v35 = vld [vmem:[%s4226_s26 + $0x1a0] sm:$0xff]  ;;  %v4284_v38 = vld [vmem:[%s4220_s21 + $0x38] sm:$0xff] }
  0x66   : > { %v872_v36 = vmul.f32 %v392_v32, %v4277_v31  ;;  %v393_v39 = vld [vmem:[%s4226_s26 + $0x38] sm:$0xff]  ;;  %v4288_v40 = vld [vmem:[%s4220_s21 + $0x40] sm:$0xff]  ;;  %v974_v42 = vmul.f32 %v438_v35, %v4262_v17  ;;  %v439_v44 = vld [vmem:[%s4226_s26 + $0x1a8] sm:$0xff] }
  0x67   : > { %v916_v23 = vadd.f32 %v915_v16, %v869_v15  ;;  %v1019_v34 = vadd.f32 %v1018_v27, %v972_v26  ;;  %v394_v41 = vld [vmem:[%s4226_s26 + $0x40] sm:$0xff]  ;;  %v873_v45 = vmul.f32 %v393_v39, %v4284_v38  ;;  %v4295_v47 = vld [vmem:[%s4220_s21 + $0x48] sm:$0xff]  ;;  %v4300_v50 = vld [vmem:[%s4220_s21 + $0x50] sm:$0xff]  ;;  %v975_v52 = vmul.f32 %v439_v44, %v4270_v24 }
  0x68   : > { %v395_v48 = vld [vmem:[%s4226_s26 + $0x48] sm:$0xff]  ;;  %v874_v49 = vmul.f32 %v394_v41, %v4288_v40  ;;  %v396_v51 = vld [vmem:[%s4226_s26 + $0x50] sm:$0xff]  ;;  %v4307_v57 = vld [vmem:[%s4220_s21 + $0x58] sm:$0xff] }
  0x69   : > { %v917_v30 = vadd.f32 %v916_v23, %v870_v22  ;;  %v1020_v43 = vadd.f32 %v1019_v34, %v973_v33  ;;  %v440_v54 = vld [vmem:[%s4226_s26 + $0x1b0] sm:$0xff]  ;;  %v875_v55 = vmul.f32 %v395_v48, %v4295_v47  ;;  %7640 = vst [vmem:[#allocation28_spill] sm:$0xff] %v4307_v57  ;;  %v397_v58 = vld [vmem:[%s4226_s26 + $0x58] sm:$0xff]  ;;  %v876_v59 = vmul.f32 %v396_v51, %v4300_v50  ;;  %v4312_v61 = vld [vmem:[%s4220_s21 + $0x60] sm:$0xff] }
  0x6a   : > { %7641 = vst [vmem:[#allocation29_spill] sm:$0xff] %v4312_v61  ;;  %v398_v62 = vld [vmem:[%s4226_s26 + $0x60] sm:$0xff]  ;;  %v976_v63 = vmul.f32 %v440_v54, %v4277_v31  ;;  %v441_v3 = vld [vmem:[%s4226_s26 + $0x1b8] sm:$0xff]  ;;  %v877_v4 = vmul.f32 %v397_v58, %v4307_v57  ;;  %v4319_v7 = vld [vmem:[%s4220_s21 + $0x68] sm:$0xff] }
  0x6b   : > { %v918_v37 = vadd.f32 %v917_v30, %v871_v29  ;;  %v1021_v53 = vadd.f32 %v1020_v43, %v974_v42  ;;  %7642 = vst [vmem:[#allocation30_spill] sm:$0xff] %v4319_v7  ;;  %v399_v8 = vld [vmem:[%s4226_s26 + $0x68] sm:$0xff]  ;;  %v442_v10 = vld [vmem:[%s4226_s26 + $0x1c0] sm:$0xff]  ;;  %v878_v11 = vmul.f32 %v398_v62, %v4312_v61  ;;  %v4325_v13 = vld [vmem:[%s4220_s21 + $0x70] sm:$0xff]  ;;  %v977_v15 = vmul.f32 %v441_v3, %v4284_v38 }
  0x6c   : > { %7643 = vst [vmem:[#allocation31_spill] sm:$0xff] %v4325_v13  ;;  %v400_v14 = vld [vmem:[%s4226_s26 + $0x70] sm:$0xff]  ;;  %v443_v18 = vld [vmem:[%s4226_s26 + $0x1c8] sm:$0xff]  ;;  %v879_v19 = vmul.f32 %v399_v8, %v4319_v7  ;;  %v4332_v21 = vld [vmem:[%s4220_s21 + $0x78] sm:$0xff]  ;;  %v978_v23 = vmul.f32 %v442_v10, %v4288_v40 }
  0x6d   : > { %v919_v46 = vadd.f32 %v918_v37, %v872_v36  ;;  %v1022_v0 = vadd.f32 %v1021_v53, %v975_v52  ;;  %7644 = vst [vmem:[#allocation32_spill] sm:$0xff] %v4332_v21  ;;  %v401_v22 = vld [vmem:[%s4226_s26 + $0x78] sm:$0xff]  ;;  %v444_v25 = vld [vmem:[%s4226_s26 + $0x1d0] sm:$0xff]  ;;  %v880_v26 = vmul.f32 %v400_v14, %v4325_v13  ;;  %v4339_v28 = vld [vmem:[%s4220_s21 + $0x80] sm:$0xff]  ;;  %v979_v30 = vmul.f32 %v443_v18, %v4295_v47 }
  0x6e   : > { %7645 = vst [vmem:[#allocation33_spill] sm:$0xff] %v4339_v28  ;;  %v402_v29 = vld [vmem:[%s4226_s26 + $0x80] sm:$0xff]  ;;  %v445_v33 = vld [vmem:[%s4226_s26 + $0x1d8] sm:$0xff]  ;;  %v881_v34 = vmul.f32 %v401_v22, %v4332_v21  ;;  %v4346_v36 = vld [vmem:[%s4220_s21 + $0x88] sm:$0xff]  ;;  %v980_v39 = vmul.f32 %v444_v25, %v4300_v50 }
  0x6f   : > { %v920_v56 = vadd.f32 %v919_v46, %v873_v45  ;;  %v1023_v16 = vadd.f32 %v1022_v0, %v976_v63  ;;  %7646 = vst [vmem:[#allocation34_spill] sm:$0xff] %v4346_v36  ;;  %v403_v37 = vld [vmem:[%s4226_s26 + $0x88] sm:$0xff]  ;;  %v446_v42 = vld [vmem:[%s4226_s26 + $0x1e0] sm:$0xff]  ;;  %v882_v43 = vmul.f32 %v402_v29, %v4339_v28  ;;  %v4353_v45 = vld [vmem:[%s4220_s21 + $0x90] sm:$0xff]  ;;  %v981_v48 = vmul.f32 %v445_v33, %v4307_v57 }
  0x70   : > { %7647 = vst [vmem:[#allocation35_spill] sm:$0xff] %v4353_v45  ;;  %v404_v46 = vld [vmem:[%s4226_s26 + $0x90] sm:$0xff]  ;;  %v447_v51 = vld [vmem:[%s4226_s26 + $0x1e8] sm:$0xff]  ;;  %v883_v52 = vmul.f32 %v403_v37, %v4346_v36  ;;  %v4360_v54 = vld [vmem:[%s4220_s21 + $0x98] sm:$0xff]  ;;  %v982_v58 = vmul.f32 %v446_v42, %v4312_v61 }
  0x71   : > { %v921_v60 = vadd.f32 %v920_v56, %v874_v49  ;;  %v1024_v32 = vadd.f32 %v1023_v16, %v977_v15  ;;  %7648 = vst [vmem:[#allocation36_spill] sm:$0xff] %v4360_v54  ;;  %v405_v56 = vld [vmem:[%s4226_s26 + $0x98] sm:$0xff]  ;;  %v4371_v62 = vld [vmem:[%s4220_s21 + $0xb0] sm:$0xff]  ;;  %v884_v0 = vmul.f32 %v404_v46, %v4353_v45  ;;  %v4382_v8 = vld [vmem:[%s4220_s21 + $0xc8] sm:$0xff]  ;;  %v983_v14 = vmul.f32 %v447_v51, %v4319_v7 }
  0x72   : > { %v448_v63 = vld [vmem:[%s4226_s26 + $0x1f0] sm:$0xff]  ;;  %7651 = vst [vmem:[#allocation39_spill] sm:$0xff] %v4382_v8  ;;  %v406_v10 = vld [vmem:[%s4226_s26 + $0xa0] sm:$0xff]  ;;  %v449_v18 = vld [vmem:[%s4226_s26 + $0x1f8] sm:$0xff]  ;;  %v885_v22 = vmul.f32 %v405_v56, %v4360_v54 }
  0x73   : > { %v922_v6 = vadd.f32 %v921_v60, %v875_v55  ;;  %v1025_v41 = vadd.f32 %v1024_v32, %v978_v23  ;;  %v4363_v55 = vld [vmem:[%s4220_s21 + $0xa0] sm:$0xff]  ;;  %v4368_v60 = vld [vmem:[%s4220_s21 + $0xa8] sm:$0xff]  ;;  %v4389_v16 = vld [vmem:[%s4220_s21 + $0xd0] sm:$0xff]  ;;  %v984_v33 = vmul.f32 %v448_v63, %v4325_v13 }
  0x74   : > { %7652 = vst [vmem:[#allocation40_spill] sm:$0xff] %v4389_v16  ;;  %v4396_v25 = vld [vmem:[%s4220_s21 + $0xd8] sm:$0xff]  ;;  %v411_v32 = vld [vmem:[%s4226_s26 + $0xc8] sm:$0xff]  ;;  %v450_v37 = vld [vmem:[%s4226_s26 + $0x200] sm:$0xff] }
  0x75   : > { %v923_v12 = vadd.f32 %v922_v6, %v876_v59  ;;  %v1026_v49 = vadd.f32 %v1025_v41, %v979_v30  ;;  %v4379_v6 = vld [vmem:[%s4220_s21 + $0xc0] sm:$0xff]  ;;  %7653 = vst [vmem:[#allocation41_spill] sm:$0xff] %v4396_v25  ;;  %v409_v29 = vld [vmem:[%s4226_s26 + $0xb8] sm:$0xff]  ;;  %v886_v41 = vmul.f32 %v406_v10, %v4363_v55  ;;  %v4417_v46 = vld [vmem:[%s4220_s21 + $0xf0] sm:$0xff] }
  0x76   : > { %7650 = vst [vmem:[#allocation38_spill] sm:$0xff] %v4379_v6  ;;  %v410_v30 = vld [vmem:[%s4226_s26 + $0xc0] sm:$0xff]  ;;  %7656 = vst [vmem:[#allocation44_spill] sm:$0xff] %v4417_v46 }
  0x77   : > { %v924_v20 = vadd.f32 %v923_v12, %v877_v4  ;;  %v1027_v59 = vadd.f32 %v1026_v49, %v980_v39  ;;  %v4376_v4 = vld [vmem:[%s4220_s21 + $0xb8] sm:$0xff]  ;;  %v408_v12 = vld [vmem:[%s4226_s26 + $0xb0] sm:$0xff]  ;;  %v414_v51 = vld [vmem:[%s4226_s26 + $0xe0] sm:$0xff] }
  0x78   : > { %7649 = vst [vmem:[#allocation37_spill] sm:$0xff] %v4376_v4  ;;  %v484_v39 = vld [vmem:[%s4226_s26 + $0x310] sm:$0xff]  ;;  %v413_v49 = vld [vmem:[%s4226_s26 + $0xd8] sm:$0xff]  ;;  %v4429_v63 = vld [vmem:[%s4220_s21 + $0x100] sm:$0xff]  ;;  %v4434_v10 = vmul.f32 %v409_v29, %v4376_v4 }
  0x79   : > { %v925_v27 = vadd.f32 %v924_v20, %v878_v11  ;;  %v407_v11 = vld [vmem:[%s4226_s26 + $0xa8] sm:$0xff]  ;;  %v1028_v15 = vadd.f32 %v1027_v59, %v981_v48  ;;  %v4420_v48 = vld [vmem:[%s4220_s21 + $0xf8] sm:$0xff]  ;;  %7658 = vst [vmem:[#allocation46_spill] sm:$0xff] %v4429_v63  ;;  %v4462_v13 = vmul.f32 %v413_v49, %v4396_v25 }
  0x7a   : > { %v483_v20 = vld [vmem:[%s4226_s26 + $0x308] sm:$0xff]  ;;  %v887_v42 = vmul.f32 %v407_v11, %v4368_v60  ;;  %7657 = vst [vmem:[#allocation45_spill] sm:$0xff] %v4420_v48  ;;  %v4437_v11 = vmul.f32 %v410_v30, %v4379_v6  ;;  %v986_v30 = vmul.f32 %v450_v37, %v4339_v28  ;;  %v420_v28 = vld [vmem:[%s4226_s26 + $0x110] sm:$0xff] }
  0x7b   : > { %v926_v35 = vadd.f32 %v925_v27, %v879_v19  ;;  %v482_v19 = vld [vmem:[%s4226_s26 + $0x300] sm:$0xff]  ;;  %v4402_v27 = vld [vmem:[%s4220_s21 + $0xe8] sm:$0xff]  ;;  %v1075_v59 = vmul.f32 %v483_v20, %v4243_v2  ;;  %v417_v20 = vld [vmem:[%s4226_s26 + $0xf8] sm:$0xff] }
  0x7c   : > { %7655 = vst [vmem:[#allocation43_spill] sm:$0xff] %v4402_v27 }
  0x7d   : > { %v927_v44 = vadd.f32 %v926_v35, %v880_v26  ;;  %v4399_v26 = vld [vmem:[%s4220_s21 + $0xe0] sm:$0xff]  ;;  %v412_v35 = vld [vmem:[%s4226_s26 + $0xd0] sm:$0xff] }
  0x7e   : > { %7654 = vst [vmem:[#allocation42_spill] sm:$0xff] %v4399_v26  ;;  %v4452_v29 = vmul.f32 %v412_v35, %v4389_v16  ;;  %v4465_v7 = vmul.f32 %v414_v51, %v4399_v26 }
  0x7f   : > { %v928_v53 = vadd.f32 %v927_v44, %v881_v34  ;;  %v1029_v34 = vadd.f32 %v1028_v15, %v982_v58  ;;  %v1074_v58 = vmul.f32 %v482_v19, %v4240_v1  ;;  %v4443_v15 = vld [vmem:[%s4220_s21 + $0x108] sm:$0xff]  ;;  %v416_v19 = vld [vmem:[%s4226_s26 + $0xf0] sm:$0xff]  ;;  %v4490_v1 = vmul.f32 %v417_v20, %v4420_v48 }
  0x80   : > { %7659 = vst [vmem:[#allocation47_spill] sm:$0xff] %v4443_v15  ;;  %v4487_v2 = vmul.f32 %v416_v19, %v4417_v46 }
  0x81   : > { %v929_v3 = vadd.f32 %v928_v53, %v882_v43  ;;  %v4414_v43 = vmul.f32 %v408_v12, %v4371_v62  ;;  %v985_v53 = vmul.f32 %v449_v18, %v4332_v21  ;;  %v1030_v56 = vadd.f32 %v1029_v34, %v983_v14  ;;  %v4446_v18 = vld [vmem:[%s4220_s21 + $0x110] sm:$0xff]  ;;  %v4457_v34 = vld [vmem:[%s4220_s21 + $0x118] sm:$0xff]  ;;  %v486_v21 = vld [vmem:[%s4226_s26 + $0x320] sm:$0xff]  ;;  %7667 = vst [vmem:[#allocation55_spill] sm:$0xff] %v4490_v1 }
  0x82   : > { %v4440_v12 = vmul.f32 %v411_v32, %v4382_v8  ;;  %7660 = vst [vmem:[#allocation48_spill] sm:$0xff] %v4446_v18  ;;  %7661 = vst [vmem:[#allocation49_spill] sm:$0xff] %v4457_v34 }
  0x83   : > { %v930_v23 = vadd.f32 %v929_v3, %v883_v52  ;;  %v415_v52 = vld [vmem:[%s4226_s26 + $0xe8] sm:$0xff]  ;;  %v485_v3 = vld [vmem:[%s4226_s26 + $0x318] sm:$0xff]  ;;  %v1031_v32 = vadd.f32 %v1030_v56, %v984_v33  ;;  %v4471_v33 = vld [vmem:[%s4220_s21 + $0x120] sm:$0xff]  ;;  %7666 = vst [vmem:[#allocation54_spill] sm:$0xff] %v4487_v2 }
  0x84   : > { %v4468_v35 = vmul.f32 %v415_v52, %v4402_v27  ;;  %7663 = vst [vmem:[#allocation51_spill] sm:$0xff] %v4471_v33  ;;  %v419_v56 = vld [vmem:[%s4226_s26 + $0x108] sm:$0xff]  ;;  %v1077_v61 = vmul.f32 %v485_v3, %v4254_v9  ;;  %v1122_v52 = vadd.f32 %v1075_v59, %v1074_v58  ;;  %v4499_v58 = vld [vmem:[%s4220_s21 + $0x140] sm:$0xff]  ;;  %v4515_v9 = vmul.f32 %v420_v28, %v4446_v18 }
  0x85   : > { %v931_v44 = vadd.f32 %v930_v23, %v884_v0  ;;  %v451_v0 = vld [vmem:[%s4226_s26 + $0x208] sm:$0xff]  ;;  %v418_v23 = vld [vmem:[%s4226_s26 + $0x100] sm:$0xff]  ;;  %v1032_v51 = vadd.f32 %v1031_v32, %v985_v53  ;;  %7670 = vst [vmem:[#allocation58_spill] sm:$0xff] %v4499_v58  ;;  %v424_v32 = vld [vmem:[%s4226_s26 + $0x130] sm:$0xff]  ;;  %v4512_v1 = vmul.f32 %v419_v56, %v4443_v15 }
  0x86   : > { %7662 = vst [vmem:[#allocation50_spill] sm:$0xff] %v4468_v35  ;;  %v987_v49 = vmul.f32 %v451_v0, %v4346_v36  ;;  %v4482_v35 = vld [vmem:[%s4220_s21 + $0x130] sm:$0xff]  ;;  %v4493_v57 = vmul.f32 %v418_v23, %v4429_v63  ;;  %v4496_v0 = vld [vmem:[%s4220_s21 + $0x138] sm:$0xff]  ;;  %v422_v59 = vld [vmem:[%s4226_s26 + $0x120] sm:$0xff]  ;;  %v1078_v36 = vmul.f32 %v486_v21, %v4262_v17 }
  0x87   : > { %v932_v14 = vadd.f32 %v931_v44, %v885_v22  ;;  %v1076_v22 = vmul.f32 %v484_v39, %v4248_v5  ;;  %v452_v44 = vld [vmem:[%s4226_s26 + $0x210] sm:$0xff]  ;;  %v4474_v39 = vld [vmem:[%s4220_s21 + $0x128] sm:$0xff]  ;;  %v421_v5 = vld [vmem:[%s4226_s26 + $0x118] sm:$0xff]  ;;  %7665 = vst [vmem:[#allocation53_spill] sm:$0xff] %v4482_v35  ;;  %v1033_v20 = vadd.f32 %v1032_v51, %v986_v30  ;;  %v4544_v17 = vmul.f32 %v424_v32, %v4482_v35 }
  0x88   : > { %7664 = vst [vmem:[#allocation52_spill] sm:$0xff] %v4474_v39  ;;  %7668 = vst [vmem:[#allocation56_spill] sm:$0xff] %v4493_v57  ;;  %v423_v3 = vld [vmem:[%s4226_s26 + $0x128] sm:$0xff]  ;;  %v988_v19 = vmul.f32 %v452_v44, %v4353_v45  ;;  %v4518_v2 = vmul.f32 %v421_v5, %v4457_v34  ;;  %v4522_v21 = vld [vmem:[%s4220_s21 + $0x150] sm:$0xff] }
  0x89   : > { %v933_v37 = vadd.f32 %v932_v14, %v886_v41  ;;  %v453_v41 = vld [vmem:[%s4226_s26 + $0x218] sm:$0xff]  ;;  %v487_v14 = vld [vmem:[%s4226_s26 + $0x328] sm:$0xff]  ;;  %7669 = vst [vmem:[#allocation57_spill] sm:$0xff] %v4496_v0  ;;  %v1123_v23 = vadd.f32 %v1122_v52, %v1076_v22  ;;  %7672 = vst [vmem:[#allocation60_spill] sm:$0xff] %v4512_v1  ;;  %v1034_v52 = vadd.f32 %v1033_v20, %v987_v49 }
  0x8a   : > { %v4507_v57 = vld [vmem:[%s4220_s21 + $0x148] sm:$0xff]  ;;  %7673 = vst [vmem:[#allocation61_spill] sm:$0xff] %v4515_v9  ;;  %7674 = vst [vmem:[#allocation62_spill] sm:$0xff] %v4518_v2  ;;  %v4525_v22 = vld [vmem:[%s4220_s21 + $0x158] sm:$0xff]  ;;  %v989_v28 = vmul.f32 %v453_v41, %v4360_v54  ;;  %v1079_v5 = vmul.f32 %v487_v14, %v4270_v24  ;;  %v4538_v9 = vmul.f32 %v422_v59, %v4471_v33 }
  0x8b   : > { %v934_v53 = vadd.f32 %v933_v37, %v887_v42  ;;  %7671 = vst [vmem:[#allocation59_spill] sm:$0xff] %v4507_v57  ;;  %v454_v42 = vld [vmem:[%s4226_s26 + $0x220] sm:$0xff]  ;;  %v488_v37 = vld [vmem:[%s4226_s26 + $0x330] sm:$0xff]  ;;  %7675 = vst [vmem:[#allocation63_spill] sm:$0xff] %v4522_v21  ;;  %v1124_v45 = vadd.f32 %v1123_v23, %v1077_v61  ;;  %v4541_v1 = vmul.f32 %v423_v3, %v4474_v39 }
  0x8c   : > { %7676 = vst [vmem:[#allocation64_spill] sm:$0xff] %v4525_v22  ;;  %v425_v44 = vld [vmem:[%s4226_s26 + $0x138] sm:$0xff]  ;;  %v426_v51 = vld [vmem:[%s4226_s26 + $0x140] sm:$0xff]  ;;  %v427_v56 = vld [vmem:[%s4226_s26 + $0x148] sm:$0xff]  ;;  %v990_v59 = vmul.f32 %v454_v42, %v4363_v55  ;;  %v1035_v54 = vadd.f32 %v1034_v52, %v988_v19  ;;  %v1080_v3 = vmul.f32 %v488_v37, %v4277_v31 }
  0x8d   : > { %v935_v30 = vadd.f32 %v934_v53, %v4414_v43  ;;  %v4533_v2 = vld [vmem:[%s4220_s21 + $0x160] sm:$0xff]  ;;  %v455_v43 = vld [vmem:[%s4226_s26 + $0x228] sm:$0xff]  ;;  %v489_v53 = vld [vmem:[%s4226_s26 + $0x338] sm:$0xff]  ;;  %7678 = vst [vmem:[#allocation66_spill] sm:$0xff] %v4538_v9  ;;  %v1125_v32 = vadd.f32 %v1124_v45, %v1078_v36  ;;  %v4567_v9 = vmul.f32 %v426_v51, %v4499_v58  ;;  %v4570_v24 = vmul.f32 %v427_v56, %v4507_v57 }
  0x8e   : > { %7677 = vst [vmem:[#allocation65_spill] sm:$0xff] %v4533_v2  ;;  %7679 = vst [vmem:[#allocation67_spill] sm:$0xff] %v4541_v1  ;;  %v4548_v41 = vld [vmem:[%s4220_s21 + $0x168] sm:$0xff]  ;;  %v4551_v61 = vld [vmem:[%s4220_s21 + $0x170] sm:$0xff]  ;;  %v4564_v1 = vmul.f32 %v425_v44, %v4496_v0  ;;  %v991_v37 = vmul.f32 %v455_v43, %v4368_v60  ;;  %v1036_v52 = vadd.f32 %v1035_v54, %v989_v28 }
  0x8f   : > { %7680 = vst [vmem:[#allocation68_spill] sm:$0xff] %v4544_v17  ;;  %v936_v49 = vadd.f32 %v935_v30, %v4434_v10  ;;  %7681 = vst [vmem:[#allocation69_spill] sm:$0xff] %v4548_v41  ;;  %v428_v14 = vld [vmem:[%s4226_s26 + $0x150] sm:$0xff]  ;;  %v429_v20 = vld [vmem:[%s4226_s26 + $0x158] sm:$0xff]  ;;  %v1081_v44 = vmul.f32 %v489_v53, %v4284_v38  ;;  %v1126_v51 = vadd.f32 %v1125_v32, %v1079_v5 }
  0x90   : > { %7682 = vst [vmem:[#allocation70_spill] sm:$0xff] %v4551_v61  ;;  %v430_v23 = vld [vmem:[%s4226_s26 + $0x160] sm:$0xff]  ;;  %v4559_v17 = vld [vmem:[%s4220_s21 + $0x178] sm:$0xff]  ;;  %v456_v10 = vld [vmem:[%s4226_s26 + $0x230] sm:$0xff]  ;;  %v4581_v56 = vmul.f32 %v428_v14, %v4522_v21 }
  0x91   : > { %7683 = vst [vmem:[#allocation71_spill] sm:$0xff] %v4559_v17  ;;  %v490_v30 = vld [vmem:[%s4226_s26 + $0x340] sm:$0xff]  ;;  %7684 = vst [vmem:[#allocation72_spill] sm:$0xff] %v4564_v1  ;;  %v937_v19 = vadd.f32 %v936_v49, %v4437_v11  ;;  %v431_v36 = vld [vmem:[%s4226_s26 + $0x168] sm:$0xff]  ;;  %v4587_v11 = vmul.f32 %v430_v23, %v4533_v2  ;;  %v992_v5 = vmul.f32 %v456_v10, %v4371_v62 }
  0x92   : > { %7685 = vst [vmem:[#allocation73_spill] sm:$0xff] %v4567_v9  ;;  %7686 = vst [vmem:[#allocation74_spill] sm:$0xff] %v4570_v24  ;;  %v432_v45 = vld [vmem:[%s4226_s26 + $0x170] sm:$0xff]  ;;  %v433_v42 = vld [vmem:[%s4226_s26 + $0x178] sm:$0xff]  ;;  %v4584_v24 = vmul.f32 %v429_v20, %v4525_v22  ;;  %v1037_v49 = vadd.f32 %v1036_v52, %v990_v59  ;;  %v1082_v14 = vmul.f32 %v490_v30, %v4288_v40 }
  0x93   : > { %v457_v9 = vld [vmem:[%s4226_s26 + $0x238] sm:$0xff]  ;;  %v491_v1 = vld [vmem:[%s4226_s26 + $0x348] sm:$0xff]  ;;  %7687 = vst [vmem:[#allocation75_spill] sm:$0xff] %v4581_v56  ;;  %7689 = vst [vmem:[#allocation77_spill] sm:$0xff] %v4587_v11  ;;  %v938_v54 = vadd.f32 %v937_v19, %v4440_v12  ;;  %v1127_v20 = vadd.f32 %v1126_v51, %v1080_v3  ;;  %v4598_v23 = vmul.f32 %v431_v36, %v4548_v41 }
  0x94   : > { %7688 = vst [vmem:[#allocation76_spill] sm:$0xff] %v4584_v24  ;;  %v458_v28 = vld [vmem:[%s4226_s26 + $0x240] sm:$0xff]  ;;  %v459_v43 = vld [vmem:[%s4226_s26 + $0x248] sm:$0xff]  ;;  %v460_v53 = vld [vmem:[%s4226_s26 + $0x250] sm:$0xff]  ;;  %v4601_v11 = vmul.f32 %v432_v45, %v4551_v61  ;;  %v4604_v12 = vmul.f32 %v433_v42, %v4559_v17  ;;  %v993_v3 = vmul.f32 %v457_v9, %v4376_v4  ;;  %v1038_v52 = vadd.f32 %v1037_v49, %v991_v37 }
  0x95   : > { %v461_v32 = vld [vmem:[%s4226_s26 + $0x258] sm:$0xff]  ;;  %v492_v24 = vld [vmem:[%s4226_s26 + $0x350] sm:$0xff]  ;;  %7690 = vst [vmem:[#allocation78_spill] sm:$0xff] %v4598_v23  ;;  %v939_v59 = vadd.f32 %v938_v54, %v4452_v29  ;;  %v462_v10 = vld [vmem:[%s4226_s26 + $0x260] sm:$0xff]  ;;  %v1083_v36 = vmul.f32 %v491_v1, %v4295_v47  ;;  %v1128_v45 = vadd.f32 %v1127_v20, %v1081_v44  ;;  %v995_v29 = vmul.f32 %v459_v43, %v4382_v8 }
  0x96   : > { %7691 = vst [vmem:[#allocation79_spill] sm:$0xff] %v4601_v11  ;;  %7692 = vst [vmem:[#allocation80_spill] sm:$0xff] %v4604_v12  ;;  %v463_v30 = vld [vmem:[%s4226_s26 + $0x268] sm:$0xff]  ;;  %v493_v19 = vld [vmem:[%s4226_s26 + $0x358] sm:$0xff]  ;;  %v994_v12 = vmul.f32 %v458_v28, %v4379_v6  ;;  %v996_v54 = vmul.f32 %v460_v53, %v4389_v16  ;;  %v997_v1 = vmul.f32 %v461_v32, %v4396_v25 }
  0x97   : > { %v530_v51 = vld [vmem:[%s4226_s26 + $0x480] sm:$0xff]  ;;  %v531_v11 = vld [vmem:[%s4226_s26 + $0x488] sm:$0xff]  ;;  %v940_v42 = vadd.f32 %v939_v59, %v4462_v13  ;;  %v464_v9 = vld [vmem:[%s4226_s26 + $0x270] sm:$0xff]  ;;  %v1039_v23 = vadd.f32 %v1038_v52, %v992_v5  ;;  %v1084_v44 = vmul.f32 %v492_v24, %v4300_v50  ;;  %v1129_v20 = vadd.f32 %v1128_v45, %v1082_v14 }
  0x98   : > { %v465_v37 = vld [vmem:[%s4226_s26 + $0x278] sm:$0xff]  ;;  %v466_v49 = vld [vmem:[%s4226_s26 + $0x280] sm:$0xff]  ;;  %v532_v59 = vld [vmem:[%s4226_s26 + $0x490] sm:$0xff]  ;;  %v4627_v43 = vmul.f32 %v462_v10, %v4399_v26  ;;  %v4630_v53 = vmul.f32 %v463_v30, %v4402_v27  ;;  %v4641_v30 = vmul.f32 %v464_v9, %v4417_v46 }
  0x99   : > { %v494_v13 = vld [vmem:[%s4226_s26 + $0x360] sm:$0xff]  ;;  %v941_v28 = vadd.f32 %v940_v42, %v4465_v7  ;;  %v7693_v56 = vld [vmem:[#allocation28_spill] sm:$0xff]  ;;  %v467_v5 = vld [vmem:[%s4226_s26 + $0x288] sm:$0xff]  ;;  %v1040_v24 = vadd.f32 %v1039_v23, %v993_v3  ;;  %v1130_v14 = vadd.f32 %v1129_v20, %v1083_v36  ;;  %v4647_v23 = vmul.f32 %v466_v49, %v4429_v63 }
  0x9a   : > { %v1085_v32 = vmul.f32 %v493_v19, %v7693_v56  ;;  %v468_v52 = vld [vmem:[%s4226_s26 + $0x290] sm:$0xff]  ;;  %v495_v25 = vld [vmem:[%s4226_s26 + $0x368] sm:$0xff]  ;;  %v533_v8 = vld [vmem:[%s4226_s26 + $0x498] sm:$0xff]  ;;  %v4644_v19 = vmul.f32 %v465_v37, %v4420_v48  ;;  %v4657_v37 = vmul.f32 %v467_v5, %v4443_v15 }
  0x9b   : > { %v7694_v45 = vld [vmem:[#allocation22_spill] sm:$0xff]  ;;  %v7695_v7 = vld [vmem:[#allocation23_spill] sm:$0xff]  ;;  %v469_v3 = vld [vmem:[%s4226_s26 + $0x298] sm:$0xff]  ;;  %v1041_v20 = vadd.f32 %v1040_v24, %v994_v12  ;;  %v4660_v49 = vmul.f32 %v468_v52, %v4446_v18 }
  0x9c   : > { %v1178_v16 = vmul.f32 %v530_v51, %v7694_v45  ;;  %v1179_v42 = vmul.f32 %v531_v11, %v7695_v7  ;;  %v7696_v10 = vld [vmem:[#allocation50_spill] sm:$0xff]  ;;  %v496_v51 = vld [vmem:[%s4226_s26 + $0x370] sm:$0xff]  ;;  %v7697_v11 = vld [vmem:[#allocation29_spill] sm:$0xff]  ;;  %v4670_v15 = vmul.f32 %v469_v3, %v4457_v34 }
  0x9d   : > { %v942_v26 = vadd.f32 %v941_v28, %v7696_v10  ;;  %v470_v36 = vld [vmem:[%s4226_s26 + $0x2a0] sm:$0xff]  ;;  %v1086_v27 = vmul.f32 %v494_v13, %v7697_v11  ;;  %v1131_v28 = vadd.f32 %v1130_v14, %v1084_v44  ;;  %v7698_v10 = vld [vmem:[#allocation24_spill] sm:$0xff]  ;;  %v471_v24 = vld [vmem:[%s4226_s26 + $0x2a8] sm:$0xff]  ;;  %v1042_v44 = vadd.f32 %v1041_v20, %v995_v29 }
  0x9e   : > { %v1180_v7 = vmul.f32 %v532_v59, %v7698_v10  ;;  %v534_v9 = vld [vmem:[%s4226_s26 + $0x4a0] sm:$0xff]  ;;  %v472_v48 = vld [vmem:[%s4226_s26 + $0x2b0] sm:$0xff]  ;;  %v497_v13 = vld [vmem:[%s4226_s26 + $0x378] sm:$0xff]  ;;  %v4673_v52 = vmul.f32 %v470_v36, %v4471_v33  ;;  %v4683_v34 = vmul.f32 %v471_v24, %v4474_v39 }
  0x9f   : > { %v7699_v46 = vld [vmem:[#allocation54_spill] sm:$0xff]  ;;  %v1132_v59 = vadd.f32 %v1131_v28, %v1085_v32  ;;  %v7701_v14 = vld [vmem:[#allocation25_spill] sm:$0xff]  ;;  %v7702_v11 = vld [vmem:[#allocation55_spill] sm:$0xff]  ;;  %v1043_v28 = vadd.f32 %v1042_v44, %v996_v54  ;;  %v4686_v36 = vmul.f32 %v472_v48, %v4482_v35 }
  0xa0   : > { %v943_v45 = vadd.f32 %v942_v26, %v7699_v46  ;;  %v7700_v63 = vld [vmem:[#allocation30_spill] sm:$0xff]  ;;  %v1181_v10 = vmul.f32 %v533_v8, %v7701_v14  ;;  %v1226_v26 = vadd.f32 %v1179_v42, %v1178_v16  ;;  %v473_v29 = vld [vmem:[%s4226_s26 + $0x2b8] sm:$0xff]  ;;  %v476_v44 = vld [vmem:[%s4226_s26 + $0x2d0] sm:$0xff] }
  0xa1   : > { %v1087_v12 = vmul.f32 %v495_v25, %v7700_v63  ;;  %v535_v46 = vld [vmem:[%s4226_s26 + $0x4a8] sm:$0xff]  ;;  %v474_v20 = vld [vmem:[%s4226_s26 + $0x2c0] sm:$0xff]  ;;  %v1133_v8 = vadd.f32 %v1132_v59, %v1086_v27  ;;  %v7705_v14 = vld [vmem:[#allocation56_spill] sm:$0xff]  ;;  %v1044_v59 = vadd.f32 %v1043_v28, %v997_v1  ;;  %v4696_v39 = vmul.f32 %v473_v29, %v4496_v0 }
  0xa2   : > { %v944_v5 = vadd.f32 %v943_v45, %v7702_v11  ;;  %v7703_v25 = vld [vmem:[#allocation31_spill] sm:$0xff]  ;;  %v498_v32 = vld [vmem:[%s4226_s26 + $0x380] sm:$0xff]  ;;  %v1227_v45 = vadd.f32 %v1226_v26, %v1180_v7  ;;  %v4699_v48 = vmul.f32 %v474_v20, %v4499_v58  ;;  %v477_v1 = vld [vmem:[%s4226_s26 + $0x2d8] sm:$0xff] }
  0xa3   : > { %v1088_v18 = vmul.f32 %v496_v51, %v7703_v25  ;;  %v7704_v16 = vld [vmem:[#allocation26_spill] sm:$0xff]  ;;  %v536_v11 = vld [vmem:[%s4226_s26 + $0x4b0] sm:$0xff]  ;;  %v1134_v7 = vadd.f32 %v1133_v8, %v1087_v12  ;;  %v7710_v29 = vld [vmem:[#allocation61_spill] sm:$0xff] }
  0xa4   : > { %v1182_v42 = vmul.f32 %v534_v9, %v7704_v16  ;;  %v945_v3 = vadd.f32 %v944_v5, %v7705_v14  ;;  %v7706_v51 = vld [vmem:[#allocation32_spill] sm:$0xff]  ;;  %v475_v54 = vld [vmem:[%s4226_s26 + $0x2c8] sm:$0xff]  ;;  %v1228_v14 = vadd.f32 %v1227_v45, %v1181_v10  ;;  %v478_v28 = vld [vmem:[%s4226_s26 + $0x2e0] sm:$0xff]  ;;  %v1184_v8 = vmul.f32 %v536_v11, %v4277_v31 }
  0xa5   : > { %v1089_v33 = vmul.f32 %v497_v13, %v7706_v51  ;;  %v499_v27 = vld [vmem:[%s4226_s26 + $0x388] sm:$0xff]  ;;  %v537_v5 = vld [vmem:[%s4226_s26 + $0x4b8] sm:$0xff]  ;;  %v500_v12 = vld [vmem:[%s4226_s26 + $0x390] sm:$0xff]  ;;  %v1135_v10 = vadd.f32 %v1134_v7, %v1088_v18  ;;  %v4710_v20 = vmul.f32 %v475_v54, %v4507_v57 }
  0xa6   : > { %v7707_v9 = vld [vmem:[#allocation27_spill] sm:$0xff]  ;;  %v7708_v16 = vld [vmem:[#allocation60_spill] sm:$0xff]  ;;  %v7709_v13 = vld [vmem:[#allocation33_spill] sm:$0xff]  ;;  %v1185_v7 = vmul.f32 %v537_v5, %v4284_v38 }
  0xa7   : > { %v1183_v26 = vmul.f32 %v535_v46, %v7707_v9  ;;  %v946_v24 = vadd.f32 %v945_v3, %v7708_v16  ;;  %v1090_v35 = vmul.f32 %v498_v32, %v7709_v13  ;;  %v1045_v46 = vadd.f32 %v1044_v59, %v4627_v43  ;;  %v538_v45 = vld [vmem:[%s4226_s26 + $0x4c0] sm:$0xff]  ;;  %v479_v43 = vld [vmem:[%s4226_s26 + $0x2e8] sm:$0xff]  ;;  %v480_v59 = vld [vmem:[%s4226_s26 + $0x2f0] sm:$0xff] }
  0xa8   : > { %v1229_v16 = vadd.f32 %v1228_v14, %v1182_v42  ;;  %v4713_v32 = vmul.f32 %v476_v44, %v4522_v21  ;;  %v7711_v58 = vld [vmem:[#allocation34_spill] sm:$0xff]  ;;  %v501_v18 = vld [vmem:[%s4226_s26 + $0x398] sm:$0xff]  ;;  %v1136_v42 = vadd.f32 %v1135_v10, %v1089_v33  ;;  %v4724_v44 = vmul.f32 %v477_v1, %v4525_v22  ;;  %v7713_v21 = vld [vmem:[#allocation35_spill] sm:$0xff] }
  0xa9   : > { %v947_v3 = vadd.f32 %v946_v24, %v7710_v29  ;;  %v1091_v0 = vmul.f32 %v499_v27, %v7711_v58  ;;  %v1046_v11 = vadd.f32 %v1045_v46, %v4630_v53  ;;  %v539_v24 = vld [vmem:[%s4226_s26 + $0x4c8] sm:$0xff]  ;;  %v4727_v27 = vmul.f32 %v478_v28, %v4533_v2  ;;  %v481_v53 = vld [vmem:[%s4226_s26 + $0x2f8] sm:$0xff]  ;;  %v502_v46 = vld [vmem:[%s4226_s26 + $0x3a0] sm:$0xff] }
  0xaa   : > { %v1230_v14 = vadd.f32 %v1229_v16, %v1183_v26  ;;  %v7712_v54 = vld [vmem:[#allocation62_spill] sm:$0xff]  ;;  %v1092_v57 = vmul.f32 %v500_v12, %v7713_v21  ;;  %v1137_v26 = vadd.f32 %v1136_v42, %v1090_v35  ;;  %v1186_v10 = vmul.f32 %v538_v45, %v4288_v40  ;;  %v7717_v2 = vld [vmem:[#allocation36_spill] sm:$0xff] }
  0xab   : > { %v948_v29 = vadd.f32 %v947_v3, %v7712_v54  ;;  %v503_v33 = vld [vmem:[%s4226_s26 + $0x3a8] sm:$0xff]  ;;  %v1047_v5 = vadd.f32 %v1046_v11, %v4641_v30  ;;  %v540_v3 = vld [vmem:[%s4226_s26 + $0x4d0] sm:$0xff]  ;;  %v4738_v28 = vmul.f32 %v479_v43, %v4548_v41  ;;  %v4741_v12 = vmul.f32 %v480_v59, %v4551_v61  ;;  %v505_v11 = vld [vmem:[%s4226_s26 + $0x3b8] sm:$0xff] }
  0xac   : > { %v1231_v16 = vadd.f32 %v1230_v14, %v1184_v8  ;;  %v7714_v1 = vld [vmem:[#allocation66_spill] sm:$0xff]  ;;  %v1093_v22 = vmul.f32 %v501_v18, %v7717_v2  ;;  %v504_v30 = vld [vmem:[%s4226_s26 + $0x3b0] sm:$0xff]  ;;  %v1138_v8 = vadd.f32 %v1137_v26, %v1091_v0  ;;  %v1187_v42 = vmul.f32 %v539_v24, %v4295_v47 }
  0xad   : > { %v949_v54 = vadd.f32 %v948_v29, %v7714_v1  ;;  %7715 = vst [vmem:[#allocation50_spill] sm:$0xff] %v4738_v28  ;;  %7716 = vst [vmem:[#allocation54_spill] sm:$0xff] %v4741_v12  ;;  %v506_v35 = vld [vmem:[%s4226_s26 + $0x3c0] sm:$0xff]  ;;  %v1048_v45 = vadd.f32 %v1047_v5, %v4644_v19  ;;  %v541_v29 = vld [vmem:[%s4226_s26 + $0x4d8] sm:$0xff]  ;;  %v4752_v59 = vmul.f32 %v481_v53, %v4559_v17 }
  0xae   : > { %v1232_v14 = vadd.f32 %v1231_v16, %v1185_v7  ;;  %v7718_v43 = vld [vmem:[#allocation67_spill] sm:$0xff]  ;;  %v1094_v18 = vmul.f32 %v502_v46, %v4363_v55  ;;  %v1095_v61 = vmul.f32 %v503_v33, %v4368_v60  ;;  %v509_v5 = vld [vmem:[%s4226_s26 + $0x3d8] sm:$0xff]  ;;  %v1139_v7 = vadd.f32 %v1138_v8, %v1092_v57  ;;  %v542_v16 = vld [vmem:[%s4226_s26 + $0x4e0] sm:$0xff] }
  0xaf   : > { %v950_v1 = vadd.f32 %v949_v54, %v7718_v43  ;;  %7719 = vst [vmem:[#allocation30_spill] sm:$0xff] %v4752_v59  ;;  %v507_v12 = vld [vmem:[%s4226_s26 + $0x3c8] sm:$0xff]  ;;  %v508_v19 = vld [vmem:[%s4226_s26 + $0x3d0] sm:$0xff]  ;;  %v1049_v0 = vadd.f32 %v1048_v45, %v4647_v23  ;;  %v1188_v24 = vmul.f32 %v540_v3, %v4300_v50  ;;  %v1096_v43 = vmul.f32 %v504_v30, %v4371_v62  ;;  %v510_v59 = vld [vmem:[%s4226_s26 + $0x3e0] sm:$0xff] }
  0xb0   : > { %v1233_v26 = vadd.f32 %v1232_v14, %v1186_v10  ;;  %v7720_v54 = vld [vmem:[#allocation68_spill] sm:$0xff]  ;;  %v1097_v46 = vmul.f32 %v505_v11, %v4376_v4  ;;  %v4766_v33 = vmul.f32 %v506_v35, %v4379_v6  ;;  %v543_v23 = vld [vmem:[%s4226_s26 + $0x4e8] sm:$0xff]  ;;  %v578_v45 = vld [vmem:[%s4226_s26 + $0x600] sm:$0xff]  ;;  %v1140_v10 = vadd.f32 %v1139_v7, %v1093_v22 }
  0xb1   : > { %v951_v53 = vadd.f32 %v950_v1, %v7720_v54  ;;  %v1050_v57 = vadd.f32 %v1049_v0, %v4657_v37  ;;  %v1189_v3 = vmul.f32 %v541_v29, %v7693_v56  ;;  %v579_v14 = vld [vmem:[%s4226_s26 + $0x608] sm:$0xff]  ;;  %v7721_v30 = vld [vmem:[#allocation72_spill] sm:$0xff]  ;;  %v7724_v6 = vld [vmem:[#allocation41_spill] sm:$0xff] }
  0xb2   : > { %v1234_v8 = vadd.f32 %v1233_v26, %v1187_v42  ;;  %v7722_v54 = vld [vmem:[#allocation39_spill] sm:$0xff]  ;;  %v7723_v17 = vld [vmem:[#allocation40_spill] sm:$0xff]  ;;  %v4782_v41 = vmul.f32 %v509_v5, %v7724_v6  ;;  %v1141_v29 = vadd.f32 %v1140_v10, %v1094_v18  ;;  %v7725_v7 = vld [vmem:[#allocation29_spill] sm:$0xff]  ;;  %v1191_v5 = vmul.f32 %v543_v23, %v7700_v63 }
  0xb3   : > { %v952_v1 = vadd.f32 %v951_v53, %v7721_v30  ;;  %v4776_v11 = vmul.f32 %v507_v12, %v7722_v54  ;;  %v4779_v35 = vmul.f32 %v508_v19, %v7723_v17  ;;  %v511_v22 = vld [vmem:[%s4226_s26 + $0x3e8] sm:$0xff]  ;;  %v512_v37 = vld [vmem:[%s4226_s26 + $0x3f0] sm:$0xff]  ;;  %v1051_v42 = vadd.f32 %v1050_v57, %v4660_v49  ;;  %v513_v12 = vld [vmem:[%s4226_s26 + $0x3f8] sm:$0xff] }
  0xb4   : > { %v544_v0 = vld [vmem:[%s4226_s26 + $0x4f0] sm:$0xff]  ;;  %v1190_v26 = vmul.f32 %v542_v16, %v7725_v7  ;;  %v1235_v53 = vadd.f32 %v1234_v8, %v1188_v24  ;;  %v7726_v54 = vld [vmem:[#allocation73_spill] sm:$0xff]  ;;  %v7727_v17 = vld [vmem:[#allocation42_spill] sm:$0xff]  ;;  %v1142_v16 = vadd.f32 %v1141_v29, %v1095_v61 }
  0xb5   : > { %v580_v30 = vld [vmem:[%s4226_s26 + $0x610] sm:$0xff]  ;;  %v953_v19 = vadd.f32 %v952_v1, %v7726_v54  ;;  %v4793_v28 = vmul.f32 %v510_v59, %v7727_v17  ;;  %v7728_v6 = vld [vmem:[#allocation22_spill] sm:$0xff]  ;;  %v545_v49 = vld [vmem:[%s4226_s26 + $0x4f8] sm:$0xff]  ;;  %v1052_v24 = vadd.f32 %v1051_v42, %v4670_v15 }
  0xb6   : > { %v1282_v56 = vmul.f32 %v578_v45, %v7728_v6  ;;  %v514_v4 = vld [vmem:[%s4226_s26 + $0x400] sm:$0xff]  ;;  %v581_v18 = vld [vmem:[%s4226_s26 + $0x618] sm:$0xff]  ;;  %v1236_v57 = vadd.f32 %v1235_v53, %v1189_v3  ;;  %v7729_v10 = vld [vmem:[#allocation23_spill] sm:$0xff]  ;;  %v1192_v6 = vmul.f32 %v544_v0, %v7703_v25  ;;  %v1143_v3 = vadd.f32 %v1142_v16, %v1096_v43 }
  0xb7   : > { %v1283_v8 = vmul.f32 %v579_v14, %v7729_v10  ;;  %v7730_v1 = vld [vmem:[#allocation74_spill] sm:$0xff]  ;;  %v7731_v7 = vld [vmem:[#allocation43_spill] sm:$0xff]  ;;  %v7732_v17 = vld [vmem:[#allocation44_spill] sm:$0xff]  ;;  %v1053_v61 = vadd.f32 %v1052_v24, %v4673_v52  ;;  %v1193_v25 = vmul.f32 %v545_v49, %v7706_v51 }
  0xb8   : > { %v954_v54 = vadd.f32 %v953_v19, %v7730_v1  ;;  %v4804_v59 = vmul.f32 %v511_v22, %v7731_v7  ;;  %v4807_v63 = vmul.f32 %v512_v37, %v7732_v17  ;;  %v515_v23 = vld [vmem:[%s4226_s26 + $0x408] sm:$0xff]  ;;  %v546_v45 = vld [vmem:[%s4226_s26 + $0x500] sm:$0xff]  ;;  %v1237_v14 = vadd.f32 %v1236_v57, %v1190_v26  ;;  %v7733_v42 = vld [vmem:[#allocation24_spill] sm:$0xff] }
  0xb9   : > { %v582_v15 = vld [vmem:[%s4226_s26 + $0x620] sm:$0xff]  ;;  %v1284_v29 = vmul.f32 %v580_v30, %v7733_v42  ;;  %v516_v53 = vld [vmem:[%s4226_s26 + $0x410] sm:$0xff]  ;;  %v517_v17 = vld [vmem:[%s4226_s26 + $0x418] sm:$0xff]  ;;  %v1054_v26 = vadd.f32 %v1053_v61, %v4683_v34  ;;  %v1144_v30 = vadd.f32 %v1143_v3, %v1097_v46  ;;  %v1330_v16 = vadd.f32 %v1283_v8, %v1282_v56 }
  0xba   : > { %v7734_v19 = vld [vmem:[#allocation45_spill] sm:$0xff]  ;;  %v7735_v10 = vld [vmem:[#allocation46_spill] sm:$0xff]  ;;  %v1238_v24 = vadd.f32 %v1237_v14, %v1191_v5  ;;  %v7738_v42 = vld [vmem:[#allocation47_spill] sm:$0xff]  ;;  %v1194_v51 = vmul.f32 %v546_v45, %v7709_v13 }
  0xbb   : > { %v4817_v22 = vmul.f32 %v513_v12, %v7734_v19  ;;  %v4820_v37 = vmul.f32 %v514_v4, %v7735_v10  ;;  %v7736_v0 = vld [vmem:[#allocation25_spill] sm:$0xff]  ;;  %v547_v52 = vld [vmem:[%s4226_s26 + $0x508] sm:$0xff]  ;;  %v4830_v4 = vmul.f32 %v515_v23, %v7738_v42  ;;  %v548_v10 = vld [vmem:[%s4226_s26 + $0x510] sm:$0xff]  ;;  %v1055_v34 = vadd.f32 %v1054_v26, %v4686_v36 }
  0xbc   : > { %v1285_v1 = vmul.f32 %v581_v18, %v7736_v0  ;;  %v583_v43 = vld [vmem:[%s4226_s26 + $0x628] sm:$0xff]  ;;  %v518_v0 = vld [vmem:[%s4226_s26 + $0x420] sm:$0xff]  ;;  %v584_v19 = vld [vmem:[%s4226_s26 + $0x630] sm:$0xff]  ;;  %v1145_v46 = vadd.f32 %v1144_v30, %v4766_v33  ;;  %v1239_v56 = vadd.f32 %v1238_v24, %v1192_v6  ;;  %v1331_v5 = vadd.f32 %v1330_v16, %v1284_v29 }
  0xbd   : > { %v7737_v12 = vld [vmem:[#allocation75_spill] sm:$0xff]  ;;  %v7739_v49 = vld [vmem:[#allocation26_spill] sm:$0xff]  ;;  %v7741_v61 = vld [vmem:[#allocation49_spill] sm:$0xff]  ;;  %v1195_v45 = vmul.f32 %v547_v52, %v7711_v58  ;;  %v1056_v33 = vadd.f32 %v1055_v34, %v4696_v39  ;;  %v1196_v58 = vmul.f32 %v548_v10, %v7713_v21 }
  0xbe   : > { %v955_v57 = vadd.f32 %v954_v54, %v7737_v12  ;;  %v1286_v18 = vmul.f32 %v582_v15, %v7739_v49  ;;  %v519_v8 = vld [vmem:[%s4226_s26 + $0x428] sm:$0xff]  ;;  %v7740_v54 = vld [vmem:[#allocation48_spill] sm:$0xff]  ;;  %v4844_v13 = vmul.f32 %v517_v17, %v7741_v61  ;;  %v1287_v15 = vmul.f32 %v583_v43, %v7707_v9  ;;  %v550_v43 = vld [vmem:[%s4226_s26 + $0x520] sm:$0xff] }
  0xbf   : > { %v4841_v23 = vmul.f32 %v516_v53, %v7740_v54  ;;  %v520_v3 = vld [vmem:[%s4226_s26 + $0x430] sm:$0xff]  ;;  %v549_v36 = vld [vmem:[%s4226_s26 + $0x518] sm:$0xff]  ;;  %v1146_v6 = vadd.f32 %v1145_v46, %v4776_v11  ;;  %v1240_v29 = vadd.f32 %v1239_v56, %v1193_v25  ;;  %v1332_v53 = vadd.f32 %v1331_v5, %v1285_v1  ;;  %v586_v16 = vld [vmem:[%s4226_s26 + $0x640] sm:$0xff] }
  0xc0   : > { %v585_v14 = vld [vmem:[%s4226_s26 + $0x638] sm:$0xff]  ;;  %v7743_v24 = vld [vmem:[#allocation51_spill] sm:$0xff]  ;;  %v1288_v9 = vmul.f32 %v584_v19, %v4277_v31  ;;  %v1057_v39 = vadd.f32 %v1056_v33, %v4699_v48  ;;  %v522_v12 = vld [vmem:[%s4226_s26 + $0x440] sm:$0xff]  ;;  %v1197_v31 = vmul.f32 %v549_v36, %v7717_v2  ;;  %v1198_v2 = vmul.f32 %v550_v43, %v4363_v55 }
  0xc1   : > { %v7742_v26 = vld [vmem:[#allocation76_spill] sm:$0xff]  ;;  %v4855_v17 = vmul.f32 %v518_v0, %v7743_v24  ;;  %v1147_v11 = vadd.f32 %v1146_v6, %v4779_v35  ;;  %v1241_v25 = vadd.f32 %v1240_v29, %v1194_v51  ;;  %v1333_v1 = vadd.f32 %v1332_v53, %v1286_v18  ;;  %v7745_v0 = vld [vmem:[#allocation53_spill] sm:$0xff]  ;;  %v523_v10 = vld [vmem:[%s4226_s26 + $0x448] sm:$0xff] }
  0xc2   : > { %v956_v30 = vadd.f32 %v955_v57, %v7742_v26  ;;  %v521_v52 = vld [vmem:[%s4226_s26 + $0x438] sm:$0xff]  ;;  %v4869_v21 = vmul.f32 %v520_v3, %v7745_v0  ;;  %v1289_v19 = vmul.f32 %v585_v14, %v4284_v38  ;;  %v551_v48 = vld [vmem:[%s4226_s26 + $0x528] sm:$0xff]  ;;  %v1058_v35 = vadd.f32 %v1057_v39, %v4710_v20  ;;  %v524_v36 = vld [vmem:[%s4226_s26 + $0x450] sm:$0xff] }
  0xc3   : > { %v7744_v57 = vld [vmem:[#allocation52_spill] sm:$0xff]  ;;  %v587_v34 = vld [vmem:[%s4226_s26 + $0x648] sm:$0xff]  ;;  %v1148_v51 = vadd.f32 %v1147_v11, %v4782_v41  ;;  %v1242_v18 = vadd.f32 %v1241_v25, %v1195_v45  ;;  %v1334_v46 = vadd.f32 %v1333_v1, %v1287_v15  ;;  %v7746_v56 = vld [vmem:[#allocation77_spill] sm:$0xff]  ;;  %v1290_v38 = vmul.f32 %v586_v16, %v4288_v40 }
  0xc4   : > { %v4866_v49 = vmul.f32 %v519_v8, %v7744_v57  ;;  %v957_v5 = vadd.f32 %v956_v30, %v7746_v56  ;;  %v7747_v8 = vld [vmem:[#allocation57_spill] sm:$0xff]  ;;  %v552_v14 = vld [vmem:[%s4226_s26 + $0x530] sm:$0xff]  ;;  %v1059_v20 = vadd.f32 %v1058_v35, %v4713_v32  ;;  %v7748_v29 = vld [vmem:[#allocation58_spill] sm:$0xff]  ;;  %v1199_v40 = vmul.f32 %v551_v48, %v4368_v60 }
  0xc5   : > { %v4880_v3 = vmul.f32 %v521_v52, %v7747_v8  ;;  %v588_v33 = vld [vmem:[%s4226_s26 + $0x650] sm:$0xff]  ;;  %v1149_v41 = vadd.f32 %v1148_v51, %v4793_v28  ;;  %v1243_v45 = vadd.f32 %v1242_v18, %v1196_v58  ;;  %v1335_v15 = vadd.f32 %v1334_v46, %v1288_v9  ;;  %v525_v6 = vld [vmem:[%s4226_s26 + $0x458] sm:$0xff]  ;;  %v526_v52 = vld [vmem:[%s4226_s26 + $0x460] sm:$0xff] }
  0xc6   : > { %v4891_v53 = vmul.f32 %v522_v12, %v7748_v29  ;;  %v7749_v26 = vld [vmem:[#allocation59_spill] sm:$0xff]  ;;  %v1291_v30 = vmul.f32 %v587_v34, %v4295_v47  ;;  %v553_v32 = vld [vmem:[%s4226_s26 + $0x538] sm:$0xff]  ;;  %v1060_v28 = vadd.f32 %v1059_v20, %v4724_v44  ;;  %v7750_v39 = vld [vmem:[#allocation78_spill] sm:$0xff]  ;;  %v1200_v60 = vmul.f32 %v552_v14, %v4371_v62 }
  0xc7   : > { %v4894_v55 = vmul.f32 %v523_v10, %v7749_v26  ;;  %v589_v43 = vld [vmem:[%s4226_s26 + $0x658] sm:$0xff]  ;;  %v1150_v58 = vadd.f32 %v1149_v41, %v4804_v59  ;;  %v1244_v9 = vadd.f32 %v1243_v45, %v1197_v31  ;;  %v1336_v16 = vadd.f32 %v1335_v15, %v1289_v19  ;;  %v7751_v25 = vld [vmem:[#allocation63_spill] sm:$0xff]  ;;  %v554_v10 = vld [vmem:[%s4226_s26 + $0x540] sm:$0xff] }
  0xc8   : > { %v958_v11 = vadd.f32 %v957_v5, %v7750_v39  ;;  %v4905_v1 = vmul.f32 %v524_v36, %v7751_v25  ;;  %v1292_v47 = vmul.f32 %v588_v33, %v4300_v50  ;;  %v527_v12 = vld [vmem:[%s4226_s26 + $0x468] sm:$0xff]  ;;  %v590_v48 = vld [vmem:[%s4226_s26 + $0x660] sm:$0xff]  ;;  %v1061_v44 = vadd.f32 %v1060_v28, %v4727_v27  ;;  %v528_v34 = vld [vmem:[%s4226_s26 + $0x470] sm:$0xff] }
  0xc9   : > { %v1151_v59 = vadd.f32 %v1150_v58, %v4807_v63  ;;  %v1245_v31 = vadd.f32 %v1244_v9, %v1198_v2  ;;  %v1337_v19 = vadd.f32 %v1336_v16, %v1290_v38  ;;  %v7752_v35 = vld [vmem:[#allocation64_spill] sm:$0xff]  ;;  %v7753_v18 = vld [vmem:[#allocation65_spill] sm:$0xff]  ;;  %v555_v27 = vld [vmem:[%s4226_s26 + $0x548] sm:$0xff] }
  0xca   : > { %v4916_v51 = vmul.f32 %v525_v6, %v7752_v35  ;;  %v4919_v62 = vmul.f32 %v526_v52, %v7753_v18  ;;  %v7754_v46 = vld [vmem:[#allocation37_spill] sm:$0xff]  ;;  %v7755_v56 = vld [vmem:[#allocation28_spill] sm:$0xff]  ;;  %v7756_v33 = vld [vmem:[#allocation50_spill] sm:$0xff] }
  0xcb   : > { %v1201_v50 = vmul.f32 %v553_v32, %v7754_v46  ;;  %v1293_v5 = vmul.f32 %v589_v43, %v7755_v56  ;;  %v529_v36 = vld [vmem:[%s4226_s26 + $0x478] sm:$0xff]  ;;  %v556_v14 = vld [vmem:[%s4226_s26 + $0x550] sm:$0xff]  ;;  %v1062_v63 = vadd.f32 %v1061_v44, %v7756_v33  ;;  %v1152_v2 = vadd.f32 %v1151_v59, %v4817_v22  ;;  %v591_v41 = vld [vmem:[%s4226_s26 + $0x668] sm:$0xff] }
  0xcc   : > { %v1246_v38 = vadd.f32 %v1245_v31, %v1199_v40  ;;  %v1338_v20 = vadd.f32 %v1337_v19, %v1291_v30  ;;  %v7757_v45 = vld [vmem:[#allocation79_spill] sm:$0xff]  ;;  %v7758_v6 = vld [vmem:[#allocation69_spill] sm:$0xff]  ;;  %v7759_v32 = vld [vmem:[#allocation38_spill] sm:$0xff] }
  0xcd   : > { %v959_v15 = vadd.f32 %v958_v11, %v7757_v45  ;;  %v4931_v52 = vmul.f32 %v527_v12, %v7758_v6  ;;  %v1202_v43 = vmul.f32 %v554_v10, %v7759_v32  ;;  %v7760_v28 = vld [vmem:[#allocation29_spill] sm:$0xff]  ;;  %v7761_v39 = vld [vmem:[#allocation54_spill] sm:$0xff]  ;;  %v1153_v40 = vadd.f32 %v1152_v2, %v4820_v37  ;;  %v592_v59 = vld [vmem:[%s4226_s26 + $0x670] sm:$0xff] }
  0xce   : > { %v1294_v58 = vmul.f32 %v590_v48, %v7760_v28  ;;  %v557_v9 = vld [vmem:[%s4226_s26 + $0x558] sm:$0xff]  ;;  %v558_v16 = vld [vmem:[%s4226_s26 + $0x560] sm:$0xff]  ;;  %v1063_v22 = vadd.f32 %v1062_v63, %v7761_v39  ;;  %v1247_v30 = vadd.f32 %v1246_v38, %v1200_v60  ;;  %v1339_v11 = vadd.f32 %v1338_v20, %v1292_v47  ;;  %v559_v44 = vld [vmem:[%s4226_s26 + $0x568] sm:$0xff] }
  0xcf   : > { %v7762_v12 = vld [vmem:[#allocation70_spill] sm:$0xff]  ;;  %v7763_v19 = vld [vmem:[#allocation71_spill] sm:$0xff]  ;;  %v7765_v46 = vld [vmem:[#allocation40_spill] sm:$0xff]  ;;  %v1154_v60 = vadd.f32 %v1153_v40, %v4830_v4 }
  0xd0   : > { %v4942_v31 = vmul.f32 %v528_v34, %v7762_v12  ;;  %v4945_v10 = vmul.f32 %v529_v36, %v7763_v19  ;;  %v7764_v18 = vld [vmem:[#allocation39_spill] sm:$0xff]  ;;  %v1204_v56 = vmul.f32 %v556_v14, %v7765_v46  ;;  %v561_v63 = vld [vmem:[%s4226_s26 + $0x578] sm:$0xff]  ;;  %v562_v37 = vld [vmem:[%s4226_s26 + $0x580] sm:$0xff]  ;;  %v1248_v47 = vadd.f32 %v1247_v30, %v1201_v50 }
  0xd1   : > { %v1203_v48 = vmul.f32 %v555_v27, %v7764_v18  ;;  %v560_v33 = vld [vmem:[%s4226_s26 + $0x570] sm:$0xff]  ;;  %v4954_v2 = vld [vmem:[%s4220_s21 + $0x68] sm:$0xff]  ;;  %v1340_v36 = vadd.f32 %v1339_v11, %v1293_v5  ;;  %v593_v38 = vld [vmem:[%s4226_s26 + $0x678] sm:$0xff]  ;;  %v1155_v40 = vadd.f32 %v1154_v60, %v4841_v23 }
  0xd2   : > { %v1295_v34 = vmul.f32 %v4954_v2, %v591_v41  ;;  %v7766_v20 = vld [vmem:[#allocation80_spill] sm:$0xff]  ;;  %v7767_v45 = vld [vmem:[#allocation30_spill] sm:$0xff]  ;;  %v7768_v14 = vld [vmem:[#allocation41_spill] sm:$0xff]  ;;  %v1249_v30 = vadd.f32 %v1248_v47, %v1202_v43 }
  0xd3   : > { %v960_v27 = vadd.f32 %v959_v15, %v7766_v20  ;;  %v1064_v32 = vadd.f32 %v1063_v22, %v7767_v45  ;;  %v1205_v28 = vmul.f32 %v557_v9, %v7768_v14  ;;  %v7769_v39 = vld [vmem:[#allocation42_spill] sm:$0xff]  ;;  %v4966_v41 = vld [vmem:[%s4220_s21 + $0x70] sm:$0xff]  ;;  %v1341_v15 = vadd.f32 %v1340_v36, %v1294_v58  ;;  %v7772_v18 = vld [vmem:[#allocation45_spill] sm:$0xff] }
  0xd4   : > { %v1206_v12 = vmul.f32 %v558_v16, %v7769_v39  ;;  %v626_v4 = vld [vmem:[%s4226_s26 + $0x780] sm:$0xff]  ;;  %v627_v50 = vld [vmem:[%s4226_s26 + $0x788] sm:$0xff]  ;;  %7770 = vst [vmem:[#allocation55_spill] sm:$0xff] %v4966_v41  ;;  %v1296_v5 = vmul.f32 %v4966_v41, %v592_v59  ;;  %v1207_v9 = vmul.f32 %v559_v44, %v7731_v7  ;;  %v7771_v19 = vld [vmem:[#allocation44_spill] sm:$0xff]  ;;  %v4976_v46 = vmul.f32 %v561_v63, %v7772_v18 }
  0xd5   : > { %v563_v22 = vld [vmem:[%s4226_s26 + $0x588] sm:$0xff]  ;;  %v594_v11 = vld [vmem:[%s4226_s26 + $0x680] sm:$0xff]  ;;  %v4973_v16 = vmul.f32 %v560_v33, %v7771_v19  ;;  %v564_v60 = vld [vmem:[%s4226_s26 + $0x590] sm:$0xff]  ;;  %v1156_v58 = vadd.f32 %v1155_v40, %v4844_v13  ;;  %v1250_v36 = vadd.f32 %v1249_v30, %v1203_v48  ;;  %v1342_v44 = vadd.f32 %v1341_v15, %v1295_v34 }
  0xd6   : > { %v7773_v23 = vld [vmem:[#allocation46_spill] sm:$0xff]  ;;  %v565_v59 = vld [vmem:[%s4226_s26 + $0x598] sm:$0xff]  ;;  %v628_v47 = vld [vmem:[%s4226_s26 + $0x790] sm:$0xff]  ;;  %v961_v63 = vrot.slane %v960_v27, 4  ;;  %v1065_v45 = vrot.slane %v1064_v32, 4  ;;  %v5009_v18 = vmul.f32 %v564_v60, %v7740_v54 }
  0xd7   : > { %v4979_v43 = vmul.f32 %v562_v37, %v7773_v23  ;;  %v4986_v20 = vld [vmem:[%s4220_s21 + $0x78] sm:$0xff]  ;;  %v595_v33 = vld [vmem:[%s4226_s26 + $0x688] sm:$0xff]  ;;  %v4991_v37 = vld [vmem:[%s4220_s21] sm:$0xff]  ;;  %v1157_v40 = vadd.f32 %v1156_v58, %v4855_v17  ;;  %v1251_v34 = vadd.f32 %v1250_v36, %v1204_v56  ;;  %v1343_v15 = vadd.f32 %v1342_v44, %v1296_v5 }
  0xd8   : > { %7774 = vst [vmem:[#allocation31_spill] sm:$0xff] %v4986_v20  ;;  %v1297_v7 = vmul.f32 %v4986_v20, %v593_v38  ;;  %7775 = vst [vmem:[#allocation56_spill] sm:$0xff] %v4991_v37  ;;  %v1386_v14 = vmul.f32 %v4991_v37, %v626_v4  ;;  %v4995_v39 = vld [vmem:[%s4220_s21 + $0x8] sm:$0xff]  ;;  %v629_v48 = vld [vmem:[%s4226_s26 + $0x798] sm:$0xff]  ;;  %v5006_v4 = vmul.f32 %v563_v22, %v7738_v42 }
  0xd9   : > { %7776 = vst [vmem:[#allocation32_spill] sm:$0xff] %v4995_v39  ;;  %v1387_v13 = vmul.f32 %v4995_v39, %v627_v50  ;;  %v5001_v38 = vld [vmem:[%s4220_s21 + $0x80] sm:$0xff]  ;;  %v596_v19 = vld [vmem:[%s4226_s26 + $0x690] sm:$0xff]  ;;  %v5012_v50 = vmul.f32 %v565_v59, %v7741_v61  ;;  %v1158_v58 = vadd.f32 %v1157_v40, %v4866_v49  ;;  %v1252_v42 = vadd.f32 %v1251_v34, %v1205_v28  ;;  %v5023_v22 = vld [vmem:[%s4220_s21 + $0x88] sm:$0xff] }
  0xda   : > { %7777 = vst [vmem:[#allocation27_spill] sm:$0xff] %v5001_v38  ;;  %v1298_v30 = vmul.f32 %v5001_v38, %v594_v11  ;;  %v5015_v17 = vld [vmem:[%s4220_s21 + $0x10] sm:$0xff]  ;;  %v566_v23 = vld [vmem:[%s4226_s26 + $0x5a0] sm:$0xff]  ;;  %v567_v11 = vld [vmem:[%s4226_s26 + $0x5a8] sm:$0xff]  ;;  %v1299_v54 = vmul.f32 %v5023_v22, %v595_v33  ;;  %v1344_v60 = vadd.f32 %v1343_v15, %v1297_v7  ;;  %v962_v59 = vadd.f32 %v961_v63, %v960_v27 }
  0xdb   : > { %v1388_v56 = vmul.f32 %v5015_v17, %v628_v47  ;;  %v630_v5 = vld [vmem:[%s4226_s26 + $0x7a0] sm:$0xff]  ;;  %v597_v61 = vld [vmem:[%s4226_s26 + $0x698] sm:$0xff]  ;;  %v1066_v36 = vadd.f32 %v1065_v45, %v1064_v32  ;;  %v1434_v38 = vadd.f32 %v1387_v13, %v1386_v14  ;;  %v631_v49 = vld [vmem:[%s4226_s26 + $0x7a8] sm:$0xff]  ;;  %v1159_v28 = vadd.f32 %v1158_v58, %v4869_v21 }
  0xdc   : > { %v5028_v44 = vld [vmem:[%s4220_s21 + $0x18] sm:$0xff]  ;;  %v1253_v40 = vadd.f32 %v1252_v42, %v1206_v12  ;;  %v5034_v34 = vld [vmem:[%s4220_s21 + $0x90] sm:$0xff]  ;;  %v1345_v27 = vadd.f32 %v1344_v60, %v1298_v30  ;;  %v598_v32 = vld [vmem:[%s4226_s26 + $0x6a0] sm:$0xff]  ;;  %v5039_v33 = vmul.f32 %v566_v23, %v7743_v24  ;;  %v5042_v63 = vmul.f32 %v567_v11, %v7744_v57 }
  0xdd   : > { %7778 = vst [vmem:[#allocation60_spill] sm:$0xff] %v5028_v44  ;;  %v1389_v47 = vmul.f32 %v5028_v44, %v629_v48  ;;  %7779 = vst [vmem:[#allocation33_spill] sm:$0xff] %v5034_v34  ;;  %v1300_v7 = vmul.f32 %v5034_v34, %v596_v19  ;;  %v5045_v45 = vld [vmem:[%s4220_s21 + $0x20] sm:$0xff]  ;;  %v1435_v12 = vadd.f32 %v1434_v38, %v1388_v56  ;;  %v568_v14 = vld [vmem:[%s4226_s26 + $0x5b0] sm:$0xff]  ;;  %v963_v11 = vrot.slane %v962_v59, 2 }
  0xde   : > { %v1390_v21 = vmul.f32 %v5045_v45, %v630_v5  ;;  %v569_v13 = vld [vmem:[%s4226_s26 + $0x5b8] sm:$0xff]  ;;  %v632_v48 = vld [vmem:[%s4226_s26 + $0x7b0] sm:$0xff]  ;;  %v1160_v30 = vadd.f32 %v1159_v28, %v4880_v3  ;;  %v1254_v15 = vadd.f32 %v1253_v40, %v1207_v9  ;;  %v1346_v57 = vadd.f32 %v1345_v27, %v1299_v54  ;;  %v599_v23 = vld [vmem:[%s4226_s26 + $0x6a8] sm:$0xff] }
  0xdf   : > { %v5053_v24 = vld [vmem:[%s4220_s21 + $0x98] sm:$0xff]  ;;  %v1067_v58 = vrot.slane %v1066_v36, 2  ;;  %v5058_v5 = vld [vmem:[%s4220_s21 + $0x28] sm:$0xff]  ;;  %v1436_v56 = vadd.f32 %v1435_v12, %v1389_v47  ;;  %v5065_v60 = vld [vmem:[%s4220_s21 + $0xa0] sm:$0xff]  ;;  %v5070_v40 = vmul.f32 %v568_v14, %v7745_v0 }
  0xe0   : > { %v1301_v19 = vmul.f32 %v5053_v24, %v597_v61  ;;  %v1391_v38 = vmul.f32 %v5058_v5, %v631_v49  ;;  %v633_v3 = vld [vmem:[%s4226_s26 + $0x7b8] sm:$0xff]  ;;  %v1161_v9 = vadd.f32 %v1160_v30, %v4891_v53  ;;  %v1255_v42 = vadd.f32 %v1254_v15, %v4973_v16  ;;  %7780 = vst [vmem:[#allocation61_spill] sm:$0xff] %v5065_v60  ;;  %v600_v28 = vld [vmem:[%s4226_s26 + $0x6b0] sm:$0xff]  ;;  %v570_v27 = vld [vmem:[%s4226_s26 + $0x5c0] sm:$0xff] }
  0xe1   : > { %v1302_v54 = vmul.f32 %v5065_v60, %v598_v32  ;;  %v1347_v61 = vadd.f32 %v1346_v57, %v1300_v7  ;;  %v5073_v49 = vmul.f32 %v569_v13, %v7747_v8  ;;  %v5076_v47 = vld [vmem:[%s4220_s21 + $0x30] sm:$0xff]  ;;  %v1437_v16 = vadd.f32 %v1436_v56, %v1390_v21  ;;  %v571_v12 = vld [vmem:[%s4226_s26 + $0x5c8] sm:$0xff]  ;;  %v634_v32 = vld [vmem:[%s4226_s26 + $0x7c0] sm:$0xff] }
  0xe2   : > { %v1392_v53 = vmul.f32 %v5076_v47, %v632_v48  ;;  %v1162_v7 = vadd.f32 %v1161_v9, %v4894_v55  ;;  %v1256_v30 = vadd.f32 %v1255_v42, %v4976_v46  ;;  %v5085_v0 = vld [vmem:[%s4220_s21 + $0xa8] sm:$0xff]  ;;  %v601_v13 = vld [vmem:[%s4226_s26 + $0x6b8] sm:$0xff]  ;;  %v964_v15 = vadd.f32 %v963_v11, %v962_v59 }
  0xe3   : > { %7781 = vst [vmem:[#allocation34_spill] sm:$0xff] %v5085_v0  ;;  %v1303_v8 = vmul.f32 %v5085_v0, %v599_v23  ;;  %v1348_v14 = vadd.f32 %v1347_v61, %v1301_v19  ;;  %v1068_v48 = vadd.f32 %v1067_v58, %v1066_v36  ;;  %v5090_v21 = vld [vmem:[%s4220_s21 + $0x38] sm:$0xff]  ;;  %v1438_v55 = vadd.f32 %v1437_v16, %v1391_v38  ;;  %v635_v56 = vld [vmem:[%s4226_s26 + $0x7c8] sm:$0xff]  ;;  %v5097_v23 = vld [vmem:[%s4220_s21 + $0xb0] sm:$0xff] }
  0xe4   : > { %v1393_v57 = vmul.f32 %v5090_v21, %v633_v3  ;;  %v1163_v46 = vadd.f32 %v1162_v7, %v4905_v1  ;;  %v1257_v9 = vadd.f32 %v1256_v30, %v4979_v43  ;;  %7782 = vst [vmem:[#allocation62_spill] sm:$0xff] %v5097_v23  ;;  %v1304_v19 = vmul.f32 %v5097_v23, %v600_v28  ;;  %v602_v36 = vld [vmem:[%s4226_s26 + $0x6c0] sm:$0xff]  ;;  %v572_v3 = vld [vmem:[%s4226_s26 + $0x5d0] sm:$0xff]  ;;  %v573_v42 = vld [vmem:[%s4226_s26 + $0x5d8] sm:$0xff] }
  0xe5   : > { %v1349_v59 = vadd.f32 %v1348_v14, %v1302_v54  ;;  %v5102_v11 = vmul.f32 %v570_v27, %v7748_v29  ;;  %v5105_v58 = vmul.f32 %v571_v12, %v7749_v26  ;;  %v5108_v38 = vld [vmem:[%s4220_s21 + $0x40] sm:$0xff]  ;;  %v1439_v43 = vadd.f32 %v1438_v55, %v1392_v53  ;;  %v636_v61 = vld [vmem:[%s4226_s26 + $0x7d0] sm:$0xff]  ;;  %v5117_v29 = vld [vmem:[%s4220_s21 + $0xb8] sm:$0xff] }
  0xe6   : > { %7783 = vst [vmem:[#allocation35_spill] sm:$0xff] %v5108_v38  ;;  %v1394_v1 = vmul.f32 %v5108_v38, %v634_v32  ;;  %v1164_v54 = vadd.f32 %v1163_v46, %v4916_v51  ;;  %v1258_v28 = vadd.f32 %v1257_v9, %v5006_v4  ;;  %7784 = vst [vmem:[#allocation66_spill] sm:$0xff] %v5117_v29  ;;  %v603_v27 = vld [vmem:[%s4226_s26 + $0x6c8] sm:$0xff]  ;;  %v965_v12 = vrot.slane %v964_v15, 1  ;;  %v637_v30 = vld [vmem:[%s4226_s26 + $0x7d8] sm:$0xff] }
  0xe7   : > { %v1305_v26 = vmul.f32 %v5117_v29, %v601_v13  ;;  %v1350_v16 = vadd.f32 %v1349_v59, %v1303_v8  ;;  %v1069_v32 = vrot.slane %v1068_v48, 1  ;;  %v5122_v53 = vld [vmem:[%s4220_s21 + $0x48] sm:$0xff]  ;;  %v1440_v51 = vadd.f32 %v1439_v43, %v1393_v57  ;;  %v5129_v13 = vld [vmem:[%s4220_s21 + $0xc0] sm:$0xff]  ;;  %v604_v46 = vld [vmem:[%s4226_s26 + $0x6d0] sm:$0xff] }
  0xe8   : > { %7785 = vst [vmem:[#allocation36_spill] sm:$0xff] %v5122_v53  ;;  %v1395_v7 = vmul.f32 %v5122_v53, %v635_v56  ;;  %v1165_v4 = vadd.f32 %v1164_v54, %v4919_v62  ;;  %v1259_v14 = vadd.f32 %v1258_v28, %v5009_v18  ;;  %7786 = vst [vmem:[#allocation67_spill] sm:$0xff] %v5129_v13  ;;  %v5140_v57 = vld [vmem:[%s4220_s21 + $0x50] sm:$0xff]  ;;  %v574_v59 = vld [vmem:[%s4226_s26 + $0x5e0] sm:$0xff] }
  0xe9   : > { %v1306_v8 = vmul.f32 %v5129_v13, %v602_v36  ;;  %v1351_v55 = vadd.f32 %v1350_v16, %v1304_v19  ;;  %v5134_v9 = vmul.f32 %v572_v3, %v7751_v25  ;;  %v5137_v56 = vmul.f32 %v573_v42, %v7752_v35  ;;  %7787 = vst [vmem:[#allocation68_spill] sm:$0xff] %v5140_v57  ;;  %v575_v43 = vld [vmem:[%s4226_s26 + $0x5e8] sm:$0xff]  ;;  %v638_v36 = vld [vmem:[%s4226_s26 + $0x7e0] sm:$0xff]  ;;  %v605_v42 = vld [vmem:[%s4226_s26 + $0x6d8] sm:$0xff] }
  0xea   : > { %v1396_v62 = vmul.f32 %v5140_v57, %v636_v61  ;;  %v1441_v18 = vadd.f32 %v1440_v51, %v1394_v1  ;;  %v1166_v19 = vadd.f32 %v1165_v4, %v4931_v52  ;;  %v1260_v54 = vadd.f32 %v1259_v14, %v5012_v50  ;;  %v5149_v25 = vld [vmem:[%s4220_s21 + $0xc8] sm:$0xff]  ;;  %v5154_v28 = vld [vmem:[%s4220_s21 + $0x58] sm:$0xff]  ;;  %v5161_v14 = vld [vmem:[%s4220_s21 + $0xd0] sm:$0xff] }
  0xeb   : > { %7788 = vst [vmem:[#allocation72_spill] sm:$0xff] %v5149_v25  ;;  %v1307_v35 = vmul.f32 %v5149_v25, %v603_v27  ;;  %v1352_v3 = vadd.f32 %v1351_v55, %v1305_v26  ;;  %v966_v61 = vadd.f32 %v965_v12, %v964_v15  ;;  %v1070_v1 = vadd.f32 %v1069_v32, %v1068_v48  ;;  %v639_v50 = vld [vmem:[%s4226_s26 + $0x7e8] sm:$0xff]  ;;  %v606_v15 = vld [vmem:[%s4226_s26 + $0x6e0] sm:$0xff]  ;;  %v640_v12 = vld [vmem:[%s4226_s26 + $0x7f0] sm:$0xff] }
  0xec   : > { %7789 = vst [vmem:[#allocation73_spill] sm:$0xff] %v5154_v28  ;;  %v1397_v16 = vmul.f32 %v5154_v28, %v637_v30  ;;  %v1442_v52 = vadd.f32 %v1441_v18, %v1395_v7  ;;  %v1167_v51 = vadd.f32 %v1166_v19, %v4942_v31  ;;  %v1261_v4 = vadd.f32 %v1260_v54, %v5039_v33  ;;  %v607_v48 = vld [vmem:[%s4226_s26 + $0x6e8] sm:$0xff]  ;;  %v5168_v32 = vld [vmem:[%s4220_s21 + $0x160] sm:$0xff]  ;;  %v5184_v54 = vld [vmem:[%s4220_s21 + $0xd8] sm:$0xff] }
  0xed   : > { %7790 = vst [vmem:[#allocation22_spill] sm:$0xff] %v5161_v14  ;;  %v1308_v26 = vmul.f32 %v5161_v14, %v604_v46  ;;  %v1353_v27 = vadd.f32 %v1352_v3, %v1306_v8  ;;  %7791 = vst [vmem:[#allocation23_spill] sm:$0xff] %v5168_v32  ;;  %v5171_v7 = vmul.f32 %v5168_v32, %v574_v59  ;;  %v5177_v31 = vld [vmem:[%s4220_s21 + $0x60] sm:$0xff]  ;;  %v675_v3 = vld [vmem:[%s4226_s26 + $0x908] sm:$0xff] }
  0xee   : > { %v5174_v30 = vmul.f32 %v575_v43, %v7758_v6  ;;  %7792 = vst [vmem:[#allocation74_spill] sm:$0xff] %v5177_v31  ;;  %v1398_v33 = vmul.f32 %v5177_v31, %v638_v36  ;;  %v1443_v55 = vadd.f32 %v1442_v52, %v1396_v62  ;;  %v674_v8 = vld [vmem:[%s4226_s26 + $0x900] sm:$0xff]  ;;  %v1168_v19 = vadd.f32 %v1167_v51, %v4945_v10  ;;  %v576_v14 = vld [vmem:[%s4226_s26 + $0x5f0] sm:$0xff]  ;;  %v641_v10 = vld [vmem:[%s4226_s26 + $0x7f8] sm:$0xff] }
  0xef   : > { %v967_v46 = vld [vmem:[#allocation2] sm:$0x1]  ;;  %v1071_v18 = vld [vmem:[#allocation2 + $0x1] sm:$0x1]  ;;  %v1262_v59 = vadd.f32 %v1261_v4, %v5042_v63  ;;  %v1309_v6 = vmul.f32 %v5184_v54, %v605_v42  ;;  %v1354_v43 = vadd.f32 %v1353_v27, %v1307_v35  ;;  %v1399_v62 = vmul.f32 %v4954_v2, %v639_v50  ;;  %v608_v31 = vld [vmem:[%s4226_s26 + $0x6f0] sm:$0xff] }
  0xf0   : > { %v968_v36 = vadd.f32 %v967_v46, %v966_v61  ;;  %v1072_v32 = vadd.f32 %v1071_v18, %v1070_v1  ;;  %v1444_v52 = vadd.f32 %v1443_v55, %v1397_v16  ;;  %v1169_v63 = vrot.slane %v1168_v19, 4  ;;  %v5194_v4 = vld [vmem:[%s4220_s21 + $0xe0] sm:$0xff]  ;;  %v676_v61 = vld [vmem:[%s4226_s26 + $0x910] sm:$0xff]  ;;  %v5199_v1 = vld [vmem:[%s4220_s21 + $0xe8] sm:$0xff] }
  0xf1   : > { %v1263_v51 = vadd.f32 %v1262_v59, %v5070_v40  ;;  %v1310_v35 = vmul.f32 %v5194_v4, %v606_v15  ;;  %v1355_v42 = vadd.f32 %v1354_v43, %v1308_v26  ;;  %7793 = vst [vmem:[#allocation43_spill] sm:$0xff] %v5199_v1  ;;  %v1311_v16 = vmul.f32 %v5199_v1, %v607_v48  ;;  %v609_v55 = vld [vmem:[%s4226_s26 + $0x6f8] sm:$0xff]  ;;  %v642_v15 = vld [vmem:[%s4226_s26 + $0x800] sm:$0xff]  ;;  %v5210_v43 = vld [vmem:[%s4220_s21 + $0x170] sm:$0xff] }
  0xf2   : > { %969 = vst [vmem:[#allocation2] sm:$0x1] %v968_v36  ;;  %1073 = vst [vmem:[#allocation2 + $0x1] sm:$0x1] %v1072_v32  ;;  %v1400_v50 = vmul.f32 %v4966_v41, %v640_v12  ;;  %v1445_v27 = vadd.f32 %v1444_v52, %v1398_v33  ;;  %v1490_v40 = vmul.f32 %v4991_v37, %v674_v8  ;;  %v677_v26 = vld [vmem:[%s4226_s26 + $0x918] sm:$0xff]  ;;  %v5216_v12 = vld [vmem:[%s4220_s21 + $0xf0] sm:$0xff] }
  0xf3   : > { %v1170_v46 = vadd.f32 %v1169_v63, %v1168_v19  ;;  %v1264_v18 = vadd.f32 %v1263_v51, %v5073_v49  ;;  %v1356_v32 = vadd.f32 %v1355_v42, %v1309_v6  ;;  %v1491_v59 = vmul.f32 %v4995_v39, %v675_v3  ;;  %7794 = vst [vmem:[#allocation24_spill] sm:$0xff] %v5210_v43  ;;  %v610_v49 = vld [vmem:[%s4226_s26 + $0x700] sm:$0xff]  ;;  %v643_v36 = vld [vmem:[%s4226_s26 + $0x808] sm:$0xff]  ;;  %v5226_v51 = vld [vmem:[%s4220_s21 + $0xf8] sm:$0xff] }
  0xf4   : > { %v5213_v48 = vmul.f32 %v5210_v43, %v576_v14  ;;  %7795 = vst [vmem:[#allocation25_spill] sm:$0xff] %v5216_v12  ;;  %v1312_v33 = vmul.f32 %v5216_v12, %v608_v31  ;;  %v1401_v8 = vmul.f32 %v4986_v20, %v641_v10  ;;  %v1446_v19 = vadd.f32 %v1445_v27, %v1399_v62  ;;  %v678_v6 = vld [vmem:[%s4226_s26 + $0x920] sm:$0xff]  ;;  %v7796_v31 = vld [vmem:[#allocation27_spill] sm:$0xff] }
  0xf5   : > { %v1171_v52 = vrot.slane %v1170_v46, 2  ;;  %v1265_v3 = vadd.f32 %v1264_v18, %v5102_v11  ;;  %v1357_v63 = vadd.f32 %v1356_v32, %v1310_v35  ;;  %v1492_v14 = vmul.f32 %v5015_v17, %v676_v61  ;;  %v611_v27 = vld [vmem:[%s4226_s26 + $0x708] sm:$0xff]  ;;  %v644_v12 = vld [vmem:[%s4226_s26 + $0x810] sm:$0xff]  ;;  %v5236_v18 = vld [vmem:[%s4220_s21 + $0x100] sm:$0xff] }
  0xf6   : > { %v1313_v42 = vmul.f32 %v5226_v51, %v609_v55  ;;  %v1402_v43 = vmul.f32 %v7796_v31, %v642_v15  ;;  %v1447_v10 = vadd.f32 %v1446_v19, %v1400_v50  ;;  %v1493_v62 = vmul.f32 %v5028_v44, %v677_v26  ;;  %v679_v1 = vld [vmem:[%s4226_s26 + $0x928] sm:$0xff]  ;;  %7797 = vst [vmem:[#allocation75_spill] sm:$0xff] %v5236_v18  ;;  %v612_v32 = vld [vmem:[%s4226_s26 + $0x710] sm:$0xff]  ;;  %v645_v19 = vld [vmem:[%s4226_s26 + $0x818] sm:$0xff] }
  0xf7   : > { %v1172_v20 = vadd.f32 %v1171_v52, %v1170_v46  ;;  %v1266_v11 = vadd.f32 %v1265_v3, %v5105_v58  ;;  %v1358_v35 = vadd.f32 %v1357_v63, %v1311_v16  ;;  %v1538_v61 = vadd.f32 %v1491_v59, %v1490_v40  ;;  %v680_v46 = vld [vmem:[%s4226_s26 + $0x930] sm:$0xff]  ;;  %v1175_v59 = vld [vmem:[#allocation2 + $0x2] sm:$0x1]  ;;  %v577_v63 = vld [vmem:[%s4226_s26 + $0x5f8] sm:$0xff] }
  0xf8   : > { %v1314_v55 = vmul.f32 %v5236_v18, %v610_v49  ;;  %v1403_v15 = vmul.f32 %v5023_v22, %v643_v36  ;;  %v1448_v50 = vadd.f32 %v1447_v10, %v1401_v8  ;;  %v1494_v26 = vmul.f32 %v5045_v45, %v678_v6  ;;  %v5246_v49 = vld [vmem:[%s4220_s21 + $0x108] sm:$0xff]  ;;  %v613_v10 = vld [vmem:[%s4226_s26 + $0x718] sm:$0xff]  ;;  %v646_v18 = vld [vmem:[%s4226_s26 + $0x820] sm:$0xff] }
  0xf9   : > { %v1173_v52 = vrot.slane %v1172_v20, 1  ;;  %v1267_v58 = vadd.f32 %v1266_v11, %v5134_v9  ;;  %v1359_v16 = vadd.f32 %v1358_v35, %v1312_v33  ;;  %v1539_v40 = vadd.f32 %v1538_v61, %v1492_v14  ;;  %v681_v35 = vld [vmem:[%s4226_s26 + $0x938] sm:$0xff] }
  0xfa   : > { %v1315_v36 = vmul.f32 %v5246_v49, %v611_v27  ;;  %v1404_v8 = vmul.f32 %v5034_v34, %v644_v12  ;;  %v1449_v6 = vadd.f32 %v1448_v50, %v1402_v43  ;;  %v1495_v3 = vmul.f32 %v5058_v5, %v679_v1  ;;  %v5257_v27 = vld [vmem:[%s4220_s21 + $0x110] sm:$0xff]  ;;  %v647_v50 = vld [vmem:[%s4226_s26 + $0x828] sm:$0xff] }
  0xfb   : > { %v1174_v9 = vadd.f32 %v1173_v52, %v1172_v20  ;;  %v1268_v33 = vadd.f32 %v1267_v58, %v5137_v56  ;;  %v1360_v14 = vadd.f32 %v1359_v16, %v1313_v42  ;;  %v1540_v11 = vadd.f32 %v1539_v40, %v1493_v62  ;;  %v614_v20 = vld [vmem:[%s4226_s26 + $0x720] sm:$0xff]  ;;  %v5267_v16 = vld [vmem:[%s4220_s21 + $0x178] sm:$0xff] }
  0xfc   : > { %v1316_v12 = vmul.f32 %v5257_v27, %v612_v32  ;;  %v1405_v43 = vmul.f32 %v5053_v24, %v645_v19  ;;  %v1450_v1 = vadd.f32 %v1449_v6, %v1403_v15  ;;  %v1496_v61 = vmul.f32 %v5076_v47, %v680_v46  ;;  %v682_v58 = vld [vmem:[%s4226_s26 + $0x940] sm:$0xff]  ;;  %v5271_v19 = vld [vmem:[%s4220_s21 + $0x118] sm:$0xff] }
  0xfd   : > { %v1176_v52 = vadd.f32 %v1175_v59, %v1174_v9  ;;  %v1269_v56 = vadd.f32 %v1268_v33, %v5171_v7  ;;  %v1361_v42 = vadd.f32 %v1360_v14, %v1314_v55  ;;  %v1541_v62 = vadd.f32 %v1540_v11, %v1494_v26  ;;  %v615_v59 = vld [vmem:[%s4226_s26 + $0x728] sm:$0xff]  ;;  %v648_v7 = vld [vmem:[%s4226_s26 + $0x830] sm:$0xff]  ;;  %v5281_v33 = vld [vmem:[%s4220_s21 + $0x120] sm:$0xff] }
  0xfe   : > { %v1225_v32 = vmul.f32 %v5267_v16, %v577_v63  ;;  %v1317_v15 = vmul.f32 %v5271_v19, %v613_v10  ;;  %v1406_v46 = vmul.f32 %v5065_v60, %v646_v18  ;;  %v1451_v40 = vadd.f32 %v1450_v1, %v1404_v8  ;;  %v683_v9 = vld [vmem:[%s4226_s26 + $0x948] sm:$0xff]  ;;  %v616_v14 = vld [vmem:[%s4226_s26 + $0x730] sm:$0xff]  ;;  %v649_v11 = vld [vmem:[%s4226_s26 + $0x838] sm:$0xff] }
  0xff   : > { %1177 = vst [vmem:[#allocation2 + $0x2] sm:$0x1] %v1176_v52  ;;  %v1270_v55 = vadd.f32 %v1269_v56, %v5174_v30  ;;  %v1362_v26 = vadd.f32 %v1361_v42, %v1315_v36  ;;  %v1497_v6 = vmul.f32 %v5090_v21, %v681_v35  ;;  %v1542_v63 = vadd.f32 %v1541_v62, %v1495_v3  ;;  %v684_v1 = vld [vmem:[%s4226_s26 + $0x950] sm:$0xff]  ;;  %v5291_v52 = vld [vmem:[%s4220_s21 + $0x128] sm:$0xff]  ;;  %v617_v56 = vld [vmem:[%s4226_s26 + $0x738] sm:$0xff] }
 0x100   : > { %v1318_v10 = vmul.f32 %v5281_v33, %v614_v20  ;;  %v1407_v18 = vmul.f32 %v5085_v0, %v647_v50  ;;  %v1452_v8 = vadd.f32 %v1451_v40, %v1405_v43  ;;  %v1498_v35 = vmul.f32 %v5108_v38, %v682_v58  ;;  %v650_v42 = vld [vmem:[%s4226_s26 + $0x840] sm:$0xff]  ;;  %v685_v58 = vld [vmem:[%s4226_s26 + $0x958] sm:$0xff]  ;;  %v5300_v40 = vld [vmem:[%s4220_s21 + $0x130] sm:$0xff] }
 0x101   : > { %v1271_v30 = vadd.f32 %v1270_v55, %v5213_v48  ;;  %v1363_v36 = vadd.f32 %v1362_v26, %v1316_v12  ;;  %v1543_v3 = vadd.f32 %v1542_v63, %v1496_v61  ;;  %v1319_v20 = vmul.f32 %v5291_v52, %v615_v59  ;;  %v619_v26 = vld [vmem:[%s4226_s26 + $0x748] sm:$0xff] }
 0x102   : > { %v1408_v43 = vmul.f32 %v5097_v23, %v648_v7  ;;  %v1453_v50 = vadd.f32 %v1452_v8, %v1406_v46  ;;  %v1499_v12 = vmul.f32 %v5122_v53, %v683_v9  ;;  %v1320_v55 = vmul.f32 %v5300_v40, %v616_v14  ;;  %v618_v7 = vld [vmem:[%s4226_s26 + $0x740] sm:$0xff] }
 0x103   : > { %v1272_v62 = vadd.f32 %v1271_v30, %v1225_v32  ;;  %v1364_v48 = vadd.f32 %v1363_v36, %v1317_v15  ;;  %v1544_v61 = vadd.f32 %v1543_v3, %v1497_v6  ;;  %v1409_v59 = vmul.f32 %v5117_v29, %v649_v11  ;;  %v651_v32 = vld [vmem:[%s4226_s26 + $0x848] sm:$0xff]  ;;  %v686_v8 = vld [vmem:[%s4226_s26 + $0x960] sm:$0xff]  ;;  %v5310_v30 = vld [vmem:[%s4220_s21 + $0x138] sm:$0xff] }
 0x104   : > { %v1454_v46 = vadd.f32 %v1453_v50, %v1407_v18  ;;  %v1500_v6 = vmul.f32 %v5140_v57, %v684_v1  ;;  %7798 = vst [vmem:[#allocation47_spill] sm:$0xff] %v5310_v30  ;;  %v1321_v14 = vmul.f32 %v5310_v30, %v617_v56  ;;  %v1410_v11 = vmul.f32 %v5129_v13, %v650_v42  ;;  %v620_v36 = vld [vmem:[%s4226_s26 + $0x750] sm:$0xff]  ;;  %v621_v3 = vld [vmem:[%s4226_s26 + $0x758] sm:$0xff]  ;;  %v5320_v57 = vld [vmem:[%s4220_s21 + $0x140] sm:$0xff] }
 0x105   : > { %v1273_v63 = vrot.slane %v1272_v62, 4  ;;  %v1365_v15 = vadd.f32 %v1364_v48, %v1318_v10  ;;  %v1545_v9 = vadd.f32 %v1544_v61, %v1498_v35  ;;  %v652_v50 = vld [vmem:[%s4226_s26 + $0x850] sm:$0xff]  ;;  %v1501_v1 = vmul.f32 %v5154_v28, %v685_v58  ;;  %v687_v61 = vld [vmem:[%s4226_s26 + $0x968] sm:$0xff]  ;;  %7799 = vst [vmem:[#allocation26_spill] sm:$0xff] %v5320_v57 }
 0x106   : > { %v1455_v18 = vadd.f32 %v1454_v46, %v1408_v43  ;;  %v1322_v56 = vmul.f32 %v5320_v57, %v618_v7  ;;  %v5324_v42 = vld [vmem:[%s4220_s21 + $0x148] sm:$0xff]  ;;  %v1411_v46 = vmul.f32 %v5149_v25, %v651_v32  ;;  %v688_v58 = vld [vmem:[%s4226_s26 + $0x970] sm:$0xff] }
 0x107   : > { %v1274_v10 = vadd.f32 %v1273_v63, %v1272_v62  ;;  %v1366_v48 = vadd.f32 %v1365_v15, %v1319_v20  ;;  %v1546_v35 = vadd.f32 %v1545_v9, %v1499_v12  ;;  %7800 = vst [vmem:[#allocation48_spill] sm:$0xff] %v5324_v42  ;;  %v1323_v43 = vmul.f32 %v5324_v42, %v619_v26  ;;  %v653_v20 = vld [vmem:[%s4226_s26 + $0x858] sm:$0xff]  ;;  %v722_v12 = vld [vmem:[%s4226_s26 + $0xa80] sm:$0xff]  ;;  %v723_v7 = vld [vmem:[%s4226_s26 + $0xa88] sm:$0xff] }
 0x108   : > { %v1456_v62 = vadd.f32 %v1455_v18, %v1409_v59  ;;  %v7801_v9 = vld [vmem:[#allocation74_spill] sm:$0xff]  ;;  %v5334_v29 = vld [vmem:[%s4220_s21 + $0x150] sm:$0xff]  ;;  %v5338_v42 = vld [vmem:[%s4220_s21 + $0x158] sm:$0xff] }
 0x109   : > { %v1275_v63 = vrot.slane %v1274_v10, 2  ;;  %v1367_v15 = vadd.f32 %v1366_v48, %v1320_v55  ;;  %v1502_v28 = vmul.f32 %v7801_v9, %v686_v8  ;;  %v1547_v13 = vadd.f32 %v1546_v35, %v1500_v6  ;;  %7802 = vst [vmem:[#allocation49_spill] sm:$0xff] %v5334_v29  ;;  %7803 = vst [vmem:[#allocation76_spill] sm:$0xff] %v5338_v42  ;;  %v7804_v32 = vld [vmem:[#allocation22_spill] sm:$0xff]  ;;  %v689_v8 = vld [vmem:[%s4226_s26 + $0x978] sm:$0xff] }
 0x10a   : > { %v1324_v26 = vmul.f32 %v5334_v29, %v620_v36  ;;  %v1325_v59 = vmul.f32 %v5338_v42, %v621_v3  ;;  %v1412_v18 = vmul.f32 %v7804_v32, %v652_v50  ;;  %v1457_v25 = vadd.f32 %v1456_v62, %v1410_v11  ;;  %v622_v55 = vld [vmem:[%s4226_s26 + $0x760] sm:$0xff]  ;;  %v724_v30 = vld [vmem:[%s4226_s26 + $0xa90] sm:$0xff]  ;;  %v655_v11 = vld [vmem:[%s4226_s26 + $0x868] sm:$0xff] }
 0x10b   : > { %v654_v48 = vld [vmem:[%s4226_s26 + $0x860] sm:$0xff]  ;;  %v1276_v9 = vadd.f32 %v1275_v63, %v1274_v10  ;;  %v1368_v6 = vadd.f32 %v1367_v15, %v1321_v14  ;;  %v1503_v35 = vmul.f32 %v4954_v2, %v687_v61  ;;  %v1548_v57 = vadd.f32 %v1547_v13, %v1501_v1  ;;  %v725_v32 = vld [vmem:[%s4226_s26 + $0xa98] sm:$0xff]  ;;  %v7805_v61 = vld [vmem:[#allocation23_spill] sm:$0xff] }
 0x10c   : > { %v1413_v36 = vmul.f32 %v5184_v54, %v653_v20  ;;  %v1458_v29 = vadd.f32 %v1457_v25, %v1411_v46  ;;  %v1504_v3 = vmul.f32 %v4966_v41, %v688_v58  ;;  %v1594_v50 = vmul.f32 %v4991_v37, %v722_v12  ;;  %v690_v62 = vld [vmem:[%s4226_s26 + $0x980] sm:$0xff]  ;;  %v7806_v58 = vld [vmem:[#allocation31_spill] sm:$0xff] }
 0x10d   : > { %v1277_v42 = vrot.slane %v1276_v9, 1  ;;  %v1369_v14 = vadd.f32 %v1368_v6, %v1322_v56  ;;  %v1549_v10 = vadd.f32 %v1548_v57, %v1502_v28  ;;  %v1595_v13 = vmul.f32 %v4995_v39, %v723_v7  ;;  %v1279_v1 = vld [vmem:[#allocation2 + $0x3] sm:$0x1]  ;;  %v623_v63 = vld [vmem:[%s4226_s26 + $0x768] sm:$0xff]  ;;  %v656_v15 = vld [vmem:[%s4226_s26 + $0x870] sm:$0xff] }
 0x10e   : > { %v1326_v20 = vmul.f32 %v7805_v61, %v622_v55  ;;  %v1414_v25 = vmul.f32 %v5194_v4, %v654_v48  ;;  %v1459_v46 = vadd.f32 %v1458_v29, %v1412_v18  ;;  %v1505_v12 = vmul.f32 %v7806_v58, %v689_v8  ;;  %v691_v41 = vld [vmem:[%s4226_s26 + $0x988] sm:$0xff]  ;;  %v726_v7 = vld [vmem:[%s4226_s26 + $0xaa0] sm:$0xff]  ;;  %v624_v48 = vld [vmem:[%s4226_s26 + $0x770] sm:$0xff] }
 0x10f   : > { %v1278_v37 = vadd.f32 %v1277_v42, %v1276_v9  ;;  %v1370_v56 = vadd.f32 %v1369_v14, %v1323_v43  ;;  %v1550_v57 = vadd.f32 %v1549_v10, %v1503_v35  ;;  %v1596_v28 = vmul.f32 %v5015_v17, %v724_v30  ;;  %v7807_v55 = vld [vmem:[#allocation43_spill] sm:$0xff]  ;;  %v657_v8 = vld [vmem:[%s4226_s26 + $0x878] sm:$0xff] }
 0x110   : > { %v1415_v6 = vmul.f32 %v7807_v55, %v655_v11  ;;  %v1460_v39 = vadd.f32 %v1459_v46, %v1413_v36  ;;  %v1506_v29 = vmul.f32 %v7796_v31, %v690_v62  ;;  %v1597_v18 = vmul.f32 %v5028_v44, %v725_v32  ;;  %v692_v42 = vld [vmem:[%s4226_s26 + $0x990] sm:$0xff]  ;;  %v727_v30 = vld [vmem:[%s4226_s26 + $0xaa8] sm:$0xff]  ;;  %v7809_v11 = vld [vmem:[#allocation25_spill] sm:$0xff] }
 0x111   : > { %v1280_v9 = vadd.f32 %v1279_v1, %v1278_v37  ;;  %v1371_v43 = vadd.f32 %v1370_v56, %v1324_v26  ;;  %v1551_v14 = vadd.f32 %v1550_v57, %v1504_v3  ;;  %v1642_v35 = vadd.f32 %v1595_v13, %v1594_v50  ;;  %v5370_v10 = vld [vmem:[%s4220_s21 + $0x168] sm:$0xff]  ;;  %v625_v31 = vld [vmem:[%s4226_s26 + $0x778] sm:$0xff]  ;;  %v658_v44 = vld [vmem:[%s4226_s26 + $0x880] sm:$0xff] }
 0x112   : > { %7808 = vst [vmem:[#allocation51_spill] sm:$0xff] %v5370_v10  ;;  %v1327_v36 = vmul.f32 %v5370_v10, %v623_v63  ;;  %v1416_v46 = vmul.f32 %v7809_v11, %v656_v15  ;;  %v1461_v62 = vadd.f32 %v1460_v39, %v1414_v25  ;;  %v1507_v32 = vmul.f32 %v5023_v22, %v691_v41  ;;  %v693_v37 = vld [vmem:[%s4226_s26 + $0x998] sm:$0xff]  ;;  %v728_v1 = vld [vmem:[%s4226_s26 + $0xab0] sm:$0xff]  ;;  %v659_v15 = vld [vmem:[%s4226_s26 + $0x888] sm:$0xff] }
 0x113   : > { %1281 = vst [vmem:[#allocation2 + $0x3] sm:$0x1] %v1280_v9  ;;  %v1372_v26 = vadd.f32 %v1371_v43, %v1325_v59  ;;  %v1552_v3 = vadd.f32 %v1551_v14, %v1505_v12  ;;  %v1598_v50 = vmul.f32 %v5045_v45, %v726_v7  ;;  %v1643_v13 = vadd.f32 %v1642_v35, %v1596_v28  ;;  %v7810_v63 = vld [vmem:[#allocation24_spill] sm:$0xff]  ;;  %v694_v9 = vld [vmem:[%s4226_s26 + $0x9a0] sm:$0xff]  ;;  %v7811_v14 = vld [vmem:[#allocation75_spill] sm:$0xff] }
 0x114   : > { %v1328_v56 = vmul.f32 %v7810_v63, %v624_v48  ;;  %v1417_v39 = vmul.f32 %v5226_v51, %v657_v8  ;;  %v1462_v25 = vadd.f32 %v1461_v62, %v1415_v6  ;;  %v1508_v41 = vmul.f32 %v5034_v34, %v692_v42  ;;  %v660_v57 = vld [vmem:[%s4226_s26 + $0x890] sm:$0xff]  ;;  %v729_v43 = vld [vmem:[%s4226_s26 + $0xab8] sm:$0xff]  ;;  %v662_v62 = vld [vmem:[%s4226_s26 + $0x8a0] sm:$0xff] }
 0x115   : > { %v1373_v59 = vadd.f32 %v1372_v26, %v1326_v20  ;;  %v1553_v12 = vadd.f32 %v1552_v3, %v1506_v29  ;;  %v1599_v7 = vmul.f32 %v5058_v5, %v727_v30  ;;  %v1644_v28 = vadd.f32 %v1643_v13, %v1597_v18  ;;  %v661_v35 = vld [vmem:[%s4226_s26 + $0x898] sm:$0xff]  ;;  %v695_v34 = vld [vmem:[%s4226_s26 + $0x9a8] sm:$0xff]  ;;  %v730_v26 = vld [vmem:[%s4226_s26 + $0xac0] sm:$0xff] }
 0x116   : > { %v1329_v48 = vmul.f32 %v5267_v16, %v625_v31  ;;  %v1418_v8 = vmul.f32 %v7811_v14, %v658_v44  ;;  %v1463_v6 = vadd.f32 %v1462_v25, %v1416_v46  ;;  %v1509_v42 = vmul.f32 %v5053_v24, %v693_v37  ;;  %v663_v3 = vld [vmem:[%s4226_s26 + $0x8a8] sm:$0xff]  ;;  %v664_v13 = vld [vmem:[%s4226_s26 + $0x8b0] sm:$0xff] }
 0x117   : > { %v1374_v20 = vadd.f32 %v1373_v59, %v1327_v36  ;;  %v1554_v29 = vadd.f32 %v1553_v12, %v1507_v32  ;;  %v1600_v30 = vmul.f32 %v5076_v47, %v728_v1  ;;  %v1645_v18 = vadd.f32 %v1644_v28, %v1598_v50  ;;  %v696_v25 = vld [vmem:[%s4226_s26 + $0x9b0] sm:$0xff]  ;;  %v731_v59 = vld [vmem:[%s4226_s26 + $0xac8] sm:$0xff]  ;;  %v665_v12 = vld [vmem:[%s4226_s26 + $0x8b8] sm:$0xff] }
 0x118   : > { %v1419_v31 = vmul.f32 %v5246_v49, %v659_v15  ;;  %v1420_v44 = vmul.f32 %v5257_v27, %v660_v57  ;;  %v1464_v46 = vadd.f32 %v1463_v6, %v1417_v39  ;;  %v1510_v37 = vmul.f32 %v5065_v60, %v694_v9  ;;  %v666_v28 = vld [vmem:[%s4226_s26 + $0x8c0] sm:$0xff]  ;;  %v697_v6 = vld [vmem:[%s4226_s26 + $0x9b8] sm:$0xff] }
 0x119   : > { %v1375_v36 = vadd.f32 %v1374_v20, %v1328_v56  ;;  %v1555_v32 = vadd.f32 %v1554_v29, %v1508_v41  ;;  %v1601_v1 = vmul.f32 %v5090_v21, %v729_v43  ;;  %v1646_v50 = vadd.f32 %v1645_v18, %v1599_v7  ;;  %v732_v20 = vld [vmem:[%s4226_s26 + $0xad0] sm:$0xff]  ;;  %v667_v29 = vld [vmem:[%s4226_s26 + $0x8c8] sm:$0xff] }
 0x11a   : > { %v1421_v15 = vmul.f32 %v5271_v19, %v661_v35  ;;  %v1422_v57 = vmul.f32 %v5281_v33, %v662_v62  ;;  %v1465_v39 = vadd.f32 %v1464_v46, %v1418_v8  ;;  %v1511_v9 = vmul.f32 %v5085_v0, %v695_v34  ;;  %v668_v18 = vld [vmem:[%s4226_s26 + $0x8d0] sm:$0xff]  ;;  %v698_v46 = vld [vmem:[%s4226_s26 + $0x9c0] sm:$0xff] }
 0x11b   : > { %v1376_v56 = vadd.f32 %v1375_v36, %v1329_v48  ;;  %v1556_v41 = vadd.f32 %v1555_v32, %v1509_v42  ;;  %v1602_v43 = vmul.f32 %v5108_v38, %v730_v26  ;;  %v1647_v7 = vadd.f32 %v1646_v50, %v1600_v30  ;;  %v733_v36 = vld [vmem:[%s4226_s26 + $0xad8] sm:$0xff]  ;;  %v7812_v32 = vld [vmem:[#allocation47_spill] sm:$0xff]  ;;  %v7813_v50 = vld [vmem:[#allocation26_spill] sm:$0xff] }
 0x11c   : > { %v1423_v35 = vmul.f32 %v5291_v52, %v663_v3  ;;  %v1424_v62 = vmul.f32 %v5300_v40, %v664_v13  ;;  %v1466_v8 = vadd.f32 %v1465_v39, %v1419_v31  ;;  %v1512_v34 = vmul.f32 %v5097_v23, %v696_v25  ;;  %v7814_v39 = vld [vmem:[#allocation66_spill] sm:$0xff]  ;;  %v669_v23 = vld [vmem:[%s4226_s26 + $0x8d8] sm:$0xff] }
 0x11d   : > { %v1377_v48 = vrot.slane %v1376_v56, 4  ;;  %v1557_v42 = vadd.f32 %v1556_v41, %v1510_v37  ;;  %v1603_v26 = vmul.f32 %v5122_v53, %v731_v59  ;;  %v1648_v30 = vadd.f32 %v1647_v7, %v1601_v1  ;;  %v670_v0 = vld [vmem:[%s4226_s26 + $0x8e0] sm:$0xff]  ;;  %v699_v38 = vld [vmem:[%s4226_s26 + $0x9c8] sm:$0xff]  ;;  %v7815_v59 = vld [vmem:[#allocation68_spill] sm:$0xff] }
 0x11e   : > { %v1425_v3 = vmul.f32 %v7812_v32, %v665_v12  ;;  %v5422_v13 = vmul.f32 %v7813_v50, %v666_v28  ;;  %v1467_v31 = vadd.f32 %v1466_v8, %v1420_v44  ;;  %v1513_v25 = vmul.f32 %v7814_v39, %v697_v6  ;;  %v734_v7 = vld [vmem:[%s4226_s26 + $0xae0] sm:$0xff]  ;;  %v7816_v12 = vld [vmem:[#allocation48_spill] sm:$0xff]  ;;  %v7818_v6 = vld [vmem:[#allocation67_spill] sm:$0xff] }
 0x11f   : > { %v1378_v60 = vadd.f32 %v1377_v48, %v1376_v56  ;;  %v1558_v37 = vadd.f32 %v1557_v42, %v1511_v9  ;;  %v1604_v1 = vmul.f32 %v7815_v59, %v732_v20  ;;  %v1649_v41 = vadd.f32 %v1648_v30, %v1602_v43  ;;  %v7817_v28 = vld [vmem:[#allocation49_spill] sm:$0xff]  ;;  %v671_v39 = vld [vmem:[%s4226_s26 + $0x8e8] sm:$0xff]  ;;  %v672_v56 = vld [vmem:[%s4226_s26 + $0x8f0] sm:$0xff] }
 0x120   : > { %v5431_v53 = vmul.f32 %v7816_v12, %v667_v29  ;;  %v5434_v50 = vmul.f32 %v7817_v28, %v668_v18  ;;  %v1468_v44 = vadd.f32 %v1467_v31, %v1421_v15  ;;  %v1514_v8 = vmul.f32 %v7818_v6, %v698_v46  ;;  %v700_v48 = vld [vmem:[%s4226_s26 + $0x9d0] sm:$0xff]  ;;  %v7819_v43 = vld [vmem:[#allocation73_spill] sm:$0xff]  ;;  %v735_v29 = vld [vmem:[%s4226_s26 + $0xae8] sm:$0xff] }
 0x121   : > { %v1379_v9 = vrot.slane %v1378_v60, 2  ;;  %v1559_v20 = vadd.f32 %v1558_v37, %v1512_v34  ;;  %v1605_v42 = vmul.f32 %v7819_v43, %v733_v36  ;;  %v1650_v30 = vadd.f32 %v1649_v41, %v1603_v26  ;;  %v7820_v59 = vld [vmem:[#allocation76_spill] sm:$0xff]  ;;  %v770_v28 = vld [vmem:[%s4226_s26 + $0xc00] sm:$0xff]  ;;  %v771_v32 = vld [vmem:[%s4226_s26 + $0xc08] sm:$0xff] }
 0x122   : > { %v5443_v12 = vmul.f32 %v7820_v59, %v669_v23  ;;  %v5446_v18 = vmul.f32 %v7805_v61, %v670_v0  ;;  %v1469_v15 = vadd.f32 %v1468_v44, %v1422_v57  ;;  %v7821_v46 = vld [vmem:[#allocation72_spill] sm:$0xff]  ;;  %v7822_v26 = vld [vmem:[#allocation74_spill] sm:$0xff]  ;;  %v5455_v43 = vmul.f32 %v5370_v10, %v671_v39 }
 0x123   : > { %v1515_v31 = vmul.f32 %v7821_v46, %v699_v38  ;;  %v701_v6 = vld [vmem:[%s4226_s26 + $0x9d8] sm:$0xff]  ;;  %v1380_v34 = vadd.f32 %v1379_v9, %v1378_v60  ;;  %v1560_v36 = vadd.f32 %v1559_v20, %v1513_v25  ;;  %v1606_v37 = vmul.f32 %v7822_v26, %v734_v7  ;;  %v736_v23 = vld [vmem:[%s4226_s26 + $0xaf0] sm:$0xff]  ;;  %v7823_v44 = vld [vmem:[#allocation22_spill] sm:$0xff] }
 0x124   : > { %v1651_v41 = vadd.f32 %v1650_v30, %v1604_v1  ;;  %v5458_v0 = vmul.f32 %v7810_v63, %v672_v56  ;;  %v1470_v57 = vadd.f32 %v1469_v15, %v1423_v35  ;;  %v1516_v38 = vmul.f32 %v7823_v44, %v700_v48  ;;  %v673_v46 = vld [vmem:[%s4226_s26 + $0x8f8] sm:$0xff]  ;;  %v702_v61 = vld [vmem:[%s4226_s26 + $0x9e0] sm:$0xff]  ;;  %v772_v60 = vld [vmem:[%s4226_s26 + $0xc10] sm:$0xff] }
 0x125   : > { %v1381_v9 = vrot.slane %v1380_v34, 1  ;;  %v1561_v25 = vadd.f32 %v1560_v36, %v1514_v8  ;;  %v1607_v1 = vmul.f32 %v4954_v2, %v735_v29  ;;  %v737_v39 = vld [vmem:[%s4226_s26 + $0xaf8] sm:$0xff]  ;;  %v1383_v20 = vld [vmem:[#allocation2 + $0x4] sm:$0x1]  ;;  %v1517_v56 = vmul.f32 %v5184_v54, %v701_v6  ;;  %v703_v26 = vld [vmem:[%s4226_s26 + $0x9e8] sm:$0xff] }
 0x126   : > { %v1652_v7 = vadd.f32 %v1651_v41, %v1605_v42  ;;  %v1471_v30 = vadd.f32 %v1470_v57, %v1424_v62  ;;  %v7824_v35 = vld [vmem:[#allocation56_spill] sm:$0xff]  ;;  %v7826_v36 = vld [vmem:[#allocation55_spill] sm:$0xff]  ;;  %v738_v41 = vld [vmem:[%s4226_s26 + $0xb00] sm:$0xff]  ;;  %v5475_v62 = vmul.f32 %v5267_v16, %v673_v46 }
 0x127   : > { %v1698_v15 = vmul.f32 %v7824_v35, %v770_v28  ;;  %v7825_v48 = vld [vmem:[#allocation32_spill] sm:$0xff]  ;;  %v1382_v10 = vadd.f32 %v1381_v9, %v1380_v34  ;;  %v1562_v8 = vadd.f32 %v1561_v25, %v1515_v31  ;;  %v1608_v2 = vmul.f32 %v7826_v36, %v736_v23  ;;  %v774_v34 = vld [vmem:[%s4226_s26 + $0xc20] sm:$0xff]  ;;  %v775_v35 = vld [vmem:[%s4226_s26 + $0xc28] sm:$0xff] }
 0x128   : > { %v1699_v44 = vmul.f32 %v7825_v48, %v771_v32  ;;  %v773_v63 = vld [vmem:[%s4226_s26 + $0xc18] sm:$0xff]  ;;  %v1653_v42 = vadd.f32 %v1652_v7, %v1606_v37  ;;  %v704_v29 = vld [vmem:[%s4226_s26 + $0x9f0] sm:$0xff]  ;;  %v1472_v6 = vadd.f32 %v1471_v30, %v1425_v3  ;;  %v1518_v28 = vmul.f32 %v5194_v4, %v702_v61  ;;  %v706_v25 = vld [vmem:[%s4226_s26 + $0xa00] sm:$0xff] }
 0x129   : > { %v1700_v32 = vmul.f32 %v5015_v17, %v772_v60  ;;  %v705_v57 = vld [vmem:[%s4226_s26 + $0x9f8] sm:$0xff]  ;;  %v1384_v9 = vadd.f32 %v1383_v20, %v1382_v10  ;;  %v1563_v31 = vadd.f32 %v1562_v8, %v1516_v38  ;;  %v1609_v23 = vmul.f32 %v7806_v58, %v737_v39  ;;  %v739_v7 = vld [vmem:[%s4226_s26 + $0xb08] sm:$0xff]  ;;  %v708_v20 = vld [vmem:[%s4226_s26 + $0xa10] sm:$0xff] }
 0x12a   : > { %v1654_v37 = vadd.f32 %v1653_v42, %v1607_v1  ;;  %v1473_v46 = vadd.f32 %v1472_v6, %v5422_v13  ;;  %v1519_v3 = vmul.f32 %v7807_v55, %v703_v26  ;;  %v7827_v30 = vld [vmem:[#allocation60_spill] sm:$0xff]  ;;  %v1746_v17 = vadd.f32 %v1699_v44, %v1698_v15  ;;  %v707_v60 = vld [vmem:[%s4226_s26 + $0xa08] sm:$0xff] }
 0x12b   : > { %v1701_v61 = vmul.f32 %v7827_v30, %v773_v63  ;;  %1385 = vst [vmem:[#allocation2 + $0x4] sm:$0x1] %v1384_v9  ;;  %v1520_v10 = vmul.f32 %v7809_v11, %v704_v29  ;;  %v1564_v58 = vadd.f32 %v1563_v31, %v1517_v56  ;;  %v7828_v38 = vld [vmem:[#allocation27_spill] sm:$0xff]  ;;  %v1521_v63 = vmul.f32 %v5226_v51, %v705_v57  ;;  %v709_v48 = vld [vmem:[%s4226_s26 + $0xa18] sm:$0xff]  ;;  %v710_v29 = vld [vmem:[%s4226_s26 + $0xa20] sm:$0xff] }
 0x12c   : > { %v1610_v1 = vmul.f32 %v7828_v38, %v738_v41  ;;  %v1655_v39 = vadd.f32 %v1654_v37, %v1608_v2  ;;  %v740_v13 = vld [vmem:[%s4226_s26 + $0xb10] sm:$0xff]  ;;  %v1474_v26 = vadd.f32 %v1473_v46, %v5431_v53  ;;  %v1702_v44 = vmul.f32 %v5045_v45, %v774_v34  ;;  %v741_v41 = vld [vmem:[%s4226_s26 + $0xb18] sm:$0xff]  ;;  %v711_v57 = vld [vmem:[%s4226_s26 + $0xa28] sm:$0xff] }
 0x12d   : > { %v1747_v15 = vadd.f32 %v1746_v17, %v1700_v32  ;;  %v776_v8 = vld [vmem:[%s4226_s26 + $0xc30] sm:$0xff]  ;;  %v1522_v36 = vmul.f32 %v7811_v14, %v706_v25  ;;  %v1565_v56 = vadd.f32 %v1564_v58, %v1518_v28  ;;  %v1611_v2 = vmul.f32 %v5023_v22, %v739_v7  ;;  %v777_v34 = vld [vmem:[%s4226_s26 + $0xc38] sm:$0xff]  ;;  %v742_v25 = vld [vmem:[%s4226_s26 + $0xb20] sm:$0xff] }
 0x12e   : > { %v1656_v42 = vadd.f32 %v1655_v39, %v1609_v23  ;;  %v1475_v53 = vadd.f32 %v1474_v26, %v5434_v50  ;;  %v1523_v6 = vmul.f32 %v5246_v49, %v707_v60  ;;  %v1703_v45 = vmul.f32 %v5058_v5, %v775_v35  ;;  %v7829_v31 = vld [vmem:[#allocation33_spill] sm:$0xff]  ;;  %v712_v37 = vld [vmem:[%s4226_s26 + $0xa30] sm:$0xff]  ;;  %v743_v58 = vld [vmem:[%s4226_s26 + $0xb28] sm:$0xff] }
 0x12f   : > { %v1748_v32 = vadd.f32 %v1747_v15, %v1701_v61  ;;  %v1524_v9 = vmul.f32 %v5257_v27, %v708_v20  ;;  %v1566_v28 = vadd.f32 %v1565_v56, %v1519_v3  ;;  %v1612_v22 = vmul.f32 %v7829_v31, %v740_v13  ;;  %v713_v30 = vld [vmem:[%s4226_s26 + $0xa38] sm:$0xff]  ;;  %v778_v61 = vld [vmem:[%s4226_s26 + $0xc40] sm:$0xff]  ;;  %v715_v20 = vld [vmem:[%s4226_s26 + $0xa48] sm:$0xff] }
 0x130   : > { %v1657_v23 = vadd.f32 %v1656_v42, %v1610_v1  ;;  %v1476_v50 = vadd.f32 %v1475_v53, %v5443_v12  ;;  %v5513_v7 = vmul.f32 %v5271_v19, %v709_v48  ;;  %v1704_v5 = vmul.f32 %v5076_v47, %v776_v8  ;;  %v714_v12 = vld [vmem:[%s4226_s26 + $0xa40] sm:$0xff]  ;;  %v779_v13 = vld [vmem:[%s4226_s26 + $0xc48] sm:$0xff]  ;;  %v744_v48 = vld [vmem:[%s4226_s26 + $0xb30] sm:$0xff] }
 0x131   : > { %v1749_v46 = vadd.f32 %v1748_v32, %v1702_v44  ;;  %v5519_v3 = vmul.f32 %v5281_v33, %v710_v29  ;;  %v1567_v17 = vadd.f32 %v1566_v28, %v1520_v10  ;;  %v1613_v60 = vmul.f32 %v5053_v24, %v741_v41  ;;  %v7830_v26 = vld [vmem:[#allocation61_spill] sm:$0xff]  ;;  %v7831_v56 = vld [vmem:[#allocation47_spill] sm:$0xff] }
 0x132   : > { %v1658_v35 = vadd.f32 %v1657_v23, %v1611_v2  ;;  %v1477_v38 = vadd.f32 %v1476_v50, %v5446_v18  ;;  %v5526_v1 = vmul.f32 %v5291_v52, %v711_v57  ;;  %v1705_v47 = vmul.f32 %v5090_v21, %v777_v34  ;;  %v716_v18 = vld [vmem:[%s4226_s26 + $0xa50] sm:$0xff]  ;;  %v717_v41 = vld [vmem:[%s4226_s26 + $0xa58] sm:$0xff]  ;;  %v7834_v57 = vld [vmem:[#allocation34_spill] sm:$0xff] }
 0x133   : > { %v1750_v39 = vadd.f32 %v1749_v46, %v1703_v45  ;;  %v5532_v10 = vmul.f32 %v5300_v40, %v712_v37  ;;  %v1568_v24 = vadd.f32 %v1567_v17, %v1521_v63  ;;  %v1614_v44 = vmul.f32 %v7830_v26, %v742_v25  ;;  %v7832_v21 = vld [vmem:[#allocation35_spill] sm:$0xff]  ;;  %v7833_v45 = vld [vmem:[#allocation26_spill] sm:$0xff]  ;;  %v745_v31 = vld [vmem:[%s4226_s26 + $0xb38] sm:$0xff] }
 0x134   : > { %v1659_v15 = vadd.f32 %v1658_v35, %v1612_v22  ;;  %v1478_v8 = vadd.f32 %v1477_v38, %v5455_v43  ;;  %v5539_v2 = vmul.f32 %v7831_v56, %v713_v30  ;;  %v1706_v42 = vmul.f32 %v7832_v21, %v778_v61  ;;  %v780_v53 = vld [vmem:[%s4226_s26 + $0xc50] sm:$0xff]  ;;  %v718_v43 = vld [vmem:[%s4226_s26 + $0xa60] sm:$0xff]  ;;  %v719_v46 = vld [vmem:[%s4226_s26 + $0xa68] sm:$0xff] }
 0x135   : > { %v1751_v29 = vadd.f32 %v1750_v39, %v1704_v5  ;;  %v5545_v63 = vmul.f32 %v7833_v45, %v714_v12  ;;  %v1569_v32 = vadd.f32 %v1568_v24, %v1522_v36  ;;  %v1615_v34 = vmul.f32 %v7834_v57, %v743_v58  ;;  %v7835_v23 = vld [vmem:[#allocation48_spill] sm:$0xff]  ;;  %v7837_v61 = vld [vmem:[#allocation49_spill] sm:$0xff]  ;;  %v783_v21 = vld [vmem:[%s4226_s26 + $0xc68] sm:$0xff] }
 0x136   : > { %v1660_v28 = vadd.f32 %v1659_v15, %v1613_v60  ;;  %v1479_v22 = vadd.f32 %v1478_v8, %v5458_v0  ;;  %v5552_v37 = vmul.f32 %v7835_v23, %v715_v20  ;;  %v7836_v25 = vld [vmem:[#allocation36_spill] sm:$0xff]  ;;  %v5558_v36 = vmul.f32 %v7837_v61, %v716_v18  ;;  %v7838_v60 = vld [vmem:[#allocation62_spill] sm:$0xff]  ;;  %v7840_v15 = vld [vmem:[#allocation23_spill] sm:$0xff] }
 0x137   : > { %v1707_v50 = vmul.f32 %v7836_v25, %v779_v13  ;;  %v1752_v5 = vadd.f32 %v1751_v29, %v1705_v47  ;;  %v781_v30 = vld [vmem:[%s4226_s26 + $0xc58] sm:$0xff]  ;;  %v1570_v17 = vadd.f32 %v1569_v32, %v1523_v6  ;;  %v1616_v35 = vmul.f32 %v7838_v60, %v744_v48  ;;  %v720_v0 = vld [vmem:[%s4226_s26 + $0xa70] sm:$0xff]  ;;  %v746_v58 = vld [vmem:[%s4226_s26 + $0xb40] sm:$0xff] }
 0x138   : > { %v1661_v12 = vadd.f32 %v1660_v28, %v1614_v44  ;;  %v1480_v38 = vadd.f32 %v1479_v22, %v5475_v62  ;;  %v5565_v39 = vmul.f32 %v7820_v59, %v717_v41  ;;  %v7839_v47 = vld [vmem:[#allocation68_spill] sm:$0xff]  ;;  %v782_v26 = vld [vmem:[%s4226_s26 + $0xc60] sm:$0xff]  ;;  %v5571_v6 = vmul.f32 %v7840_v15, %v718_v43  ;;  %v747_v62 = vld [vmem:[%s4226_s26 + $0xb48] sm:$0xff] }
 0x139   : > { %v1708_v20 = vmul.f32 %v7839_v47, %v780_v53  ;;  %v1753_v13 = vadd.f32 %v1752_v5, %v1706_v42  ;;  %v721_v24 = vld [vmem:[%s4226_s26 + $0xa78] sm:$0xff]  ;;  %v1571_v18 = vadd.f32 %v1570_v17, %v1524_v9  ;;  %v7841_v44 = vld [vmem:[#allocation66_spill] sm:$0xff]  ;;  %v7842_v41 = vld [vmem:[#allocation51_spill] sm:$0xff] }
 0x13a   : > { %v1617_v48 = vmul.f32 %v7841_v44, %v745_v31  ;;  %v1662_v8 = vadd.f32 %v1661_v12, %v1615_v34  ;;  %v1481_v29 = vrot.slane %v1480_v38, 4  ;;  %v5577_v32 = vmul.f32 %v7842_v41, %v719_v46  ;;  %v7843_v53 = vld [vmem:[#allocation73_spill] sm:$0xff]  ;;  %v819_v43 = vld [vmem:[%s4226_s26 + $0xd88] sm:$0xff]  ;;  %v7844_v22 = vld [vmem:[#allocation24_spill] sm:$0xff] }
 0x13b   : > { %v1709_v42 = vmul.f32 %v7843_v53, %v781_v30  ;;  %v1754_v57 = vadd.f32 %v1753_v13, %v1707_v50  ;;  %v818_v28 = vld [vmem:[%s4226_s26 + $0xd80] sm:$0xff]  ;;  %v5583_v9 = vmul.f32 %v7844_v22, %v720_v0  ;;  %v1572_v31 = vadd.f32 %v1571_v18, %v5513_v7  ;;  %v7845_v34 = vld [vmem:[#allocation67_spill] sm:$0xff]  ;;  %v749_v46 = vld [vmem:[%s4226_s26 + $0xb58] sm:$0xff] }
 0x13c   : > { %v1618_v25 = vmul.f32 %v7845_v34, %v746_v58  ;;  %v1663_v5 = vadd.f32 %v1662_v8, %v1616_v35  ;;  %v748_v17 = vld [vmem:[%s4226_s26 + $0xb50] sm:$0xff]  ;;  %v1482_v60 = vadd.f32 %v1481_v29, %v1480_v38  ;;  %v5590_v30 = vmul.f32 %v5267_v16, %v721_v24  ;;  %v7846_v50 = vld [vmem:[#allocation74_spill] sm:$0xff]  ;;  %v785_v24 = vld [vmem:[%s4226_s26 + $0xc78] sm:$0xff] }
 0x13d   : > { %v1710_v12 = vmul.f32 %v7846_v50, %v782_v26  ;;  %v1755_v47 = vadd.f32 %v1754_v57, %v1708_v20  ;;  %v784_v0 = vld [vmem:[%s4226_s26 + $0xc70] sm:$0xff]  ;;  %v1573_v7 = vadd.f32 %v1572_v31, %v5519_v3  ;;  %v5598_v35 = vld [vmem:[%s4220_s21 + $0x68] sm:$0xff]  ;;  %v750_v16 = vld [vmem:[%s4226_s26 + $0xb60] sm:$0xff]  ;;  %v1621_v22 = vmul.f32 %v5184_v54, %v749_v46 }
 0x13e   : > { %v820_v13 = vld [vmem:[%s4226_s26 + $0xd90] sm:$0xff]  ;;  %v1664_v18 = vadd.f32 %v1663_v5, %v1617_v48  ;;  %v1711_v38 = vmul.f32 %v5598_v35, %v783_v21  ;;  %v1483_v44 = vrot.slane %v1482_v60, 2  ;;  %v3324_v20 = vld [vmem:[%s4220_s21] sm:$0xff]  ;;  %v3325_v29 = vld [vmem:[%s4220_s21 + $0x8] sm:$0xff]  ;;  %v1622_v54 = vmul.f32 %v5194_v4, %v750_v16 }
 0x13f   : > { %v7847_v15 = vld [vmem:[#allocation72_spill] sm:$0xff]  ;;  %v1756_v26 = vadd.f32 %v1755_v47, %v1709_v42  ;;  %v1802_v8 = vmul.f32 %v3324_v20, %v818_v28  ;;  %v1803_v3 = vmul.f32 %v3325_v29, %v819_v43  ;;  %v1574_v48 = vadd.f32 %v1573_v7, %v5526_v1  ;;  %v751_v31 = vld [vmem:[%s4226_s26 + $0xb68] sm:$0xff]  ;;  %v786_v34 = vld [vmem:[%s4226_s26 + $0xc80] sm:$0xff] }
 0x140   : > { %v1619_v58 = vmul.f32 %v7847_v15, %v747_v62  ;;  %v821_v53 = vld [vmem:[%s4226_s26 + $0xd98] sm:$0xff]  ;;  %v7848_v62 = vld [vmem:[#allocation22_spill] sm:$0xff]  ;;  %v1665_v21 = vadd.f32 %v1664_v18, %v1618_v25  ;;  %v1484_v42 = vadd.f32 %v1483_v44, %v1482_v60  ;;  %v5612_v5 = vld [vmem:[%s4220_s21 + $0x70] sm:$0xff]  ;;  %v1623_v16 = vmul.f32 %v7807_v55, %v751_v31 }
 0x141   : > { %v1620_v57 = vmul.f32 %v7848_v62, %v748_v17  ;;  %v1712_v28 = vmul.f32 %v5612_v5, %v784_v0  ;;  %v1757_v43 = vadd.f32 %v1756_v26, %v1710_v12  ;;  %v3327_v50 = vld [vmem:[%s4220_s21 + $0x10] sm:$0xff]  ;;  %v822_v47 = vld [vmem:[%s4226_s26 + $0xda0] sm:$0xff]  ;;  %v1575_v17 = vadd.f32 %v1574_v48, %v5532_v10  ;;  %v5620_v46 = vld [vmem:[%s4220_s21 + $0x78] sm:$0xff] }
 0x142   : > { %v1804_v1 = vmul.f32 %v3327_v50, %v820_v13  ;;  %v1666_v25 = vadd.f32 %v1665_v21, %v1619_v58  ;;  %v1713_v60 = vmul.f32 %v5620_v46, %v785_v24  ;;  %v752_v7 = vld [vmem:[%s4226_s26 + $0xb70] sm:$0xff]  ;;  %v787_v15 = vld [vmem:[%s4226_s26 + $0xc88] sm:$0xff]  ;;  %v1485_v0 = vrot.slane %v1484_v42, 1  ;;  %v3329_v18 = vld [vmem:[%s4220_s21 + $0x18] sm:$0xff] }
 0x143   : > { %v1758_v12 = vadd.f32 %v1757_v43, %v1711_v38  ;;  %v1805_v13 = vmul.f32 %v3329_v18, %v821_v53  ;;  %v1850_v44 = vadd.f32 %v1803_v3, %v1802_v8  ;;  %v823_v10 = vld [vmem:[%s4226_s26 + $0xda8] sm:$0xff]  ;;  %v1487_v4 = vld [vmem:[#allocation2 + $0x5] sm:$0x1]  ;;  %v1576_v58 = vadd.f32 %v1575_v17, %v5539_v2  ;;  %v753_v38 = vld [vmem:[%s4226_s26 + $0xb78] sm:$0xff] }
 0x144   : > { %v1667_v26 = vadd.f32 %v1666_v25, %v1620_v57  ;;  %v5630_v24 = vld [vmem:[%s4220_s21 + $0x80] sm:$0xff]  ;;  %v1486_v53 = vadd.f32 %v1485_v0, %v1484_v42  ;;  %v788_v2 = vld [vmem:[%s4226_s26 + $0xc90] sm:$0xff]  ;;  %v1624_v21 = vmul.f32 %v7809_v11, %v752_v7  ;;  %v755_v43 = vld [vmem:[%s4226_s26 + $0xb88] sm:$0xff]  ;;  %v1625_v7 = vmul.f32 %v5226_v51, %v753_v38 }
 0x145   : > { %v1714_v20 = vmul.f32 %v5630_v24, %v786_v34  ;;  %v754_v29 = vld [vmem:[%s4226_s26 + $0xb80] sm:$0xff]  ;;  %v1759_v8 = vadd.f32 %v1758_v12, %v1712_v28  ;;  %v1851_v62 = vadd.f32 %v1850_v44, %v1804_v1  ;;  %v824_v55 = vld [vmem:[%s4226_s26 + $0xdb0] sm:$0xff]  ;;  %v1577_v57 = vadd.f32 %v1576_v58, %v5545_v63  ;;  %v5641_v34 = vld [vmem:[%s4220_s21 + $0x88] sm:$0xff] }
 0x146   : > { %v3331_v3 = vld [vmem:[%s4220_s21 + $0x20] sm:$0xff]  ;;  %v1668_v31 = vadd.f32 %v1667_v26, %v1621_v22  ;;  %v1715_v42 = vmul.f32 %v5641_v34, %v787_v15  ;;  %v756_v28 = vld [vmem:[%s4226_s26 + $0xb90] sm:$0xff]  ;;  %v1488_v50 = vadd.f32 %v1487_v4, %v1486_v53  ;;  %v3333_v1 = vld [vmem:[%s4220_s21 + $0x28] sm:$0xff]  ;;  %v1626_v0 = vmul.f32 %v7811_v14, %v754_v29 }
 0x147   : > { %v1806_v48 = vmul.f32 %v3331_v3, %v822_v47  ;;  %v1760_v47 = vadd.f32 %v1759_v8, %v1713_v60  ;;  %v1807_v17 = vmul.f32 %v3333_v1, %v823_v10  ;;  %v1852_v25 = vadd.f32 %v1851_v62, %v1805_v13  ;;  %v789_v63 = vld [vmem:[%s4226_s26 + $0xc98] sm:$0xff]  ;;  %v758_v18 = vld [vmem:[%s4226_s26 + $0xba0] sm:$0xff]  ;;  %v5655_v60 = vld [vmem:[%s4220_s21 + $0x90] sm:$0xff] }
 0x148   : > { %v825_v11 = vld [vmem:[%s4226_s26 + $0xdb8] sm:$0xff]  ;;  %v1578_v22 = vadd.f32 %v1577_v57, %v5552_v37  ;;  %v1669_v15 = vadd.f32 %v1668_v31, %v1622_v54  ;;  %1489 = vst [vmem:[#allocation2 + $0x5] sm:$0x1] %v1488_v50  ;;  %v1716_v13 = vmul.f32 %v5655_v60, %v788_v2  ;;  %v3335_v10 = vld [vmem:[%s4220_s21 + $0x30] sm:$0xff]  ;;  %v790_v51 = vld [vmem:[%s4226_s26 + $0xca0] sm:$0xff]  ;;  %v1627_v58 = vmul.f32 %v5246_v49, %v755_v43 }
 0x149   : > { %v757_v12 = vld [vmem:[%s4226_s26 + $0xb98] sm:$0xff]  ;;  %v1761_v44 = vadd.f32 %v1760_v47, %v1714_v20  ;;  %v1808_v4 = vmul.f32 %v3335_v10, %v824_v55  ;;  %v1853_v37 = vadd.f32 %v1852_v25, %v1806_v48  ;;  %v826_v14 = vld [vmem:[%s4226_s26 + $0xdc0] sm:$0xff]  ;;  %v5664_v26 = vmul.f32 %v5257_v27, %v756_v28  ;;  %v759_v29 = vld [vmem:[%s4226_s26 + $0xba8] sm:$0xff] }
 0x14a   : > { %v1579_v54 = vadd.f32 %v1578_v22, %v5558_v36  ;;  %v1670_v38 = vadd.f32 %v1669_v15, %v1623_v16  ;;  %v760_v20 = vld [vmem:[%s4226_s26 + $0xbb0] sm:$0xff]  ;;  %v5669_v53 = vld [vmem:[%s4220_s21 + $0x98] sm:$0xff]  ;;  %v791_v49 = vld [vmem:[%s4226_s26 + $0xca8] sm:$0xff]  ;;  %v5677_v16 = vmul.f32 %v5271_v19, %v757_v12  ;;  %v5680_v55 = vmul.f32 %v5281_v33, %v758_v18 }
 0x14b   : > { %v1717_v8 = vmul.f32 %v5669_v53, %v789_v63  ;;  %v1762_v3 = vadd.f32 %v1761_v44, %v1715_v42  ;;  %v3337_v48 = vld [vmem:[%s4220_s21 + $0x38] sm:$0xff]  ;;  %v1854_v36 = vadd.f32 %v1853_v37, %v1807_v17  ;;  %v827_v27 = vld [vmem:[%s4226_s26 + $0xdc8] sm:$0xff]  ;;  %v762_v42 = vld [vmem:[%s4226_s26 + $0xbc0] sm:$0xff]  ;;  %v5696_v25 = vmul.f32 %v5300_v40, %v760_v20 }
 0x14c   : > { %v1809_v62 = vmul.f32 %v3337_v48, %v825_v11  ;;  %v1580_v2 = vadd.f32 %v1579_v54, %v5565_v39  ;;  %v1671_v57 = vadd.f32 %v1670_v38, %v1624_v21  ;;  %v761_v31 = vld [vmem:[%s4226_s26 + $0xbb8] sm:$0xff]  ;;  %v5685_v43 = vld [vmem:[%s4220_s21 + $0xa0] sm:$0xff]  ;;  %v792_v1 = vld [vmem:[%s4226_s26 + $0xcb0] sm:$0xff]  ;;  %v5693_v21 = vmul.f32 %v5291_v52, %v759_v29 }
 0x14d   : > { %v1718_v28 = vmul.f32 %v5685_v43, %v790_v51  ;;  %v1763_v50 = vadd.f32 %v1762_v3, %v1716_v13  ;;  %v3339_v47 = vld [vmem:[%s4220_s21 + $0x40] sm:$0xff]  ;;  %v1855_v19 = vadd.f32 %v1854_v36, %v1808_v4  ;;  %v828_v33 = vld [vmem:[%s4226_s26 + $0xdd0] sm:$0xff]  ;;  %v763_v11 = vld [vmem:[%s4226_s26 + $0xbc8] sm:$0xff]  ;;  %v5712_v4 = vmul.f32 %v7833_v45, %v762_v42 }
 0x14e   : > { %v1810_v39 = vmul.f32 %v3339_v47, %v826_v14  ;;  %v1581_v17 = vadd.f32 %v1580_v2, %v5571_v6  ;;  %v1672_v63 = vadd.f32 %v1671_v57, %v1625_v7  ;;  %v764_v22 = vld [vmem:[%s4226_s26 + $0xbd0] sm:$0xff]  ;;  %v5701_v15 = vld [vmem:[%s4220_s21 + $0xa8] sm:$0xff]  ;;  %v793_v44 = vld [vmem:[%s4226_s26 + $0xcb8] sm:$0xff]  ;;  %v5709_v7 = vmul.f32 %v7831_v56, %v761_v31 }
 0x14f   : > { %v1719_v12 = vmul.f32 %v5701_v15, %v791_v49  ;;  %v1764_v18 = vadd.f32 %v1763_v50, %v1717_v8  ;;  %v3341_v13 = vld [vmem:[%s4220_s21 + $0x48] sm:$0xff]  ;;  %v1856_v52 = vadd.f32 %v1855_v19, %v1809_v62  ;;  %v829_v40 = vld [vmem:[%s4226_s26 + $0xdd8] sm:$0xff]  ;;  %v766_v14 = vld [vmem:[%s4226_s26 + $0xbe0] sm:$0xff]  ;;  %v5728_v48 = vmul.f32 %v7837_v61, %v764_v22 }
 0x150   : > { %v1811_v6 = vmul.f32 %v3341_v13, %v827_v27  ;;  %v1582_v10 = vadd.f32 %v1581_v17, %v5577_v32  ;;  %v1673_v37 = vadd.f32 %v1672_v63, %v1626_v0  ;;  %v765_v51 = vld [vmem:[%s4226_s26 + $0xbd8] sm:$0xff]  ;;  %v5717_v54 = vld [vmem:[%s4220_s21 + $0xb0] sm:$0xff]  ;;  %v794_v8 = vld [vmem:[%s4226_s26 + $0xcc0] sm:$0xff]  ;;  %v5725_v0 = vmul.f32 %v7835_v23, %v763_v11 }
 0x151   : > { %v1720_v38 = vmul.f32 %v5717_v54, %v792_v1  ;;  %v1765_v29 = vadd.f32 %v1764_v18, %v1718_v28  ;;  %v3343_v20 = vld [vmem:[%s4220_s21 + $0x50] sm:$0xff]  ;;  %v1857_v56 = vadd.f32 %v1856_v52, %v1810_v39  ;;  %v830_v45 = vld [vmem:[%s4226_s26 + $0xde0] sm:$0xff]  ;;  %v767_v36 = vld [vmem:[%s4226_s26 + $0xbe8] sm:$0xff]  ;;  %v5741_v28 = vmul.f32 %v7820_v59, %v765_v51 }
 0x152   : > { %v1812_v32 = vmul.f32 %v3343_v20, %v828_v33  ;;  %v1583_v3 = vadd.f32 %v1582_v10, %v5583_v9  ;;  %v1674_v62 = vadd.f32 %v1673_v37, %v1627_v58  ;;  %v768_v49 = vld [vmem:[%s4226_s26 + $0xbf0] sm:$0xff]  ;;  %v5733_v27 = vld [vmem:[%s4220_s21 + $0xb8] sm:$0xff]  ;;  %v795_v23 = vld [vmem:[%s4226_s26 + $0xcc8] sm:$0xff]  ;;  %v5764_v18 = vmul.f32 %v7842_v41, %v767_v36 }
 0x153   : > { %v1721_v2 = vmul.f32 %v5733_v27, %v793_v44  ;;  %v1766_v57 = vadd.f32 %v1765_v29, %v1719_v12  ;;  %v3345_v9 = vld [vmem:[%s4220_s21 + $0x58] sm:$0xff]  ;;  %v1858_v42 = vadd.f32 %v1857_v56, %v1811_v6  ;;  %v831_v61 = vld [vmem:[%s4226_s26 + $0xde8] sm:$0xff]  ;;  %v5744_v50 = vld [vmem:[%s4220_s21 + $0x160] sm:$0xff] }
 0x154   : > { %v1813_v31 = vmul.f32 %v3345_v9, %v829_v40  ;;  %v1584_v58 = vadd.f32 %v1583_v3, %v5590_v30  ;;  %7849 = vst [vmem:[#allocation52_spill] sm:$0xff] %v5744_v50  ;;  %v5747_v47 = vmul.f32 %v5744_v50, %v766_v14  ;;  %v1675_v39 = vadd.f32 %v1674_v62, %v5664_v26  ;;  %v5751_v19 = vld [vmem:[%s4220_s21 + $0x180] sm:$0xff]  ;;  %v5754_v1 = vld [vmem:[%s4220_s21 + $0x188] sm:$0xff]  ;;  %v796_v22 = vld [vmem:[%s4226_s26 + $0xcd0] sm:$0xff] }
 0x155   : > { %v5757_v33 = vld [vmem:[%s4220_s21 + $0xc0] sm:$0xff]  ;;  %v1767_v30 = vadd.f32 %v1766_v57, %v1720_v38  ;;  %v1859_v11 = vadd.f32 %v1858_v42, %v1812_v32  ;;  %v832_v12 = vld [vmem:[%s4226_s26 + $0xdf0] sm:$0xff]  ;;  %v769_v40 = vld [vmem:[%s4226_s26 + $0xbf8] sm:$0xff]  ;;  %v1815_v41 = vmul.f32 %v5598_v35, %v831_v61 }
 0x156   : > { %v1722_v59 = vmul.f32 %v5757_v33, %v794_v8  ;;  %v3348_v17 = vld [vmem:[%s4220_s21 + $0x60] sm:$0xff]  ;;  %v1585_v26 = vrot.slane %v1584_v58, 4  ;;  %v5767_v13 = vld [vmem:[%s4220_s21 + $0x170] sm:$0xff]  ;;  %v1676_v52 = vadd.f32 %v1675_v39, %v5677_v16  ;;  %v5778_v10 = vld [vmem:[%s4220_s21 + $0xc8] sm:$0xff] }
 0x157   : > { %v1814_v63 = vmul.f32 %v3348_v17, %v830_v45  ;;  %v5770_v6 = vmul.f32 %v5767_v13, %v768_v49  ;;  %v5774_v44 = vld [vmem:[%s4220_s21 + $0x190] sm:$0xff]  ;;  %v1723_v37 = vmul.f32 %v5778_v10, %v795_v23  ;;  %v1768_v51 = vadd.f32 %v1767_v30, %v1721_v2  ;;  %v797_v38 = vld [vmem:[%s4226_s26 + $0xcd8] sm:$0xff]  ;;  %v3351_v32 = vld [vmem:[%s4226_s26] sm:$0xff] }
 0x158   : > { %7850 = vst [vmem:[#allocation53_spill] sm:$0xff] %v5774_v44  ;;  %v1860_v14 = vadd.f32 %v1859_v11, %v1813_v31  ;;  %v833_v29 = vld [vmem:[%s4226_s26 + $0xdf8] sm:$0xff]  ;;  %v1586_v20 = vadd.f32 %v1585_v26, %v1584_v58  ;;  %v1677_v16 = vadd.f32 %v1676_v52, %v5680_v55  ;;  %v1906_v56 = vmul.f32 %v3351_v32, %v5751_v19  ;;  %v3352_v8 = vld [vmem:[%s4226_s26 + $0x8] sm:$0xff]  ;;  %v5793_v35 = vld [vmem:[%s4220_s21 + $0xd0] sm:$0xff] }
 0x159   : > { %v1907_v45 = vmul.f32 %v3352_v8, %v5754_v1  ;;  %v5790_v3 = vld [vmem:[%s4220_s21 + $0x198] sm:$0xff]  ;;  %v1724_v62 = vmul.f32 %v5793_v35, %v796_v22  ;;  %v1769_v36 = vadd.f32 %v1768_v51, %v1722_v59  ;;  %v1816_v49 = vmul.f32 %v5612_v5, %v832_v12  ;;  %v798_v2 = vld [vmem:[%s4226_s26 + $0xce0] sm:$0xff]  ;;  %v3355_v61 = vld [vmem:[%s4226_s26 + $0x10] sm:$0xff] }
 0x15a   : > { %v1861_v55 = vadd.f32 %v1860_v14, %v1814_v63  ;;  %v834_v57 = vld [vmem:[%s4226_s26 + $0xe00] sm:$0xff]  ;;  %v1587_v9 = vrot.slane %v1586_v20, 2  ;;  %v5800_v31 = vld [vmem:[%s4220_s21 + $0x178] sm:$0xff]  ;;  %v1678_v23 = vadd.f32 %v1677_v16, %v5693_v21  ;;  %v1908_v58 = vmul.f32 %v3355_v61, %v5774_v44  ;;  %v799_v11 = vld [vmem:[%s4226_s26 + $0xce8] sm:$0xff] }
 0x15b   : > { %v5803_v42 = vmul.f32 %v5800_v31, %v769_v40  ;;  %v5809_v5 = vld [vmem:[%s4220_s21 + $0x1a0] sm:$0xff]  ;;  %v5812_v39 = vld [vmem:[%s4220_s21 + $0xd8] sm:$0xff]  ;;  %v1770_v30 = vadd.f32 %v1769_v36, %v1723_v37  ;;  %v1817_v17 = vmul.f32 %v5620_v46, %v833_v29  ;;  %v835_v22 = vld [vmem:[%s4226_s26 + $0xe08] sm:$0xff]  ;;  %v1954_v40 = vadd.f32 %v1907_v45, %v1906_v56 }
 0x15c   : > { %v1725_v59 = vmul.f32 %v5812_v39, %v797_v38  ;;  %v1862_v63 = vadd.f32 %v1861_v55, %v1815_v41  ;;  %v1588_v21 = vadd.f32 %v1587_v9, %v1586_v20  ;;  %v1679_v12 = vadd.f32 %v1678_v23, %v5696_v25  ;;  %v3357_v26 = vld [vmem:[%s4226_s26 + $0x18] sm:$0xff]  ;;  %v5822_v51 = vld [vmem:[%s4220_s21 + $0x1a8] sm:$0xff]  ;;  %v5825_v37 = vld [vmem:[%s4220_s21 + $0xe0] sm:$0xff] }
 0x15d   : > { %v1909_v52 = vmul.f32 %v3357_v26, %v5790_v3  ;;  %v1726_v46 = vmul.f32 %v5825_v37, %v798_v2  ;;  %v1771_v14 = vadd.f32 %v1770_v30, %v1724_v62  ;;  %v1818_v41 = vmul.f32 %v5630_v24, %v834_v57  ;;  %v800_v29 = vld [vmem:[%s4226_s26 + $0xcf0] sm:$0xff]  ;;  %v3359_v32 = vld [vmem:[%s4226_s26 + $0x20] sm:$0xff]  ;;  %v5838_v24 = vld [vmem:[%s4220_s21 + $0xe8] sm:$0xff] }
 0x15e   : > { %v1863_v38 = vadd.f32 %v1862_v63, %v1816_v49  ;;  %v836_v25 = vld [vmem:[%s4226_s26 + $0xe10] sm:$0xff]  ;;  %v1589_v20 = vrot.slane %v1588_v21, 1  ;;  %v1680_v16 = vadd.f32 %v1679_v12, %v5709_v7  ;;  %v1910_v56 = vmul.f32 %v3359_v32, %v5809_v5  ;;  %v1591_v62 = vld [vmem:[#allocation2 + $0x6] sm:$0x1]  ;;  %v801_v7 = vld [vmem:[%s4226_s26 + $0xcf8] sm:$0xff] }
 0x15f   : > { %v1955_v8 = vadd.f32 %v1954_v40, %v1908_v58  ;;  %v5835_v45 = vld [vmem:[%s4220_s21 + $0x1b0] sm:$0xff]  ;;  %v1727_v36 = vmul.f32 %v5838_v24, %v799_v11  ;;  %v1772_v49 = vadd.f32 %v1771_v14, %v1725_v59  ;;  %v1819_v55 = vmul.f32 %v5641_v34, %v835_v22  ;;  %v837_v57 = vld [vmem:[%s4226_s26 + $0xe18] sm:$0xff]  ;;  %v3361_v61 = vld [vmem:[%s4226_s26 + $0x28] sm:$0xff] }
 0x160   : > { %v1864_v2 = vadd.f32 %v1863_v38, %v1817_v17  ;;  %v1590_v9 = vadd.f32 %v1589_v20, %v1588_v21  ;;  %v1681_v23 = vadd.f32 %v1680_v16, %v5712_v4  ;;  %v1911_v58 = vmul.f32 %v3361_v61, %v5822_v51  ;;  %v5848_v63 = vld [vmem:[%s4220_s21 + $0x1b8] sm:$0xff]  ;;  %v802_v59 = vld [vmem:[%s4226_s26 + $0xd00] sm:$0xff]  ;;  %v5852_v34 = vld [vmem:[%s4220_s21 + $0xf0] sm:$0xff] }
 0x161   : > { %v1956_v30 = vadd.f32 %v1955_v8, %v1909_v52  ;;  %v1728_v17 = vmul.f32 %v5852_v34, %v800_v29  ;;  %v1773_v11 = vadd.f32 %v1772_v49, %v1726_v46  ;;  %v1820_v22 = vmul.f32 %v5655_v60, %v836_v25  ;;  %v803_v4 = vld [vmem:[%s4226_s26 + $0xd08] sm:$0xff]  ;;  %v838_v12 = vld [vmem:[%s4226_s26 + $0xe20] sm:$0xff]  ;;  %v3363_v40 = vld [vmem:[%s4226_s26 + $0x30] sm:$0xff] }
 0x162   : > { %v1865_v21 = vadd.f32 %v1864_v2, %v1818_v41  ;;  %v1592_v26 = vadd.f32 %v1591_v62, %v1590_v9  ;;  %v1682_v52 = vadd.f32 %v1681_v23, %v5725_v0  ;;  %v1912_v14 = vmul.f32 %v3363_v40, %v5835_v45  ;;  %v5862_v20 = vld [vmem:[%s4220_s21 + $0x1c0] sm:$0xff]  ;;  %v804_v46 = vld [vmem:[%s4226_s26 + $0xd10] sm:$0xff]  ;;  %v5866_v60 = vld [vmem:[%s4220_s21 + $0xf8] sm:$0xff] }
 0x163   : > { %v1957_v38 = vadd.f32 %v1956_v30, %v1910_v56  ;;  %v1729_v41 = vmul.f32 %v5866_v60, %v801_v7  ;;  %v1774_v29 = vadd.f32 %v1773_v11, %v1727_v36  ;;  %v1821_v25 = vmul.f32 %v5669_v53, %v837_v57  ;;  %v805_v0 = vld [vmem:[%s4226_s26 + $0xd18] sm:$0xff]  ;;  %v839_v32 = vld [vmem:[%s4226_s26 + $0xe28] sm:$0xff]  ;;  %v5874_v8 = vld [vmem:[%s4220_s21 + $0x100] sm:$0xff] }
 0x164   : > { %v1866_v16 = vadd.f32 %v1865_v21, %v1819_v55  ;;  %1593 = vst [vmem:[#allocation2 + $0x6] sm:$0x1] %v1592_v26  ;;  %v1683_v56 = vadd.f32 %v1682_v52, %v5728_v48  ;;  %v1730_v62 = vmul.f32 %v5874_v8, %v802_v59  ;;  %v3366_v49 = vld [vmem:[%s4226_s26 + $0x38] sm:$0xff]  ;;  %v5880_v53 = vld [vmem:[%s4220_s21 + $0x1c8] sm:$0xff]  ;;  %v806_v55 = vld [vmem:[%s4226_s26 + $0xd20] sm:$0xff]  ;;  %v1822_v9 = vmul.f32 %v5685_v43, %v838_v12 }
 0x165   : > { %v1913_v2 = vmul.f32 %v3366_v49, %v5848_v63  ;;  %v1958_v36 = vadd.f32 %v1957_v38, %v1911_v58  ;;  %v5884_v7 = vld [vmem:[%s4220_s21 + $0x108] sm:$0xff]  ;;  %v1775_v57 = vadd.f32 %v1774_v29, %v1728_v17  ;;  %v840_v30 = vld [vmem:[%s4226_s26 + $0xe30] sm:$0xff]  ;;  %v3369_v21 = vld [vmem:[%s4226_s26 + $0x40] sm:$0xff]  ;;  %v1823_v52 = vmul.f32 %v5701_v15, %v839_v32 }
 0x166   : > { %v1731_v48 = vmul.f32 %v5884_v7, %v803_v4  ;;  %v1867_v23 = vadd.f32 %v1866_v16, %v1820_v22  ;;  %v807_v61 = vld [vmem:[%s4226_s26 + $0xd28] sm:$0xff]  ;;  %v1684_v58 = vadd.f32 %v1683_v56, %v5741_v28  ;;  %v5892_v59 = vld [vmem:[%s4220_s21 + $0x110] sm:$0xff]  ;;  %v1914_v26 = vmul.f32 %v3369_v21, %v5862_v20  ;;  %v5902_v22 = vld [vmem:[%s4220_s21 + $0x118] sm:$0xff] }
 0x167   : > { %v1732_v11 = vmul.f32 %v5892_v59, %v804_v46  ;;  %v1959_v4 = vadd.f32 %v1958_v36, %v1912_v14  ;;  %v5898_v17 = vld [vmem:[%s4220_s21 + $0x1d0] sm:$0xff]  ;;  %v1733_v28 = vmul.f32 %v5902_v22, %v805_v0  ;;  %v1776_v12 = vadd.f32 %v1775_v57, %v1729_v41  ;;  %v809_v38 = vld [vmem:[%s4226_s26 + $0xd38] sm:$0xff]  ;;  %v5910_v29 = vld [vmem:[%s4220_s21 + $0x120] sm:$0xff] }
 0x168   : > { %v808_v43 = vld [vmem:[%s4226_s26 + $0xd30] sm:$0xff]  ;;  %v1868_v40 = vadd.f32 %v1867_v23, %v1821_v25  ;;  %v841_v46 = vld [vmem:[%s4226_s26 + $0xe38] sm:$0xff]  ;;  %v1685_v14 = vadd.f32 %v1684_v58, %v5747_v47  ;;  %v1734_v16 = vmul.f32 %v5910_v29, %v806_v55  ;;  %v3372_v56 = vld [vmem:[%s4226_s26 + $0x48] sm:$0xff]  ;;  %v1824_v36 = vmul.f32 %v5717_v54, %v840_v30 }
 0x169   : > { %v1915_v49 = vmul.f32 %v3372_v56, %v5880_v53  ;;  %v1960_v0 = vadd.f32 %v1959_v4, %v1913_v2  ;;  %v5916_v41 = vld [vmem:[%s4220_s21 + $0x1d8] sm:$0xff]  ;;  %v810_v15 = vld [vmem:[%s4226_s26 + $0xd40] sm:$0xff]  ;;  %v5920_v25 = vld [vmem:[%s4220_s21 + $0x128] sm:$0xff]  ;;  %v1777_v32 = vadd.f32 %v1776_v12, %v1730_v62 }
 0x16a   : > { %7851 = vst [vmem:[#allocation77_spill] sm:$0xff] %v5916_v41  ;;  %v5923_v47 = vmul.f32 %v5920_v25, %v807_v61  ;;  %v1869_v55 = vadd.f32 %v1868_v40, %v1822_v9  ;;  %v811_v57 = vld [vmem:[%s4226_s26 + $0xd48] sm:$0xff]  ;;  %v842_v23 = vld [vmem:[%s4226_s26 + $0xe40] sm:$0xff]  ;;  %v1686_v2 = vadd.f32 %v1685_v14, %v5764_v18  ;;  %v5930_v58 = vld [vmem:[%s4220_s21 + $0x130] sm:$0xff] }
 0x16b   : > { %7852 = vst [vmem:[#allocation57_spill] sm:$0xff] %v5930_v58  ;;  %v5933_v21 = vmul.f32 %v5930_v58, %v808_v43  ;;  %v3375_v4 = vld [vmem:[%s4226_s26 + $0x50] sm:$0xff]  ;;  %v1961_v62 = vadd.f32 %v1960_v0, %v1914_v26  ;;  %v5938_v54 = vld [vmem:[%s4220_s21 + $0x1e0] sm:$0xff]  ;;  %v5942_v30 = vld [vmem:[%s4220_s21 + $0x138] sm:$0xff]  ;;  %v1778_v12 = vadd.f32 %v1777_v32, %v1731_v48  ;;  %v1825_v43 = vmul.f32 %v5733_v27, %v841_v46 }
 0x16c   : > { %v1916_v61 = vmul.f32 %v3375_v4, %v5898_v17  ;;  %v812_v9 = vld [vmem:[%s4226_s26 + $0xd50] sm:$0xff]  ;;  %v5945_v18 = vmul.f32 %v5942_v30, %v809_v38  ;;  %v1870_v40 = vadd.f32 %v1869_v55, %v1823_v52  ;;  %v813_v14 = vld [vmem:[%s4226_s26 + $0xd58] sm:$0xff]  ;;  %v843_v56 = vld [vmem:[%s4226_s26 + $0xe48] sm:$0xff]  ;;  %v1687_v26 = vadd.f32 %v1686_v2, %v5770_v6 }
 0x16d   : > { %v5952_v0 = vld [vmem:[%s4220_s21 + $0x140] sm:$0xff]  ;;  %v3378_v58 = vld [vmem:[%s4226_s26 + $0x58] sm:$0xff]  ;;  %v1962_v48 = vadd.f32 %v1961_v62, %v1915_v49  ;;  %v5960_v27 = vld [vmem:[%s4220_s21 + $0x1e8] sm:$0xff]  ;;  %v1779_v6 = vadd.f32 %v1778_v12, %v1732_v11  ;;  %v1826_v55 = vmul.f32 %v5757_v33, %v842_v23 }
 0x16e   : > { %7853 = vst [vmem:[#allocation58_spill] sm:$0xff] %v5952_v0  ;;  %v5955_v4 = vmul.f32 %v5952_v0, %v810_v15  ;;  %v1917_v38 = vmul.f32 %v3378_v58, %v5916_v41  ;;  %7854 = vst [vmem:[#allocation59_spill] sm:$0xff] %v5960_v27  ;;  %v814_v52 = vld [vmem:[%s4226_s26 + $0xd60] sm:$0xff]  ;;  %v5964_v46 = vld [vmem:[%s4220_s21 + $0x148] sm:$0xff]  ;;  %v1871_v15 = vadd.f32 %v1870_v40, %v1824_v36 }
 0x16f   : > { %7855 = vst [vmem:[#allocation78_spill] sm:$0xff] %v5964_v46  ;;  %v5967_v32 = vmul.f32 %v5964_v46, %v811_v57  ;;  %v5971_v2 = vld [vmem:[%s4220_s21 + $0x1f0] sm:$0xff]  ;;  %v1688_v49 = vadd.f32 %v1687_v26, %v5803_v42  ;;  %v3381_v57 = vld [vmem:[%s4226_s26 + $0x60] sm:$0xff]  ;;  %v1963_v12 = vadd.f32 %v1962_v48, %v1916_v61  ;;  %v5984_v46 = vld [vmem:[%s4220_s21 + $0x158] sm:$0xff]  ;;  %v1780_v36 = vadd.f32 %v1779_v6, %v1733_v28 }
 0x170   : > { %7856 = vst [vmem:[#allocation63_spill] sm:$0xff] %v5971_v2  ;;  %v844_v0 = vld [vmem:[%s4226_s26 + $0xe50] sm:$0xff]  ;;  %v1918_v11 = vmul.f32 %v3381_v57, %v5938_v54  ;;  %7858 = vst [vmem:[#allocation65_spill] sm:$0xff] %v5984_v46  ;;  %v5987_v33 = vmul.f32 %v5984_v46, %v813_v14  ;;  %v1827_v42 = vmul.f32 %v5778_v10, %v843_v56  ;;  %v815_v40 = vld [vmem:[%s4226_s26 + $0xd68] sm:$0xff] }
 0x171   : > { %v5976_v58 = vld [vmem:[%s4220_s21 + $0x150] sm:$0xff]  ;;  %v1872_v23 = vadd.f32 %v1871_v15, %v1825_v43  ;;  %v1689_v26 = vrot.slane %v1688_v49, 4  ;;  %v3383_v61 = vld [vmem:[%s4226_s26 + $0x68] sm:$0xff]  ;;  %v1964_v14 = vadd.f32 %v1963_v12, %v1917_v38  ;;  %v5998_v57 = vld [vmem:[%s4220_s21 + $0x1f8] sm:$0xff]  ;;  %v1781_v28 = vadd.f32 %v1780_v36, %v1734_v16 }
 0x172   : > { %7857 = vst [vmem:[#allocation64_spill] sm:$0xff] %v5976_v58  ;;  %v5979_v62 = vmul.f32 %v5976_v58, %v812_v9  ;;  %v845_v9 = vld [vmem:[%s4226_s26 + $0xe58] sm:$0xff]  ;;  %v5993_v58 = vmul.f32 %v5744_v50, %v814_v52  ;;  %v1919_v48 = vmul.f32 %v3383_v61, %v5960_v27  ;;  %v1828_v10 = vmul.f32 %v5793_v35, %v844_v0  ;;  %v3384_v43 = vld [vmem:[%s4226_s26 + $0x70] sm:$0xff]  ;;  %v6004_v15 = vld [vmem:[%s4220_s21 + $0x200] sm:$0xff] }
 0x173   : > { %v1873_v56 = vadd.f32 %v1872_v23, %v1826_v55  ;;  %v1920_v6 = vmul.f32 %v3384_v43, %v5971_v2  ;;  %7859 = vst [vmem:[#allocation37_spill] sm:$0xff] %v6004_v15  ;;  %v846_v52 = vld [vmem:[%s4226_s26 + $0xe60] sm:$0xff]  ;;  %v1690_v50 = vadd.f32 %v1689_v26, %v1688_v49  ;;  %v1965_v46 = vadd.f32 %v1964_v14, %v1918_v11  ;;  %v3386_v12 = vld [vmem:[%s4226_s26 + $0x188] sm:$0xff]  ;;  %v3388_v14 = vld [vmem:[%s4226_s26 + $0x78] sm:$0xff] }
 0x174   : > { %v3385_v61 = vld [vmem:[%s4226_s26 + $0x180] sm:$0xff]  ;;  %v2012_v16 = vmul.f32 %v3386_v12, %v5754_v1  ;;  %v6012_v35 = vld [vmem:[%s4220_s21 + $0x168] sm:$0xff]  ;;  %v1782_v55 = vadd.f32 %v1781_v28, %v5923_v47  ;;  %v1829_v36 = vmul.f32 %v5812_v39, %v845_v9  ;;  %v1921_v43 = vmul.f32 %v3388_v14, %v5998_v57  ;;  %v3389_v12 = vld [vmem:[%s4226_s26 + $0x190] sm:$0xff] }
 0x175   : > { %v2011_v38 = vmul.f32 %v3385_v61, %v5751_v19  ;;  %7860 = vst [vmem:[#allocation28_spill] sm:$0xff] %v6012_v35  ;;  %v6015_v0 = vmul.f32 %v6012_v35, %v815_v40  ;;  %v1874_v49 = vadd.f32 %v1873_v56, %v1827_v42  ;;  %v6020_v11 = vld [vmem:[%s4220_s21 + $0x208] sm:$0xff]  ;;  %v1691_v26 = vrot.slane %v1690_v50, 2  ;;  %v3390_v42 = vld [vmem:[%s4226_s26 + $0x80] sm:$0xff]  ;;  %v6032_v56 = vld [vmem:[%s4220_s21 + $0x210] sm:$0xff] }
 0x176   : > { %7861 = vst [vmem:[#allocation50_spill] sm:$0xff] %v6020_v11  ;;  %v847_v23 = vld [vmem:[%s4226_s26 + $0xe68] sm:$0xff]  ;;  %v1966_v61 = vadd.f32 %v1965_v46, %v1919_v48  ;;  %v2013_v40 = vmul.f32 %v3389_v12, %v5774_v44  ;;  %v1783_v47 = vadd.f32 %v1782_v55, %v5933_v21  ;;  %v1830_v28 = vmul.f32 %v5825_v37, %v846_v52  ;;  %v848_v35 = vld [vmem:[%s4226_s26 + $0xe70] sm:$0xff]  ;;  %v3391_v48 = vld [vmem:[%s4226_s26 + $0x198] sm:$0xff] }
 0x177   : > { %v1875_v39 = vadd.f32 %v1874_v49, %v1828_v10  ;;  %v1922_v9 = vmul.f32 %v3390_v42, %v6004_v15  ;;  %v1692_v14 = vadd.f32 %v1691_v26, %v1690_v50  ;;  %v2014_v12 = vmul.f32 %v3391_v48, %v5790_v3  ;;  %v3392_v52 = vld [vmem:[%s4226_s26 + $0x88] sm:$0xff]  ;;  %v6042_v49 = vld [vmem:[%s4220_s21 + $0x218] sm:$0xff]  ;;  %v3393_v26 = vld [vmem:[%s4226_s26 + $0x1a0] sm:$0xff] }
 0x178   : > { %v1967_v46 = vadd.f32 %v1966_v61, %v1920_v6  ;;  %v2059_v44 = vadd.f32 %v2012_v16, %v2011_v38  ;;  %v1784_v21 = vadd.f32 %v1783_v47, %v5945_v18  ;;  %v1831_v37 = vmul.f32 %v5838_v24, %v847_v23  ;;  %v849_v42 = vld [vmem:[%s4226_s26 + $0xe78] sm:$0xff]  ;;  %v1695_v16 = vld [vmem:[#allocation2 + $0x7] sm:$0x1]  ;;  %v3394_v61 = vld [vmem:[%s4226_s26 + $0x90] sm:$0xff] }
 0x179   : > { %v1876_v10 = vadd.f32 %v1875_v39, %v1829_v36  ;;  %v1923_v55 = vmul.f32 %v3392_v52, %v6020_v11  ;;  %v1693_v50 = vrot.slane %v1692_v14, 1  ;;  %v2015_v38 = vmul.f32 %v3393_v26, %v5809_v5  ;;  %v816_v39 = vld [vmem:[%s4226_s26 + $0xd70] sm:$0xff]  ;;  %v850_v48 = vld [vmem:[%s4226_s26 + $0xe80] sm:$0xff]  ;;  %v3395_v52 = vld [vmem:[%s4226_s26 + $0x1a8] sm:$0xff] }
 0x17a   : > { %v1968_v6 = vadd.f32 %v1967_v46, %v1921_v43  ;;  %v2060_v18 = vadd.f32 %v2059_v44, %v2013_v40  ;;  %v1785_v24 = vadd.f32 %v1784_v21, %v5955_v4  ;;  %v1832_v36 = vmul.f32 %v5852_v34, %v848_v35  ;;  %v6056_v4 = vld [vmem:[%s4220_s21 + $0x220] sm:$0xff]  ;;  %v3396_v21 = vld [vmem:[%s4226_s26 + $0x98] sm:$0xff]  ;;  %v3397_v26 = vld [vmem:[%s4226_s26 + $0x1b0] sm:$0xff] }
 0x17b   : > { %v1877_v23 = vadd.f32 %v1876_v10, %v1830_v28  ;;  %v1924_v47 = vmul.f32 %v3394_v61, %v6032_v56  ;;  %v1694_v43 = vadd.f32 %v1693_v50, %v1692_v14  ;;  %v2016_v44 = vmul.f32 %v3395_v52, %v5822_v51  ;;  %v817_v14 = vld [vmem:[%s4226_s26 + $0xd78] sm:$0xff] }
 0x17c   : > { %v1969_v46 = vadd.f32 %v1968_v6, %v1922_v9  ;;  %v2061_v40 = vadd.f32 %v2060_v18, %v2014_v12  ;;  %v1786_v34 = vadd.f32 %v1785_v24, %v5967_v32  ;;  %v1833_v35 = vmul.f32 %v5866_v60, %v849_v42  ;;  %v851_v9 = vld [vmem:[%s4226_s26 + $0xe88] sm:$0xff] }
 0x17d   : > { %v1878_v28 = vadd.f32 %v1877_v23, %v1831_v37  ;;  %v1925_v10 = vmul.f32 %v3396_v21, %v6042_v49  ;;  %v1696_v50 = vadd.f32 %v1695_v16, %v1694_v43  ;;  %v2017_v12 = vmul.f32 %v3397_v26, %v5835_v45  ;;  %v6067_v32 = vld [vmem:[%s4220_s21 + $0x228] sm:$0xff]  ;;  %v852_v23 = vld [vmem:[%s4226_s26 + $0xe90] sm:$0xff]  ;;  %v853_v16 = vld [vmem:[%s4226_s26 + $0xe98] sm:$0xff] }
 0x17e   : > { %v1970_v6 = vadd.f32 %v1969_v46, %v1923_v55  ;;  %v2062_v18 = vadd.f32 %v2061_v40, %v2015_v38  ;;  %v1744_v60 = vmul.f32 %v5767_v13, %v816_v39  ;;  %v1787_v37 = vadd.f32 %v1786_v34, %v5979_v62  ;;  %v3398_v55 = vld [vmem:[%s4226_s26 + $0xa0] sm:$0xff]  ;;  %v3399_v43 = vld [vmem:[%s4226_s26 + $0x1b8] sm:$0xff]  ;;  %v6079_v62 = vld [vmem:[%s4220_s21 + $0x230] sm:$0xff] }
 0x17f   : > { %v1834_v42 = vmul.f32 %v5874_v8, %v850_v48  ;;  %v1879_v24 = vadd.f32 %v1878_v28, %v1832_v36  ;;  %1697 = vst [vmem:[#allocation2 + $0x7] sm:$0x1] %v1696_v50  ;;  %v1926_v61 = vmul.f32 %v3398_v55, %v6056_v4  ;;  %v2018_v39 = vmul.f32 %v3399_v43, %v5848_v63  ;;  %v854_v40 = vld [vmem:[%s4226_s26 + $0xea0] sm:$0xff]  ;;  %v855_v34 = vld [vmem:[%s4226_s26 + $0xea8] sm:$0xff]  ;;  %v856_v26 = vld [vmem:[%s4226_s26 + $0xeb0] sm:$0xff] }
 0x180   : > { %v1971_v38 = vadd.f32 %v1970_v6, %v1924_v47  ;;  %v2063_v46 = vadd.f32 %v2062_v18, %v2016_v44  ;;  %v1745_v8 = vmul.f32 %v5800_v31, %v817_v14  ;;  %v1788_v36 = vadd.f32 %v1787_v37, %v5987_v33  ;;  %v3400_v47 = vld [vmem:[%s4226_s26 + $0xa8] sm:$0xff]  ;;  %v3401_v44 = vld [vmem:[%s4226_s26 + $0x1c0] sm:$0xff]  ;;  %v6091_v6 = vld [vmem:[%s4220_s21 + $0x238] sm:$0xff] }
 0x181   : > { %v1835_v48 = vmul.f32 %v5884_v7, %v851_v9  ;;  %v1880_v52 = vadd.f32 %v1879_v24, %v1833_v35  ;;  %v1927_v28 = vmul.f32 %v3400_v47, %v6067_v32  ;;  %v2019_v50 = vmul.f32 %v3401_v44, %v5862_v20  ;;  %7862 = vst [vmem:[#allocation79_spill] sm:$0xff] %v6091_v6  ;;  %v857_v18 = vld [vmem:[%s4226_s26 + $0xeb8] sm:$0xff]  ;;  %v859_v43 = vld [vmem:[%s4226_s26 + $0xec8] sm:$0xff] }
 0x182   : > { %v1972_v21 = vadd.f32 %v1971_v38, %v1925_v10  ;;  %v2064_v14 = vadd.f32 %v2063_v46, %v2017_v12  ;;  %v1789_v33 = vadd.f32 %v1788_v36, %v5993_v58  ;;  %v1836_v7 = vmul.f32 %v5892_v59, %v852_v23  ;;  %v3402_v10 = vld [vmem:[%s4226_s26 + $0xb0] sm:$0xff]  ;;  %v3403_v12 = vld [vmem:[%s4226_s26 + $0x1c8] sm:$0xff]  ;;  %v6103_v38 = vld [vmem:[%s4220_s21 + $0x240] sm:$0xff] }
 0x183   : > { %v1837_v35 = vmul.f32 %v5902_v22, %v853_v16  ;;  %v1881_v9 = vadd.f32 %v1880_v52, %v1834_v42  ;;  %v1928_v37 = vmul.f32 %v3402_v10, %v6079_v62  ;;  %v2020_v55 = vmul.f32 %v3403_v12, %v5880_v53  ;;  %v858_v16 = vld [vmem:[%s4226_s26 + $0xec0] sm:$0xff]  ;;  %v6115_v47 = vld [vmem:[%s4220_s21 + $0x248] sm:$0xff]  ;;  %v861_v44 = vld [vmem:[%s4226_s26 + $0xed8] sm:$0xff] }
 0x184   : > { %v1973_v24 = vadd.f32 %v1972_v21, %v1926_v61  ;;  %v2065_v58 = vadd.f32 %v2064_v14, %v2018_v39  ;;  %v1790_v59 = vadd.f32 %v1789_v33, %v6015_v0  ;;  %v1838_v22 = vmul.f32 %v5910_v29, %v854_v40  ;;  %v3404_v61 = vld [vmem:[%s4226_s26 + $0xb8] sm:$0xff]  ;;  %v3405_v39 = vld [vmem:[%s4226_s26 + $0x1d0] sm:$0xff]  ;;  %7863 = vst [vmem:[#allocation69_spill] sm:$0xff] %v6115_v47  ;;  %v3406_v14 = vld [vmem:[%s4226_s26 + $0xc0] sm:$0xff] }
 0x185   : > { %v1839_v42 = vmul.f32 %v5920_v25, %v855_v34  ;;  %v1882_v23 = vadd.f32 %v1881_v9, %v1835_v48  ;;  %v1929_v46 = vmul.f32 %v3404_v61, %v6091_v6  ;;  %v2021_v52 = vmul.f32 %v3405_v39, %v5898_v17  ;;  %v7864_v40 = vld [vmem:[#allocation57_spill] sm:$0xff]  ;;  %v860_v21 = vld [vmem:[%s4226_s26 + $0xed0] sm:$0xff] }
 0x186   : > { %v1974_v36 = vadd.f32 %v1973_v24, %v1927_v28  ;;  %v2066_v0 = vadd.f32 %v2065_v58, %v2019_v50  ;;  %v1791_v29 = vadd.f32 %v1790_v59, %v1744_v60  ;;  %v1840_v25 = vmul.f32 %v7864_v40, %v856_v26  ;;  %v3407_v9 = vld [vmem:[%s4226_s26 + $0x1d8] sm:$0xff]  ;;  %v6126_v24 = vld [vmem:[%s4220_s21 + $0x250] sm:$0xff]  ;;  %v7866_v26 = vld [vmem:[#allocation58_spill] sm:$0xff] }
 0x187   : > { %v1841_v48 = vmul.f32 %v5942_v30, %v857_v18  ;;  %v1883_v34 = vadd.f32 %v1882_v23, %v1836_v7  ;;  %v1930_v28 = vmul.f32 %v3406_v14, %v6103_v38  ;;  %v2022_v50 = vmul.f32 %v3407_v9, %v5916_v41  ;;  %7865 = vst [vmem:[#allocation38_spill] sm:$0xff] %v6126_v24  ;;  %v7867_v18 = vld [vmem:[#allocation78_spill] sm:$0xff]  ;;  %v6133_v58 = vld [vmem:[%s4220_s21 + $0x258] sm:$0xff] }
 0x188   : > { %v1975_v33 = vadd.f32 %v1974_v36, %v1928_v37  ;;  %v2067_v10 = vadd.f32 %v2066_v0, %v2020_v55  ;;  %v1792_v60 = vadd.f32 %v1791_v29, %v1745_v8  ;;  %v1842_v30 = vmul.f32 %v7866_v26, %v858_v16  ;;  %7868 = vst [vmem:[#allocation29_spill] sm:$0xff] %v6133_v58  ;;  %v3408_v37 = vld [vmem:[%s4226_s26 + $0xc8] sm:$0xff]  ;;  %v3409_v55 = vld [vmem:[%s4226_s26 + $0x1e0] sm:$0xff]  ;;  %v7869_v39 = vld [vmem:[#allocation64_spill] sm:$0xff] }
 0x189   : > { %v6130_v7 = vmul.f32 %v7867_v18, %v859_v43  ;;  %v1884_v12 = vadd.f32 %v1883_v34, %v1837_v35  ;;  %v1931_v59 = vmul.f32 %v3408_v37, %v6115_v47  ;;  %v2023_v61 = vmul.f32 %v3409_v55, %v5938_v54  ;;  %v7870_v43 = vld [vmem:[#allocation65_spill] sm:$0xff]  ;;  %v3413_v26 = vld [vmem:[%s4226_s26 + $0x1f0] sm:$0xff] }
 0x18a   : > { %v1976_v23 = vadd.f32 %v1975_v33, %v1929_v46  ;;  %v2068_v8 = vadd.f32 %v2067_v10, %v2021_v52  ;;  %v1793_v36 = vrot.slane %v1792_v60, 4  ;;  %v6140_v16 = vmul.f32 %v7869_v39, %v860_v21  ;;  %v6146_v29 = vld [vmem:[%s4220_s21 + $0x260] sm:$0xff]  ;;  %v3410_v46 = vld [vmem:[%s4226_s26 + $0xd0] sm:$0xff]  ;;  %v3411_v52 = vld [vmem:[%s4226_s26 + $0x1e8] sm:$0xff] }
 0x18b   : > { %v6143_v0 = vmul.f32 %v7870_v43, %v861_v44  ;;  %v1885_v35 = vadd.f32 %v1884_v12, %v1838_v22  ;;  %7871 = vst [vmem:[#allocation54_spill] sm:$0xff] %v6146_v29  ;;  %v862_v40 = vld [vmem:[%s4226_s26 + $0xee0] sm:$0xff]  ;;  %v1932_v34 = vmul.f32 %v3410_v46, %v6126_v24  ;;  %v2024_v33 = vmul.f32 %v3411_v52, %v5960_v27  ;;  %v3412_v44 = vld [vmem:[%s4226_s26 + $0xd8] sm:$0xff]  ;;  %v6158_v12 = vld [vmem:[%s4220_s21 + $0x268] sm:$0xff] }
 0x18c   : > { %v1977_v14 = vadd.f32 %v1976_v23, %v1930_v28  ;;  %v2069_v9 = vadd.f32 %v2068_v8, %v2022_v50  ;;  %v1794_v21 = vadd.f32 %v1793_v36, %v1792_v60  ;;  %v1933_v22 = vmul.f32 %v3412_v44, %v6133_v58  ;;  %7872 = vst [vmem:[#allocation70_spill] sm:$0xff] %v6158_v12  ;;  %v3414_v23 = vld [vmem:[%s4226_s26 + $0x300] sm:$0xff]  ;;  %v3415_v50 = vld [vmem:[%s4226_s26 + $0x308] sm:$0xff]  ;;  %v7873_v8 = vld [vmem:[#allocation52_spill] sm:$0xff] }
 0x18d   : > { %v1886_v10 = vadd.f32 %v1885_v35, %v1839_v42  ;;  %v2025_v18 = vmul.f32 %v3413_v26, %v5971_v2  ;;  %v2115_v55 = vmul.f32 %v3414_v23, %v5751_v19  ;;  %v2116_v42 = vmul.f32 %v3415_v50, %v5754_v1  ;;  %v3416_v43 = vld [vmem:[%s4226_s26 + $0xe0] sm:$0xff]  ;;  %v3417_v46 = vld [vmem:[%s4226_s26 + $0x1f8] sm:$0xff] }
 0x18e   : > { %v1978_v37 = vadd.f32 %v1977_v14, %v1931_v59  ;;  %v2070_v28 = vadd.f32 %v2069_v9, %v2023_v61  ;;  %v1795_v60 = vrot.slane %v1794_v21, 2  ;;  %v6165_v36 = vmul.f32 %v7873_v8, %v862_v40  ;;  %v6170_v59 = vld [vmem:[%s4220_s21 + $0x270] sm:$0xff]  ;;  %v7875_v44 = vld [vmem:[#allocation53_spill] sm:$0xff] }
 0x18f   : > { %v1887_v39 = vadd.f32 %v1886_v10, %v1840_v25  ;;  %v1934_v35 = vmul.f32 %v3416_v43, %v6146_v29  ;;  %7874 = vst [vmem:[#allocation71_spill] sm:$0xff] %v6170_v59  ;;  %v2026_v14 = vmul.f32 %v3417_v46, %v5998_v57  ;;  %v3418_v9 = vld [vmem:[%s4226_s26 + $0x310] sm:$0xff]  ;;  %v3419_v25 = vld [vmem:[%s4226_s26 + $0xe8] sm:$0xff]  ;;  %v3420_v50 = vld [vmem:[%s4226_s26 + $0x200] sm:$0xff]  ;;  %v2163_v46 = vadd.f32 %v2116_v42, %v2115_v55 }
 0x190   : > { %v1979_v61 = vadd.f32 %v1978_v37, %v1932_v34  ;;  %v2071_v52 = vadd.f32 %v2070_v28, %v2024_v33  ;;  %v2117_v26 = vmul.f32 %v3418_v9, %v7875_v44  ;;  %v1796_v23 = vadd.f32 %v1795_v60, %v1794_v21  ;;  %v6181_v43 = vld [vmem:[%s4220_s21 + $0x278] sm:$0xff]  ;;  %v3423_v9 = vld [vmem:[%s4226_s26 + $0x208] sm:$0xff] }
 0x191   : > { %v1888_v40 = vadd.f32 %v1887_v39, %v1841_v48  ;;  %v1935_v10 = vmul.f32 %v3419_v25, %v6158_v12  ;;  %v2027_v8 = vmul.f32 %v3420_v50, %v6004_v15  ;;  %v3421_v33 = vld [vmem:[%s4226_s26 + $0x318] sm:$0xff]  ;;  %v3422_v48 = vld [vmem:[%s4226_s26 + $0xf0] sm:$0xff]  ;;  %v2028_v25 = vmul.f32 %v3423_v9, %v6020_v11  ;;  %v6190_v50 = vld [vmem:[%s4220_s21 + $0x280] sm:$0xff] }
 0x192   : > { %v1980_v34 = vadd.f32 %v1979_v61, %v1933_v22  ;;  %v2072_v37 = vadd.f32 %v2071_v52, %v2025_v18  ;;  %v2118_v28 = vmul.f32 %v3421_v33, %v5790_v3  ;;  %v1797_v21 = vrot.slane %v1796_v23, 1  ;;  %v1799_v22 = vld [vmem:[#allocation2 + $0x8] sm:$0x1]  ;;  %v3424_v52 = vld [vmem:[%s4226_s26 + $0x320] sm:$0xff]  ;;  %v3425_v33 = vld [vmem:[%s4226_s26 + $0xf8] sm:$0xff] }
 0x193   : > { %v1889_v60 = vadd.f32 %v1888_v40, %v1842_v30  ;;  %v1936_v39 = vmul.f32 %v3422_v48, %v6170_v59  ;;  %v2119_v55 = vmul.f32 %v3424_v52, %v5809_v5  ;;  %v2164_v42 = vadd.f32 %v2163_v46, %v2117_v26  ;;  %v3426_v9 = vld [vmem:[%s4226_s26 + $0x210] sm:$0xff]  ;;  %v6200_v59 = vld [vmem:[%s4220_s21 + $0x288] sm:$0xff]  ;;  %v3429_v52 = vld [vmem:[%s4226_s26 + $0x218] sm:$0xff] }
 0x194   : > { %v1981_v18 = vadd.f32 %v1980_v34, %v1934_v35  ;;  %v2073_v61 = vadd.f32 %v2072_v37, %v2026_v14  ;;  %v1798_v30 = vadd.f32 %v1797_v21, %v1796_v23  ;;  %v1937_v48 = vmul.f32 %v3425_v33, %v6181_v43  ;;  %7876 = vst [vmem:[#allocation39_spill] sm:$0xff] %v6200_v59  ;;  %v863_v35 = vld [vmem:[%s4226_s26 + $0xee8] sm:$0xff]  ;;  %v3428_v21 = vld [vmem:[%s4226_s26 + $0x100] sm:$0xff] }
 0x195   : > { %v1890_v40 = vadd.f32 %v1889_v60, %v6130_v7  ;;  %v2029_v11 = vmul.f32 %v3426_v9, %v6032_v56  ;;  %v3427_v26 = vld [vmem:[%s4226_s26 + $0x328] sm:$0xff]  ;;  %v2165_v37 = vadd.f32 %v2164_v42, %v2118_v28  ;;  %v1938_v60 = vmul.f32 %v3428_v21, %v6190_v50  ;;  %v6211_v9 = vld [vmem:[%s4220_s21 + $0x290] sm:$0xff]  ;;  %v3432_v21 = vld [vmem:[%s4226_s26 + $0x220] sm:$0xff] }
 0x196   : > { %v1982_v14 = vadd.f32 %v1981_v18, %v1935_v10  ;;  %v2074_v34 = vadd.f32 %v2073_v61, %v2027_v8  ;;  %v2120_v23 = vmul.f32 %v3427_v26, %v5822_v51  ;;  %v1800_v7 = vadd.f32 %v1799_v22, %v1798_v30  ;;  %v864_v10 = vld [vmem:[%s4226_s26 + $0xef0] sm:$0xff] }
 0x197   : > { %v1891_v46 = vadd.f32 %v1890_v40, %v6140_v16  ;;  %v2030_v33 = vmul.f32 %v3429_v52, %v6042_v49  ;;  %v3430_v28 = vld [vmem:[%s4226_s26 + $0x330] sm:$0xff]  ;;  %v2166_v61 = vadd.f32 %v2165_v37, %v2119_v55  ;;  %v3431_v40 = vld [vmem:[%s4226_s26 + $0x108] sm:$0xff]  ;;  %v3433_v37 = vld [vmem:[%s4226_s26 + $0x338] sm:$0xff] }
 0x198   : > { %v1983_v8 = vadd.f32 %v1982_v14, %v1936_v39  ;;  %v2075_v18 = vadd.f32 %v2074_v34, %v2028_v25  ;;  %v2121_v22 = vmul.f32 %v3430_v28, %v5835_v45  ;;  %1801 = vst [vmem:[#allocation2 + $0x8] sm:$0x1] %v1800_v7  ;;  %v7877_v16 = vld [vmem:[#allocation28_spill] sm:$0xff]  ;;  %v1939_v26 = vmul.f32 %v3431_v40, %v6200_v59 }
 0x199   : > { %v1847_v42 = vmul.f32 %v7877_v16, %v863_v35  ;;  %v1892_v30 = vadd.f32 %v1891_v46, %v6143_v0  ;;  %v2031_v39 = vmul.f32 %v3432_v21, %v6056_v4  ;;  %v6223_v25 = vld [vmem:[%s4220_s21 + $0x298] sm:$0xff]  ;;  %v2122_v35 = vmul.f32 %v3433_v37, %v5848_v63  ;;  %v3434_v52 = vld [vmem:[%s4226_s26 + $0x110] sm:$0xff]  ;;  %v3435_v16 = vld [vmem:[%s4226_s26 + $0x228] sm:$0xff] }
 0x19a   : > { %v865_v14 = vld [vmem:[%s4226_s26 + $0xef8] sm:$0xff]  ;;  %v1984_v55 = vadd.f32 %v1983_v8, %v1937_v48  ;;  %v2076_v34 = vadd.f32 %v2075_v18, %v2029_v11  ;;  %v2167_v7 = vadd.f32 %v2166_v61, %v2120_v23  ;;  %v1848_v0 = vmul.f32 %v5767_v13, %v864_v10  ;;  %v6235_v48 = vld [vmem:[%s4220_s21 + $0x2a0] sm:$0xff]  ;;  %v6238_v11 = vld [vmem:[%s4220_s21 + $0x2a8] sm:$0xff] }
 0x19b   : > { %v1893_v46 = vadd.f32 %v1892_v30, %v6165_v36  ;;  %v1940_v28 = vmul.f32 %v3434_v52, %v6211_v9  ;;  %v2032_v40 = vmul.f32 %v3435_v16, %v6067_v32  ;;  %7878 = vst [vmem:[#allocation40_spill] sm:$0xff] %v6238_v11  ;;  %v3436_v18 = vld [vmem:[%s4226_s26 + $0x340] sm:$0xff]  ;;  %v1849_v10 = vmul.f32 %v5800_v31, %v865_v14  ;;  %v3437_v30 = vld [vmem:[%s4226_s26 + $0x118] sm:$0xff]  ;;  %v3438_v37 = vld [vmem:[%s4226_s26 + $0x230] sm:$0xff] }
 0x19c   : > { %v1985_v23 = vadd.f32 %v1984_v55, %v1938_v60  ;;  %v2077_v8 = vadd.f32 %v2076_v34, %v2030_v33  ;;  %v2123_v13 = vmul.f32 %v3436_v18, %v5862_v20  ;;  %v2168_v36 = vadd.f32 %v2167_v7, %v2121_v22  ;;  %v6248_v60 = vld [vmem:[%s4220_s21 + $0x2b0] sm:$0xff]  ;;  %v6251_v33 = vld [vmem:[%s4220_s21 + $0x2b8] sm:$0xff]  ;;  %v3439_v34 = vld [vmem:[%s4226_s26 + $0x348] sm:$0xff] }
 0x19d   : > { %v1894_v61 = vadd.f32 %v1893_v46, %v1847_v42  ;;  %v1941_v21 = vmul.f32 %v3437_v30, %v6223_v25  ;;  %v2033_v52 = vmul.f32 %v3438_v37, %v6079_v62  ;;  %7879 = vst [vmem:[#allocation80_spill] sm:$0xff] %v6251_v33  ;;  %v2124_v31 = vmul.f32 %v3439_v34, %v5880_v53  ;;  %v3440_v7 = vld [vmem:[%s4226_s26 + $0x120] sm:$0xff]  ;;  %v3441_v16 = vld [vmem:[%s4226_s26 + $0x128] sm:$0xff]  ;;  %v3442_v30 = vld [vmem:[%s4226_s26 + $0x238] sm:$0xff] }
 0x19e   : > { %v1986_v55 = vadd.f32 %v1985_v23, %v1939_v26  ;;  %v2078_v22 = vadd.f32 %v2077_v8, %v2031_v39  ;;  %v2169_v42 = vadd.f32 %v2168_v36, %v2122_v35  ;;  %v1942_v46 = vmul.f32 %v3440_v7, %v6235_v48  ;;  %v6262_v39 = vld [vmem:[%s4220_s21 + $0x2c0] sm:$0xff]  ;;  %v6265_v23 = vld [vmem:[%s4220_s21 + $0x2c8] sm:$0xff]  ;;  %v3443_v8 = vld [vmem:[%s4226_s26 + $0x350] sm:$0xff] }
 0x19f   : > { %v1895_v14 = vadd.f32 %v1894_v61, %v1848_v0  ;;  %v1943_v18 = vmul.f32 %v3441_v16, %v6238_v11  ;;  %v2034_v26 = vmul.f32 %v3442_v30, %v6091_v6  ;;  %7880 = vst [vmem:[#allocation30_spill] sm:$0xff] %v6265_v23  ;;  %v2125_v36 = vmul.f32 %v3443_v8, %v5898_v17  ;;  %v3444_v34 = vld [vmem:[%s4226_s26 + $0x130] sm:$0xff]  ;;  %v3445_v16 = vld [vmem:[%s4226_s26 + $0x138] sm:$0xff]  ;;  %v3446_v11 = vld [vmem:[%s4226_s26 + $0x240] sm:$0xff] }
 0x1a0   : > { %v1987_v35 = vadd.f32 %v1986_v55, %v1940_v28  ;;  %v2079_v0 = vadd.f32 %v2078_v22, %v2032_v40  ;;  %v2170_v61 = vadd.f32 %v2169_v42, %v2123_v13  ;;  %v1944_v7 = vmul.f32 %v3444_v34, %v6248_v60  ;;  %v6276_v28 = vld [vmem:[%s4220_s21 + $0x2d0] sm:$0xff]  ;;  %v6279_v40 = vld [vmem:[%s4220_s21 + $0x2d8] sm:$0xff]  ;;  %v3448_v8 = vld [vmem:[%s4226_s26 + $0x140] sm:$0xff] }
 0x1a1   : > { %v1896_v37 = vadd.f32 %v1895_v14, %v1849_v10  ;;  %v1945_v30 = vmul.f32 %v3445_v16, %v6251_v33  ;;  %v2035_v6 = vmul.f32 %v3446_v11, %v6103_v38  ;;  %7881 = vst [vmem:[#allocation41_spill] sm:$0xff] %v6276_v28  ;;  %7882 = vst [vmem:[#allocation42_spill] sm:$0xff] %v6279_v40  ;;  %v3447_v22 = vld [vmem:[%s4226_s26 + $0x358] sm:$0xff]  ;;  %v3449_v16 = vld [vmem:[%s4226_s26 + $0x148] sm:$0xff] }
 0x1a2   : > { %v1988_v55 = vadd.f32 %v1987_v35, %v1941_v21  ;;  %v2080_v13 = vadd.f32 %v2079_v0, %v2033_v52  ;;  %v2126_v10 = vmul.f32 %v3447_v22, %v5916_v41  ;;  %v2171_v42 = vadd.f32 %v2170_v61, %v2124_v31  ;;  %v3450_v33 = vld [vmem:[%s4226_s26 + $0x248] sm:$0xff]  ;;  %v3451_v0 = vld [vmem:[%s4226_s26 + $0x360] sm:$0xff]  ;;  %v3452_v41 = vld [vmem:[%s4226_s26 + $0x150] sm:$0xff] }
 0x1a3   : > { %v1897_v14 = vrot.slane %v1896_v37, 4  ;;  %v1946_v34 = vmul.f32 %v3448_v8, %v6262_v39  ;;  %v6287_v11 = vmul.f32 %v3449_v16, %v6265_v23  ;;  %v2036_v21 = vmul.f32 %v3450_v33, %v6115_v47  ;;  %v3453_v16 = vld [vmem:[%s4226_s26 + $0x158] sm:$0xff]  ;;  %v3454_v33 = vld [vmem:[%s4226_s26 + $0x250] sm:$0xff] }
 0x1a4   : > { %v1989_v52 = vadd.f32 %v1988_v55, %v1942_v46  ;;  %v2081_v35 = vadd.f32 %v2080_v13, %v2034_v26  ;;  %v2127_v31 = vmul.f32 %v3451_v0, %v5938_v54  ;;  %v2172_v61 = vadd.f32 %v2171_v42, %v2125_v36  ;;  %v6304_v26 = vld [vmem:[%s4220_s21 + $0x2e0] sm:$0xff]  ;;  %v3455_v36 = vld [vmem:[%s4226_s26 + $0x368] sm:$0xff] }
 0x1a5   : > { %v1898_v22 = vadd.f32 %v1897_v14, %v1896_v37  ;;  %v6295_v8 = vmul.f32 %v3452_v41, %v6276_v28  ;;  %v6299_v23 = vmul.f32 %v3453_v16, %v6279_v40  ;;  %v2037_v46 = vmul.f32 %v3454_v33, %v6126_v24  ;;  %7883 = vst [vmem:[#allocation44_spill] sm:$0xff] %v6304_v26  ;;  %v3456_v14 = vld [vmem:[%s4226_s26 + $0x258] sm:$0xff]  ;;  %v3457_v16 = vld [vmem:[%s4226_s26 + $0x370] sm:$0xff]  ;;  %v3458_v33 = vld [vmem:[%s4226_s26 + $0x480] sm:$0xff] }
 0x1a6   : > { %v1990_v55 = vadd.f32 %v1989_v52, %v1943_v18  ;;  %v2082_v13 = vadd.f32 %v2081_v35, %v2035_v6  ;;  %v2128_v37 = vmul.f32 %v3455_v36, %v5960_v27  ;;  %v2173_v42 = vadd.f32 %v2172_v61, %v2126_v10  ;;  %v3459_v35 = vld [vmem:[%s4226_s26 + $0x488] sm:$0xff]  ;;  %v3460_v36 = vld [vmem:[%s4226_s26 + $0x160] sm:$0xff] }
 0x1a7   : > { %v1899_v41 = vrot.slane %v1898_v22, 2  ;;  %v2038_v0 = vmul.f32 %v3456_v14, %v6133_v58  ;;  %v2129_v40 = vmul.f32 %v3457_v16, %v5971_v2  ;;  %v2219_v24 = vmul.f32 %v3458_v33, %v5751_v19  ;;  %v3461_v58 = vld [vmem:[%s4226_s26 + $0x260] sm:$0xff]  ;;  %v3462_v2 = vld [vmem:[%s4226_s26 + $0x378] sm:$0xff] }
 0x1a8   : > { %v1991_v18 = vadd.f32 %v1990_v55, %v1944_v7  ;;  %v2083_v6 = vadd.f32 %v2082_v13, %v2036_v21  ;;  %v2174_v52 = vadd.f32 %v2173_v42, %v2127_v31  ;;  %v2220_v10 = vmul.f32 %v3459_v35, %v5754_v1  ;;  %v3463_v55 = vld [vmem:[%s4226_s26 + $0x490] sm:$0xff]  ;;  %v3464_v13 = vld [vmem:[%s4226_s26 + $0x268] sm:$0xff]  ;;  %v3466_v33 = vld [vmem:[%s4226_s26 + $0x498] sm:$0xff] }
 0x1a9   : > { %v1900_v61 = vadd.f32 %v1899_v41, %v1898_v22  ;;  %v6318_v14 = vmul.f32 %v3460_v36, %v6304_v26  ;;  %v2039_v16 = vmul.f32 %v3461_v58, %v6146_v29  ;;  %v2130_v19 = vmul.f32 %v3462_v2, %v5998_v57  ;;  %v3465_v41 = vld [vmem:[%s4226_s26 + $0x380] sm:$0xff]  ;;  %v7884_v35 = vld [vmem:[#allocation71_spill] sm:$0xff] }
 0x1aa   : > { %v1992_v7 = vadd.f32 %v1991_v18, %v1945_v30  ;;  %v2084_v21 = vadd.f32 %v2083_v6, %v2037_v46  ;;  %v2175_v31 = vadd.f32 %v2174_v52, %v2128_v37  ;;  %v2221_v1 = vmul.f32 %v3463_v55, %v7875_v44  ;;  %v1903_v30 = vld [vmem:[#allocation2 + $0x9] sm:$0x1]  ;;  %v3467_v52 = vld [vmem:[%s4226_s26 + $0x270] sm:$0xff] }
 0x1ab   : > { %v1901_v22 = vrot.slane %v1900_v61, 1  ;;  %v2040_v42 = vmul.f32 %v3464_v13, %v6158_v12  ;;  %v2131_v58 = vmul.f32 %v3465_v41, %v6004_v15  ;;  %v2222_v2 = vmul.f32 %v3466_v33, %v5790_v3  ;;  %v3468_v55 = vld [vmem:[%s4226_s26 + $0x388] sm:$0xff]  ;;  %v3469_v41 = vld [vmem:[%s4226_s26 + $0x4a0] sm:$0xff]  ;;  %v6349_v33 = vld [vmem:[%s4220_s21 + $0x2f0] sm:$0xff] }
 0x1ac   : > { %v1993_v46 = vadd.f32 %v1992_v7, %v1946_v34  ;;  %v2085_v37 = vadd.f32 %v2084_v21, %v2038_v0  ;;  %v2176_v18 = vadd.f32 %v2175_v31, %v2129_v40  ;;  %v2267_v6 = vadd.f32 %v2220_v10, %v2219_v24  ;;  %v7885_v13 = vld [vmem:[#allocation50_spill] sm:$0xff]  ;;  %v3471_v21 = vld [vmem:[%s4226_s26 + $0x390] sm:$0xff] }
 0x1ad   : > { %v1902_v44 = vadd.f32 %v1901_v22, %v1900_v61  ;;  %v2041_v36 = vmul.f32 %v3467_v52, %v7884_v35  ;;  %v2132_v26 = vmul.f32 %v3468_v55, %v7885_v13  ;;  %v2223_v15 = vmul.f32 %v3469_v41, %v5809_v5  ;;  %v6339_v3 = vld [vmem:[%s4220_s21 + $0x2e8] sm:$0xff]  ;;  %v3470_v61 = vld [vmem:[%s4226_s26 + $0x278] sm:$0xff]  ;;  %v3477_v41 = vld [vmem:[%s4226_s26 + $0x170] sm:$0xff] }
 0x1ae   : > { %7886 = vst [vmem:[#allocation45_spill] sm:$0xff] %v6339_v3  ;;  %v1994_v34 = vadd.f32 %v1993_v46, %v6287_v11  ;;  %v2086_v0 = vadd.f32 %v2085_v37, %v2039_v16  ;;  %v2177_v24 = vadd.f32 %v2176_v18, %v2130_v19  ;;  %v2268_v40 = vadd.f32 %v2267_v6, %v2221_v1  ;;  %v3472_v22 = vld [vmem:[%s4226_s26 + $0x4a8] sm:$0xff]  ;;  %v3474_v37 = vld [vmem:[%s4226_s26 + $0x280] sm:$0xff]  ;;  %v3475_v6 = vld [vmem:[%s4226_s26 + $0x398] sm:$0xff] }
 0x1af   : > { %v1904_v10 = vadd.f32 %v1903_v30, %v1902_v44  ;;  %v2042_v7 = vmul.f32 %v3470_v61, %v6181_v43  ;;  %v2133_v31 = vmul.f32 %v3471_v21, %v6032_v56  ;;  %v2224_v5 = vmul.f32 %v3472_v22, %v5822_v51  ;;  %v3473_v30 = vld [vmem:[%s4226_s26 + $0x168] sm:$0xff]  ;;  %v3476_v44 = vld [vmem:[%s4226_s26 + $0x4b0] sm:$0xff]  ;;  %v3481_v21 = vld [vmem:[%s4226_s26 + $0x178] sm:$0xff] }
 0x1b0   : > { %v1995_v11 = vadd.f32 %v1994_v34, %v6295_v8  ;;  %v2087_v16 = vadd.f32 %v2086_v0, %v2040_v42  ;;  %v2178_v19 = vadd.f32 %v2177_v24, %v2131_v58  ;;  %v2269_v1 = vadd.f32 %v2268_v40, %v2222_v2  ;;  %v6361_v42 = vld [vmem:[%s4220_s21 + $0x2f8] sm:$0xff]  ;;  %v3478_v0 = vld [vmem:[%s4226_s26 + $0x288] sm:$0xff]  ;;  %v3479_v40 = vld [vmem:[%s4226_s26 + $0x3a0] sm:$0xff] }
 0x1b1   : > { %1905 = vst [vmem:[#allocation2 + $0x9] sm:$0x1] %v1904_v10  ;;  %v1951_v46 = vmul.f32 %v3473_v30, %v6339_v3  ;;  %v2043_v18 = vmul.f32 %v3474_v37, %v6190_v50  ;;  %v2134_v51 = vmul.f32 %v3475_v6, %v6042_v49  ;;  %v2225_v8 = vmul.f32 %v3476_v44, %v5835_v45  ;;  %v3480_v10 = vld [vmem:[%s4226_s26 + $0x4b8] sm:$0xff]  ;;  %v3484_v30 = vld [vmem:[%s4226_s26 + $0x4c0] sm:$0xff]  ;;  %v3486_v44 = vld [vmem:[%s4226_s26 + $0x3b0] sm:$0xff] }
 0x1b2   : > { %v1996_v58 = vadd.f32 %v1995_v11, %v6299_v23  ;;  %v2088_v2 = vadd.f32 %v2087_v16, %v2041_v36  ;;  %v2179_v52 = vadd.f32 %v2178_v19, %v2132_v26  ;;  %v2270_v55 = vadd.f32 %v2269_v1, %v2223_v15  ;;  %v3482_v11 = vld [vmem:[%s4226_s26 + $0x290] sm:$0xff]  ;;  %v3483_v19 = vld [vmem:[%s4226_s26 + $0x3a8] sm:$0xff]  ;;  %v3485_v37 = vld [vmem:[%s4226_s26 + $0x298] sm:$0xff] }
 0x1b3   : > { %v1952_v34 = vmul.f32 %v3477_v41, %v6349_v33  ;;  %v2044_v24 = vmul.f32 %v3478_v0, %v6200_v59  ;;  %v2135_v45 = vmul.f32 %v3479_v40, %v6056_v4  ;;  %v2226_v61 = vmul.f32 %v3480_v10, %v5848_v63  ;;  %v7887_v0 = vld [vmem:[#allocation79_spill] sm:$0xff] }
 0x1b4   : > { %v1997_v23 = vadd.f32 %v1996_v58, %v6318_v14  ;;  %v2089_v26 = vadd.f32 %v2088_v2, %v2042_v7  ;;  %v2180_v36 = vadd.f32 %v2179_v52, %v2133_v31  ;;  %v2271_v15 = vadd.f32 %v2270_v55, %v2224_v5  ;;  %v3487_v2 = vld [vmem:[%s4226_s26 + $0x4c8] sm:$0xff]  ;;  %v3490_v10 = vld [vmem:[%s4226_s26 + $0x4d0] sm:$0xff] }
 0x1b5   : > { %v1953_v22 = vmul.f32 %v3481_v21, %v6361_v42  ;;  %v2045_v16 = vmul.f32 %v3482_v11, %v6211_v9  ;;  %v2136_v1 = vmul.f32 %v3483_v19, %v6067_v32  ;;  %v2227_v63 = vmul.f32 %v3484_v30, %v5862_v20  ;;  %v3492_v21 = vld [vmem:[%s4226_s26 + $0x2b0] sm:$0xff]  ;;  %v3493_v19 = vld [vmem:[%s4226_s26 + $0x3c0] sm:$0xff] }
 0x1b6   : > { %v1998_v14 = vadd.f32 %v1997_v23, %v1951_v46  ;;  %v2090_v7 = vadd.f32 %v2089_v26, %v2043_v18  ;;  %v2181_v31 = vadd.f32 %v2180_v36, %v2134_v51  ;;  %v2272_v5 = vadd.f32 %v2271_v15, %v2225_v8  ;;  %v3488_v18 = vld [vmem:[%s4226_s26 + $0x2a0] sm:$0xff]  ;;  %v3489_v8 = vld [vmem:[%s4226_s26 + $0x3b8] sm:$0xff] }
 0x1b7   : > { %v2046_v6 = vmul.f32 %v3485_v37, %v6223_v25  ;;  %v2137_v58 = vmul.f32 %v3486_v44, %v6079_v62  ;;  %v2228_v52 = vmul.f32 %v3487_v2, %v5880_v53  ;;  %v2047_v51 = vmul.f32 %v3488_v18, %v6235_v48  ;;  %v7890_v37 = vld [vmem:[#allocation80_spill] sm:$0xff]  ;;  %v3496_v2 = vld [vmem:[%s4226_s26 + $0x2c0] sm:$0xff] }
 0x1b8   : > { %v1999_v55 = vadd.f32 %v1998_v14, %v1952_v34  ;;  %v2091_v41 = vadd.f32 %v2090_v7, %v2044_v24  ;;  %v2182_v20 = vadd.f32 %v2181_v31, %v2135_v45  ;;  %v2273_v46 = vadd.f32 %v2272_v5, %v2226_v61  ;;  %v3491_v24 = vld [vmem:[%s4226_s26 + $0x2a8] sm:$0xff]  ;;  %v7888_v45 = vld [vmem:[#allocation40_spill] sm:$0xff]  ;;  %v7889_v7 = vld [vmem:[#allocation77_spill] sm:$0xff] }
 0x1b9   : > { %v2138_v40 = vmul.f32 %v3489_v8, %v7887_v0  ;;  %v2229_v23 = vmul.f32 %v3490_v10, %v5898_v17  ;;  %v2048_v61 = vmul.f32 %v3491_v24, %v7888_v45  ;;  %v2049_v11 = vmul.f32 %v3492_v21, %v6248_v60  ;;  %v3494_v14 = vld [vmem:[%s4226_s26 + $0x4d8] sm:$0xff]  ;;  %v3499_v10 = vld [vmem:[%s4226_s26 + $0x2c8] sm:$0xff]  ;;  %v3501_v21 = vld [vmem:[%s4226_s26 + $0x3d0] sm:$0xff] }
 0x1ba   : > { %v2000_v26 = vadd.f32 %v1999_v55, %v1953_v22  ;;  %v2092_v36 = vadd.f32 %v2091_v41, %v2045_v16  ;;  %v2183_v15 = vadd.f32 %v2182_v20, %v2136_v1  ;;  %v2274_v34 = vadd.f32 %v2273_v46, %v2227_v63  ;;  %v3495_v5 = vld [vmem:[%s4226_s26 + $0x2b8] sm:$0xff]  ;;  %v3497_v41 = vld [vmem:[%s4226_s26 + $0x3c8] sm:$0xff]  ;;  %v3498_v46 = vld [vmem:[%s4226_s26 + $0x4e0] sm:$0xff] }
 0x1bb   : > { %v2139_v30 = vmul.f32 %v3493_v19, %v6103_v38  ;;  %v2230_v31 = vmul.f32 %v3494_v14, %v7889_v7  ;;  %v2050_v44 = vmul.f32 %v3495_v5, %v7890_v37  ;;  %v2051_v55 = vmul.f32 %v3496_v2, %v6262_v39  ;;  %v7892_v19 = vld [vmem:[#allocation38_spill] sm:$0xff]  ;;  %v3504_v2 = vld [vmem:[%s4226_s26 + $0x4f0] sm:$0xff] }
 0x1bc   : > { %v2001_v22 = vrot.slane %v2000_v26, 4  ;;  %v2093_v16 = vadd.f32 %v2092_v36, %v2046_v6  ;;  %v2184_v1 = vadd.f32 %v2183_v15, %v2137_v58  ;;  %v2275_v63 = vadd.f32 %v2274_v34, %v2228_v52  ;;  %v7891_v36 = vld [vmem:[#allocation30_spill] sm:$0xff]  ;;  %v3500_v34 = vld [vmem:[%s4226_s26 + $0x2d0] sm:$0xff] }
 0x1bd   : > { %v2140_v20 = vmul.f32 %v3497_v41, %v6115_v47  ;;  %v2231_v18 = vmul.f32 %v3498_v46, %v5938_v54  ;;  %v2052_v15 = vmul.f32 %v3499_v10, %v7891_v36  ;;  %v6413_v24 = vmul.f32 %v3500_v34, %v6276_v28  ;;  %v7894_v41 = vld [vmem:[#allocation63_spill] sm:$0xff]  ;;  %v3505_v10 = vld [vmem:[%s4226_s26 + $0x600] sm:$0xff] }
 0x1be   : > { %v2002_v8 = vadd.f32 %v2001_v22, %v2000_v26  ;;  %v2094_v6 = vadd.f32 %v2093_v16, %v2047_v51  ;;  %v2185_v58 = vadd.f32 %v2184_v1, %v2138_v40  ;;  %v2276_v52 = vadd.f32 %v2275_v63, %v2229_v23  ;;  %v3502_v26 = vld [vmem:[%s4226_s26 + $0x4e8] sm:$0xff]  ;;  %v3503_v1 = vld [vmem:[%s4226_s26 + $0x3d8] sm:$0xff]  ;;  %v6425_v34 = vld [vmem:[%s4220_s21 + $0x180] sm:$0xff] }
 0x1bf   : > { %v2141_v14 = vmul.f32 %v3501_v21, %v7892_v19  ;;  %v2232_v51 = vmul.f32 %v3502_v26, %v5960_v27  ;;  %v7893_v63 = vld [vmem:[#allocation29_spill] sm:$0xff]  ;;  %v2233_v46 = vmul.f32 %v3504_v2, %v7894_v41  ;;  %7895 = vst [vmem:[#allocation46_spill] sm:$0xff] %v6425_v34  ;;  %v2323_v21 = vmul.f32 %v6425_v34, %v3505_v10  ;;  %v3507_v26 = vld [vmem:[%s4226_s26 + $0x608] sm:$0xff]  ;;  %v3512_v27 = vld [vmem:[%s4226_s26 + $0x610] sm:$0xff] }
 0x1c0   : > { %v2003_v40 = vrot.slane %v2002_v8, 2  ;;  %v2095_v22 = vadd.f32 %v2094_v6, %v2048_v61  ;;  %v2186_v23 = vadd.f32 %v2185_v58, %v2139_v30  ;;  %v2277_v16 = vadd.f32 %v2276_v52, %v2230_v31  ;;  %v6430_v61 = vld [vmem:[%s4220_s21 + $0x188] sm:$0xff]  ;;  %v3510_v41 = vld [vmem:[%s4226_s26 + $0x3e0] sm:$0xff]  ;;  %v3511_v10 = vld [vmem:[%s4226_s26 + $0x4f8] sm:$0xff] }
 0x1c1   : > { %v2142_v5 = vmul.f32 %v3503_v1, %v7893_v63  ;;  %7896 = vst [vmem:[#allocation31_spill] sm:$0xff] %v6430_v61  ;;  %v2324_v30 = vmul.f32 %v6430_v61, %v3507_v26  ;;  %v3509_v1 = vld [vmem:[%s4226_s26 + $0x2d8] sm:$0xff]  ;;  %v7897_v63 = vld [vmem:[#allocation42_spill] sm:$0xff]  ;;  %v2143_v19 = vmul.f32 %v3510_v41, %v6146_v29  ;;  %v2234_v34 = vmul.f32 %v3511_v10, %v5998_v57  ;;  %v6441_v47 = vld [vmem:[%s4220_s21 + $0x190] sm:$0xff] }
 0x1c2   : > { %v2004_v31 = vadd.f32 %v2003_v40, %v2002_v8  ;;  %v2096_v6 = vadd.f32 %v2095_v22, %v2049_v11  ;;  %v2187_v58 = vadd.f32 %v2186_v23, %v2140_v20  ;;  %v2278_v52 = vadd.f32 %v2277_v16, %v2231_v18  ;;  %7898 = vst [vmem:[#allocation43_spill] sm:$0xff] %v6441_v47  ;;  %v2008_v22 = vld [vmem:[#allocation2 + $0x10] sm:$0x1]  ;;  %v3514_v23 = vld [vmem:[%s4226_s26 + $0x3e8] sm:$0xff]  ;;  %v3515_v41 = vld [vmem:[%s4226_s26 + $0x500] sm:$0xff] }
 0x1c3   : > { %v2054_v2 = vmul.f32 %v3509_v1, %v7897_v63  ;;  %v2325_v11 = vmul.f32 %v6441_v47, %v3512_v27  ;;  %v2144_v16 = vmul.f32 %v3514_v23, %v6158_v12  ;;  %v7899_v26 = vld [vmem:[#allocation37_spill] sm:$0xff]  ;;  %v2371_v47 = vadd.f32 %v2324_v30, %v2323_v21  ;;  %v3519_v23 = vld [vmem:[%s4226_s26 + $0x508] sm:$0xff] }
 0x1c4   : > { %v2005_v20 = vrot.slane %v2004_v31, 1  ;;  %v2097_v8 = vadd.f32 %v2096_v6, %v2050_v44  ;;  %v2188_v18 = vadd.f32 %v2187_v58, %v2141_v14  ;;  %v2279_v40 = vadd.f32 %v2278_v52, %v2232_v51  ;;  %v3516_v10 = vld [vmem:[%s4226_s26 + $0x618] sm:$0xff]  ;;  %v3518_v58 = vld [vmem:[%s4226_s26 + $0x3f0] sm:$0xff]  ;;  %v3520_v12 = vld [vmem:[%s4226_s26 + $0x620] sm:$0xff] }
 0x1c5   : > { %v2235_v1 = vmul.f32 %v3515_v41, %v7899_v26  ;;  %v6450_v29 = vld [vmem:[%s4220_s21 + $0x198] sm:$0xff]  ;;  %v2145_v52 = vmul.f32 %v3518_v58, %v7884_v35  ;;  %v2236_v41 = vmul.f32 %v3519_v23, %v7885_v13  ;;  %v6459_v26 = vld [vmem:[%s4220_s21 + $0x1a0] sm:$0xff]  ;;  %v2372_v21 = vadd.f32 %v2371_v47, %v2325_v11  ;;  %v3524_v58 = vld [vmem:[%s4226_s26 + $0x628] sm:$0xff] }
 0x1c6   : > { %v2326_v27 = vmul.f32 %v6450_v29, %v3516_v10  ;;  %v2006_v44 = vadd.f32 %v2005_v20, %v2004_v31  ;;  %v2098_v14 = vadd.f32 %v2097_v8, %v2051_v55  ;;  %v2189_v51 = vadd.f32 %v2188_v18, %v2142_v5  ;;  %v3522_v31 = vld [vmem:[%s4226_s26 + $0x2e0] sm:$0xff]  ;;  %v7900_v20 = vld [vmem:[#allocation44_spill] sm:$0xff]  ;;  %v6468_v23 = vld [vmem:[%s4220_s21 + $0x1a8] sm:$0xff] }
 0x1c7   : > { %v2280_v6 = vadd.f32 %v2279_v40, %v2233_v46  ;;  %v2327_v10 = vmul.f32 %v6459_v26, %v3520_v12  ;;  %v2055_v8 = vmul.f32 %v3522_v31, %v7900_v20  ;;  %v3523_v18 = vld [vmem:[%s4226_s26 + $0x3f8] sm:$0xff]  ;;  %v2328_v47 = vmul.f32 %v6468_v23, %v3524_v58  ;;  %v3532_v31 = vld [vmem:[%s4226_s26 + $0x2f0] sm:$0xff]  ;;  %v3533_v58 = vld [vmem:[%s4226_s26 + $0x408] sm:$0xff] }
 0x1c8   : > { %v2009_v30 = vadd.f32 %v2008_v22, %v2006_v44  ;;  %v2099_v55 = vadd.f32 %v2098_v14, %v2052_v15  ;;  %v2190_v5 = vadd.f32 %v2189_v51, %v2143_v19  ;;  %v2146_v40 = vmul.f32 %v3523_v18, %v6181_v43  ;;  %v3527_v44 = vld [vmem:[%s4226_s26 + $0x2e8] sm:$0xff]  ;;  %v3528_v51 = vld [vmem:[%s4226_s26 + $0x400] sm:$0xff] }
 0x1c9   : > { %v2281_v46 = vadd.f32 %v2280_v6, %v2234_v34  ;;  %v2373_v12 = vadd.f32 %v2372_v21, %v2326_v27  ;;  %v3526_v34 = vld [vmem:[%s4226_s26 + $0x510] sm:$0xff]  ;;  %v2056_v14 = vmul.f32 %v3527_v44, %v6339_v3  ;;  %v2147_v6 = vmul.f32 %v3528_v51, %v6190_v50  ;;  %v3534_v44 = vld [vmem:[%s4226_s26 + $0x638] sm:$0xff] }
 0x1ca   : > { %2010 = vst [vmem:[#allocation2 + $0x10] sm:$0x1] %v2009_v30  ;;  %v2100_v15 = vadd.f32 %v2099_v55, %v6413_v24  ;;  %v2191_v19 = vadd.f32 %v2190_v5, %v2144_v16  ;;  %v2237_v11 = vmul.f32 %v3526_v34, %v6032_v56  ;;  %v3529_v27 = vld [vmem:[%s4226_s26 + $0x630] sm:$0xff]  ;;  %v3531_v5 = vld [vmem:[%s4226_s26 + $0x518] sm:$0xff]  ;;  %v2057_v18 = vmul.f32 %v3532_v31, %v6349_v33 }
 0x1cb   : > { %v2282_v22 = vadd.f32 %v2281_v46, %v2235_v1  ;;  %v6480_v21 = vld [vmem:[%s4220_s21 + $0x1b0] sm:$0xff]  ;;  %v2374_v16 = vadd.f32 %v2373_v12, %v2327_v10  ;;  %v2238_v1 = vmul.f32 %v3531_v5, %v6042_v49  ;;  %v2148_v34 = vmul.f32 %v3533_v58, %v6200_v59  ;;  %v6491_v51 = vld [vmem:[%s4220_s21 + $0x1b8] sm:$0xff]  ;;  %v3539_v58 = vld [vmem:[%s4226_s26 + $0x640] sm:$0xff] }
 0x1cc   : > { %v2329_v24 = vmul.f32 %v6480_v21, %v3529_v27  ;;  %v2101_v30 = vadd.f32 %v2100_v15, %v2054_v2  ;;  %v2192_v55 = vadd.f32 %v2191_v19, %v2145_v52  ;;  %v2330_v2 = vmul.f32 %v6491_v51, %v3534_v44  ;;  %v3536_v15 = vld [vmem:[%s4226_s26 + $0x520] sm:$0xff]  ;;  %v3538_v5 = vld [vmem:[%s4226_s26 + $0x410] sm:$0xff] }
 0x1cd   : > { %v2283_v46 = vadd.f32 %v2282_v22, %v2236_v41  ;;  %v2375_v52 = vadd.f32 %v2374_v16, %v2328_v47  ;;  %v2239_v41 = vmul.f32 %v3536_v15, %v6056_v4  ;;  %v3537_v22 = vld [vmem:[%s4226_s26 + $0x2f8] sm:$0xff]  ;;  %v2149_v31 = vmul.f32 %v3538_v5, %v6211_v9  ;;  %v6502_v59 = vld [vmem:[%s4220_s21 + $0x1c0] sm:$0xff]  ;;  %v3544_v5 = vld [vmem:[%s4226_s26 + $0x648] sm:$0xff] }
 0x1ce   : > { %v2102_v10 = vadd.f32 %v2101_v30, %v2055_v8  ;;  %v2193_v12 = vadd.f32 %v2192_v55, %v2146_v40  ;;  %v2058_v27 = vmul.f32 %v3537_v22, %v6361_v42  ;;  %v2331_v47 = vmul.f32 %v6502_v59, %v3539_v58  ;;  %v3541_v30 = vld [vmem:[%s4226_s26 + $0x528] sm:$0xff]  ;;  %v3543_v15 = vld [vmem:[%s4226_s26 + $0x420] sm:$0xff] }
 0x1cf   : > { %v2284_v19 = vadd.f32 %v2283_v46, %v2237_v11  ;;  %v2376_v8 = vadd.f32 %v2375_v52, %v2329_v24  ;;  %v2240_v11 = vmul.f32 %v3541_v30, %v6067_v32  ;;  %v3542_v46 = vld [vmem:[%s4226_s26 + $0x418] sm:$0xff]  ;;  %v2151_v22 = vmul.f32 %v3543_v15, %v6235_v48  ;;  %v3545_v52 = vld [vmem:[%s4226_s26 + $0x530] sm:$0xff] }
 0x1d0   : > { %v2103_v40 = vadd.f32 %v2102_v10, %v2056_v14  ;;  %v2194_v16 = vadd.f32 %v2193_v12, %v2147_v6  ;;  %v2150_v44 = vmul.f32 %v3542_v46, %v6223_v25  ;;  %v2332_v58 = vmul.f32 %v3544_v5, %v5880_v53  ;;  %v3546_v12 = vld [vmem:[%s4226_s26 + $0x428] sm:$0xff]  ;;  %v3547_v30 = vld [vmem:[%s4226_s26 + $0x430] sm:$0xff]  ;;  %v3551_v5 = vld [vmem:[%s4226_s26 + $0x440] sm:$0xff] }
 0x1d1   : > { %v2285_v55 = vadd.f32 %v2284_v19, %v2238_v1  ;;  %v2377_v24 = vadd.f32 %v2376_v8, %v2330_v2  ;;  %v2241_v10 = vmul.f32 %v3545_v52, %v6079_v62  ;;  %v2152_v19 = vmul.f32 %v3546_v12, %v7888_v45  ;;  %v3548_v15 = vld [vmem:[%s4226_s26 + $0x650] sm:$0xff]  ;;  %v3549_v8 = vld [vmem:[%s4226_s26 + $0x538] sm:$0xff] }
 0x1d2   : > { %v2104_v14 = vadd.f32 %v2103_v40, %v2057_v18  ;;  %v2195_v6 = vadd.f32 %v2194_v16, %v2148_v34  ;;  %v2153_v46 = vmul.f32 %v3547_v30, %v6248_v60  ;;  %v2333_v53 = vmul.f32 %v3548_v15, %v5898_v17  ;;  %v3550_v16 = vld [vmem:[%s4226_s26 + $0x438] sm:$0xff]  ;;  %v3555_v30 = vld [vmem:[%s4226_s26 + $0x450] sm:$0xff] }
 0x1d3   : > { %v2286_v1 = vadd.f32 %v2285_v55, %v2239_v41  ;;  %v2378_v2 = vadd.f32 %v2377_v24, %v2331_v47  ;;  %v2242_v40 = vmul.f32 %v3549_v8, %v7887_v0  ;;  %v2154_v55 = vmul.f32 %v3550_v16, %v7890_v37  ;;  %v3552_v12 = vld [vmem:[%s4226_s26 + $0x658] sm:$0xff]  ;;  %v3553_v24 = vld [vmem:[%s4226_s26 + $0x540] sm:$0xff]  ;;  %v3557_v8 = vld [vmem:[%s4226_s26 + $0x548] sm:$0xff] }
 0x1d4   : > { %v2105_v18 = vadd.f32 %v2104_v14, %v2058_v27  ;;  %v2196_v34 = vadd.f32 %v2195_v6, %v2149_v31  ;;  %v6527_v52 = vmul.f32 %v3551_v5, %v6262_v39  ;;  %v2334_v17 = vmul.f32 %v3552_v12, %v7889_v7  ;;  %v3554_v6 = vld [vmem:[%s4226_s26 + $0x448] sm:$0xff]  ;;  %v3556_v7 = vld [vmem:[%s4226_s26 + $0x660] sm:$0xff]  ;;  %v3558_v5 = vld [vmem:[%s4226_s26 + $0x458] sm:$0xff] }
 0x1d5   : > { %v2287_v41 = vadd.f32 %v2286_v1, %v2240_v11  ;;  %v2379_v27 = vadd.f32 %v2378_v2, %v2332_v58  ;;  %v2243_v14 = vmul.f32 %v3553_v24, %v6103_v38  ;;  %v6535_v1 = vmul.f32 %v3554_v6, %v7891_v36  ;;  %v7901_v16 = vld [vmem:[#allocation69_spill] sm:$0xff] }
 0x1d6   : > { %v2106_v31 = vrot.slane %v2105_v18, 4  ;;  %v2197_v47 = vadd.f32 %v2196_v34, %v2150_v44  ;;  %v6539_v15 = vmul.f32 %v3555_v30, %v6276_v28  ;;  %v2335_v58 = vmul.f32 %v3556_v7, %v5938_v54  ;;  %v3559_v24 = vld [vmem:[%s4226_s26 + $0x460] sm:$0xff]  ;;  %v3560_v54 = vld [vmem:[%s4226_s26 + $0x668] sm:$0xff]  ;;  %v3562_v7 = vld [vmem:[%s4226_s26 + $0x670] sm:$0xff] }
 0x1d7   : > { %v2288_v11 = vadd.f32 %v2287_v41, %v2241_v10  ;;  %v2380_v44 = vadd.f32 %v2379_v27, %v2333_v53  ;;  %v2244_v10 = vmul.f32 %v3557_v8, %v7901_v16  ;;  %v6547_v12 = vmul.f32 %v3558_v5, %v7897_v63  ;;  %v7902_v30 = vld [vmem:[#allocation59_spill] sm:$0xff] }
 0x1d8   : > { %v2107_v2 = vadd.f32 %v2106_v31, %v2105_v18  ;;  %v2198_v34 = vadd.f32 %v2197_v47, %v2151_v22  ;;  %v6551_v6 = vmul.f32 %v3559_v24, %v7900_v20  ;;  %v2336_v53 = vmul.f32 %v3560_v54, %v7902_v30  ;;  %v3561_v31 = vld [vmem:[%s4226_s26 + $0x550] sm:$0xff]  ;;  %v3563_v24 = vld [vmem:[%s4226_s26 + $0x780] sm:$0xff]  ;;  %v3564_v28 = vld [vmem:[%s4226_s26 + $0x788] sm:$0xff] }
 0x1d9   : > { %v2289_v41 = vadd.f32 %v2288_v11, %v2242_v40  ;;  %v2381_v22 = vadd.f32 %v2380_v44, %v2334_v17  ;;  %v7903_v40 = vld [vmem:[#allocation38_spill] sm:$0xff]  ;;  %v7904_v8 = vld [vmem:[#allocation63_spill] sm:$0xff]  ;;  %v2428_v17 = vmul.f32 %v3564_v28, %v6430_v61  ;;  %v7906_v54 = vld [vmem:[#allocation29_spill] sm:$0xff] }
 0x1da   : > { %v2108_v18 = vrot.slane %v2107_v2, 2  ;;  %v2199_v27 = vadd.f32 %v2198_v34, %v2152_v19  ;;  %v2245_v47 = vmul.f32 %v3561_v31, %v7903_v40  ;;  %v2337_v5 = vmul.f32 %v3562_v7, %v7904_v8  ;;  %v7905_v20 = vld [vmem:[#allocation46_spill] sm:$0xff]  ;;  %v3565_v34 = vld [vmem:[%s4226_s26 + $0x558] sm:$0xff]  ;;  %v3568_v8 = vld [vmem:[%s4226_s26 + $0x790] sm:$0xff] }
 0x1db   : > { %v2290_v11 = vadd.f32 %v2289_v41, %v2243_v14  ;;  %v2382_v63 = vadd.f32 %v2381_v22, %v2335_v58  ;;  %v2427_v16 = vmul.f32 %v3563_v24, %v7905_v20  ;;  %v2246_v30 = vmul.f32 %v3565_v34, %v7906_v54  ;;  %v3566_v14 = vld [vmem:[%s4226_s26 + $0x468] sm:$0xff]  ;;  %v3567_v58 = vld [vmem:[%s4226_s26 + $0x678] sm:$0xff]  ;;  %v3570_v54 = vld [vmem:[%s4226_s26 + $0x680] sm:$0xff] }
 0x1dc   : > { %v2109_v44 = vadd.f32 %v2108_v18, %v2107_v2  ;;  %v2200_v19 = vadd.f32 %v2199_v27, %v2153_v46  ;;  %v6567_v41 = vmul.f32 %v3566_v14, %v6339_v3  ;;  %v2338_v22 = vmul.f32 %v3567_v58, %v5998_v57  ;;  %v7907_v24 = vld [vmem:[#allocation43_spill] sm:$0xff]  ;;  %v3569_v18 = vld [vmem:[%s4226_s26 + $0x560] sm:$0xff]  ;;  %v3571_v20 = vld [vmem:[%s4226_s26 + $0x798] sm:$0xff] }
 0x1dd   : > { %v2291_v31 = vadd.f32 %v2290_v11, %v2244_v10  ;;  %v2383_v7 = vadd.f32 %v2382_v63, %v2336_v53  ;;  %v2429_v28 = vmul.f32 %v3568_v8, %v7907_v24  ;;  %v7908_v27 = vld [vmem:[#allocation54_spill] sm:$0xff]  ;;  %v2112_v11 = vld [vmem:[#allocation2 + $0x11] sm:$0x1]  ;;  %v7909_v14 = vld [vmem:[#allocation37_spill] sm:$0xff]  ;;  %v2430_v57 = vmul.f32 %v3571_v20, %v6450_v29 }
 0x1de   : > { %v2110_v2 = vrot.slane %v2109_v44, 1  ;;  %v2201_v46 = vadd.f32 %v2200_v19, %v2154_v55  ;;  %v2247_v34 = vmul.f32 %v3569_v18, %v7908_v27  ;;  %v2339_v3 = vmul.f32 %v3570_v54, %v7909_v14  ;;  %v3572_v19 = vld [vmem:[%s4226_s26 + $0x568] sm:$0xff] }
 0x1df   : > { %v2292_v10 = vadd.f32 %v2291_v31, %v2245_v47  ;;  %v2384_v61 = vadd.f32 %v2383_v7, %v2337_v5  ;;  %v2475_v63 = vadd.f32 %v2428_v17, %v2427_v16  ;;  %v7910_v58 = vld [vmem:[#allocation70_spill] sm:$0xff]  ;;  %v3575_v17 = vld [vmem:[%s4226_s26 + $0x570] sm:$0xff] }
 0x1e0   : > { %v2111_v53 = vadd.f32 %v2110_v2, %v2109_v44  ;;  %v2202_v55 = vadd.f32 %v2201_v46, %v6527_v52  ;;  %v2248_v8 = vmul.f32 %v3572_v19, %v7910_v58  ;;  %v3573_v31 = vld [vmem:[%s4226_s26 + $0x688] sm:$0xff]  ;;  %v3574_v5 = vld [vmem:[%s4226_s26 + $0x7a0] sm:$0xff]  ;;  %v2249_v52 = vmul.f32 %v3575_v17, %v7884_v35  ;;  %v3576_v2 = vld [vmem:[%s4226_s26 + $0x690] sm:$0xff] }
 0x1e1   : > { %v2293_v47 = vadd.f32 %v2292_v10, %v2246_v30  ;;  %v2340_v18 = vmul.f32 %v3573_v31, %v7885_v13  ;;  %v2385_v27 = vadd.f32 %v2384_v61, %v2338_v22  ;;  %v2431_v54 = vmul.f32 %v3574_v5, %v6459_v26  ;;  %v3577_v61 = vld [vmem:[%s4226_s26 + $0x7a8] sm:$0xff]  ;;  %v3584_v5 = vld [vmem:[%s4226_s26 + $0x6a0] sm:$0xff] }
 0x1e2   : > { %v2476_v7 = vadd.f32 %v2475_v63, %v2429_v28  ;;  %v2113_v20 = vadd.f32 %v2112_v11, %v2111_v53  ;;  %v2203_v16 = vadd.f32 %v2202_v55, %v6535_v1  ;;  %v2341_v30 = vmul.f32 %v3576_v2, %v6032_v56  ;;  %v3578_v28 = vld [vmem:[%s4226_s26 + $0x470] sm:$0xff]  ;;  %v3579_v11 = vld [vmem:[%s4226_s26 + $0x578] sm:$0xff]  ;;  %v3586_v17 = vld [vmem:[%s4226_s26 + $0x588] sm:$0xff] }
 0x1e3   : > { %v2294_v44 = vadd.f32 %v2293_v47, %v2247_v34  ;;  %v2386_v13 = vadd.f32 %v2385_v27, %v2339_v3  ;;  %v2432_v22 = vmul.f32 %v3577_v61, %v6468_v23  ;;  %v2161_v1 = vmul.f32 %v3578_v28, %v6349_v33  ;;  %v3580_v56 = vld [vmem:[%s4226_s26 + $0x698] sm:$0xff]  ;;  %v3581_v63 = vld [vmem:[%s4226_s26 + $0x7b0] sm:$0xff]  ;;  %v3583_v47 = vld [vmem:[%s4226_s26 + $0x580] sm:$0xff] }
 0x1e4   : > { %v2477_v46 = vadd.f32 %v2476_v7, %v2430_v57  ;;  %2114 = vst [vmem:[#allocation2 + $0x11] sm:$0x1] %v2113_v20  ;;  %v2204_v10 = vadd.f32 %v2203_v16, %v6539_v15  ;;  %v2250_v34 = vmul.f32 %v3579_v11, %v6181_v43  ;;  %v2342_v3 = vmul.f32 %v3580_v56, %v6042_v49  ;;  %v3582_v55 = vld [vmem:[%s4226_s26 + $0x478] sm:$0xff]  ;;  %v3587_v2 = vld [vmem:[%s4226_s26 + $0x590] sm:$0xff]  ;;  %v3588_v61 = vld [vmem:[%s4226_s26 + $0x6a8] sm:$0xff] }
 0x1e5   : > { %v2295_v14 = vadd.f32 %v2294_v44, %v2248_v8  ;;  %v2387_v27 = vadd.f32 %v2386_v13, %v2340_v18  ;;  %v2433_v57 = vmul.f32 %v3581_v63, %v6480_v21  ;;  %v2162_v19 = vmul.f32 %v3582_v55, %v6361_v42  ;;  %v3585_v7 = vld [vmem:[%s4226_s26 + $0x7b8] sm:$0xff]  ;;  %v3593_v63 = vld [vmem:[%s4226_s26 + $0x7c8] sm:$0xff] }
 0x1e6   : > { %v2478_v53 = vadd.f32 %v2477_v46, %v2431_v54  ;;  %v2205_v15 = vadd.f32 %v2204_v10, %v6547_v12  ;;  %v2251_v8 = vmul.f32 %v3583_v47, %v6190_v50  ;;  %v2343_v49 = vmul.f32 %v3584_v5, %v6056_v4  ;;  %v7911_v12 = vld [vmem:[#allocation39_spill] sm:$0xff]  ;;  %v3589_v46 = vld [vmem:[%s4226_s26 + $0x7c0] sm:$0xff]  ;;  %v3590_v10 = vld [vmem:[%s4226_s26 + $0x598] sm:$0xff] }
 0x1e7   : > { %v2296_v31 = vadd.f32 %v2295_v14, %v2249_v52  ;;  %v2388_v18 = vadd.f32 %v2387_v27, %v2341_v30  ;;  %v2434_v54 = vmul.f32 %v3585_v7, %v6491_v51  ;;  %v2252_v44 = vmul.f32 %v3586_v17, %v7911_v12  ;;  %v3591_v14 = vld [vmem:[%s4226_s26 + $0x5a0] sm:$0xff]  ;;  %v3592_v27 = vld [vmem:[%s4226_s26 + $0x6b0] sm:$0xff]  ;;  %v3597_v5 = vld [vmem:[%s4226_s26 + $0x6b8] sm:$0xff] }
 0x1e8   : > { %v2479_v20 = vadd.f32 %v2478_v53, %v2432_v22  ;;  %v2206_v16 = vadd.f32 %v2205_v15, %v6551_v6  ;;  %v2253_v52 = vmul.f32 %v3587_v2, %v6211_v9  ;;  %v2344_v4 = vmul.f32 %v3588_v61, %v6067_v32  ;;  %v6629_v53 = vld [vmem:[%s4220_s21 + $0x1c8] sm:$0xff]  ;;  %v3598_v7 = vld [vmem:[%s4226_s26 + $0x7d0] sm:$0xff]  ;;  %v3600_v17 = vld [vmem:[%s4226_s26 + $0x5b8] sm:$0xff] }
 0x1e9   : > { %v2297_v13 = vadd.f32 %v2296_v31, %v2250_v34  ;;  %v2389_v30 = vadd.f32 %v2388_v18, %v2342_v3  ;;  %v2435_v22 = vmul.f32 %v3589_v46, %v6502_v59  ;;  %v2254_v11 = vmul.f32 %v3590_v10, %v6223_v25  ;;  %v3595_v15 = vld [vmem:[%s4226_s26 + $0x5a8] sm:$0xff]  ;;  %v3596_v31 = vld [vmem:[%s4226_s26 + $0x5b0] sm:$0xff]  ;;  %v3602_v61 = vld [vmem:[%s4226_s26 + $0x6c0] sm:$0xff] }
 0x1ea   : > { %v2480_v28 = vadd.f32 %v2479_v20, %v2433_v57  ;;  %v2207_v6 = vadd.f32 %v2206_v16, %v6567_v41  ;;  %v2255_v34 = vmul.f32 %v3591_v14, %v6235_v48  ;;  %v2345_v32 = vmul.f32 %v3592_v27, %v6079_v62  ;;  %v6642_v20 = vld [vmem:[%s4220_s21 + $0x1d0] sm:$0xff]  ;;  %v3603_v46 = vld [vmem:[%s4226_s26 + $0x7d8] sm:$0xff]  ;;  %v3605_v10 = vld [vmem:[%s4226_s26 + $0x5c8] sm:$0xff] }
 0x1eb   : > { %v2298_v56 = vadd.f32 %v2297_v13, %v2251_v8  ;;  %v2390_v3 = vadd.f32 %v2389_v30, %v2343_v49  ;;  %v2436_v41 = vmul.f32 %v6629_v53, %v3593_v63  ;;  %v2256_v47 = vmul.f32 %v3595_v15, %v7888_v45 }
 0x1ec   : > { %v2481_v57 = vadd.f32 %v2480_v28, %v2434_v54  ;;  %v2208_v55 = vadd.f32 %v2207_v6, %v2161_v1  ;;  %v6636_v8 = vmul.f32 %v3596_v31, %v6248_v60  ;;  %v2346_v49 = vmul.f32 %v3597_v5, %v7887_v0  ;;  %v3610_v5 = vld [vmem:[%s4226_s26 + $0x5d8] sm:$0xff] }
 0x1ed   : > { %v2299_v62 = vadd.f32 %v2298_v56, %v2252_v44  ;;  %v2391_v18 = vadd.f32 %v2390_v3, %v2344_v4  ;;  %v2437_v1 = vmul.f32 %v6642_v20, %v3598_v7  ;;  %v6647_v2 = vmul.f32 %v3600_v17, %v7890_v37  ;;  %v3601_v44 = vld [vmem:[%s4226_s26 + $0x5c0] sm:$0xff] }
 0x1ee   : > { %v2482_v54 = vadd.f32 %v2481_v57, %v2435_v22  ;;  %v2209_v16 = vadd.f32 %v2208_v55, %v2162_v19  ;;  %v6651_v13 = vmul.f32 %v3601_v44, %v6262_v39  ;;  %v2347_v4 = vmul.f32 %v3602_v61, %v6103_v38  ;;  %v6657_v22 = vld [vmem:[%s4220_s21 + $0x1d8] sm:$0xff]  ;;  %v3608_v55 = vld [vmem:[%s4226_s26 + $0x7e0] sm:$0xff] }
 0x1ef   : > { %v2300_v0 = vadd.f32 %v2299_v62, %v2253_v52  ;;  %v2392_v30 = vadd.f32 %v2391_v18, %v2345_v32  ;;  %7912 = vst [vmem:[#allocation25_spill] sm:$0xff] %v6657_v22  ;;  %v2438_v19 = vmul.f32 %v6657_v22, %v3603_v46  ;;  %v6662_v14 = vmul.f32 %v3605_v10, %v7891_v36  ;;  %v3606_v52 = vld [vmem:[%s4226_s26 + $0x5d0] sm:$0xff]  ;;  %v7913_v56 = vld [vmem:[#allocation41_spill] sm:$0xff]  ;;  %v3607_v32 = vld [vmem:[%s4226_s26 + $0x6c8] sm:$0xff] }
 0x1f0   : > { %v2483_v28 = vadd.f32 %v2482_v54, %v2436_v41  ;;  %v2210_v6 = vrot.slane %v2209_v16, 4  ;;  %v6666_v27 = vmul.f32 %v3606_v52, %v7913_v56  ;;  %v7914_v3 = vld [vmem:[#allocation69_spill] sm:$0xff]  ;;  %v7916_v18 = vld [vmem:[#allocation42_spill] sm:$0xff]  ;;  %v7917_v54 = vld [vmem:[#allocation44_spill] sm:$0xff] }
 0x1f1   : > { %v2301_v38 = vadd.f32 %v2300_v0, %v2254_v11  ;;  %v2348_v63 = vmul.f32 %v3607_v32, %v7914_v3  ;;  %v2393_v57 = vadd.f32 %v2392_v30, %v2346_v49  ;;  %v6672_v41 = vld [vmem:[%s4220_s21 + $0x1e0] sm:$0xff]  ;;  %v6677_v7 = vmul.f32 %v3610_v5, %v7916_v18  ;;  %v3612_v49 = vld [vmem:[%s4226_s26 + $0x6d0] sm:$0xff]  ;;  %v6687_v30 = vld [vmem:[%s4220_s21 + $0x1e8] sm:$0xff] }
 0x1f2   : > { %7915 = vst [vmem:[#allocation75_spill] sm:$0xff] %v6672_v41  ;;  %v2439_v15 = vmul.f32 %v6672_v41, %v3608_v55  ;;  %v2484_v31 = vadd.f32 %v2483_v28, %v2437_v1  ;;  %v2211_v62 = vadd.f32 %v2210_v6, %v2209_v16  ;;  %v3611_v11 = vld [vmem:[%s4226_s26 + $0x5e0] sm:$0xff]  ;;  %v2349_v0 = vmul.f32 %v3612_v49, %v7903_v40  ;;  %v3613_v1 = vld [vmem:[%s4226_s26 + $0x7e8] sm:$0xff]  ;;  %v3617_v40 = vld [vmem:[%s4226_s26 + $0x6d8] sm:$0xff] }
 0x1f3   : > { %v6681_v17 = vmul.f32 %v3611_v11, %v7917_v54  ;;  %v2302_v44 = vadd.f32 %v2301_v38, %v2255_v34  ;;  %v2394_v61 = vadd.f32 %v2393_v57, %v2347_v4  ;;  %v2440_v16 = vmul.f32 %v6687_v30, %v3613_v1  ;;  %v3615_v10 = vld [vmem:[%s4226_s26 + $0x900] sm:$0xff]  ;;  %v3616_v34 = vld [vmem:[%s4226_s26 + $0x908] sm:$0xff]  ;;  %v3618_v5 = vld [vmem:[%s4226_s26 + $0x7f0] sm:$0xff] }
 0x1f4   : > { %v2485_v46 = vadd.f32 %v2484_v31, %v2438_v19  ;;  %v2212_v28 = vrot.slane %v2211_v62, 2  ;;  %v7918_v52 = vld [vmem:[#allocation46_spill] sm:$0xff]  ;;  %v7919_v38 = vld [vmem:[#allocation31_spill] sm:$0xff]  ;;  %v7920_v55 = vld [vmem:[#allocation29_spill] sm:$0xff] }
 0x1f5   : > { %v2303_v6 = vadd.f32 %v2302_v44, %v2256_v47  ;;  %v2531_v32 = vmul.f32 %v3615_v10, %v7918_v52  ;;  %v2532_v3 = vmul.f32 %v3616_v34, %v7919_v38  ;;  %v2350_v4 = vmul.f32 %v3617_v40, %v7920_v55  ;;  %v6698_v11 = vld [vmem:[%s4220_s21 + $0x1f0] sm:$0xff]  ;;  %v3620_v44 = vld [vmem:[%s4226_s26 + $0x5e8] sm:$0xff]  ;;  %v7922_v49 = vld [vmem:[#allocation45_spill] sm:$0xff] }
 0x1f6   : > { %v2395_v57 = vadd.f32 %v2394_v61, %v2348_v63  ;;  %7921 = vst [vmem:[#allocation76_spill] sm:$0xff] %v6698_v11  ;;  %v2441_v19 = vmul.f32 %v6698_v11, %v3618_v5  ;;  %v2486_v47 = vadd.f32 %v2485_v46, %v2439_v15  ;;  %v2213_v31 = vadd.f32 %v2212_v28, %v2211_v62  ;;  %v3621_v34 = vld [vmem:[%s4226_s26 + $0x910] sm:$0xff]  ;;  %v3622_v55 = vld [vmem:[%s4226_s26 + $0x6e0] sm:$0xff]  ;;  %v3623_v5 = vld [vmem:[%s4226_s26 + $0x7f8] sm:$0xff] }
 0x1f7   : > { %v6703_v1 = vmul.f32 %v3620_v44, %v7922_v49  ;;  %v2304_v10 = vadd.f32 %v2303_v6, %v6636_v8  ;;  %v2533_v40 = vmul.f32 %v3621_v34, %v7907_v24  ;;  %v7923_v63 = vld [vmem:[#allocation54_spill] sm:$0xff]  ;;  %v6712_v15 = vld [vmem:[%s4220_s21 + $0x1f8] sm:$0xff]  ;;  %v2579_v34 = vadd.f32 %v2532_v3, %v2531_v32  ;;  %v2216_v49 = vld [vmem:[#allocation2 + $0x12] sm:$0x1] }
 0x1f8   : > { %v2351_v61 = vmul.f32 %v3622_v55, %v7923_v63  ;;  %v2396_v54 = vadd.f32 %v2395_v57, %v2349_v0  ;;  %v2442_v62 = vmul.f32 %v6712_v15, %v3623_v5  ;;  %v2487_v46 = vadd.f32 %v2486_v47, %v2440_v16  ;;  %v3625_v6 = vld [vmem:[%s4226_s26 + $0x918] sm:$0xff]  ;;  %v3626_v55 = vld [vmem:[%s4226_s26 + $0x6e8] sm:$0xff]  ;;  %v3627_v63 = vld [vmem:[%s4226_s26 + $0x800] sm:$0xff] }
 0x1f9   : > { %v2214_v28 = vrot.slane %v2213_v31, 1  ;;  %v2305_v8 = vadd.f32 %v2304_v10, %v6647_v2  ;;  %v2534_v44 = vmul.f32 %v3625_v6, %v6450_v29  ;;  %v2352_v0 = vmul.f32 %v3626_v55, %v7910_v58  ;;  %v6722_v24 = vld [vmem:[%s4220_s21 + $0x200] sm:$0xff]  ;;  %v3630_v6 = vld [vmem:[%s4226_s26 + $0x6f0] sm:$0xff]  ;;  %v6732_v55 = vld [vmem:[%s4220_s21 + $0x208] sm:$0xff] }
 0x1fa   : > { %v2397_v57 = vadd.f32 %v2396_v54, %v2350_v4  ;;  %v2443_v16 = vmul.f32 %v6722_v24, %v3627_v63  ;;  %v2488_v47 = vadd.f32 %v2487_v46, %v2441_v19  ;;  %v3629_v5 = vld [vmem:[%s4226_s26 + $0x920] sm:$0xff]  ;;  %v2580_v3 = vadd.f32 %v2579_v34, %v2533_v40  ;;  %v3631_v4 = vld [vmem:[%s4226_s26 + $0x808] sm:$0xff]  ;;  %v3634_v34 = vld [vmem:[%s4226_s26 + $0x6f8] sm:$0xff] }
 0x1fb   : > { %v2215_v2 = vadd.f32 %v2214_v28, %v2213_v31  ;;  %v2306_v10 = vadd.f32 %v2305_v8, %v6651_v13  ;;  %v2535_v32 = vmul.f32 %v3629_v5, %v6459_v26  ;;  %v2353_v58 = vmul.f32 %v3630_v6, %v7884_v35  ;;  %v3633_v28 = vld [vmem:[%s4226_s26 + $0x928] sm:$0xff]  ;;  %v6742_v63 = vld [vmem:[%s4220_s21 + $0x210] sm:$0xff]  ;;  %v3640_v6 = vld [vmem:[%s4226_s26 + $0x818] sm:$0xff] }
 0x1fc   : > { %v2398_v54 = vadd.f32 %v2397_v57, %v2351_v61  ;;  %v2444_v19 = vmul.f32 %v6732_v55, %v3631_v4  ;;  %v2489_v31 = vadd.f32 %v2488_v47, %v2442_v62  ;;  %v2536_v40 = vmul.f32 %v3633_v28, %v6468_v23  ;;  %v3635_v57 = vld [vmem:[%s4226_s26 + $0x810] sm:$0xff]  ;;  %v3644_v28 = vld [vmem:[%s4226_s26 + $0x708] sm:$0xff] }
 0x1fd   : > { %v2217_v46 = vadd.f32 %v2216_v49, %v2215_v2  ;;  %v2307_v13 = vadd.f32 %v2306_v10, %v6662_v14  ;;  %v2581_v8 = vadd.f32 %v2580_v3, %v2534_v44  ;;  %v2354_v35 = vmul.f32 %v3634_v34, %v6181_v43  ;;  %v3637_v14 = vld [vmem:[%s4226_s26 + $0x5f0] sm:$0xff]  ;;  %v3639_v10 = vld [vmem:[%s4226_s26 + $0x700] sm:$0xff] }
 0x1fe   : > { %v2399_v61 = vadd.f32 %v2398_v54, %v2352_v0  ;;  %v2445_v62 = vmul.f32 %v6742_v63, %v3635_v57  ;;  %v2490_v49 = vadd.f32 %v2489_v31, %v2443_v16  ;;  %v2265_v47 = vmul.f32 %v3637_v14, %v6349_v33  ;;  %v3638_v2 = vld [vmem:[%s4226_s26 + $0x930] sm:$0xff]  ;;  %v6754_v16 = vld [vmem:[%s4220_s21 + $0x218] sm:$0xff]  ;;  %v3645_v34 = vld [vmem:[%s4226_s26 + $0x820] sm:$0xff] }
 0x1ff   : > { %2218 = vst [vmem:[#allocation2 + $0x12] sm:$0x1] %v2217_v46  ;;  %v2308_v44 = vadd.f32 %v2307_v13, %v6666_v27  ;;  %v2537_v43 = vmul.f32 %v3638_v2, %v6480_v21  ;;  %v2582_v0 = vadd.f32 %v2581_v8, %v2535_v32  ;;  %v2355_v5 = vmul.f32 %v3639_v10, %v6190_v50  ;;  %v3642_v31 = vld [vmem:[%s4226_s26 + $0x5f8] sm:$0xff]  ;;  %v3650_v10 = vld [vmem:[%s4226_s26 + $0x828] sm:$0xff] }
 0x200   : > { %v2400_v3 = vadd.f32 %v2399_v61, %v2353_v58  ;;  %v2446_v54 = vmul.f32 %v6754_v16, %v3640_v6  ;;  %v2491_v4 = vadd.f32 %v2490_v49, %v2444_v19  ;;  %v2266_v27 = vmul.f32 %v3642_v31, %v6361_v42  ;;  %v3643_v32 = vld [vmem:[%s4226_s26 + $0x938] sm:$0xff]  ;;  %v6766_v61 = vld [vmem:[%s4220_s21 + $0x220] sm:$0xff]  ;;  %v3647_v49 = vld [vmem:[%s4226_s26 + $0x710] sm:$0xff] }
 0x201   : > { %v2309_v46 = vadd.f32 %v2308_v44, %v6677_v7  ;;  %v2538_v13 = vmul.f32 %v3643_v32, %v6491_v51  ;;  %v2583_v50 = vadd.f32 %v2582_v0, %v2536_v40  ;;  %v2356_v58 = vmul.f32 %v3644_v28, %v7911_v12  ;;  %v3648_v40 = vld [vmem:[%s4226_s26 + $0x940] sm:$0xff]  ;;  %v3649_v2 = vld [vmem:[%s4226_s26 + $0x718] sm:$0xff]  ;;  %v6790_v28 = vld [vmem:[%s4220_s21 + $0x230] sm:$0xff] }
 0x202   : > { %v2401_v8 = vadd.f32 %v2400_v3, %v2354_v35  ;;  %v2447_v19 = vmul.f32 %v6766_v61, %v3645_v34  ;;  %v2492_v57 = vadd.f32 %v2491_v4, %v2445_v62  ;;  %v2357_v14 = vmul.f32 %v3647_v49, %v6211_v9  ;;  %v6778_v3 = vld [vmem:[%s4220_s21 + $0x228] sm:$0xff]  ;;  %v3652_v6 = vld [vmem:[%s4226_s26 + $0x720] sm:$0xff] }
 0x203   : > { %v2310_v7 = vadd.f32 %v2309_v46, %v6681_v17  ;;  %v2539_v44 = vmul.f32 %v3648_v40, %v6502_v59  ;;  %v2584_v12 = vadd.f32 %v2583_v50, %v2537_v43  ;;  %v2358_v35 = vmul.f32 %v3649_v2, %v6223_v25  ;;  %v3653_v43 = vld [vmem:[%s4226_s26 + $0x948] sm:$0xff]  ;;  %v3655_v50 = vld [vmem:[%s4226_s26 + $0x830] sm:$0xff]  ;;  %v3660_v40 = vld [vmem:[%s4226_s26 + $0x838] sm:$0xff] }
 0x204   : > { %v2402_v0 = vadd.f32 %v2401_v8, %v2355_v5  ;;  %v2448_v17 = vmul.f32 %v6778_v3, %v3650_v10  ;;  %v2493_v62 = vadd.f32 %v2492_v57, %v2446_v54  ;;  %v2359_v4 = vmul.f32 %v3652_v6, %v6235_v48  ;;  %v3654_v46 = vld [vmem:[%s4226_s26 + $0x728] sm:$0xff]  ;;  %v3657_v48 = vld [vmem:[%s4226_s26 + $0x730] sm:$0xff]  ;;  %v3662_v2 = vld [vmem:[%s4226_s26 + $0x740] sm:$0xff] }
 0x205   : > { %v2311_v9 = vadd.f32 %v2310_v7, %v6703_v1  ;;  %v2540_v31 = vmul.f32 %v3653_v43, %v6629_v53  ;;  %v2585_v25 = vadd.f32 %v2584_v12, %v2538_v13  ;;  %v2360_v5 = vmul.f32 %v3654_v46, %v7888_v45  ;;  %v3658_v57 = vld [vmem:[%s4226_s26 + $0x950] sm:$0xff]  ;;  %v3659_v45 = vld [vmem:[%s4226_s26 + $0x738] sm:$0xff]  ;;  %v3665_v6 = vld [vmem:[%s4226_s26 + $0x840] sm:$0xff] }
 0x206   : > { %v2403_v32 = vadd.f32 %v2402_v0, %v2356_v58  ;;  %v2449_v1 = vmul.f32 %v6790_v28, %v3655_v50  ;;  %v2494_v54 = vadd.f32 %v2493_v62, %v2447_v19  ;;  %v2361_v34 = vmul.f32 %v3657_v48, %v6248_v60  ;;  %v6803_v12 = vld [vmem:[%s4220_s21 + $0x238] sm:$0xff]  ;;  %v3664_v62 = vld [vmem:[%s4226_s26 + $0x748] sm:$0xff]  ;;  %v3668_v46 = vld [vmem:[%s4226_s26 + $0x960] sm:$0xff] }
 0x207   : > { %v2312_v8 = vadd.f32 %v2311_v9, %v2265_v47  ;;  %v2541_v13 = vmul.f32 %v3658_v57, %v6642_v20  ;;  %v2586_v7 = vadd.f32 %v2585_v25, %v2539_v44  ;;  %v6799_v58 = vmul.f32 %v3659_v45, %v7890_v37  ;;  %v3663_v44 = vld [vmem:[%s4226_s26 + $0x958] sm:$0xff]  ;;  %v3667_v25 = vld [vmem:[%s4226_s26 + $0x750] sm:$0xff] }
 0x208   : > { %v2404_v49 = vadd.f32 %v2403_v32, %v2357_v14  ;;  %v2450_v47 = vmul.f32 %v6803_v12, %v3660_v40  ;;  %v2495_v19 = vadd.f32 %v2494_v54, %v2448_v17  ;;  %v6808_v0 = vmul.f32 %v3662_v2, %v6262_v39  ;;  %v6818_v17 = vld [vmem:[%s4220_s21 + $0x240] sm:$0xff]  ;;  %v3669_v50 = vld [vmem:[%s4226_s26 + $0x758] sm:$0xff]  ;;  %v6838_v45 = vld [vmem:[%s4220_s21 + $0x250] sm:$0xff] }
 0x209   : > { %v2313_v60 = vadd.f32 %v2312_v8, %v2266_v27  ;;  %v2542_v37 = vmul.f32 %v3663_v44, %v6657_v22  ;;  %v2587_v10 = vadd.f32 %v2586_v7, %v2540_v31  ;;  %v6814_v14 = vmul.f32 %v3664_v62, %v7891_v36  ;;  %v3670_v8 = vld [vmem:[%s4226_s26 + $0x848] sm:$0xff]  ;;  %v3672_v7 = vld [vmem:[%s4226_s26 + $0x850] sm:$0xff]  ;;  %7924 = vst [vmem:[#allocation56_spill] sm:$0xff] %v6838_v45  ;;  %v3675_v2 = vld [vmem:[%s4226_s26 + $0xa80] sm:$0xff] }
 0x20a   : > { %v2405_v9 = vadd.f32 %v2404_v49, %v2358_v35  ;;  %v2451_v27 = vmul.f32 %v6818_v17, %v3665_v6  ;;  %v2496_v39 = vadd.f32 %v2495_v19, %v2449_v1  ;;  %v6823_v31 = vmul.f32 %v3667_v25, %v7913_v56  ;;  %v6833_v1 = vld [vmem:[%s4220_s21 + $0x248] sm:$0xff]  ;;  %v3677_v62 = vld [vmem:[%s4226_s26 + $0x760] sm:$0xff]  ;;  %v6855_v25 = vld [vmem:[%s4220_s21 + $0x258] sm:$0xff] }
 0x20b   : > { %v2314_v43 = vrot.slane %v2313_v60, 4  ;;  %v2543_v36 = vmul.f32 %v3668_v46, %v6672_v41  ;;  %v2588_v32 = vadd.f32 %v2587_v10, %v2541_v13  ;;  %v6829_v35 = vmul.f32 %v3669_v50, %v7916_v18  ;;  %v3674_v49 = vld [vmem:[%s4226_s26 + $0x968] sm:$0xff]  ;;  %7926 = vst [vmem:[#allocation32_spill] sm:$0xff] %v6855_v25  ;;  %v3681_v50 = vld [vmem:[%s4226_s26 + $0xa90] sm:$0xff] }
 0x20c   : > { %v2406_v54 = vadd.f32 %v2405_v9, %v2359_v4  ;;  %v2452_v48 = vmul.f32 %v6833_v1, %v3670_v8  ;;  %v2497_v57 = vadd.f32 %v2496_v39, %v2450_v47  ;;  %v2453_v13 = vmul.f32 %v6838_v45, %v3672_v7  ;;  %v3676_v47 = vld [vmem:[%s4226_s26 + $0xa88] sm:$0xff]  ;;  %v7925_v9 = vld [vmem:[#allocation44_spill] sm:$0xff]  ;;  %v3682_v7 = vld [vmem:[%s4226_s26 + $0x860] sm:$0xff] }
 0x20d   : > { %v2315_v56 = vadd.f32 %v2314_v43, %v2313_v60  ;;  %v2544_v18 = vmul.f32 %v3674_v49, %v6687_v30  ;;  %v2589_v4 = vadd.f32 %v2588_v32, %v2542_v37  ;;  %v2635_v44 = vmul.f32 %v3675_v2, %v7918_v52  ;;  %v3678_v39 = vld [vmem:[%s4226_s26 + $0x970] sm:$0xff]  ;;  %v3679_v43 = vld [vmem:[%s4226_s26 + $0x858] sm:$0xff]  ;;  %v6862_v49 = vld [vmem:[%s4220_s21 + $0x260] sm:$0xff] }
 0x20e   : > { %v2407_v40 = vadd.f32 %v2406_v54, %v2360_v5  ;;  %v2498_v19 = vadd.f32 %v2497_v57, %v2451_v27  ;;  %v2636_v60 = vmul.f32 %v3676_v47, %v7919_v38  ;;  %v6849_v6 = vmul.f32 %v3677_v62, %v7925_v9  ;;  %v7927_v54 = vld [vmem:[#allocation43_spill] sm:$0xff]  ;;  %7928 = vst [vmem:[#allocation55_spill] sm:$0xff] %v6862_v49 }
 0x20f   : > { %v2316_v10 = vrot.slane %v2315_v56, 2  ;;  %v2545_v37 = vmul.f32 %v3678_v39, %v6698_v11  ;;  %v2590_v5 = vadd.f32 %v2589_v4, %v2543_v36  ;;  %v2454_v46 = vmul.f32 %v6855_v25, %v3679_v43  ;;  %v6872_v9 = vld [vmem:[%s4220_s21 + $0x268] sm:$0xff]  ;;  %v3688_v43 = vld [vmem:[%s4226_s26 + $0x980] sm:$0xff] }
 0x210   : > { %v2408_v27 = vadd.f32 %v2407_v40, %v2361_v34  ;;  %v2499_v32 = vadd.f32 %v2498_v19, %v2452_v48  ;;  %v2637_v8 = vmul.f32 %v3681_v50, %v7927_v54  ;;  %v2455_v36 = vmul.f32 %v6862_v49, %v3682_v7  ;;  %v3684_v34 = vld [vmem:[%s4226_s26 + $0x978] sm:$0xff]  ;;  %v3690_v7 = vld [vmem:[%s4226_s26 + $0x870] sm:$0xff] }
 0x211   : > { %v2317_v57 = vadd.f32 %v2316_v10, %v2315_v56  ;;  %v2546_v4 = vmul.f32 %v3684_v34, %v6712_v15  ;;  %v2591_v40 = vadd.f32 %v2590_v5, %v2544_v18  ;;  %v3685_v19 = vld [vmem:[%s4226_s26 + $0xa98] sm:$0xff]  ;;  %v2683_v62 = vadd.f32 %v2636_v60, %v2635_v44  ;;  %v3686_v10 = vld [vmem:[%s4226_s26 + $0x868] sm:$0xff]  ;;  %v6882_v34 = vld [vmem:[%s4220_s21 + $0x270] sm:$0xff] }
 0x212   : > { %v2409_v2 = vadd.f32 %v2408_v27, %v6799_v58  ;;  %v2500_v48 = vadd.f32 %v2499_v32, %v2453_v13  ;;  %v2638_v47 = vmul.f32 %v3685_v19, %v6450_v29  ;;  %v2456_v39 = vmul.f32 %v6872_v9, %v3686_v10  ;;  %v2320_v58 = vld [vmem:[#allocation2 + $0x13] sm:$0x1]  ;;  %v3689_v32 = vld [vmem:[%s4226_s26 + $0xaa0] sm:$0xff]  ;;  %v3692_v10 = vld [vmem:[%s4226_s26 + $0x988] sm:$0xff] }
 0x213   : > { %v2318_v56 = vrot.slane %v2317_v57, 1  ;;  %v2547_v18 = vmul.f32 %v3688_v43, %v6722_v24  ;;  %v2592_v5 = vadd.f32 %v2591_v40, %v2545_v37  ;;  %v2639_v44 = vmul.f32 %v3689_v32, %v6459_v26  ;;  %v3696_v32 = vld [vmem:[%s4226_s26 + $0x990] sm:$0xff] }
 0x214   : > { %v2410_v13 = vadd.f32 %v2409_v2, %v6808_v0  ;;  %v2501_v27 = vadd.f32 %v2500_v48, %v2454_v46  ;;  %v2684_v60 = vadd.f32 %v2683_v62, %v2637_v8  ;;  %v2457_v19 = vmul.f32 %v6882_v34, %v3690_v7  ;;  %v3693_v2 = vld [vmem:[%s4226_s26 + $0xaa8] sm:$0xff]  ;;  %v3694_v62 = vld [vmem:[%s4226_s26 + $0x878] sm:$0xff]  ;;  %v3699_v7 = vld [vmem:[%s4226_s26 + $0x880] sm:$0xff] }
 0x215   : > { %v2319_v50 = vadd.f32 %v2318_v56, %v2317_v57  ;;  %v2548_v37 = vmul.f32 %v3692_v10, %v6732_v55  ;;  %v2593_v40 = vadd.f32 %v2592_v5, %v2546_v4  ;;  %v2640_v48 = vmul.f32 %v3693_v2, %v6468_v23  ;;  %v6892_v56 = vld [vmem:[%s4220_s21 + $0x278] sm:$0xff]  ;;  %v6904_v10 = vld [vmem:[%s4220_s21 + $0x280] sm:$0xff] }
 0x216   : > { %v2411_v0 = vadd.f32 %v2410_v13, %v6814_v14  ;;  %v2502_v46 = vadd.f32 %v2501_v27, %v2455_v36  ;;  %v2685_v8 = vadd.f32 %v2684_v60, %v2638_v47  ;;  %v2458_v43 = vmul.f32 %v6892_v56, %v3694_v62  ;;  %v3697_v13 = vld [vmem:[%s4226_s26 + $0xab0] sm:$0xff]  ;;  %v3698_v27 = vld [vmem:[%s4226_s26 + $0x768] sm:$0xff]  ;;  %v7929_v60 = vld [vmem:[#allocation45_spill] sm:$0xff] }
 0x217   : > { %v2321_v57 = vadd.f32 %v2320_v58, %v2319_v50  ;;  %v2549_v4 = vmul.f32 %v3696_v32, %v6742_v63  ;;  %v2594_v5 = vadd.f32 %v2593_v40, %v2547_v18  ;;  %v2641_v47 = vmul.f32 %v3697_v13, %v6480_v21  ;;  %v3704_v32 = vld [vmem:[%s4226_s26 + $0x888] sm:$0xff] }
 0x218   : > { %v2412_v14 = vadd.f32 %v2411_v0, %v6823_v31  ;;  %v2503_v36 = vadd.f32 %v2502_v46, %v2456_v39  ;;  %v2686_v58 = vadd.f32 %v2685_v8, %v2639_v44  ;;  %v2368_v50 = vmul.f32 %v3698_v27, %v7929_v60  ;;  %v3701_v31 = vld [vmem:[%s4226_s26 + $0x998] sm:$0xff]  ;;  %v6916_v13 = vld [vmem:[%s4220_s21 + $0x288] sm:$0xff] }
 0x219   : > { %2322 = vst [vmem:[#allocation2 + $0x13] sm:$0x1] %v2321_v57  ;;  %v2459_v18 = vmul.f32 %v6904_v10, %v3699_v7  ;;  %v2550_v39 = vmul.f32 %v3701_v31, %v6754_v16  ;;  %v2595_v40 = vadd.f32 %v2594_v5, %v2548_v37  ;;  %v3702_v46 = vld [vmem:[%s4226_s26 + $0xab8] sm:$0xff]  ;;  %v3703_v57 = vld [vmem:[%s4226_s26 + $0x770] sm:$0xff]  ;;  %v2460_v37 = vmul.f32 %v6916_v13, %v3704_v32  ;;  %v3706_v5 = vld [vmem:[%s4226_s26 + $0x9a0] sm:$0xff] }
 0x21a   : > { %v2413_v0 = vadd.f32 %v2412_v14, %v6829_v35  ;;  %v2504_v44 = vadd.f32 %v2503_v36, %v2457_v19  ;;  %v2642_v2 = vmul.f32 %v3702_v46, %v6491_v51  ;;  %v2687_v8 = vadd.f32 %v2686_v58, %v2640_v48  ;;  %v3707_v48 = vld [vmem:[%s4226_s26 + $0xac0] sm:$0xff]  ;;  %v3708_v27 = vld [vmem:[%s4226_s26 + $0x778] sm:$0xff]  ;;  %v3709_v7 = vld [vmem:[%s4226_s26 + $0x890] sm:$0xff] }
 0x21b   : > { %v2369_v62 = vmul.f32 %v3703_v57, %v6349_v33  ;;  %v2551_v35 = vmul.f32 %v3706_v5, %v6766_v61  ;;  %v2596_v19 = vadd.f32 %v2595_v40, %v2549_v4  ;;  %v2643_v58 = vmul.f32 %v3707_v48, %v6502_v59  ;;  %v6928_v31 = vld [vmem:[%s4220_s21 + $0x290] sm:$0xff]  ;;  %v3711_v40 = vld [vmem:[%s4226_s26 + $0x9a8] sm:$0xff]  ;;  %v6937_v57 = vld [vmem:[%s4220_s21 + $0x298] sm:$0xff] }
 0x21c   : > { %v2414_v14 = vadd.f32 %v2413_v0, %v6849_v6  ;;  %v2505_v36 = vadd.f32 %v2504_v44, %v2458_v43  ;;  %v2688_v33 = vadd.f32 %v2687_v8, %v2641_v47  ;;  %v2370_v60 = vmul.f32 %v3708_v27, %v6361_v42  ;;  %v3712_v46 = vld [vmem:[%s4226_s26 + $0xac8] sm:$0xff]  ;;  %v3713_v42 = vld [vmem:[%s4226_s26 + $0x898] sm:$0xff]  ;;  %v3715_v5 = vld [vmem:[%s4226_s26 + $0x8a0] sm:$0xff] }
 0x21d   : > { %v2461_v4 = vmul.f32 %v6928_v31, %v3709_v7  ;;  %v2552_v6 = vmul.f32 %v3711_v40, %v6778_v3  ;;  %v2597_v43 = vadd.f32 %v2596_v19, %v2550_v39  ;;  %v2644_v47 = vmul.f32 %v3712_v46, %v6629_v53  ;;  %v6942_v48 = vld [vmem:[%s4220_s21 + $0x2a0] sm:$0xff]  ;;  %v3719_v7 = vld [vmem:[%s4226_s26 + $0x8a8] sm:$0xff] }
 0x21e   : > { %v2415_v0 = vadd.f32 %v2414_v14, %v2368_v50  ;;  %v2506_v44 = vadd.f32 %v2505_v36, %v2459_v18  ;;  %v2689_v8 = vadd.f32 %v2688_v33, %v2642_v2  ;;  %v2462_v32 = vmul.f32 %v6937_v57, %v3713_v42  ;;  %v3717_v18 = vld [vmem:[%s4226_s26 + $0x9b0] sm:$0xff]  ;;  %v6951_v40 = vld [vmem:[%s4220_s21 + $0x2a8] sm:$0xff] }
 0x21f   : > { %v2463_v50 = vmul.f32 %v6942_v48, %v3715_v5  ;;  %v2553_v39 = vmul.f32 %v3717_v18, %v6790_v28  ;;  %v2598_v19 = vadd.f32 %v2597_v43, %v2551_v35  ;;  %v3718_v36 = vld [vmem:[%s4226_s26 + $0xad0] sm:$0xff]  ;;  %7930 = vst [vmem:[#allocation60_spill] sm:$0xff] %v6951_v40  ;;  %v2464_v46 = vmul.f32 %v6951_v40, %v3719_v7  ;;  %v6965_v7 = vld [vmem:[%s4220_s21 + $0x2b8] sm:$0xff] }
 0x220   : > { %v2416_v14 = vadd.f32 %v2415_v0, %v2369_v62  ;;  %v2507_v2 = vadd.f32 %v2506_v44, %v2460_v37  ;;  %v2645_v33 = vmul.f32 %v3718_v36, %v6642_v20  ;;  %v2690_v27 = vadd.f32 %v2689_v8, %v2643_v58  ;;  %v3721_v42 = vld [vmem:[%s4226_s26 + $0x8b0] sm:$0xff]  ;;  %v3723_v37 = vld [vmem:[%s4226_s26 + $0x9b8] sm:$0xff]  ;;  %7932 = vst [vmem:[#allocation33_spill] sm:$0xff] %v6965_v7 }
 0x221   : > { %v6956_v5 = vld [vmem:[%s4220_s21 + $0x2b0] sm:$0xff]  ;;  %v2554_v35 = vmul.f32 %v3723_v37, %v6803_v12  ;;  %v2599_v43 = vadd.f32 %v2598_v19, %v2552_v6  ;;  %v3724_v44 = vld [vmem:[%s4226_s26 + $0xad8] sm:$0xff] }
 0x222   : > { %7931 = vst [vmem:[#allocation27_spill] sm:$0xff] %v6956_v5  ;;  %v2465_v62 = vmul.f32 %v6956_v5, %v3721_v42  ;;  %v2417_v0 = vadd.f32 %v2416_v14, %v2370_v60  ;;  %v2508_v58 = vadd.f32 %v2507_v2, %v2461_v4  ;;  %v2646_v8 = vmul.f32 %v3724_v44, %v6657_v22  ;;  %v3725_v36 = vld [vmem:[%s4226_s26 + $0x8b8] sm:$0xff]  ;;  %v3727_v42 = vld [vmem:[%s4226_s26 + $0x8c0] sm:$0xff]  ;;  %v3731_v44 = vld [vmem:[%s4226_s26 + $0x8c8] sm:$0xff] }
 0x223   : > { %v2691_v18 = vadd.f32 %v2690_v27, %v2644_v47  ;;  %v2466_v40 = vmul.f32 %v6965_v7, %v3725_v36  ;;  %v6970_v5 = vld [vmem:[%s4220_s21 + $0x2c0] sm:$0xff]  ;;  %v2600_v19 = vadd.f32 %v2599_v43, %v2553_v39  ;;  %v6981_v36 = vld [vmem:[%s4220_s21 + $0x2c8] sm:$0xff] }
 0x224   : > { %7933 = vst [vmem:[#allocation61_spill] sm:$0xff] %v6970_v5  ;;  %v6973_v60 = vmul.f32 %v6970_v5, %v3727_v42  ;;  %v3729_v4 = vld [vmem:[%s4226_s26 + $0x9c0] sm:$0xff]  ;;  %v2418_v47 = vrot.slane %v2417_v0, 4  ;;  %v2509_v14 = vadd.f32 %v2508_v58, %v2462_v32  ;;  %7934 = vst [vmem:[#allocation47_spill] sm:$0xff] %v6981_v36  ;;  %v6984_v7 = vmul.f32 %v6981_v36, %v3731_v44  ;;  %v3733_v42 = vld [vmem:[%s4226_s26 + $0x8d0] sm:$0xff] }
 0x225   : > { %v2555_v6 = vmul.f32 %v3729_v4, %v6818_v17  ;;  %v3730_v2 = vld [vmem:[%s4226_s26 + $0xae0] sm:$0xff]  ;;  %v2692_v37 = vadd.f32 %v2691_v18, %v2645_v33  ;;  %v6988_v5 = vld [vmem:[%s4220_s21 + $0x2d0] sm:$0xff]  ;;  %v3735_v32 = vld [vmem:[%s4226_s26 + $0x9c8] sm:$0xff]  ;;  %v2601_v58 = vadd.f32 %v2600_v19, %v2554_v35 }
 0x226   : > { %v2647_v27 = vmul.f32 %v3730_v2, %v6672_v41  ;;  %7935 = vst [vmem:[#allocation35_spill] sm:$0xff] %v6988_v5  ;;  %v6991_v39 = vmul.f32 %v6988_v5, %v3733_v42  ;;  %v2556_v43 = vmul.f32 %v3735_v32, %v6833_v1  ;;  %v2419_v33 = vadd.f32 %v2418_v47, %v2417_v0  ;;  %v3736_v4 = vld [vmem:[%s4226_s26 + $0xae8] sm:$0xff]  ;;  %v3737_v36 = vld [vmem:[%s4226_s26 + $0x9d0] sm:$0xff]  ;;  %v3739_v32 = vld [vmem:[%s4226_s26 + $0xc00] sm:$0xff] }
 0x227   : > { %v2510_v18 = vadd.f32 %v2509_v14, %v2463_v50  ;;  %v2648_v2 = vmul.f32 %v3736_v4, %v6687_v30  ;;  %v2693_v44 = vadd.f32 %v2692_v37, %v2646_v8  ;;  %v2557_v41 = vmul.f32 %v3737_v36, %v6838_v45  ;;  %v3738_v42 = vld [vmem:[%s4226_s26 + $0xaf0] sm:$0xff]  ;;  %v3740_v47 = vld [vmem:[%s4226_s26 + $0xc08] sm:$0xff]  ;;  %v3741_v14 = vld [vmem:[%s4226_s26 + $0x8d8] sm:$0xff] }
 0x228   : > { %v2602_v22 = vadd.f32 %v2601_v58, %v2555_v6  ;;  %v2649_v5 = vmul.f32 %v3738_v42, %v6698_v11  ;;  %v2739_v35 = vmul.f32 %v3739_v32, %v7918_v52  ;;  %v2420_v0 = vrot.slane %v2419_v33, 2  ;;  %v7007_v37 = vld [vmem:[%s4220_s21 + $0x2d8] sm:$0xff]  ;;  %v3746_v32 = vld [vmem:[%s4226_s26 + $0x9e0] sm:$0xff] }
 0x229   : > { %v2511_v50 = vadd.f32 %v2510_v18, %v2464_v46  ;;  %v2694_v19 = vadd.f32 %v2693_v44, %v2647_v27  ;;  %v2740_v8 = vmul.f32 %v3740_v47, %v7919_v38  ;;  %7936 = vst [vmem:[#allocation26_spill] sm:$0xff] %v7007_v37  ;;  %v7010_v6 = vmul.f32 %v7007_v37, %v3741_v14  ;;  %v3743_v36 = vld [vmem:[%s4226_s26 + $0x9d8] sm:$0xff]  ;;  %v3745_v38 = vld [vmem:[%s4226_s26 + $0xc10] sm:$0xff]  ;;  %v3747_v37 = vld [vmem:[%s4226_s26 + $0xb00] sm:$0xff] }
 0x22a   : > { %v2558_v58 = vmul.f32 %v3743_v36, %v6855_v25  ;;  %v2603_v52 = vadd.f32 %v2602_v22, %v2556_v43  ;;  %v3744_v4 = vld [vmem:[%s4226_s26 + $0xaf8] sm:$0xff]  ;;  %v2421_v27 = vadd.f32 %v2420_v0, %v2419_v33  ;;  %v2741_v42 = vmul.f32 %v3745_v38, %v7927_v54  ;;  %v2424_v0 = vld [vmem:[#allocation2 + $0x14] sm:$0x1]  ;;  %v3749_v54 = vld [vmem:[%s4226_s26 + $0x9e8] sm:$0xff] }
 0x22b   : > { %v2650_v46 = vmul.f32 %v3744_v4, %v6712_v15  ;;  %v2512_v18 = vadd.f32 %v2511_v50, %v2465_v62  ;;  %v2695_v44 = vadd.f32 %v2694_v19, %v2648_v2  ;;  %v2559_v47 = vmul.f32 %v3746_v32, %v6862_v49  ;;  %v3748_v22 = vld [vmem:[%s4226_s26 + $0xc18] sm:$0xff]  ;;  %v3750_v38 = vld [vmem:[%s4226_s26 + $0xb08] sm:$0xff] }
 0x22c   : > { %v2604_v14 = vadd.f32 %v2603_v52, %v2557_v41  ;;  %v2651_v36 = vmul.f32 %v3747_v37, %v6722_v24  ;;  %v2742_v43 = vmul.f32 %v3748_v22, %v6450_v29  ;;  %v2422_v4 = vrot.slane %v2421_v27, 1  ;;  %v3751_v52 = vld [vmem:[%s4226_s26 + $0xc20] sm:$0xff] }
 0x22d   : > { %v2513_v62 = vadd.f32 %v2512_v18, %v2466_v40  ;;  %v2696_v33 = vadd.f32 %v2695_v44, %v2649_v5  ;;  %v2787_v2 = vadd.f32 %v2740_v8, %v2739_v35  ;;  %v2560_v50 = vmul.f32 %v3749_v54, %v6872_v9  ;;  %v3752_v8 = vld [vmem:[%s4226_s26 + $0x9f0] sm:$0xff] }
 0x22e   : > { %v2605_v19 = vadd.f32 %v2604_v14, %v2558_v58  ;;  %v2652_v41 = vmul.f32 %v3750_v38, %v6732_v55  ;;  %v2743_v37 = vmul.f32 %v3751_v52, %v6459_v26  ;;  %v2423_v29 = vadd.f32 %v2422_v4, %v2421_v27  ;;  %v3753_v58 = vld [vmem:[%s4226_s26 + $0xb10] sm:$0xff]  ;;  %v3754_v14 = vld [vmem:[%s4226_s26 + $0xc28] sm:$0xff] }
 0x22f   : > { %v2514_v40 = vadd.f32 %v2513_v62, %v6973_v60  ;;  %v2697_v5 = vadd.f32 %v2696_v33, %v2650_v46  ;;  %v2788_v35 = vadd.f32 %v2787_v2, %v2741_v42  ;;  %v2561_v18 = vmul.f32 %v3752_v8, %v6882_v34  ;;  %v3755_v46 = vld [vmem:[%s4226_s26 + $0x8e0] sm:$0xff]  ;;  %v3757_v62 = vld [vmem:[%s4226_s26 + $0x9f8] sm:$0xff]  ;;  %v3760_v38 = vld [vmem:[%s4226_s26 + $0x8e8] sm:$0xff] }
 0x230   : > { %v2606_v44 = vadd.f32 %v2605_v19, %v2559_v47  ;;  %v2653_v32 = vmul.f32 %v3753_v58, %v6742_v63  ;;  %v2744_v22 = vmul.f32 %v3754_v14, %v6468_v23  ;;  %v2425_v26 = vadd.f32 %v2424_v0, %v2423_v29  ;;  %v7040_v42 = vld [vmem:[%s4220_s21 + $0x2e0] sm:$0xff]  ;;  %v3758_v23 = vld [vmem:[%s4226_s26 + $0xb18] sm:$0xff]  ;;  %v7052_v52 = vld [vmem:[%s4220_s21 + $0x2e8] sm:$0xff] }
 0x231   : > { %v2515_v27 = vadd.f32 %v2514_v40, %v6984_v7  ;;  %v2698_v4 = vadd.f32 %v2697_v5, %v2651_v36  ;;  %v2789_v60 = vadd.f32 %v2788_v35, %v2742_v43  ;;  %v2471_v47 = vmul.f32 %v7040_v42, %v3755_v46  ;;  %v3759_v43 = vld [vmem:[%s4226_s26 + $0xc30] sm:$0xff]  ;;  %v3762_v29 = vld [vmem:[%s4226_s26 + $0xa00] sm:$0xff]  ;;  %v3764_v8 = vld [vmem:[%s4226_s26 + $0xc38] sm:$0xff] }
 0x232   : > { %v2562_v33 = vmul.f32 %v3757_v62, %v6892_v56  ;;  %v2607_v2 = vadd.f32 %v2606_v44, %v2560_v50  ;;  %v2654_v0 = vmul.f32 %v3758_v23, %v6754_v16  ;;  %2426 = vst [vmem:[#allocation2 + $0x14] sm:$0x1] %v2425_v26  ;;  %v2745_v54 = vmul.f32 %v3759_v43, %v6480_v21  ;;  %v3763_v35 = vld [vmem:[%s4226_s26 + $0xb20] sm:$0xff]  ;;  %v3765_v58 = vld [vmem:[%s4226_s26 + $0x8f0] sm:$0xff]  ;;  %v7075_v23 = vld [vmem:[%s4220_s21 + $0x2f8] sm:$0xff] }
 0x233   : > { %v2516_v7 = vadd.f32 %v2515_v27, %v6991_v39  ;;  %v2699_v36 = vadd.f32 %v2698_v4, %v2652_v41  ;;  %v2790_v19 = vadd.f32 %v2789_v60, %v2743_v37  ;;  %v2472_v50 = vmul.f32 %v7052_v52, %v3760_v38  ;;  %v7064_v14 = vld [vmem:[%s4220_s21 + $0x2f0] sm:$0xff]  ;;  %v3768_v60 = vld [vmem:[%s4226_s26 + $0xb28] sm:$0xff] }
 0x234   : > { %v2563_v40 = vmul.f32 %v3762_v29, %v6904_v10  ;;  %v2608_v5 = vadd.f32 %v2607_v2, %v2561_v18  ;;  %v2655_v39 = vmul.f32 %v3763_v35, %v6766_v61  ;;  %v2746_v37 = vmul.f32 %v3764_v8, %v6491_v51  ;;  %v3767_v18 = vld [vmem:[%s4226_s26 + $0xa08] sm:$0xff]  ;;  %v3769_v51 = vld [vmem:[%s4226_s26 + $0xc40] sm:$0xff]  ;;  %v3770_v2 = vld [vmem:[%s4226_s26 + $0x8f8] sm:$0xff] }
 0x235   : > { %v2517_v41 = vadd.f32 %v2516_v7, %v7010_v6  ;;  %v2700_v21 = vadd.f32 %v2699_v36, %v2653_v32  ;;  %v2791_v44 = vadd.f32 %v2790_v19, %v2744_v22  ;;  %v2473_v26 = vmul.f32 %v7064_v14, %v3765_v58  ;;  %v3772_v36 = vld [vmem:[%s4226_s26 + $0xa10] sm:$0xff]  ;;  %v3777_v8 = vld [vmem:[%s4226_s26 + $0xb38] sm:$0xff] }
 0x236   : > { %v2564_v27 = vmul.f32 %v3767_v18, %v6916_v13  ;;  %v2609_v4 = vadd.f32 %v2608_v5, %v2562_v33  ;;  %v2656_v6 = vmul.f32 %v3768_v60, %v6778_v3  ;;  %v2747_v22 = vmul.f32 %v3769_v51, %v6502_v59  ;;  %v3773_v19 = vld [vmem:[%s4226_s26 + $0xb30] sm:$0xff]  ;;  %v3774_v59 = vld [vmem:[%s4226_s26 + $0xc48] sm:$0xff]  ;;  %v3775_v5 = vld [vmem:[%s4226_s26 + $0xa18] sm:$0xff] }
 0x237   : > { %v2518_v32 = vadd.f32 %v2517_v41, %v2471_v47  ;;  %v2701_v46 = vadd.f32 %v2700_v21, %v2654_v0  ;;  %v2792_v62 = vadd.f32 %v2791_v44, %v2745_v54  ;;  %v2474_v7 = vmul.f32 %v7075_v23, %v3770_v2  ;;  %v3776_v41 = vld [vmem:[%s4226_s26 + $0xa20] sm:$0xff]  ;;  %v3778_v58 = vld [vmem:[%s4226_s26 + $0xc50] sm:$0xff] }
 0x238   : > { %v2565_v33 = vmul.f32 %v3772_v36, %v6928_v31  ;;  %v2610_v43 = vadd.f32 %v2609_v4, %v2563_v40  ;;  %v2657_v47 = vmul.f32 %v3773_v19, %v6790_v28  ;;  %v2748_v54 = vmul.f32 %v3774_v59, %v6629_v53  ;;  %v3779_v4 = vld [vmem:[%s4226_s26 + $0xa28] sm:$0xff]  ;;  %v7937_v60 = vld [vmem:[#allocation60_spill] sm:$0xff]  ;;  %v3781_v2 = vld [vmem:[%s4226_s26 + $0xb40] sm:$0xff] }
 0x239   : > { %v2519_v0 = vadd.f32 %v2518_v32, %v2472_v50  ;;  %v2702_v38 = vadd.f32 %v2701_v46, %v2655_v39  ;;  %v2793_v29 = vadd.f32 %v2792_v62, %v2746_v37  ;;  %v2566_v35 = vmul.f32 %v3775_v5, %v6937_v57  ;;  %v3780_v46 = vld [vmem:[%s4226_s26 + $0xa30] sm:$0xff]  ;;  %v7939_v19 = vld [vmem:[#allocation25_spill] sm:$0xff] }
 0x23a   : > { %v2567_v21 = vmul.f32 %v3776_v41, %v6942_v48  ;;  %v2611_v40 = vadd.f32 %v2610_v43, %v2564_v27  ;;  %v2658_v44 = vmul.f32 %v3777_v8, %v6803_v12  ;;  %v2749_v18 = vmul.f32 %v3778_v58, %v6642_v20  ;;  %v7938_v51 = vld [vmem:[#allocation27_spill] sm:$0xff]  ;;  %v3782_v43 = vld [vmem:[%s4226_s26 + $0xc58] sm:$0xff]  ;;  %v3784_v5 = vld [vmem:[%s4226_s26 + $0xa40] sm:$0xff] }
 0x23b   : > { %v2520_v50 = vadd.f32 %v2519_v0, %v2473_v26  ;;  %v2703_v39 = vadd.f32 %v2702_v38, %v2656_v6  ;;  %v2794_v37 = vadd.f32 %v2793_v29, %v2747_v22  ;;  %v2568_v32 = vmul.f32 %v3779_v4, %v7937_v60  ;;  %v3783_v38 = vld [vmem:[%s4226_s26 + $0xa38] sm:$0xff] }
 0x23c   : > { %v2569_v62 = vmul.f32 %v3780_v46, %v7938_v51  ;;  %v2612_v27 = vadd.f32 %v2611_v40, %v2565_v33  ;;  %v2659_v36 = vmul.f32 %v3781_v2, %v6818_v17  ;;  %v2750_v0 = vmul.f32 %v3782_v43, %v7939_v19  ;;  %v7940_v59 = vld [vmem:[#allocation33_spill] sm:$0xff]  ;;  %v3785_v40 = vld [vmem:[%s4226_s26 + $0xb48] sm:$0xff]  ;;  %v3788_v43 = vld [vmem:[%s4226_s26 + $0xa50] sm:$0xff] }
 0x23d   : > { %v2521_v26 = vadd.f32 %v2520_v50, %v2474_v7  ;;  %v2704_v6 = vadd.f32 %v2703_v39, %v2657_v47  ;;  %v2795_v22 = vadd.f32 %v2794_v37, %v2748_v54  ;;  %v2570_v29 = vmul.f32 %v3783_v38, %v7940_v59  ;;  %v7941_v41 = vld [vmem:[#allocation61_spill] sm:$0xff]  ;;  %v7942_v39 = vld [vmem:[#allocation75_spill] sm:$0xff] }
 0x23e   : > { %v2571_v8 = vmul.f32 %v3784_v5, %v7941_v41  ;;  %v2613_v33 = vadd.f32 %v2612_v27, %v2566_v35  ;;  %v2660_v58 = vmul.f32 %v3785_v40, %v6833_v1  ;;  %v3786_v50 = vld [vmem:[%s4226_s26 + $0xc60] sm:$0xff]  ;;  %v3787_v54 = vld [vmem:[%s4226_s26 + $0xa48] sm:$0xff]  ;;  %v3789_v5 = vld [vmem:[%s4226_s26 + $0xb50] sm:$0xff] }
 0x23f   : > { %v2522_v7 = vrot.slane %v2521_v26, 4  ;;  %v2705_v47 = vadd.f32 %v2704_v6, %v2658_v44  ;;  %v2751_v4 = vmul.f32 %v3786_v50, %v7942_v39  ;;  %v2796_v46 = vadd.f32 %v2795_v22, %v2749_v18  ;;  %v7943_v37 = vld [vmem:[#allocation47_spill] sm:$0xff] }
 0x240   : > { %v7110_v2 = vmul.f32 %v3787_v54, %v7943_v37  ;;  %v7944_v38 = vld [vmem:[#allocation35_spill] sm:$0xff]  ;;  %v2614_v27 = vadd.f32 %v2613_v33, %v2567_v21  ;;  %v2661_v44 = vmul.f32 %v3789_v5, %v6838_v45  ;;  %v3791_v37 = vld [vmem:[%s4226_s26 + $0xb58] sm:$0xff] }
 0x241   : > { %v7114_v35 = vmul.f32 %v3788_v43, %v7944_v38  ;;  %v2523_v6 = vadd.f32 %v2522_v7, %v2521_v26  ;;  %v2706_v40 = vadd.f32 %v2705_v47, %v2659_v36  ;;  %v3790_v18 = vld [vmem:[%s4226_s26 + $0xc68] sm:$0xff]  ;;  %v2797_v50 = vadd.f32 %v2796_v46, %v2750_v0  ;;  %v3792_v43 = vld [vmem:[%s4226_s26 + $0xd80] sm:$0xff]  ;;  %v3796_v47 = vld [vmem:[%s4226_s26 + $0xc70] sm:$0xff] }
 0x242   : > { %v2752_v22 = vmul.f32 %v3790_v18, %v6687_v30  ;;  %v2615_v54 = vadd.f32 %v2614_v27, %v2568_v32  ;;  %v2662_v41 = vmul.f32 %v3791_v37, %v6855_v25  ;;  %v3793_v38 = vld [vmem:[%s4220_s21 + $0x180] sm:$0xff]  ;;  %v3794_v33 = vld [vmem:[%s4226_s26 + $0xd88] sm:$0xff]  ;;  %v2753_v18 = vmul.f32 %v3796_v47, %v6698_v11  ;;  %v3797_v0 = vld [vmem:[%s4226_s26 + $0xa58] sm:$0xff] }
 0x243   : > { %v2843_v21 = vmul.f32 %v3793_v38, %v3792_v43  ;;  %v3795_v5 = vld [vmem:[%s4220_s21 + $0x188] sm:$0xff]  ;;  %v2524_v36 = vrot.slane %v2523_v6, 2  ;;  %v2707_v7 = vadd.f32 %v2706_v40, %v2660_v58  ;;  %v2798_v32 = vadd.f32 %v2797_v50, %v2751_v4  ;;  %v3798_v25 = vld [vmem:[%s4226_s26 + $0xb60] sm:$0xff]  ;;  %v3799_v43 = vld [vmem:[%s4226_s26 + $0xd90] sm:$0xff] }
 0x244   : > { %v2844_v26 = vmul.f32 %v3795_v5, %v3794_v33  ;;  %v7945_v46 = vld [vmem:[#allocation26_spill] sm:$0xff]  ;;  %v2616_v27 = vadd.f32 %v2615_v54, %v2569_v62  ;;  %v2663_v38 = vmul.f32 %v3798_v25, %v6862_v49  ;;  %v3800_v33 = vld [vmem:[%s4220_s21 + $0x190] sm:$0xff]  ;;  %v3801_v45 = vld [vmem:[%s4226_s26 + $0xc78] sm:$0xff] }
 0x245   : > { %v7130_v37 = vmul.f32 %v3797_v0, %v7945_v46  ;;  %v2845_v5 = vmul.f32 %v3800_v33, %v3799_v43  ;;  %v2525_v58 = vadd.f32 %v2524_v36, %v2523_v6  ;;  %v2708_v40 = vadd.f32 %v2707_v7, %v2661_v44  ;;  %v3802_v0 = vld [vmem:[%s4226_s26 + $0xb68] sm:$0xff]  ;;  %v3803_v54 = vld [vmem:[%s4226_s26 + $0xd98] sm:$0xff]  ;;  %v3805_v6 = vld [vmem:[%s4226_s26 + $0xc80] sm:$0xff] }
 0x246   : > { %v2754_v47 = vmul.f32 %v3801_v45, %v6712_v15  ;;  %v2799_v4 = vadd.f32 %v2798_v32, %v2752_v22  ;;  %v2617_v50 = vadd.f32 %v2616_v27, %v2570_v29  ;;  %v2664_v62 = vmul.f32 %v3802_v0, %v6872_v9  ;;  %v3804_v46 = vld [vmem:[%s4220_s21 + $0x198] sm:$0xff]  ;;  %v2528_v36 = vld [vmem:[#allocation2 + $0x15] sm:$0x1]  ;;  %v3807_v32 = vld [vmem:[%s4226_s26 + $0xda0] sm:$0xff] }
 0x247   : > { %v2846_v25 = vmul.f32 %v3804_v46, %v3803_v54  ;;  %v2891_v49 = vadd.f32 %v2844_v26, %v2843_v21  ;;  %v2526_v11 = vrot.slane %v2525_v58, 1  ;;  %v2709_v43 = vadd.f32 %v2708_v40, %v2662_v41  ;;  %v3806_v22 = vld [vmem:[%s4226_s26 + $0xb70] sm:$0xff]  ;;  %v3808_v27 = vld [vmem:[%s4220_s21 + $0x1a0] sm:$0xff]  ;;  %v3809_v41 = vld [vmem:[%s4226_s26 + $0xc88] sm:$0xff] }
 0x248   : > { %v2755_v44 = vmul.f32 %v3805_v6, %v6722_v24  ;;  %v2800_v45 = vadd.f32 %v2799_v4, %v2753_v18  ;;  %v2618_v29 = vadd.f32 %v2617_v50, %v2571_v8  ;;  %v2665_v7 = vmul.f32 %v3806_v22, %v6882_v34  ;;  %v3810_v8 = vld [vmem:[%s4226_s26 + $0xb78] sm:$0xff]  ;;  %v3811_v50 = vld [vmem:[%s4226_s26 + $0xda8] sm:$0xff] }
 0x249   : > { %v2847_v33 = vmul.f32 %v3808_v27, %v3807_v32  ;;  %v2892_v21 = vadd.f32 %v2891_v49, %v2845_v5  ;;  %v2527_v26 = vadd.f32 %v2526_v11, %v2525_v58  ;;  %v2710_v46 = vadd.f32 %v2709_v43, %v2663_v38  ;;  %v3812_v54 = vld [vmem:[%s4220_s21 + $0x1a8] sm:$0xff]  ;;  %v3813_v38 = vld [vmem:[%s4226_s26 + $0xc90] sm:$0xff] }
 0x24a   : > { %v2756_v40 = vmul.f32 %v3809_v41, %v6732_v55  ;;  %v2801_v0 = vadd.f32 %v2800_v45, %v2754_v47  ;;  %v2619_v18 = vadd.f32 %v2618_v29, %v7110_v2  ;;  %v2666_v4 = vmul.f32 %v3810_v8, %v6892_v56  ;;  %v3814_v47 = vld [vmem:[%s4226_s26 + $0xa60] sm:$0xff]  ;;  %v3815_v45 = vld [vmem:[%s4226_s26 + $0xdb0] sm:$0xff] }
 0x24b   : > { %v2848_v6 = vmul.f32 %v3812_v54, %v3811_v50  ;;  %v2893_v22 = vadd.f32 %v2892_v21, %v2846_v25  ;;  %v2529_v49 = vadd.f32 %v2528_v36, %v2527_v26  ;;  %v2711_v11 = vadd.f32 %v2710_v46, %v2664_v62  ;;  %v3816_v29 = vld [vmem:[%s4220_s21 + $0x1b0] sm:$0xff]  ;;  %v3817_v36 = vld [vmem:[%s4226_s26 + $0xb80] sm:$0xff]  ;;  %v3818_v21 = vld [vmem:[%s4226_s26 + $0xc98] sm:$0xff] }
 0x24c   : > { %v2757_v5 = vmul.f32 %v3813_v38, %v6742_v63  ;;  %v2802_v58 = vadd.f32 %v2801_v0, %v2755_v44  ;;  %v2575_v2 = vmul.f32 %v3814_v47, %v7040_v42  ;;  %v2620_v43 = vadd.f32 %v2619_v18, %v7114_v35  ;;  %v3819_v46 = vld [vmem:[%s4226_s26 + $0xa68] sm:$0xff]  ;;  %v3820_v0 = vld [vmem:[%s4226_s26 + $0xdb8] sm:$0xff]  ;;  %v3826_v47 = vld [vmem:[%s4220_s21 + $0x1c0] sm:$0xff] }
 0x24d   : > { %v2849_v32 = vmul.f32 %v3816_v29, %v3815_v45  ;;  %v2894_v25 = vadd.f32 %v2893_v22, %v2847_v33  ;;  %2530 = vst [vmem:[#allocation2 + $0x15] sm:$0x1] %v2529_v49  ;;  %v2667_v62 = vmul.f32 %v3817_v36, %v6904_v10  ;;  %v2712_v27 = vadd.f32 %v2711_v11, %v2665_v7  ;;  %v3821_v33 = vld [vmem:[%s4220_s21 + $0x1b8] sm:$0xff]  ;;  %v3822_v50 = vld [vmem:[%s4226_s26 + $0xb88] sm:$0xff]  ;;  %v3823_v22 = vld [vmem:[%s4226_s26 + $0xca0] sm:$0xff] }
 0x24e   : > { %v2758_v44 = vmul.f32 %v3818_v21, %v6754_v16  ;;  %v2803_v26 = vadd.f32 %v2802_v58, %v2756_v40  ;;  %v2576_v35 = vmul.f32 %v3819_v46, %v7052_v52  ;;  %v2621_v41 = vadd.f32 %v2620_v43, %v7130_v37  ;;  %v3824_v11 = vld [vmem:[%s4226_s26 + $0xa70] sm:$0xff]  ;;  %v3825_v58 = vld [vmem:[%s4226_s26 + $0xdc0] sm:$0xff] }
 0x24f   : > { %v2850_v18 = vmul.f32 %v3821_v33, %v3820_v0  ;;  %v2895_v8 = vadd.f32 %v2894_v25, %v2848_v6  ;;  %v2668_v7 = vmul.f32 %v3822_v50, %v6916_v13  ;;  %v2713_v54 = vadd.f32 %v2712_v27, %v2666_v4  ;;  %v3827_v45 = vld [vmem:[%s4226_s26 + $0xb90] sm:$0xff]  ;;  %v3828_v25 = vld [vmem:[%s4226_s26 + $0xca8] sm:$0xff]  ;;  %v3829_v27 = vld [vmem:[%s4226_s26 + $0xa78] sm:$0xff] }
 0x250   : > { %v2759_v40 = vmul.f32 %v3823_v22, %v6766_v61  ;;  %v2804_v49 = vadd.f32 %v2803_v26, %v2757_v5  ;;  %v2577_v38 = vmul.f32 %v3824_v11, %v7064_v14  ;;  %v2622_v37 = vadd.f32 %v2621_v41, %v2575_v2  ;;  %v3830_v26 = vld [vmem:[%s4226_s26 + $0xdc8] sm:$0xff]  ;;  %v3831_v41 = vld [vmem:[%s4226_s26 + $0xb98] sm:$0xff]  ;;  %v3832_v33 = vld [vmem:[%s4226_s26 + $0xcb0] sm:$0xff] }
 0x251   : > { %v2851_v43 = vmul.f32 %v3826_v47, %v3825_v58  ;;  %v2896_v6 = vadd.f32 %v2895_v8, %v2849_v32  ;;  %v2669_v29 = vmul.f32 %v3827_v45, %v6928_v31  ;;  %v2714_v4 = vadd.f32 %v2713_v54, %v2667_v62  ;;  %v3833_v54 = vld [vmem:[%s4226_s26 + $0xdd0] sm:$0xff]  ;;  %v3835_v11 = vld [vmem:[%s4226_s26 + $0xcb8] sm:$0xff]  ;;  %v3838_v45 = vld [vmem:[%s4226_s26 + $0xcc0] sm:$0xff] }
 0x252   : > { %v2760_v36 = vmul.f32 %v3828_v25, %v6778_v3  ;;  %v2805_v5 = vadd.f32 %v2804_v49, %v2758_v44  ;;  %v2578_v21 = vmul.f32 %v3829_v27, %v7075_v23  ;;  %v2623_v2 = vadd.f32 %v2622_v37, %v2576_v35  ;;  %v3834_v49 = vld [vmem:[%s4226_s26 + $0xba0] sm:$0xff]  ;;  %v3836_v47 = vld [vmem:[%s4226_s26 + $0xdd8] sm:$0xff] }
 0x253   : > { %v2852_v46 = vmul.f32 %v3830_v26, %v6629_v53  ;;  %v2897_v32 = vadd.f32 %v2896_v6, %v2850_v18  ;;  %v2670_v0 = vmul.f32 %v3831_v41, %v6937_v57  ;;  %v2715_v62 = vadd.f32 %v2714_v4, %v2668_v7  ;;  %v3837_v6 = vld [vmem:[%s4226_s26 + $0xba8] sm:$0xff] }
 0x254   : > { %v2761_v8 = vmul.f32 %v3832_v33, %v6790_v28  ;;  %v2806_v44 = vadd.f32 %v2805_v5, %v2759_v40  ;;  %v2624_v50 = vadd.f32 %v2623_v2, %v2577_v38  ;;  %v2853_v35 = vmul.f32 %v3833_v54, %v6642_v20  ;;  %v3839_v5 = vld [vmem:[%s4226_s26 + $0xde0] sm:$0xff]  ;;  %v3841_v26 = vld [vmem:[%s4226_s26 + $0xcc8] sm:$0xff]  ;;  %v7946_v54 = vld [vmem:[#allocation56_spill] sm:$0xff] }
 0x255   : > { %v2898_v22 = vadd.f32 %v2897_v32, %v2851_v43  ;;  %v2671_v53 = vmul.f32 %v3834_v49, %v6942_v48  ;;  %v2716_v18 = vadd.f32 %v2715_v62, %v2669_v29  ;;  %v2762_v37 = vmul.f32 %v3835_v11, %v6803_v12 }
 0x256   : > { %v2807_v7 = vadd.f32 %v2806_v44, %v2760_v36  ;;  %v2625_v58 = vadd.f32 %v2624_v50, %v2578_v21  ;;  %v2854_v40 = vmul.f32 %v3836_v47, %v7939_v19  ;;  %v2672_v20 = vmul.f32 %v3837_v6, %v7937_v60  ;;  %v3840_v21 = vld [vmem:[%s4226_s26 + $0xbb0] sm:$0xff] }
 0x257   : > { %v2899_v38 = vadd.f32 %v2898_v22, %v2852_v46  ;;  %v2717_v43 = vadd.f32 %v2716_v18, %v2670_v0  ;;  %v2763_v4 = vmul.f32 %v3838_v45, %v6818_v17  ;;  %v2855_v36 = vmul.f32 %v3839_v5, %v7942_v39  ;;  %v3842_v0 = vld [vmem:[%s4226_s26 + $0xde8] sm:$0xff]  ;;  %v3844_v50 = vld [vmem:[%s4226_s26 + $0xcd0] sm:$0xff]  ;;  %v3848_v45 = vld [vmem:[%s4226_s26 + $0xdf8] sm:$0xff] }
 0x258   : > { %v2808_v29 = vadd.f32 %v2807_v7, %v2761_v8  ;;  %v2626_v25 = vrot.slane %v2625_v58, 4  ;;  %v2673_v19 = vmul.f32 %v3840_v21, %v7938_v51  ;;  %v2764_v46 = vmul.f32 %v3841_v26, %v6833_v1  ;;  %v3843_v8 = vld [vmem:[%s4226_s26 + $0xbb8] sm:$0xff]  ;;  %v3846_v7 = vld [vmem:[%s4226_s26 + $0xbc0] sm:$0xff]  ;;  %v7950_v5 = vld [vmem:[#allocation47_spill] sm:$0xff] }
 0x259   : > { %v2900_v27 = vadd.f32 %v2899_v38, %v2853_v35  ;;  %v2718_v2 = vadd.f32 %v2717_v43, %v2671_v53  ;;  %v2856_v62 = vmul.f32 %v3842_v0, %v6687_v30  ;;  %v2674_v39 = vmul.f32 %v3843_v8, %v7940_v59  ;;  %v3845_v53 = vld [vmem:[%s4226_s26 + $0xdf0] sm:$0xff]  ;;  %v3850_v21 = vld [vmem:[%s4226_s26 + $0xce0] sm:$0xff] }
 0x25a   : > { %v2809_v32 = vadd.f32 %v2808_v29, %v2762_v37  ;;  %v2627_v41 = vadd.f32 %v2626_v25, %v2625_v58  ;;  %v2765_v35 = vmul.f32 %v3844_v50, %v7946_v54  ;;  %v7947_v18 = vld [vmem:[#allocation76_spill] sm:$0xff]  ;;  %v7948_v58 = vld [vmem:[#allocation61_spill] sm:$0xff]  ;;  %v3849_v25 = vld [vmem:[%s4226_s26 + $0xbc8] sm:$0xff] }
 0x25b   : > { %v2901_v33 = vadd.f32 %v2900_v27, %v2854_v40  ;;  %v2719_v44 = vadd.f32 %v2718_v2, %v2672_v20  ;;  %v2857_v11 = vmul.f32 %v3845_v53, %v7947_v18  ;;  %v2675_v30 = vmul.f32 %v3846_v7, %v7948_v58  ;;  %v3847_v40 = vld [vmem:[%s4226_s26 + $0xcd8] sm:$0xff]  ;;  %v7951_v2 = vld [vmem:[#allocation55_spill] sm:$0xff]  ;;  %v3851_v0 = vld [vmem:[%s4226_s26 + $0xe00] sm:$0xff] }
 0x25c   : > { %v2810_v22 = vadd.f32 %v2809_v32, %v2763_v4  ;;  %v2628_v49 = vrot.slane %v2627_v41, 2  ;;  %v7949_v38 = vld [vmem:[#allocation32_spill] sm:$0xff]  ;;  %v2858_v4 = vmul.f32 %v3848_v45, %v6712_v15  ;;  %v2676_v27 = vmul.f32 %v3849_v25, %v7950_v5  ;;  %v7952_v8 = vld [vmem:[#allocation35_spill] sm:$0xff] }
 0x25d   : > { %v2902_v37 = vadd.f32 %v2901_v33, %v2855_v36  ;;  %v2720_v47 = vadd.f32 %v2719_v44, %v2673_v19  ;;  %v2766_v6 = vmul.f32 %v3847_v40, %v7949_v38  ;;  %v2767_v26 = vmul.f32 %v3850_v21, %v7951_v2  ;;  %v2632_v33 = vld [vmem:[#allocation2 + $0x16] sm:$0x1]  ;;  %v3853_v50 = vld [vmem:[%s4226_s26 + $0xce8] sm:$0xff]  ;;  %v3859_v25 = vld [vmem:[%s4226_s26 + $0xcf8] sm:$0xff] }
 0x25e   : > { %v2811_v20 = vadd.f32 %v2810_v22, %v2764_v46  ;;  %v2629_v43 = vadd.f32 %v2628_v49, %v2627_v41  ;;  %v2859_v46 = vmul.f32 %v3851_v0, %v6722_v24  ;;  %v3852_v15 = vld [vmem:[%s4226_s26 + $0xbd0] sm:$0xff]  ;;  %v3855_v24 = vld [vmem:[%s4226_s26 + $0xbd8] sm:$0xff] }
 0x25f   : > { %v2903_v29 = vadd.f32 %v2902_v37, %v2856_v62  ;;  %v2721_v36 = vadd.f32 %v2720_v47, %v2674_v39  ;;  %v2677_v62 = vmul.f32 %v3852_v15, %v7952_v8  ;;  %v2768_v39 = vmul.f32 %v3853_v50, %v6872_v9  ;;  %v7953_v37 = vld [vmem:[#allocation26_spill] sm:$0xff]  ;;  %v3856_v47 = vld [vmem:[%s4226_s26 + $0xcf0] sm:$0xff]  ;;  %v3860_v21 = vld [vmem:[%s4226_s26 + $0xe18] sm:$0xff] }
 0x260   : > { %v2812_v19 = vadd.f32 %v2811_v20, %v2765_v35  ;;  %v2630_v32 = vrot.slane %v2629_v43, 1  ;;  %v3854_v35 = vld [vmem:[%s4226_s26 + $0xe08] sm:$0xff]  ;;  %v2769_v40 = vmul.f32 %v3856_v47, %v6882_v34  ;;  %v3857_v45 = vld [vmem:[%s4226_s26 + $0xe10] sm:$0xff]  ;;  %v3863_v15 = vld [vmem:[%s4226_s26 + $0xe20] sm:$0xff] }
 0x261   : > { %v2904_v41 = vadd.f32 %v2903_v29, %v2857_v11  ;;  %v2722_v44 = vadd.f32 %v2721_v36, %v2675_v30  ;;  %v2860_v53 = vmul.f32 %v3854_v35, %v6732_v55  ;;  %v2678_v11 = vmul.f32 %v3855_v24, %v7953_v37  ;;  %v3858_v29 = vld [vmem:[%s4226_s26 + $0xbe0] sm:$0xff]  ;;  %v3864_v50 = vld [vmem:[%s4226_s26 + $0xbf0] sm:$0xff] }
 0x262   : > { %v2813_v22 = vadd.f32 %v2812_v19, %v2766_v6  ;;  %v2631_v49 = vadd.f32 %v2630_v32, %v2629_v43  ;;  %v2861_v6 = vmul.f32 %v3857_v45, %v6742_v63  ;;  %v2679_v55 = vmul.f32 %v3858_v29, %v7040_v42  ;;  %v3861_v32 = vld [vmem:[%s4226_s26 + $0xbe8] sm:$0xff]  ;;  %v3868_v47 = vld [vmem:[%s4226_s26 + $0xd10] sm:$0xff]  ;;  %v3870_v29 = vld [vmem:[%s4226_s26 + $0xd18] sm:$0xff] }
 0x263   : > { %v2905_v18 = vadd.f32 %v2904_v41, %v2858_v4  ;;  %v2723_v7 = vadd.f32 %v2722_v44, %v2676_v27  ;;  %v2770_v27 = vmul.f32 %v3859_v25, %v6892_v56  ;;  %v2680_v63 = vmul.f32 %v3861_v32, %v7052_v52 }
 0x264   : > { %v2814_v30 = vadd.f32 %v2813_v22, %v2767_v26  ;;  %v2633_v20 = vadd.f32 %v2632_v33, %v2631_v49  ;;  %v2862_v26 = vmul.f32 %v3860_v21, %v6754_v16  ;;  %v2681_v16 = vmul.f32 %v3864_v50, %v7064_v14  ;;  %v3865_v22 = vld [vmem:[%s4226_s26 + $0xd08] sm:$0xff]  ;;  %v3872_v21 = vld [vmem:[%s4226_s26 + $0xd20] sm:$0xff]  ;;  %v3876_v50 = vld [vmem:[%s4226_s26 + $0xd30] sm:$0xff] }
 0x265   : > { %v2906_v43 = vadd.f32 %v2905_v18, %v2859_v46  ;;  %v2724_v4 = vadd.f32 %v2723_v7, %v2677_v62  ;;  %v3862_v46 = vld [vmem:[%s4226_s26 + $0xd00] sm:$0xff]  ;;  %v2863_v62 = vmul.f32 %v3863_v15, %v6766_v61  ;;  %v2772_v49 = vmul.f32 %v3865_v22, %v6916_v13 }
 0x266   : > { %v2815_v36 = vadd.f32 %v2814_v30, %v2768_v39  ;;  %2634 = vst [vmem:[#allocation2 + $0x16] sm:$0x1] %v2633_v20  ;;  %v2771_v41 = vmul.f32 %v3862_v46, %v6904_v10  ;;  %v3869_v20 = vld [vmem:[%s4226_s26 + $0xe30] sm:$0xff]  ;;  %v3874_v46 = vld [vmem:[%s4226_s26 + $0xd28] sm:$0xff] }
 0x267   : > { %v2907_v19 = vadd.f32 %v2906_v43, %v2860_v53  ;;  %v2725_v0 = vadd.f32 %v2724_v4, %v2678_v11  ;;  %v3866_v53 = vld [vmem:[%s4226_s26 + $0xe28] sm:$0xff]  ;;  %v3867_v11 = vld [vmem:[%s4226_s26 + $0xbf8] sm:$0xff]  ;;  %v2865_v45 = vmul.f32 %v3869_v20, %v6790_v28  ;;  %v3873_v28 = vld [vmem:[%s4226_s26 + $0xe40] sm:$0xff] }
 0x268   : > { %v2816_v33 = vadd.f32 %v2815_v36, %v2769_v40  ;;  %v2864_v18 = vmul.f32 %v3866_v53, %v6778_v3  ;;  %v2682_v7 = vmul.f32 %v3867_v11, %v7075_v23  ;;  %v2773_v40 = vmul.f32 %v3868_v47, %v6928_v31  ;;  %v3871_v4 = vld [vmem:[%s4226_s26 + $0xe38] sm:$0xff]  ;;  %v3880_v47 = vld [vmem:[%s4226_s26 + $0xd40] sm:$0xff] }
 0x269   : > { %v2908_v44 = vadd.f32 %v2907_v19, %v2861_v6  ;;  %v2726_v39 = vadd.f32 %v2725_v0, %v2679_v55  ;;  %v2774_v3 = vmul.f32 %v3870_v29, %v6937_v57  ;;  %v2866_v25 = vmul.f32 %v3871_v4, %v6803_v12  ;;  %v3875_v12 = vld [vmem:[%s4226_s26 + $0xe48] sm:$0xff]  ;;  %v3878_v53 = vld [vmem:[%s4226_s26 + $0xd38] sm:$0xff] }
 0x26a   : > { %v2817_v35 = vadd.f32 %v2816_v33, %v2770_v27  ;;  %v2867_v32 = vmul.f32 %v3873_v28, %v6818_v17  ;;  %v2868_v15 = vmul.f32 %v3875_v12, %v6833_v1  ;;  %v3877_v17 = vld [vmem:[%s4226_s26 + $0xe50] sm:$0xff]  ;;  %v3879_v1 = vld [vmem:[%s4226_s26 + $0xe58] sm:$0xff]  ;;  %v3888_v12 = vld [vmem:[%s4226_s26 + $0xd60] sm:$0xff] }
 0x26b   : > { %v2909_v24 = vadd.f32 %v2908_v44, %v2862_v26  ;;  %v2727_v61 = vadd.f32 %v2726_v39, %v2680_v63  ;;  %v2775_v26 = vmul.f32 %v3872_v21, %v6942_v48  ;;  %v2869_v22 = vmul.f32 %v3877_v17, %v7946_v54  ;;  %v3881_v54 = vld [vmem:[%s4226_s26 + $0xe60] sm:$0xff] }
 0x26c   : > { %v2818_v30 = vadd.f32 %v2817_v35, %v2771_v41  ;;  %v2776_v41 = vmul.f32 %v3874_v46, %v7937_v60  ;;  %v2870_v11 = vmul.f32 %v3879_v1, %v7949_v38  ;;  %v2871_v20 = vmul.f32 %v3881_v54, %v7951_v2  ;;  %v2736_v38 = vld [vmem:[#allocation2 + $0x17] sm:$0x1]  ;;  %v3896_v54 = vld [vmem:[%s4226_s26 + $0xea0] sm:$0xff] }
 0x26d   : > { %v2910_v6 = vadd.f32 %v2909_v24, %v2863_v62  ;;  %v2728_v43 = vadd.f32 %v2727_v61, %v2681_v16  ;;  %v2777_v16 = vmul.f32 %v3876_v50, %v7938_v51 }
 0x26e   : > { %v2819_v55 = vadd.f32 %v2818_v30, %v2772_v49 }
 0x26f   : > { %v2911_v27 = vadd.f32 %v2910_v6, %v2864_v18  ;;  %v2729_v36 = vadd.f32 %v2728_v43, %v2682_v7  ;;  %v2778_v18 = vmul.f32 %v3878_v53, %v7940_v59  ;;  %v3882_v43 = vld [vmem:[%s4226_s26 + $0xd48] sm:$0xff] }
 0x270   : > { %v2820_v19 = vadd.f32 %v2819_v55, %v2773_v40  ;;  %v2779_v40 = vmul.f32 %v3880_v47, %v7948_v58  ;;  %v2780_v29 = vmul.f32 %v3882_v43, %v7950_v5  ;;  %v3883_v55 = vld [vmem:[%s4226_s26 + $0xe68] sm:$0xff]  ;;  %v3895_v47 = vld [vmem:[%s4226_s26 + $0xe98] sm:$0xff] }
 0x271   : > { %v2912_v63 = vadd.f32 %v2911_v27, %v2865_v45  ;;  %v2730_v0 = vrot.slane %v2729_v36, 4  ;;  %v2872_v4 = vmul.f32 %v3883_v55, %v6872_v9  ;;  %v3887_v9 = vld [vmem:[%s4226_s26 + $0xe78] sm:$0xff]  ;;  %v3897_v43 = vld [vmem:[%s4226_s26 + $0xea8] sm:$0xff] }
 0x272   : > { %v2821_v33 = vadd.f32 %v2820_v19, %v2774_v3 }
 0x273   : > { %v2913_v62 = vadd.f32 %v2912_v63, %v2866_v25  ;;  %v2731_v44 = vadd.f32 %v2730_v0, %v2729_v36  ;;  %v3884_v36 = vld [vmem:[%s4226_s26 + $0xd50] sm:$0xff]  ;;  %v3886_v63 = vld [vmem:[%s4226_s26 + $0xd58] sm:$0xff] }
 0x274   : > { %v2822_v39 = vadd.f32 %v2821_v33, %v2775_v26  ;;  %v2781_v21 = vmul.f32 %v3884_v36, %v7952_v8  ;;  %v3885_v26 = vld [vmem:[%s4226_s26 + $0xe70] sm:$0xff]  ;;  %v2782_v0 = vmul.f32 %v3886_v63, %v7953_v37  ;;  %v2840_v63 = vld [vmem:[#allocation2 + $0x18] sm:$0x1] }
 0x275   : > { %v2914_v49 = vadd.f32 %v2913_v62, %v2867_v32  ;;  %v2732_v35 = vrot.slane %v2731_v44, 2  ;;  %v2873_v19 = vmul.f32 %v3885_v26, %v6882_v34  ;;  %v3889_v34 = vld [vmem:[%s4226_s26 + $0xe80] sm:$0xff] }
 0x276   : > { %v2823_v24 = vadd.f32 %v2822_v39, %v2776_v41  ;;  %v2874_v41 = vmul.f32 %v3887_v9, %v6892_v56 }
 0x277   : > { %v2915_v7 = vadd.f32 %v2914_v49, %v2868_v15  ;;  %v2733_v61 = vadd.f32 %v2732_v35, %v2731_v44  ;;  %v2783_v15 = vmul.f32 %v3888_v12, %v7040_v42  ;;  %v2875_v44 = vmul.f32 %v3889_v34, %v6904_v10  ;;  %v3892_v35 = vld [vmem:[%s4226_s26 + $0xd70] sm:$0xff]  ;;  %v3905_v34 = vld [vmem:[%s4226_s26 + $0xee8] sm:$0xff] }
 0x278   : > { %v2824_v30 = vadd.f32 %v2823_v24, %v2777_v16  ;;  %v3890_v16 = vld [vmem:[%s4226_s26 + $0xd68] sm:$0xff]  ;;  %v2785_v53 = vmul.f32 %v3892_v35, %v7064_v14  ;;  %v3893_v24 = vld [vmem:[%s4226_s26 + $0xe90] sm:$0xff] }
 0x279   : > { %v2916_v45 = vadd.f32 %v2915_v7, %v2869_v22  ;;  %v2734_v6 = vrot.slane %v2733_v61, 1  ;;  %v2784_v39 = vmul.f32 %v3890_v16, %v7052_v52  ;;  %v3891_v22 = vld [vmem:[%s4226_s26 + $0xe88] sm:$0xff]  ;;  %v2877_v1 = vmul.f32 %v3893_v24, %v6928_v31  ;;  %v3906_v16 = vld [vmem:[%s4226_s26 + $0xef0] sm:$0xff] }
 0x27a   : > { %v2825_v3 = vadd.f32 %v2824_v30, %v2778_v18  ;;  %v2876_v56 = vmul.f32 %v3891_v22, %v6916_v13  ;;  %v2880_v31 = vmul.f32 %v3897_v43, %v7937_v60 }
 0x27b   : > { %v2917_v25 = vadd.f32 %v2916_v45, %v2870_v11  ;;  %v2735_v27 = vadd.f32 %v2734_v6, %v2733_v61  ;;  %v3894_v11 = vld [vmem:[%s4226_s26 + $0xd78] sm:$0xff] }
 0x27c   : > { %v2826_v2 = vadd.f32 %v2825_v3, %v2779_v40  ;;  %v2786_v7 = vmul.f32 %v3894_v11, %v7075_v23  ;;  %v2878_v40 = vmul.f32 %v3895_v47, %v6937_v57 }
 0x27d   : > { %v2918_v28 = vadd.f32 %v2917_v25, %v2871_v20  ;;  %v2737_v32 = vadd.f32 %v2736_v38, %v2735_v27  ;;  %v2879_v20 = vmul.f32 %v3896_v54, %v6942_v48  ;;  %v3898_v38 = vld [vmem:[%s4226_s26 + $0xeb0] sm:$0xff]  ;;  %v3899_v25 = vld [vmem:[%s4226_s26 + $0xeb8] sm:$0xff] }
 0x27e   : > { %v2827_v46 = vadd.f32 %v2826_v2, %v2780_v29  ;;  %v2881_v55 = vmul.f32 %v3898_v38, %v7938_v51  ;;  %v2882_v27 = vmul.f32 %v3899_v25, %v7940_v59 }
 0x27f   : > { %v2919_v33 = vadd.f32 %v2918_v28, %v2872_v4  ;;  %2738 = vst [vmem:[#allocation2 + $0x17] sm:$0x1] %v2737_v32 }
 0x280   : > { %v2828_v62 = vadd.f32 %v2827_v46, %v2781_v21  ;;  %v3900_v21 = vld [vmem:[%s4226_s26 + $0xec0] sm:$0xff] }
 0x281   : > { %v2920_v50 = vadd.f32 %v2919_v33, %v2873_v19  ;;  %v2883_v2 = vmul.f32 %v3900_v21, %v7948_v58  ;;  %v3901_v19 = vld [vmem:[%s4226_s26 + $0xec8] sm:$0xff] }
 0x282   : > { %v2829_v17 = vadd.f32 %v2828_v62, %v2782_v0  ;;  %v2884_v28 = vmul.f32 %v3901_v19, %v7950_v5  ;;  %v3902_v0 = vld [vmem:[%s4226_s26 + $0xed0] sm:$0xff] }
 0x283   : > { %v2921_v49 = vadd.f32 %v2920_v50, %v2874_v41  ;;  %v2885_v59 = vmul.f32 %v3902_v0, %v7952_v8  ;;  %v3903_v41 = vld [vmem:[%s4226_s26 + $0xed8] sm:$0xff]  ;;  %v2889_v8 = vmul.f32 %v3906_v16, %v7064_v14  ;;  %v2951_v14 = vld [vmem:[#allocation2] sm:$0xff] (!%p3138_p7) }
 0x284   : > { %v2830_v18 = vadd.f32 %v2829_v17, %v2783_v15  ;;  %v2886_v58 = vmul.f32 %v3903_v41, %v7953_v37  ;;  %v3904_v15 = vld [vmem:[%s4226_s26 + $0xee0] sm:$0xff]  ;;  %v3907_v17 = vld [vmem:[%s4226_s26 + $0xef8] sm:$0xff]  ;;  %2955 = vadd.xlane.f32.xlu0 (!%p3138_p7), %v2951_v14 }
 0x285   : > { %v2922_v10 = vadd.f32 %v2921_v49, %v2875_v44  ;;  %v2887_v62 = vmul.f32 %v3904_v15, %v7040_v42  ;;  %v2888_v44 = vmul.f32 %v3905_v34, %v7052_v52  ;;  %v2890_v22 = vmul.f32 %v3907_v17, %v7075_v23  ;;  %v2952_v23 = vld [vmem:[#allocation2 + $0x8] sm:$0x3] (!%p3138_p7) }
 0x286   : > { %v2831_v61 = vadd.f32 %v2830_v18, %v2784_v39  ;;  %v2953_v52 = vld [vmem:[#allocation2 + $0x10] sm:$0xff] (!%p3138_p7)  ;;  %v2958_v47 = vsel (!%p3138_p7), %vm2957_vm0, %v2952_v23, 0.0 }
 0x287   : > { %v2923_v13 = vadd.f32 %v2922_v10, %v2876_v56  ;;  %2961 = vadd.xlane.f32.xlu1 (!%p3138_p7), %v2953_v52 }
 0x288   : > { %v2832_v30 = vadd.f32 %v2831_v61, %v2785_v53  ;;  %2959 = vadd.xlane.f32.xlu0 (!%p3138_p7), %v2958_v47 }
 0x289   : > { %v2924_v45 = vadd.f32 %v2923_v13, %v2877_v1  ;;  %v2944_v1 = vld [vmem:[#allocation2 + $0x19] sm:$0x1] }
 0x28a   : > { %v2833_v6 = vadd.f32 %v2832_v30, %v2786_v7 }
 0x28b   : > { %v2925_v29 = vadd.f32 %v2924_v45, %v2878_v40  ;;  %v2970_v40 = vlaneseq (!%p3138_p7) }
 0x28c   : > { %v2834_v3 = vrot.slane %v2833_v6, 4 }
 0x28d   : > { %v2926_v4 = vadd.f32 %v2925_v29, %v2879_v20  ;;  %v2971_v13 = vand.u32 (!%p3138_p7), 127, %v2970_v40  ;;  %v2973_v30 = vshrl.u32 (!%p3138_p7), %v2970_v40, 7 }
 0x28e   : > { %v2835_v57 = vadd.f32 %v2834_v3, %v2833_v6 }
 0x28f   : > { %v2927_v36 = vadd.f32 %v2926_v4, %v2880_v31  ;;  %v2976_v54 = vadd.s32 (!%p3138_p7), 4294967288, %v2971_v13  ;;  %v2974_v6 = vsub.s32 (!%p3138_p7), %v2971_v13, %v2973_v30 }
 0x290   : > { %v2836_v48 = vrot.slane %v2835_v57, 2 }
 0x291   : > { %v2928_v26 = vadd.f32 %v2927_v36, %v2881_v55  ;;  %v2979_v43 = vsub.s32 (!%p3138_p7), %v2976_v54, %v2973_v30 }
 0x292   : > { %v2837_v60 = vadd.f32 %v2836_v48, %v2835_v57 }
 0x293   : > { %v2929_v51 = vadd.f32 %v2928_v26, %v2882_v27 }
 0x294   : > { %v2838_v32 = vrot.slane %v2837_v60, 1 }
 0x295   : > { %v2930_v46 = vadd.f32 %v2929_v51, %v2883_v2 }
 0x296   : > { %v2839_v9 = vadd.f32 %v2838_v32, %v2837_v60 }
 0x297   : > { %v2931_v33 = vadd.f32 %v2930_v46, %v2884_v28 }
 0x298   : > { %v2841_v12 = vadd.f32 %v2840_v63, %v2839_v9 }
 0x299   : > { %v2932_v5 = vadd.f32 %v2931_v33, %v2885_v59 }
 0x29a   : > { %2842 = vst [vmem:[#allocation2 + $0x18] sm:$0x1] %v2841_v12 }
 0x29b   : > { %v2933_v50 = vadd.f32 %v2932_v5, %v2886_v58 }
 0x29d   : > { %v2934_v39 = vadd.f32 %v2933_v50, %v2887_v62 }
 0x29f   : > { %v2935_v56 = vadd.f32 %v2934_v39, %v2888_v44 }
 0x2a1   : > { %v2936_v37 = vadd.f32 %v2935_v56, %v2889_v8 }
 0x2a3   : > { %v2937_v49 = vadd.f32 %v2936_v37, %v2890_v22 }
 0x2a5   : > { %v2938_v35 = vrot.slane %v2937_v49, 4 }
 0x2a7   : > { %v2939_v53 = vadd.f32 %v2938_v35, %v2937_v49 }
 0x2a9   : > { %v2940_v18 = vrot.slane %v2939_v53, 2 }
 0x2ab   : > { %v2941_v42 = vadd.f32 %v2940_v18, %v2939_v53 }
 0x2ad   : > { %v2942_v24 = vrot.slane %v2941_v42, 1  ;;  %2950 = sbr.rel (%p3138_p7) target bundleno = 847 (0x34f), region = 44 }
 0x2af   : > { %v2943_v10 = vadd.f32 %v2942_v24, %v2941_v42 }
 0x2b1   : > { %v2945_v11 = vadd.f32 %v2944_v1, %v2943_v10 }
 0x2b3   : > { %2946 = vst [vmem:[#allocation2 + $0x19] sm:$0x1] %v2945_v11 }
 0x2ba   : > { %v2954_v7 = vld [vmem:[#allocation2 + $0x18] sm:$0x3] }
 0x2bb   : > { %v2963_v61 = vsel %vm2957_vm0, %v2954_v7, 0.0 }
 0x2bc   : > { %2964 = vadd.xlane.f32.xlu1 %v2963_v61 }
 0x311   : > { %v2956_v45 = vpop.xlane.xlu0 %2955 }
 0x312   : > { %v2975_v38 = vrot.slane %v2956_v45, %v2974_v6 }
 0x314   : > { %v2962_v20 = vpop.xlane.xlu1 %2961 }
 0x315   : > { %v2960_v29 = vpop.xlane.xlu0 %2959  ;;  %v2986_v3 = vrot.slane %v2962_v20, %v2974_v6 }
 0x316   : > { %v2980_v4 = vrot.slane %v2960_v29, %v2979_v43 }
 0x318   : > { %v2982_v25 = vsel %vm2981_vm1, %v2980_v4, %v2975_v38 }
 0x349   : > { %v2965_v31 = vpop.xlane.xlu1 %2964 }
 0x34a   : > { %v2990_v55 = vrot.slane %v2965_v31, %v2979_v43 }
 0x34c   : > { %v2991_v57 = vsel %vm2981_vm1, %v2990_v55, %v2986_v3 }
 0x34d   : > { %v2993_v27 = vsel %vm2992_vm2, %v2991_v57, %v2982_v25 }
 0x34e   : > { %2996 = vst.msk [vmem:[%s275_s3] sm:$0x3] %vm2995_vm3, %v2993_v27 }
 0x34f PF: > { %s3140_s15 = sshll.u32 %s4022_s16, 5  ;;  %s3011_s17 = sshll.u32 %s275_s3, 4  ;;  %s3012_s17 = int_to_ptr.vmem [resolvable:$true] %s3011_s17 }
 0x350   : > { %s7348_s24 = scalar_lea.hbm %s7410_s2, %s3140_s15  ;;  %s2998_s18 = scalar_lea.sflag [#allocation5], %s273_s22 }
 0x351   : > { %s3908_s5 = scalar_lea.vmem %s3012_s17, 32  ;;  %s4049_s25 = smov [#allocation8]  }
 0x352   : > { %p3909_p8 = scmp.ne.s32.totalorder %s3012_s17, %s3908_s5  ;;  %s3912_s4 = sshll.u32 %s4049_s25, 4  ;;  %s3913_s4 = int_to_ptr.vmem [resolvable:$false] %s3912_s4 }
 0x353   : > { %s3914_s29 = scalar_lea.vmem %s3913_s4, 64  ;;  %p3915_p11 = scmp.lt.s32.totalorder %s3012_s17, %s3913_s4 }
 0x354   : > { %p3910_p9 = pnand %p3909_p8, %p4158_p12  ;;  %p3916_p13 = scmp.lt.s32.totalorder %s3914_s29, %s3908_s5 }
 0x356   : > { %p3911_p10 = pneg %p3910_p9  ;;  %p3917_p0 = por %p3916_p13, %p3915_p11 }
 0x358   : > { %p3918_p2 = pnand %p3917_p0, %p3911_p10 }
 0x35a   : > { %3921 = shalt.err (!%p3918_p2)
}
 0x35b   : > { %s3922_s16 = scalar_lea.hbm %s7348_s24, 32  ;;  %s3926_s20 = scalar_lea.hbm %s7410_s2, 64 }
 0x35c   : > { %p3923_p3 = scmp.ne.s32.totalorder %s7348_s24, %s3922_s16  ;;  %p3927_p5 = scmp.lt.u32.totalorder %s7348_s24, %s7410_s2 }
 0x35d   : > { %p3928_p7 = scmp.lt.u32.totalorder %s3926_s20, %s3922_s16  ;;  %p3930_p9 = scmp.lt.u32.totalorder %s3922_s16, %s7348_s24 }
 0x35e   : > { %p3924_p4 = pnand %p3923_p3, %p4158_p12 }
 0x35f   : > { %p3929_p8 = por %p3928_p7, %p3927_p5 }
 0x360   : > { %p3925_p6 = pneg %p3924_p4 }
 0x361   : > { %p3931_p10 = por %p3930_p9, %p3929_p8 }
 0x363   : > { %p3932_p11 = pnand %p3931_p10, %p3925_p6 }
 0x365   : > { %3935 = shalt.err (!%p3932_p11)
}
 0x366   : > { %3167 = dma.vmem_to_hbm [thread:$0]  (%p4158_p12), %s3012_s17, 32, %s7348_s24, %s2998_s18  }
 0x367 PF: > { %p3173_p13 = scmp.ge.s32.totalorder %s4034_s19, 2  ;;  %s3023_s30 = sand.u32 1, %s3994_s9  }
 0x368   : > { %s3024_s3 = scalar_lea.sflag [#allocation5], %s3023_s30 }
 0x369   : > { %p3170_p0 = pnand %p3173_p13, %p4166_p1 }
 0x36b   : > { %3989 = dma.done.wait (!%p3170_p0), %s3024_s3, 32  }
 0x36c   : > { %3991 = vsyncadd (!%p3170_p0), %s3024_s3, 4294967264  ;;  %s21_s19 = sadd.s32 1, %s4034_s19   ;;  %s7954_s15 = sld [smem:[#allocation18_spill]] }
 0x36d   : > { %p18_p2 = scmp.ge.s32.totalorder %s21_s19, 6   ;;  %s7955_s16 = sld [smem:[#allocation19_spill]] }
 0x36e   : > { %s7956_s17 = sld [smem:[#allocation20_spill]]  ;;  %s7957_s18 = sld [smem:[#allocation21_spill]] }
 0x36f   : > { %s7958_s9 = smov %s3998_s10  ;;  %s7959_s10 = smov %s4002_s11 }
 0x370   : > { %s7960_s11 = smov %s4153_s6  ;;  %s7961_s12 = smov %s4010_s13 }
 0x371   : > { %s7962_s13 = smov %s4014_s14  ;;  %s7963_s14 = smov %s4156_s7 }
 0x372   :  { %20 = sbr.rel (!%p18_p2) target bundleno = 11 (0xb), region = 105 }
 0x379   :  { %3029 = vsyncpa [#allocation4], 1 }
 0x37a   :  { %3031 = vsyncpa [#allocation4 + $0x1], 1 }
 0x37b   :  { %3032 = vsyncpa [#allocation7], 1 }
 0x37c   :  { %3034 = vsyncpa [#allocation7 + $0x1], 1 }
 0x37d   :  { %3035 = vsyncpa [#allocation5], 1 }
 0x37e   :  { %3037 = vsyncpa [#allocation5 + $0x1], 1 }

</bundles_post_ra>
